<compile_context>
chip_gen: v7x
topology: tpu7x:2x2x1
jax: 0.10.0
libtpu: 0.0.40
codegen_flags: <defaults>
</compile_context>

<pallas_src>
import math

import jax
import jax.numpy as jnp
from jax import lax
from jax.experimental import pallas as pl
from jax.experimental.pallas import tpu as pltpu


# ----------------------------------------------------------------------------
# Pallas kernels
# ----------------------------------------------------------------------------
def _linear_kernel(x_ref, w_ref, b_ref, o_ref):
    acc = jnp.dot(x_ref[...], w_ref[...], preferred_element_type=jnp.float32)
    o_ref[...] = (acc + b_ref[...]).astype(o_ref.dtype)


def _mlp2_kernel(x_ref, w1_ref, b1_ref, w2_ref, b2_ref, o_ref):
    # fused build_mlp: relu(x @ W1 + b1) @ W2 + b2 (eval: no BN / dropout)
    h = jnp.dot(x_ref[...], w1_ref[...], preferred_element_type=jnp.float32) + b1_ref[...]
    h = jnp.maximum(h, 0.0)
    o_ref[...] = (jnp.dot(h, w2_ref[...], preferred_element_type=jnp.float32)
                  + b2_ref[...]).astype(o_ref.dtype)


def _gcn_stack_kernel(x_ref, adjb_ref, w_ref, b_ref, o_ref):
    # Whole GCN stack in one launch, lane-dense layout:
    #   x: (BNT, J*E)     adjb = kron(adj^T, I_E): (J*E, J*E)
    #   w_ref[l] = kron(I_J, W_l): (J*E, J*E), b_ref[l]: (1, J*E)
    # per layer: x = relu( (x @ W_big + b_big) @ adj_big )
    # which equals relu(adj @ (x @ W + b)) applied per (b,n,t) slab.
    x = x_ref[...]
    adj_big = adjb_ref[...]
    for l in range(w_ref.shape[0]):  # static unrolled loop over GCN layers
        sup = jnp.dot(x, w_ref[l], preferred_element_type=jnp.float32) + b_ref[l]
        x = jnp.maximum(jnp.dot(sup, adj_big, preferred_element_type=jnp.float32), 0.0)
    o_ref[...] = x.astype(o_ref.dtype)


def _tnt_stack_kernel(seq_ref, bias_ref, wqkv_ref, bqkv_ref, wo_ref, bo_ref,
                      w1_ref, b1_ref, w2_ref, b2_ref, ln_ref,
                      cls_ref, tok_ref, state_ref):
    # Grid = (scale, layer).  The (B, S, d) sequence state lives in VMEM scratch
    # and is carried across the (inner, "arbitrary") layer axis; it is
    # initialized from the input sequence at layer 0 of each scale.
    # Per step: LN1 -> Q/K/V -> masked attention -> O proj -> residual
    #           -> LN2 -> FFN (relu) -> residual; emit CLS + first-N tokens.
    l = pl.program_id(1)

    @pl.when(l == 0)
    def _():
        state_ref[...] = seq_ref[0]

    x = state_ref[...]                            # (B, S, d)
    B, S, d = x.shape
    n_tok = tok_ref.shape[2] // B                 # tokens emitted per batch row
    xf = x.reshape(B * S, d)

    lnp = ln_ref[0, 0]                            # (4, d): ln1_g, ln1_b, ln2_g, ln2_b
    bqkv = bqkv_ref[0, 0]                         # (3, d)

    def layer_norm(v, g, b):
        mu = jnp.mean(v, axis=-1, keepdims=True)
        var = jnp.mean((v - mu) ** 2, axis=-1, keepdims=True)
        return (v - mu) * lax.rsqrt(var + 1e-5) * g + b

    h = layer_norm(xf, lnp[0:1], lnp[1:2])

    q = (jnp.dot(h, wqkv_ref[0, 0], preferred_element_type=jnp.float32)
         + bqkv[0:1]).reshape(B, S, d)
    k = (jnp.dot(h, wqkv_ref[0, 1], preferred_element_type=jnp.float32)
         + bqkv[1:2]).reshape(B, S, d)
    v = (jnp.dot(h, wqkv_ref[0, 2], preferred_element_type=jnp.float32)
         + bqkv[2:3]).reshape(B, S, d)

    s = jnp.einsum("bqd,bkd->bqk", q, k, preferred_element_type=jnp.float32)
    s = s * (1.0 / math.sqrt(d)) + bias_ref[...]          # (1,1,S) key mask
    s = s - jnp.max(s, axis=-1, keepdims=True)
    e = jnp.exp(s)
    p = e / jnp.sum(e, axis=-1, keepdims=True)
    attn = jnp.einsum("bqk,bkd->bqd", p, v, preferred_element_type=jnp.float32)

    o = jnp.dot(attn.reshape(B * S, d), wo_ref[0, 0],
                preferred_element_type=jnp.float32) + bo_ref[0, 0]
    x2 = xf + o

    h2 = layer_norm(x2, lnp[2:3], lnp[3:4])
    ff = jnp.maximum(jnp.dot(h2, w1_ref[0, 0], preferred_element_type=jnp.float32)
                     + b1_ref[0, 0], 0.0)
    ff = jnp.dot(ff, w2_ref[0, 0], preferred_element_type=jnp.float32) + b2_ref[0, 0]
    out = (x2 + ff).reshape(B, S, d)

    state_ref[...] = out
    cls_ref[0, 0] = out[:, 0, :]                           # (B, d)
    tok_ref[0, 0] = out[:, 1:1 + n_tok, :].reshape(B * n_tok, d)


# ----------------------------------------------------------------------------
# Pallas wrappers
# ----------------------------------------------------------------------------
def linear_pallas(x, w, b):
    x = x.astype(jnp.float32)
    w = w.astype(jnp.float32)
    M, K = x.shape
    Nout = w.shape[1]
    return pl.pallas_call(
        _linear_kernel,
        grid=(1,),
        out_shape=jax.ShapeDtypeStruct((M, Nout), jnp.float32),
        in_specs=[pl.BlockSpec((M, K), lambda i: (0, 0)),
                  pl.BlockSpec((K, Nout), lambda i: (0, 0)),
                  pl.BlockSpec((1, Nout), lambda i: (0, 0))],
        out_specs=pl.BlockSpec((M, Nout), lambda i: (0, 0)),
    )(x, w, b.reshape(1, Nout).astype(jnp.float32))


def mlp2_pallas(x, w1, b1, w2, b2):
    x = x.astype(jnp.float32)
    M, K = x.shape
    H = w1.shape[1]
    Nout = w2.shape[1]
    return pl.pallas_call(
        _mlp2_kernel,
        grid=(1,),
        out_shape=jax.ShapeDtypeStruct((M, Nout), jnp.float32),
        in_specs=[pl.BlockSpec((M, K), lambda i: (0, 0)),
                  pl.BlockSpec((K, H), lambda i: (0, 0)),
                  pl.BlockSpec((1, H), lambda i: (0, 0)),
                  pl.BlockSpec((H, Nout), lambda i: (0, 0)),
                  pl.BlockSpec((1, Nout), lambda i: (0, 0))],
        out_specs=pl.BlockSpec((M, Nout), lambda i: (0, 0)),
    )(x, w1.astype(jnp.float32), b1.reshape(1, H).astype(jnp.float32),
      w2.astype(jnp.float32), b2.reshape(1, Nout).astype(jnp.float32))


def gcn_stack_pallas(x, adj_big, w_big, b_big):
    M, D = x.shape
    Lg = w_big.shape[0]
    return pl.pallas_call(
        _gcn_stack_kernel,
        grid=(1,),
        out_shape=jax.ShapeDtypeStruct((M, D), jnp.float32),
        in_specs=[pl.BlockSpec((M, D), lambda i: (0, 0)),
                  pl.BlockSpec((D, D), lambda i: (0, 0)),
                  pl.BlockSpec((Lg, D, D), lambda i: (0, 0, 0)),
                  pl.BlockSpec((Lg, 1, D), lambda i: (0, 0, 0))],
        out_specs=pl.BlockSpec((M, D), lambda i: (0, 0)),
    )(x.astype(jnp.float32), adj_big.astype(jnp.float32),
      w_big.astype(jnp.float32), b_big.astype(jnp.float32))


def tnt_stack_pallas(tnt, seqs, attn_bias, n_person):
    """All TNT layers x 4 scales x full batch in a single pallas_call.

    seqs: (4, B, S_pad, d); attn_bias: (4, 1, S_pad) additive key mask.
    Returns:
      cls_out: (L, 4, B, d)            per-layer CLS for every scale,
      tok_out: (L, 4, B*n_person, d)   per-layer first-n_person tokens
                                        (the scale-1 slice is the person tokens).
    """
    NS, B, S, d = seqs.shape
    L = tnt["wo"].shape[0]

    in_specs = [
        pl.BlockSpec((1, B, S, d), lambda s, l: (s, 0, 0, 0)),        # seqs (read at l==0)
        pl.BlockSpec((1, 1, S), lambda s, l: (s, 0, 0)),              # key mask
        pl.BlockSpec((1, 3, d, d), lambda s, l: (l, s, 0, 0)),        # wq/wk/wv
        pl.BlockSpec((1, 1, 3, d), lambda s, l: (l, s, 0, 0)),        # bq/bk/bv
        pl.BlockSpec((1, 1, d, d), lambda s, l: (l, s, 0, 0)),        # wo
        pl.BlockSpec((1, 1, 1, d), lambda s, l: (l, s, 0, 0)),        # bo
        pl.BlockSpec((1, 1, d, 2 * d), lambda s, l: (l, s, 0, 0)),    # w1
        pl.BlockSpec((1, 1, 1, 2 * d), lambda s, l: (l, s, 0, 0)),    # b1
        pl.BlockSpec((1, 1, 2 * d, d), lambda s, l: (l, s, 0, 0)),    # w2
        pl.BlockSpec((1, 1, 1, d), lambda s, l: (l, s, 0, 0)),        # b2
        pl.BlockSpec((1, 1, 4, d), lambda s, l: (l, s, 0, 0)),        # ln params
    ]
    out_specs = [
        pl.BlockSpec((1, 1, B, d), lambda s, l: (l, s, 0, 0)),                 # CLS
        pl.BlockSpec((1, 1, B * n_person, d), lambda s, l: (l, s, 0, 0)),      # tokens
    ]
    out_shape = [jax.ShapeDtypeStruct((L, NS, B, d), jnp.float32),
                 jax.ShapeDtypeStruct((L, NS, B * n_person, d), jnp.float32)]

    cls_out, tok_out = pl.pallas_call(
        _tnt_stack_kernel,
        grid=(NS, L),
        out_shape=out_shape,
        in_specs=in_specs,
        out_specs=out_specs,
        scratch_shapes=[pltpu.VMEM((B, S, d), jnp.float32)],
        compiler_params=pltpu.CompilerParams(
            dimension_semantics=("parallel", "arbitrary")),
    )(seqs.astype(jnp.float32), attn_bias.astype(jnp.float32),
      tnt["wqkv"], tnt["bqkv"], tnt["wo"], tnt["bo"],
      tnt["w1"], tnt["b1"], tnt["w2"], tnt["b2"], tnt["ln"])
    return cls_out, tok_out


# ----------------------------------------------------------------------------
# Plain-JAX glue
# ----------------------------------------------------------------------------
def mlp_apply(layers, x):
    """build_mlp equivalent (eval mode, no BN/dropout)."""
    if len(layers) == 1:
        (w, b), = layers
        return linear_pallas(x, w, b)
    if len(layers) == 2:
        (w1, b1), (w2, b2) = layers
        return mlp2_pallas(x, w1, b1, w2, b2)
    for i, (w, b) in enumerate(layers):  # generic fallback (unused here)
        y = linear_pallas(x, w, b)
        x = jnp.maximum(y, 0.0) if i < len(layers) - 1 else y
    return x


# ----------------------------------------------------------------------------
# COMPOSER forward
# ----------------------------------------------------------------------------
def composer_forward(params, cfg, joint_feats, ball_feats):
    del ball_feats  # volleyball path, ball_trajectory_use=False
    B, N, J, T, _ = joint_feats.shape
    d = cfg["d"]
    emb = cfg["emb"]
    L_tnt = cfg["TNT_n_layers"]
    nc = cfg["num_classes"]
    npc = cfg["num_person_action_classes"]
    nproto = cfg["nmb_prototypes"]

    jfp = joint_feats[..., :cfg["joint2person_feat_dim"]]      # joints->person feats
    image_coords = joint_feats[..., -2:].astype(jnp.int32)     # (B,N,J,T,2) = (x, y)

    # ---- learned Fourier image-coordinate embedding (plain jnp; tiny op) -----
    H, W = cfg["image_h"], cfg["image_w"]
    coords_h = jnp.arange(H, dtype=jnp.float32) / H
    coords_w = jnp.arange(W, dtype=jnp.float32) / W
    gw, gh = jnp.meshgrid(coords_w, coords_h)
    xy = jnp.stack([gw, gh], axis=-1).reshape(H * W, 2)
    proj = 2.0 * jnp.pi * (xy @ params["img_w"] + params["img_b"][None, :])
    img_learned = jnp.concatenate([jnp.sin(proj), jnp.cos(proj)], axis=-1)  # (H*W, emb)
    flat_idx = image_coords[..., 1] * W + image_coords[..., 0]              # y*W + x
    image_coords_embeded = img_learned[flat_idx]                            # 1-D take

    jf = joint_feats[..., :-2]                                  # drop (x, y)
    time_ids = jnp.broadcast_to(jnp.arange(1, T + 1, dtype=jnp.int32), (B, N, J, T))
    time_seq = params["time_embed"][time_ids]

    joint_class_ids = jf[..., -1].astype(jnp.int32)
    joint_classes_embeded = params["joint_class_embed"][joint_class_ids]

    # ---- GCN stack: single fused, lane-dense kernel (kron weights from init) --
    BNT = B * N * T
    x_r = jnp.swapaxes(joint_classes_embeded, 2, 3).reshape(BNT, J * emb)
    y_r = gcn_stack_pallas(x_r, params["adj_big"], params["gcn_w_big"],
                           params["gcn_b_big"])
    joint_classes_encode = jnp.swapaxes(y_r.reshape(B, N, T, J, emb), 2, 3)

    jf = jf[..., :-1]                                           # raw joint feats (emb)
    CLS = params["special_token_embed"][jnp.zeros((B, 1), jnp.int32)]   # (B,1,d)

    # ---- track projections (fused 2-layer MLP kernels) -----------------------
    composite = jnp.concatenate(
        [jf, time_seq, image_coords_embeded, joint_classes_encode], axis=-1)
    joint_proj = mlp_apply(params["joint_track_mlp"],
                           composite.reshape(B * N * J, T * 4 * emb)).reshape(B, N * J, d)
    person_proj = mlp_apply(params["person_track_mlp"],
                            jfp.reshape(B * N, -1)).reshape(B, N, d)

    tem1 = jnp.repeat(person_proj, N, axis=1)          # index N*i+j -> person i
    tem2 = jnp.tile(person_proj, (1, N, 1))            # index N*i+j -> person j
    tem3 = jnp.concatenate([tem1, tem2], axis=-1)
    inter_idx = jnp.array(
        [N * i + j for i in range(N) for j in range(N) if j != i], dtype=jnp.int32)
    interaction = tem3[:, inter_idx, :]                 # (B, N(N-1), 2d)
    inter_proj = mlp_apply(params["interaction_mlp"],
                           interaction.reshape(-1, 2 * d)).reshape(B, N * (N - 1), d)

    # volleyball grouping by middle-hip x coordinate
    fidx = cfg["group_person_frame_idx"]
    hips = (jfp[:, :, 11, fidx, -2:] + jfp[:, :, 12, fidx, -2:]) / 2.0
    order = jnp.argsort(hips[:, :, 0], axis=-1)
    half = N // 2
    left_idx, right_idx = order[:, :half], order[:, half:]
    pp_flat = person_proj.reshape(B * N, d)
    # NOTE: indexing the flattened (B*N, d) tensor with raw per-batch argsort
    # indices (no batch offset) reproduces the original PyTorch code exactly
    # (`.flatten(0,1)[idx.flatten(0,1)]`), including its cross-batch behavior.
    left_repre = pp_flat[left_idx.reshape(-1)].reshape(B, half * d)
    right_repre = pp_flat[right_idx.reshape(-1)].reshape(B, half * d)
    # both group-MLP calls share weights -> stack along M into ONE fused MLP call
    group_out = mlp_apply(params["p2g_mlp"],
                          jnp.concatenate([left_repre, right_repre], axis=0))  # (2B, d)
    group_proj = jnp.stack([group_out[:B], group_out[B:]], axis=1)              # (B, 2, d)

    # ---- TNT stand-in: all layers/scales/batch in ONE pallas_call ------------
    # TODO(synk): source of models/tnt_four_scales.py (TNT) is not provided; this is a
    # simplified per-scale transformer stand-in with the same output interface
    # (per-layer fine/middle/coarse/group CLS + joint/person tokens); left/right
    # group indices are not used by the stand-in.
    lens = [1 + N * J, 1 + N, 1 + N * (N - 1), 1 + 2]
    S_pad = ((max(lens) + 7) // 8) * 8

    def pad_seq(toks):
        seq = jnp.concatenate([CLS, toks], axis=1)
        return jnp.pad(seq, ((0, 0), (0, S_pad - seq.shape[1]), (0, 0)))

    seqs = jnp.stack([pad_seq(joint_proj), pad_seq(person_proj),
                      pad_seq(inter_proj), pad_seq(group_proj)], axis=0)  # (4,B,S_pad,d)
    pos = jnp.arange(S_pad)
    attn_bias = jnp.where(pos[None, :] < jnp.array(lens)[:, None],
                          0.0, -1e9).astype(jnp.float32)[:, None, :]      # (4,1,S_pad)

    cls_all, tok_all = tnt_stack_pallas(params["tnt"], seqs, attn_bias, N)
    # cls_all: (L, 4, B, d); person tokens come from scale 1 (middle):
    person_all = tok_all[:, 1].reshape(L_tnt, B, N, d)                    # (L, B, N, d)

    # ---- merged heads: classifier + person classifier + prototypes in ONE call
    last_cls = cls_all[-1]                                                # (4, B, d)
    normed = last_cls / jnp.maximum(
        jnp.linalg.norm(last_cls, axis=-1, keepdims=True), 1e-12)
    rows = jnp.concatenate([cls_all.reshape(L_tnt * 4 * B, d),
                            person_all.reshape(L_tnt * B * N, d),
                            normed.reshape(4 * B, d)], axis=0)            # (40, d)
    head_out = linear_pallas(rows, params["head_w"], params["head_b"])    # (40, 33)

    n_cls_rows = L_tnt * 4 * B
    n_per_rows = L_tnt * B * N
    cls_logits = head_out[:n_cls_rows, :nc].reshape(L_tnt, 4, B, nc)
    per_logits = head_out[n_cls_rows:n_cls_rows + n_per_rows,
                          nc:nc + npc].reshape(L_tnt, B * N, npc)
    proto_scores = head_out[n_cls_rows + n_per_rows:,
                            nc + npc:].reshape(4, B, nproto)

    pred_logits = [[cls_logits[l, 0], cls_logits[l, 1], cls_logits[l, 2],
                    cls_logits[l, 3]] for l in range(L_tnt)]
    pred_logits_person = [per_logits[l] for l in range(L_tnt)]
    scores = [proto_scores[0], proto_scores[1], proto_scores[2], proto_scores[3]]

    return pred_logits, pred_logits_person, scores


# ----------------------------------------------------------------------------
# Deterministic parameter initialization
# ----------------------------------------------------------------------------
class KeyGen:
    def __init__(self, seed):
        self.key = jax.random.PRNGKey(seed)

    def __call__(self):
        self.key, sub = jax.random.split(self.key)
        return sub


def _init_mlp(kg, in_dim, hidden_dims, out_dim):
    layers = []
    dims = [in_dim] + (hidden_dims or [])
    for i in range(len(dims) - 1):
        w = jax.random.normal(kg(), (dims[i], dims[i + 1]), jnp.float32) / math.sqrt(dims[i])
        layers.append((w, jnp.zeros((dims[i + 1],), jnp.float32)))
    w = jax.random.normal(kg(), (dims[-1], out_dim), jnp.float32) / math.sqrt(dims[-1])
    layers.append((w, jnp.zeros((out_dim,), jnp.float32)))
    return layers


def _init_tnt_stack(kg, d, n_layers, num_scales=4):
    def nrm(shape, fan_in):
        return jax.random.normal(kg(), shape, jnp.float32) / math.sqrt(fan_in)

    ln = jnp.stack([jnp.ones((n_layers, num_scales, d), jnp.float32),
                    jnp.zeros((n_layers, num_scales, d), jnp.float32),
                    jnp.ones((n_layers, num_scales, d), jnp.float32),
                    jnp.zeros((n_layers, num_scales, d), jnp.float32)],
                   axis=2)                                   # (L, NS, 4, d)
    return {
        "wqkv": nrm((n_layers, num_scales * 3, d, d), d),    # [q,k,v] per scale
        "bqkv": jnp.zeros((n_layers, num_scales, 3, d), jnp.float32),
        "wo": nrm((n_layers, num_scales, d, d), d),
        "bo": jnp.zeros((n_layers, num_scales, 1, d), jnp.float32),
        "w1": nrm((n_layers, num_scales, d, 2 * d), d),
        "b1": jnp.zeros((n_layers, num_scales, 1, 2 * d), jnp.float32),
        "w2": nrm((n_layers, num_scales, 2 * d, d), 2 * d),
        "b2": jnp.zeros((n_layers, num_scales, 1, d), jnp.float32),
        "ln": ln,
    }


def init_params(cfg):
    kg = KeyGen(42)
    J, T, N = cfg["J"], cfg["T"], cfg["N"]
    emb, d = cfg["emb"], cfg["d"]
    Lg = cfg["num_gcn_layers"]

    # deterministic joint-graph adjacency (chain + self-loops, row-normalized);
    # stands in for models/joint_graph.txt which is not available in-script.
    A = jnp.eye(J, dtype=jnp.float32)
    idx = jnp.arange(J - 1)
    A = A.at[idx, idx + 1].set(1.0).at[idx + 1, idx].set(1.0)
    A = A / jnp.sum(A, axis=-1, keepdims=True)

    gcn_w = jnp.stack(
        [jax.random.normal(kg(), (emb, emb), jnp.float32) / math.sqrt(emb)
         for _ in range(Lg)], axis=0)
    gcn_b = jnp.zeros((Lg, emb), jnp.float32)

    # parameter-only kron expansions hoisted out of the forward pass
    eyeJ = jnp.eye(J, dtype=jnp.float32)
    eyeE = jnp.eye(emb, dtype=jnp.float32)
    gcn_w_big = jnp.einsum("jk,lmn->ljmkn", eyeJ, gcn_w).reshape(Lg, J * emb, J * emb)
    gcn_b_big = jnp.tile(gcn_b, (1, J)).reshape(Lg, 1, J * emb)
    adj_big = jnp.einsum("ij,kl->jkil", A, eyeE).reshape(J * emb, J * emb)

    # merged classification heads (classifier | person classifier | prototypes)
    (cw, cb), = _init_mlp(kg, d, None, cfg["num_classes"])
    (pw, pb), = _init_mlp(kg, d, None, cfg["num_person_action_classes"])
    proto_w = jax.random.normal(kg(), (d, cfg["nmb_prototypes"]), jnp.float32) / math.sqrt(d)
    head_w = jnp.concatenate([cw, pw, proto_w], axis=1)                  # (d, nc+npc+np)
    head_b = jnp.concatenate(
        [cb, pb, jnp.zeros((cfg["nmb_prototypes"],), jnp.float32)]).reshape(1, -1)

    params = {
        "img_w": jax.random.normal(kg(), (2, emb // 2), jnp.float32),
        "img_b": jnp.zeros((emb // 2,), jnp.float32),
        "time_embed": 0.02 * jax.random.normal(kg(), (cfg["max_times_embed"], emb), jnp.float32),
        "joint_class_embed": 0.02 * jax.random.normal(kg(), (J, emb), jnp.float32),
        "special_token_embed": 0.02 * jax.random.normal(kg(), (cfg["max_num_tokens"], d), jnp.float32),
        "gcn_w_big": gcn_w_big,
        "gcn_b_big": gcn_b_big,
        "adj_big": adj_big,
        "joint_track_mlp": _init_mlp(kg, T * emb * 4, [d], d),
        "person_track_mlp": _init_mlp(kg, J * T * cfg["joint2person_feat_dim"], [d], d),
        "interaction_mlp": _init_mlp(kg, 2 * d, [d], d),
        "p2g_mlp": _init_mlp(kg, (N // 2) * d, [d], d),
        "head_w": head_w,
        "head_b": head_b,
        "tnt": _init_tnt_stack(kg, d, cfg["TNT_n_layers"]),
    }
    return params


# ----------------------------------------------------------------------------
# Main
# ----------------------------------------------------------------------------
if __name__ == "__main__":
    cfg = dict(N=4, J=17, T=4, emb=16, d=32,
               num_gcn_layers=2, TNT_n_layers=2,
               max_num_tokens=4, max_times_embed=8,
               image_h=32, image_w=32,
               num_classes=8, num_person_action_classes=9, nmb_prototypes=16,
               joint2person_feat_dim=19, group_person_frame_idx=2)

    params = init_params(cfg)

    key = jax.random.PRNGKey(0)
    k1, k2, k3, k4 = jax.random.split(key, 4)
    B, N, J, T = 2, cfg["N"], cfg["J"], cfg["T"]
    base = jax.random.normal(k1, (B, N, J, T, cfg["emb"]), jnp.float32)
    class_col = jnp.broadcast_to(
        jnp.arange(J, dtype=jnp.float32)[None, None, :, None, None], (B, N, J, T, 1))
    xs = jax.random.randint(k2, (B, N, J, T, 1), 0, cfg["image_w"]).astype(jnp.float32)
    ys = jax.random.randint(k3, (B, N, J, T, 1), 0, cfg["image_h"]).astype(jnp.float32)
    # last-dim layout: [16 raw feats | joint_class_id | x | y]  -> 19 = emb + 3
    joint_feats = jnp.concatenate([base, class_col, xs, ys], axis=-1)
    ball_feats = jax.random.normal(k4, (B, T, 6), jnp.float32)  # unused

    fwd = jax.jit(lambda p, jf, bf: composer_forward(p, cfg, jf, bf))
    out = fwd(params, joint_feats, ball_feats)
    jax.block_until_ready(out)
    print("KERNEL_OK")
</pallas_src>

<mosaic_0001>
module attributes {stable_mosaic.version = 11 : i64} {
  func.func @_gcn_stack_kernel(%arg0: i32, %arg1: memref<32x272xf32, #tpu.memory_space<vmem>>, %arg2: memref<272x272xf32, #tpu.memory_space<vmem>>, %arg3: memref<2x272x272xf32, #tpu.memory_space<vmem>>, %arg4: memref<2x1x272xf32, #tpu.memory_space<vmem>>, %arg5: memref<32x272xf32, #tpu.memory_space<vmem>>) attributes {dimension_semantics = [#tpu.dimension_semantics<arbitrary>], iteration_bounds = array<i64: 1>, scalar_prefetch = 0 : i64, scratch_operands = 0 : i64, tpu.core_type = #tpu.core_type<tc>, window_params = [{pipeline_mode = #tpu.pipeline_mode<synchronous>, transform_indices = @transform_0, window_bounds = array<i64: 32, 272>}, {pipeline_mode = #tpu.pipeline_mode<synchronous>, transform_indices = @transform_1, window_bounds = array<i64: 272, 272>}, {pipeline_mode = #tpu.pipeline_mode<synchronous>, transform_indices = @transform_2, window_bounds = array<i64: 2, 272, 272>}, {pipeline_mode = #tpu.pipeline_mode<synchronous>, transform_indices = @transform_3, window_bounds = array<i64: 2, 1, 272>}, {pipeline_mode = #tpu.pipeline_mode<synchronous>, transform_indices = @transform_4, window_bounds = array<i64: 32, 272>}]} {
    %c0 = arith.constant 0 : index
    %c0_0 = arith.constant 0 : index
    %0 = vector.load %arg1[%c0, %c0_0] : memref<32x272xf32, #tpu.memory_space<vmem>>, vector<32x272xf32>
    %c0_1 = arith.constant 0 : index
    %c0_2 = arith.constant 0 : index
    %1 = vector.load %arg2[%c0_1, %c0_2] : memref<272x272xf32, #tpu.memory_space<vmem>>, vector<272x272xf32>
    %c0_3 = arith.constant 0 : index
    %c0_4 = arith.constant 0 : index
    %c0_5 = arith.constant 0 : index
    %2 = vector.load %arg3[%c0_3, %c0_4, %c0_5] : memref<2x272x272xf32, #tpu.memory_space<vmem>>, vector<1x272x272xf32>
    %3 = vector.shape_cast %2 : vector<1x272x272xf32> to vector<272x272xf32>
    %cst = arith.constant dense<0.000000e+00> : vector<32x272xf32>
    %4 = tpu.matmul %0, %3, %cst {dimension_numbers = #tpu.dot_dimension_numbers<[1], [0], [0], [1], [0, 0, 1, 1], [], []>} : vector<32x272xf32>, vector<272x272xf32>, vector<32x272xf32> -> vector<32x272xf32>
    %c0_6 = arith.constant 0 : index
    %c0_7 = arith.constant 0 : index
    %c0_8 = arith.constant 0 : index
    %5 = vector.load %arg4[%c0_6, %c0_7, %c0_8] : memref<2x1x272xf32, #tpu.memory_space<vmem>>, vector<1x1x272xf32>
    %6 = vector.shape_cast %5 : vector<1x1x272xf32> to vector<1x272xf32>
    %7 = vector.broadcast %6 : vector<1x272xf32> to vector<32x272xf32>
    %8 = arith.addf %4, %7 : vector<32x272xf32>
    %cst_9 = arith.constant dense<0.000000e+00> : vector<32x272xf32>
    %9 = tpu.matmul %8, %1, %cst_9 {dimension_numbers = #tpu.dot_dimension_numbers<[1], [0], [0], [1], [0, 0, 1, 1], [], []>} : vector<32x272xf32>, vector<272x272xf32>, vector<32x272xf32> -> vector<32x272xf32>
    %cst_10 = arith.constant 0.000000e+00 : f32
    %10 = vector.broadcast %cst_10 : f32 to vector<32x272xf32>
    %11 = arith.maximumf %9, %10 : vector<32x272xf32>
    %c1 = arith.constant 1 : index
    %c0_11 = arith.constant 0 : index
    %c0_12 = arith.constant 0 : index
    %12 = vector.load %arg3[%c1, %c0_11, %c0_12] : memref<2x272x272xf32, #tpu.memory_space<vmem>>, vector<1x272x272xf32>
    %13 = vector.shape_cast %12 : vector<1x272x272xf32> to vector<272x272xf32>
    %cst_13 = arith.constant dense<0.000000e+00> : vector<32x272xf32>
    %14 = tpu.matmul %11, %13, %cst_13 {dimension_numbers = #tpu.dot_dimension_numbers<[1], [0], [0], [1], [0, 0, 1, 1], [], []>} : vector<32x272xf32>, vector<272x272xf32>, vector<32x272xf32> -> vector<32x272xf32>
    %c1_14 = arith.constant 1 : index
    %c0_15 = arith.constant 0 : index
    %c0_16 = arith.constant 0 : index
    %15 = vector.load %arg4[%c1_14, %c0_15, %c0_16] : memref<2x1x272xf32, #tpu.memory_space<vmem>>, vector<1x1x272xf32>
    %16 = vector.shape_cast %15 : vector<1x1x272xf32> to vector<1x272xf32>
    %17 = vector.broadcast %16 : vector<1x272xf32> to vector<32x272xf32>
    %18 = arith.addf %14, %17 : vector<32x272xf32>
    %cst_17 = arith.constant dense<0.000000e+00> : vector<32x272xf32>
    %19 = tpu.matmul %18, %1, %cst_17 {dimension_numbers = #tpu.dot_dimension_numbers<[1], [0], [0], [1], [0, 0, 1, 1], [], []>} : vector<32x272xf32>, vector<272x272xf32>, vector<32x272xf32> -> vector<32x272xf32>
    %cst_18 = arith.constant 0.000000e+00 : f32
    %20 = vector.broadcast %cst_18 : f32 to vector<32x272xf32>
    %21 = arith.maximumf %19, %20 : vector<32x272xf32>
    %c0_19 = arith.constant 0 : index
    %c0_20 = arith.constant 0 : index
    %22 = vector.load %arg5[%c0_19, %c0_20] : memref<32x272xf32, #tpu.memory_space<vmem>>, vector<32x272xf32>
    tpu.vector_store %arg5[%c0_19, %c0_20], %21 {strides = array<i32>} : memref<32x272xf32, #tpu.memory_space<vmem>>, vector<32x272xf32>,
    return
  }
  func.func @transform_0(%arg0: i32) -> (i32, i32) {
    %c0_i32 = arith.constant 0 : i32
    %c0_i32_0 = arith.constant 0 : i32
    %c0_i32_1 = arith.constant 0 : i32
    return %c0_i32, %c0_i32_0 : i32, i32
  }
  func.func @transform_1(%arg0: i32) -> (i32, i32) {
    %c0_i32 = arith.constant 0 : i32
    %c0_i32_0 = arith.constant 0 : i32
    %c0_i32_1 = arith.constant 0 : i32
    return %c0_i32, %c0_i32_0 : i32, i32
  }
  func.func @transform_2(%arg0: i32) -> (i32, i32, i32) {
    %c0_i32 = arith.constant 0 : i32
    %c0_i32_0 = arith.constant 0 : i32
    %c0_i32_1 = arith.constant 0 : i32
    %c0_i32_2 = arith.constant 0 : i32
    return %c0_i32, %c0_i32_0, %c0_i32_1 : i32, i32, i32
  }
  func.func @transform_3(%arg0: i32) -> (i32, i32, i32) {
    %c0_i32 = arith.constant 0 : i32
    %c0_i32_0 = arith.constant 0 : i32
    %c0_i32_1 = arith.constant 0 : i32
    %c0_i32_2 = arith.constant 0 : i32
    return %c0_i32, %c0_i32_0, %c0_i32_1 : i32, i32, i32
  }
  func.func @transform_4(%arg0: i32) -> (i32, i32) {
    %c0_i32 = arith.constant 0 : i32
    %c0_i32_0 = arith.constant 0 : i32
    %c0_i32_1 = arith.constant 0 : i32
    return %c0_i32, %c0_i32_0 : i32, i32
  }
}

module attributes {stable_mosaic.version = 11 : i64} {
  func.func @_mlp2_kernel(%arg0: i32, %arg1: memref<136x256xf32, #tpu.memory_space<vmem>>, %arg2: memref<256x32xf32, #tpu.memory_space<vmem>>, %arg3: memref<1x32xf32, #tpu.memory_space<vmem>>, %arg4: memref<32x32xf32, #tpu.memory_space<vmem>>, %arg5: memref<1x32xf32, #tpu.memory_space<vmem>>, %arg6: memref<136x32xf32, #tpu.memory_space<vmem>>) attributes {dimension_semantics = [#tpu.dimension_semantics<arbitrary>], iteration_bounds = array<i64: 1>, scalar_prefetch = 0 : i64, scratch_operands = 0 : i64, tpu.core_type = #tpu.core_type<tc>, window_params = [{pipeline_mode = #tpu.pipeline_mode<synchronous>, transform_indices = @transform_0, window_bounds = array<i64: 136, 256>}, {pipeline_mode = #tpu.pipeline_mode<synchronous>, transform_indices = @transform_1, window_bounds = array<i64: 256, 32>}, {pipeline_mode = #tpu.pipeline_mode<synchronous>, transform_indices = @transform_2, window_bounds = array<i64: 1, 32>}, {pipeline_mode = #tpu.pipeline_mode<synchronous>, transform_indices = @transform_3, window_bounds = array<i64: 32, 32>}, {pipeline_mode = #tpu.pipeline_mode<synchronous>, transform_indices = @transform_4, window_bounds = array<i64: 1, 32>}, {pipeline_mode = #tpu.pipeline_mode<synchronous>, transform_indices = @transform_5, window_bounds = array<i64: 136, 32>}]} {
    %c0 = arith.constant 0 : index
    %c0_0 = arith.constant 0 : index
    %0 = vector.load %arg1[%c0, %c0_0] : memref<136x256xf32, #tpu.memory_space<vmem>>, vector<136x256xf32>
    %c0_1 = arith.constant 0 : index
    %c0_2 = arith.constant 0 : index
    %1 = vector.load %arg2[%c0_1, %c0_2] : memref<256x32xf32, #tpu.memory_space<vmem>>, vector<256x32xf32>
    %cst = arith.constant dense<0.000000e+00> : vector<136x32xf32>
    %2 = tpu.matmul %0, %1, %cst {dimension_numbers = #tpu.dot_dimension_numbers<[1], [0], [0], [1], [0, 0, 1, 1], [], []>} : vector<136x256xf32>, vector<256x32xf32>, vector<136x32xf32> -> vector<136x32xf32>
    %c0_3 = arith.constant 0 : index
    %c0_4 = arith.constant 0 : index
    %3 = vector.load %arg3[%c0_3, %c0_4] : memref<1x32xf32, #tpu.memory_space<vmem>>, vector<1x32xf32>
    %4 = vector.broadcast %3 : vector<1x32xf32> to vector<136x32xf32>
    %5 = arith.addf %2, %4 : vector<136x32xf32>
    %cst_5 = arith.constant 0.000000e+00 : f32
    %6 = vector.broadcast %cst_5 : f32 to vector<136x32xf32>
    %7 = arith.maximumf %5, %6 : vector<136x32xf32>
    %c0_6 = arith.constant 0 : index
    %c0_7 = arith.constant 0 : index
    %8 = vector.load %arg4[%c0_6, %c0_7] : memref<32x32xf32, #tpu.memory_space<vmem>>, vector<32x32xf32>
    %cst_8 = arith.constant dense<0.000000e+00> : vector<136x32xf32>
    %9 = tpu.matmul %7, %8, %cst_8 {dimension_numbers = #tpu.dot_dimension_numbers<[1], [0], [0], [1], [0, 0, 1, 1], [], []>} : vector<136x32xf32>, vector<32x32xf32>, vector<136x32xf32> -> vector<136x32xf32>
    %c0_9 = arith.constant 0 : index
    %c0_10 = arith.constant 0 : index
    %10 = vector.load %arg5[%c0_9, %c0_10] : memref<1x32xf32, #tpu.memory_space<vmem>>, vector<1x32xf32>
    %11 = vector.broadcast %10 : vector<1x32xf32> to vector<136x32xf32>
    %12 = arith.addf %9, %11 : vector<136x32xf32>
    %c0_11 = arith.constant 0 : index
    %c0_12 = arith.constant 0 : index
    %13 = vector.load %arg6[%c0_11, %c0_12] : memref<136x32xf32, #tpu.memory_space<vmem>>, vector<136x32xf32>
    tpu.vector_store %arg6[%c0_11, %c0_12], %12 {strides = array<i32>} : memref<136x32xf32, #tpu.memory_space<vmem>>, vector<136x32xf32>,
    return
  }
  func.func @transform_0(%arg0: i32) -> (i32, i32) {
    %c0_i32 = arith.constant 0 : i32
    %c0_i32_0 = arith.constant 0 : i32
    %c0_i32_1 = arith.constant 0 : i32
    return %c0_i32, %c0_i32_0 : i32, i32
  }
  func.func @transform_1(%arg0: i32) -> (i32, i32) {
    %c0_i32 = arith.constant 0 : i32
    %c0_i32_0 = arith.constant 0 : i32
    %c0_i32_1 = arith.constant 0 : i32
    return %c0_i32, %c0_i32_0 : i32, i32
  }
  func.func @transform_2(%arg0: i32) -> (i32, i32) {
    %c0_i32 = arith.constant 0 : i32
    %c0_i32_0 = arith.constant 0 : i32
    %c0_i32_1 = arith.constant 0 : i32
    return %c0_i32, %c0_i32_0 : i32, i32
  }
  func.func @transform_3(%arg0: i32) -> (i32, i32) {
    %c0_i32 = arith.constant 0 : i32
    %c0_i32_0 = arith.constant 0 : i32
    %c0_i32_1 = arith.constant 0 : i32
    return %c0_i32, %c0_i32_0 : i32, i32
  }
  func.func @transform_4(%arg0: i32) -> (i32, i32) {
    %c0_i32 = arith.constant 0 : i32
    %c0_i32_0 = arith.constant 0 : i32
    %c0_i32_1 = arith.constant 0 : i32
    return %c0_i32, %c0_i32_0 : i32, i32
  }
  func.func @transform_5(%arg0: i32) -> (i32, i32) {
    %c0_i32 = arith.constant 0 : i32
    %c0_i32_0 = arith.constant 0 : i32
    %c0_i32_1 = arith.constant 0 : i32
    return %c0_i32, %c0_i32_0 : i32, i32
  }
}

module attributes {stable_mosaic.version = 11 : i64} {
  func.func @_mlp2_kernel(%arg0: i32, %arg1: memref<8x1292xf32, #tpu.memory_space<vmem>>, %arg2: memref<1292x32xf32, #tpu.memory_space<vmem>>, %arg3: memref<1x32xf32, #tpu.memory_space<vmem>>, %arg4: memref<32x32xf32, #tpu.memory_space<vmem>>, %arg5: memref<1x32xf32, #tpu.memory_space<vmem>>, %arg6: memref<8x32xf32, #tpu.memory_space<vmem>>) attributes {dimension_semantics = [#tpu.dimension_semantics<arbitrary>], iteration_bounds = array<i64: 1>, scalar_prefetch = 0 : i64, scratch_operands = 0 : i64, tpu.core_type = #tpu.core_type<tc>, window_params = [{pipeline_mode = #tpu.pipeline_mode<synchronous>, transform_indices = @transform_0, window_bounds = array<i64: 8, 1292>}, {pipeline_mode = #tpu.pipeline_mode<synchronous>, transform_indices = @transform_1, window_bounds = array<i64: 1292, 32>}, {pipeline_mode = #tpu.pipeline_mode<synchronous>, transform_indices = @transform_2, window_bounds = array<i64: 1, 32>}, {pipeline_mode = #tpu.pipeline_mode<synchronous>, transform_indices = @transform_3, window_bounds = array<i64: 32, 32>}, {pipeline_mode = #tpu.pipeline_mode<synchronous>, transform_indices = @transform_4, window_bounds = array<i64: 1, 32>}, {pipeline_mode = #tpu.pipeline_mode<synchronous>, transform_indices = @transform_5, window_bounds = array<i64: 8, 32>}]} {
    %c0 = arith.constant 0 : index
    %c0_0 = arith.constant 0 : index
    %0 = vector.load %arg1[%c0, %c0_0] : memref<8x1292xf32, #tpu.memory_space<vmem>>, vector<8x1292xf32>
    %c0_1 = arith.constant 0 : index
    %c0_2 = arith.constant 0 : index
    %1 = vector.load %arg2[%c0_1, %c0_2] : memref<1292x32xf32, #tpu.memory_space<vmem>>, vector<1292x32xf32>
    %cst = arith.constant dense<0.000000e+00> : vector<8x32xf32>
    %2 = tpu.matmul %0, %1, %cst {dimension_numbers = #tpu.dot_dimension_numbers<[1], [0], [0], [1], [0, 0, 1, 1], [], []>} : vector<8x1292xf32>, vector<1292x32xf32>, vector<8x32xf32> -> vector<8x32xf32>
    %c0_3 = arith.constant 0 : index
    %c0_4 = arith.constant 0 : index
    %3 = vector.load %arg3[%c0_3, %c0_4] : memref<1x32xf32, #tpu.memory_space<vmem>>, vector<1x32xf32>
    %4 = vector.broadcast %3 : vector<1x32xf32> to vector<8x32xf32>
    %5 = arith.addf %2, %4 : vector<8x32xf32>
    %cst_5 = arith.constant 0.000000e+00 : f32
    %6 = vector.broadcast %cst_5 : f32 to vector<8x32xf32>
    %7 = arith.maximumf %5, %6 : vector<8x32xf32>
    %c0_6 = arith.constant 0 : index
    %c0_7 = arith.constant 0 : index
    %8 = vector.load %arg4[%c0_6, %c0_7] : memref<32x32xf32, #tpu.memory_space<vmem>>, vector<32x32xf32>
    %cst_8 = arith.constant dense<0.000000e+00> : vector<8x32xf32>
    %9 = tpu.matmul %7, %8, %cst_8 {dimension_numbers = #tpu.dot_dimension_numbers<[1], [0], [0], [1], [0, 0, 1, 1], [], []>} : vector<8x32xf32>, vector<32x32xf32>, vector<8x32xf32> -> vector<8x32xf32>
    %c0_9 = arith.constant 0 : index
    %c0_10 = arith.constant 0 : index
    %10 = vector.load %arg5[%c0_9, %c0_10] : memref<1x32xf32, #tpu.memory_space<vmem>>, vector<1x32xf32>
    %11 = vector.broadcast %10 : vector<1x32xf32> to vector<8x32xf32>
    %12 = arith.addf %9, %11 : vector<8x32xf32>
    %c0_11 = arith.constant 0 : index
    %c0_12 = arith.constant 0 : index
    %13 = vector.load %arg6[%c0_11, %c0_12] : memref<8x32xf32, #tpu.memory_space<vmem>>, vector<8x32xf32>
    tpu.vector_store %arg6[%c0_11, %c0_12], %12 {strides = array<i32>} : memref<8x32xf32, #tpu.memory_space<vmem>>, vector<8x32xf32>,
    return
  }
  func.func @transform_0(%arg0: i32) -> (i32, i32) {
    %c0_i32 = arith.constant 0 : i32
    %c0_i32_0 = arith.constant 0 : i32
    %c0_i32_1 = arith.constant 0 : i32
    return %c0_i32, %c0_i32_0 : i32, i32
  }
  func.func @transform_1(%arg0: i32) -> (i32, i32) {
    %c0_i32 = arith.constant 0 : i32
    %c0_i32_0 = arith.constant 0 : i32
    %c0_i32_1 = arith.constant 0 : i32
    return %c0_i32, %c0_i32_0 : i32, i32
  }
  func.func @transform_2(%arg0: i32) -> (i32, i32) {
    %c0_i32 = arith.constant 0 : i32
    %c0_i32_0 = arith.constant 0 : i32
    %c0_i32_1 = arith.constant 0 : i32
    return %c0_i32, %c0_i32_0 : i32, i32
  }
  func.func @transform_3(%arg0: i32) -> (i32, i32) {
    %c0_i32 = arith.constant 0 : i32
    %c0_i32_0 = arith.constant 0 : i32
    %c0_i32_1 = arith.constant 0 : i32
    return %c0_i32, %c0_i32_0 : i32, i32
  }
  func.func @transform_4(%arg0: i32) -> (i32, i32) {
    %c0_i32 = arith.constant 0 : i32
    %c0_i32_0 = arith.constant 0 : i32
    %c0_i32_1 = arith.constant 0 : i32
    return %c0_i32, %c0_i32_0 : i32, i32
  }
  func.func @transform_5(%arg0: i32) -> (i32, i32) {
    %c0_i32 = arith.constant 0 : i32
    %c0_i32_0 = arith.constant 0 : i32
    %c0_i32_1 = arith.constant 0 : i32
    return %c0_i32, %c0_i32_0 : i32, i32
  }
}

module attributes {stable_mosaic.version = 11 : i64} {
  func.func @_mlp2_kernel(%arg0: i32, %arg1: memref<24x64xf32, #tpu.memory_space<vmem>>, %arg2: memref<64x32xf32, #tpu.memory_space<vmem>>, %arg3: memref<1x32xf32, #tpu.memory_space<vmem>>, %arg4: memref<32x32xf32, #tpu.memory_space<vmem>>, %arg5: memref<1x32xf32, #tpu.memory_space<vmem>>, %arg6: memref<24x32xf32, #tpu.memory_space<vmem>>) attributes {dimension_semantics = [#tpu.dimension_semantics<arbitrary>], iteration_bounds = array<i64: 1>, scalar_prefetch = 0 : i64, scratch_operands = 0 : i64, tpu.core_type = #tpu.core_type<tc>, window_params = [{pipeline_mode = #tpu.pipeline_mode<synchronous>, transform_indices = @transform_0, window_bounds = array<i64: 24, 64>}, {pipeline_mode = #tpu.pipeline_mode<synchronous>, transform_indices = @transform_1, window_bounds = array<i64: 64, 32>}, {pipeline_mode = #tpu.pipeline_mode<synchronous>, transform_indices = @transform_2, window_bounds = array<i64: 1, 32>}, {pipeline_mode = #tpu.pipeline_mode<synchronous>, transform_indices = @transform_3, window_bounds = array<i64: 32, 32>}, {pipeline_mode = #tpu.pipeline_mode<synchronous>, transform_indices = @transform_4, window_bounds = array<i64: 1, 32>}, {pipeline_mode = #tpu.pipeline_mode<synchronous>, transform_indices = @transform_5, window_bounds = array<i64: 24, 32>}]} {
    %c0 = arith.constant 0 : index
    %c0_0 = arith.constant 0 : index
    %0 = vector.load %arg1[%c0, %c0_0] : memref<24x64xf32, #tpu.memory_space<vmem>>, vector<24x64xf32>
    %c0_1 = arith.constant 0 : index
    %c0_2 = arith.constant 0 : index
    %1 = vector.load %arg2[%c0_1, %c0_2] : memref<64x32xf32, #tpu.memory_space<vmem>>, vector<64x32xf32>
    %cst = arith.constant dense<0.000000e+00> : vector<24x32xf32>
    %2 = tpu.matmul %0, %1, %cst {dimension_numbers = #tpu.dot_dimension_numbers<[1], [0], [0], [1], [0, 0, 1, 1], [], []>} : vector<24x64xf32>, vector<64x32xf32>, vector<24x32xf32> -> vector<24x32xf32>
    %c0_3 = arith.constant 0 : index
    %c0_4 = arith.constant 0 : index
    %3 = vector.load %arg3[%c0_3, %c0_4] : memref<1x32xf32, #tpu.memory_space<vmem>>, vector<1x32xf32>
    %4 = vector.broadcast %3 : vector<1x32xf32> to vector<24x32xf32>
    %5 = arith.addf %2, %4 : vector<24x32xf32>
    %cst_5 = arith.constant 0.000000e+00 : f32
    %6 = vector.broadcast %cst_5 : f32 to vector<24x32xf32>
    %7 = arith.maximumf %5, %6 : vector<24x32xf32>
    %c0_6 = arith.constant 0 : index
    %c0_7 = arith.constant 0 : index
    %8 = vector.load %arg4[%c0_6, %c0_7] : memref<32x32xf32, #tpu.memory_space<vmem>>, vector<32x32xf32>
    %cst_8 = arith.constant dense<0.000000e+00> : vector<24x32xf32>
    %9 = tpu.matmul %7, %8, %cst_8 {dimension_numbers = #tpu.dot_dimension_numbers<[1], [0], [0], [1], [0, 0, 1, 1], [], []>} : vector<24x32xf32>, vector<32x32xf32>, vector<24x32xf32> -> vector<24x32xf32>
    %c0_9 = arith.constant 0 : index
    %c0_10 = arith.constant 0 : index
    %10 = vector.load %arg5[%c0_9, %c0_10] : memref<1x32xf32, #tpu.memory_space<vmem>>, vector<1x32xf32>
    %11 = vector.broadcast %10 : vector<1x32xf32> to vector<24x32xf32>
    %12 = arith.addf %9, %11 : vector<24x32xf32>
    %c0_11 = arith.constant 0 : index
    %c0_12 = arith.constant 0 : index
    %13 = vector.load %arg6[%c0_11, %c0_12] : memref<24x32xf32, #tpu.memory_space<vmem>>, vector<24x32xf32>
    tpu.vector_store %arg6[%c0_11, %c0_12], %12 {strides = array<i32>} : memref<24x32xf32, #tpu.memory_space<vmem>>, vector<24x32xf32>,
    return
  }
  func.func @transform_0(%arg0: i32) -> (i32, i32) {
    %c0_i32 = arith.constant 0 : i32
    %c0_i32_0 = arith.constant 0 : i32
    %c0_i32_1 = arith.constant 0 : i32
    return %c0_i32, %c0_i32_0 : i32, i32
  }
  func.func @transform_1(%arg0: i32) -> (i32, i32) {
    %c0_i32 = arith.constant 0 : i32
    %c0_i32_0 = arith.constant 0 : i32
    %c0_i32_1 = arith.constant 0 : i32
    return %c0_i32, %c0_i32_0 : i32, i32
  }
  func.func @transform_2(%arg0: i32) -> (i32, i32) {
    %c0_i32 = arith.constant 0 : i32
    %c0_i32_0 = arith.constant 0 : i32
    %c0_i32_1 = arith.constant 0 : i32
    return %c0_i32, %c0_i32_0 : i32, i32
  }
  func.func @transform_3(%arg0: i32) -> (i32, i32) {
    %c0_i32 = arith.constant 0 : i32
    %c0_i32_0 = arith.constant 0 : i32
    %c0_i32_1 = arith.constant 0 : i32
    return %c0_i32, %c0_i32_0 : i32, i32
  }
  func.func @transform_4(%arg0: i32) -> (i32, i32) {
    %c0_i32 = arith.constant 0 : i32
    %c0_i32_0 = arith.constant 0 : i32
    %c0_i32_1 = arith.constant 0 : i32
    return %c0_i32, %c0_i32_0 : i32, i32
  }
  func.func @transform_5(%arg0: i32) -> (i32, i32) {
    %c0_i32 = arith.constant 0 : i32
    %c0_i32_0 = arith.constant 0 : i32
    %c0_i32_1 = arith.constant 0 : i32
    return %c0_i32, %c0_i32_0 : i32, i32
  }
}

module attributes {stable_mosaic.version = 11 : i64} {
  func.func @_mlp2_kernel(%arg0: i32, %arg1: memref<4x64xf32, #tpu.memory_space<vmem>>, %arg2: memref<64x32xf32, #tpu.memory_space<vmem>>, %arg3: memref<1x32xf32, #tpu.memory_space<vmem>>, %arg4: memref<32x32xf32, #tpu.memory_space<vmem>>, %arg5: memref<1x32xf32, #tpu.memory_space<vmem>>, %arg6: memref<4x32xf32, #tpu.memory_space<vmem>>) attributes {dimension_semantics = [#tpu.dimension_semantics<arbitrary>], iteration_bounds = array<i64: 1>, scalar_prefetch = 0 : i64, scratch_operands = 0 : i64, tpu.core_type = #tpu.core_type<tc>, window_params = [{pipeline_mode = #tpu.pipeline_mode<synchronous>, transform_indices = @transform_0, window_bounds = array<i64: 4, 64>}, {pipeline_mode = #tpu.pipeline_mode<synchronous>, transform_indices = @transform_1, window_bounds = array<i64: 64, 32>}, {pipeline_mode = #tpu.pipeline_mode<synchronous>, transform_indices = @transform_2, window_bounds = array<i64: 1, 32>}, {pipeline_mode = #tpu.pipeline_mode<synchronous>, transform_indices = @transform_3, window_bounds = array<i64: 32, 32>}, {pipeline_mode = #tpu.pipeline_mode<synchronous>, transform_indices = @transform_4, window_bounds = array<i64: 1, 32>}, {pipeline_mode = #tpu.pipeline_mode<synchronous>, transform_indices = @transform_5, window_bounds = array<i64: 4, 32>}]} {
    %c0 = arith.constant 0 : index
    %c0_0 = arith.constant 0 : index
    %0 = vector.load %arg1[%c0, %c0_0] : memref<4x64xf32, #tpu.memory_space<vmem>>, vector<4x64xf32>
    %c0_1 = arith.constant 0 : index
    %c0_2 = arith.constant 0 : index
    %1 = vector.load %arg2[%c0_1, %c0_2] : memref<64x32xf32, #tpu.memory_space<vmem>>, vector<64x32xf32>
    %cst = arith.constant dense<0.000000e+00> : vector<4x32xf32>
    %2 = tpu.matmul %0, %1, %cst {dimension_numbers = #tpu.dot_dimension_numbers<[1], [0], [0], [1], [0, 0, 1, 1], [], []>} : vector<4x64xf32>, vector<64x32xf32>, vector<4x32xf32> -> vector<4x32xf32>
    %c0_3 = arith.constant 0 : index
    %c0_4 = arith.constant 0 : index
    %3 = vector.load %arg3[%c0_3, %c0_4] : memref<1x32xf32, #tpu.memory_space<vmem>>, vector<1x32xf32>
    %4 = vector.broadcast %3 : vector<1x32xf32> to vector<4x32xf32>
    %5 = arith.addf %2, %4 : vector<4x32xf32>
    %cst_5 = arith.constant 0.000000e+00 : f32
    %6 = vector.broadcast %cst_5 : f32 to vector<4x32xf32>
    %7 = arith.maximumf %5, %6 : vector<4x32xf32>
    %c0_6 = arith.constant 0 : index
    %c0_7 = arith.constant 0 : index
    %8 = vector.load %arg4[%c0_6, %c0_7] : memref<32x32xf32, #tpu.memory_space<vmem>>, vector<32x32xf32>
    %cst_8 = arith.constant dense<0.000000e+00> : vector<4x32xf32>
    %9 = tpu.matmul %7, %8, %cst_8 {dimension_numbers = #tpu.dot_dimension_numbers<[1], [0], [0], [1], [0, 0, 1, 1], [], []>} : vector<4x32xf32>, vector<32x32xf32>, vector<4x32xf32> -> vector<4x32xf32>
    %c0_9 = arith.constant 0 : index
    %c0_10 = arith.constant 0 : index
    %10 = vector.load %arg5[%c0_9, %c0_10] : memref<1x32xf32, #tpu.memory_space<vmem>>, vector<1x32xf32>
    %11 = vector.broadcast %10 : vector<1x32xf32> to vector<4x32xf32>
    %12 = arith.addf %9, %11 : vector<4x32xf32>
    %c0_11 = arith.constant 0 : index
    %c0_12 = arith.constant 0 : index
    %13 = vector.load %arg6[%c0_11, %c0_12] : memref<4x32xf32, #tpu.memory_space<vmem>>, vector<4x32xf32>
    tpu.vector_store %arg6[%c0_11, %c0_12], %12 {strides = array<i32>} : memref<4x32xf32, #tpu.memory_space<vmem>>, vector<4x32xf32>,
    return
  }
  func.func @transform_0(%arg0: i32) -> (i32, i32) {
    %c0_i32 = arith.constant 0 : i32
    %c0_i32_0 = arith.constant 0 : i32
    %c0_i32_1 = arith.constant 0 : i32
    return %c0_i32, %c0_i32_0 : i32, i32
  }
  func.func @transform_1(%arg0: i32) -> (i32, i32) {
    %c0_i32 = arith.constant 0 : i32
    %c0_i32_0 = arith.constant 0 : i32
    %c0_i32_1 = arith.constant 0 : i32
    return %c0_i32, %c0_i32_0 : i32, i32
  }
  func.func @transform_2(%arg0: i32) -> (i32, i32) {
    %c0_i32 = arith.constant 0 : i32
    %c0_i32_0 = arith.constant 0 : i32
    %c0_i32_1 = arith.constant 0 : i32
    return %c0_i32, %c0_i32_0 : i32, i32
  }
  func.func @transform_3(%arg0: i32) -> (i32, i32) {
    %c0_i32 = arith.constant 0 : i32
    %c0_i32_0 = arith.constant 0 : i32
    %c0_i32_1 = arith.constant 0 : i32
    return %c0_i32, %c0_i32_0 : i32, i32
  }
  func.func @transform_4(%arg0: i32) -> (i32, i32) {
    %c0_i32 = arith.constant 0 : i32
    %c0_i32_0 = arith.constant 0 : i32
    %c0_i32_1 = arith.constant 0 : i32
    return %c0_i32, %c0_i32_0 : i32, i32
  }
  func.func @transform_5(%arg0: i32) -> (i32, i32) {
    %c0_i32 = arith.constant 0 : i32
    %c0_i32_0 = arith.constant 0 : i32
    %c0_i32_1 = arith.constant 0 : i32
    return %c0_i32, %c0_i32_0 : i32, i32
  }
}

module attributes {stable_mosaic.version = 11 : i64} {
  func.func @_tnt_stack_kernel(%arg0: i32, %arg1: i32, %arg2: memref<1x2x72x32xf32, #tpu.memory_space<vmem>>, %arg3: memref<1x1x72xf32, #tpu.memory_space<vmem>>, %arg4: memref<1x3x32x32xf32, #tpu.memory_space<vmem>>, %arg5: memref<1x1x3x32xf32, #tpu.memory_space<vmem>>, %arg6: memref<1x1x32x32xf32, #tpu.memory_space<vmem>>, %arg7: memref<1x1x1x32xf32, #tpu.memory_space<vmem>>, %arg8: memref<1x1x32x64xf32, #tpu.memory_space<vmem>>, %arg9: memref<1x1x1x64xf32, #tpu.memory_space<vmem>>, %arg10: memref<1x1x64x32xf32, #tpu.memory_space<vmem>>, %arg11: memref<1x1x1x32xf32, #tpu.memory_space<vmem>>, %arg12: memref<1x1x4x32xf32, #tpu.memory_space<vmem>>, %arg13: memref<1x1x2x32xf32, #tpu.memory_space<vmem>>, %arg14: memref<1x1x8x32xf32, #tpu.memory_space<vmem>>, %arg15: memref<2x72x32xf32, #tpu.memory_space<vmem>>) attributes {dimension_semantics = [#tpu.dimension_semantics<parallel>, #tpu.dimension_semantics<arbitrary>], iteration_bounds = array<i64: 4, 2>, scalar_prefetch = 0 : i64, scratch_operands = 1 : i64, tpu.core_type = #tpu.core_type<tc>, window_params = [{transform_indices = @transform_0, window_bounds = array<i64: 1, 2, 72, 32>}, {transform_indices = @transform_1, window_bounds = array<i64: 1, 1, 72>}, {transform_indices = @transform_2, window_bounds = array<i64: 1, 3, 32, 32>}, {transform_indices = @transform_3, window_bounds = array<i64: 1, 1, 3, 32>}, {transform_indices = @transform_4, window_bounds = array<i64: 1, 1, 32, 32>}, {transform_indices = @transform_5, window_bounds = array<i64: 1, 1, 1, 32>}, {transform_indices = @transform_6, window_bounds = array<i64: 1, 1, 32, 64>}, {transform_indices = @transform_7, window_bounds = array<i64: 1, 1, 1, 64>}, {transform_indices = @transform_8, window_bounds = array<i64: 1, 1, 64, 32>}, {transform_indices = @transform_9, window_bounds = array<i64: 1, 1, 1, 32>}, {transform_indices = @transform_10, window_bounds = array<i64: 1, 1, 4, 32>}, {transform_indices = @transform_11, window_bounds = array<i64: 1, 1, 2, 32>}, {transform_indices = @transform_12, window_bounds = array<i64: 1, 1, 8, 32>}]} {
    %c0_i32 = arith.constant 0 : i32
    %0 = arith.cmpi eq, %arg1, %c0_i32 : i32
    %1 = arith.extui %0 : i1 to i32
    %c0_i32_0 = arith.constant 0 : i32
    %2 = arith.cmpi ne, %1, %c0_i32_0 : i32
    scf.if %2 {
      %c0_80 = arith.constant 0 : index
      %c0_81 = arith.constant 0 : index
      %c0_82 = arith.constant 0 : index
      %c0_83 = arith.constant 0 : index
      %132 = vector.load %arg2[%c0_80, %c0_81, %c0_82, %c0_83] : memref<1x2x72x32xf32, #tpu.memory_space<vmem>>, vector<1x2x72x32xf32>
      %133 = vector.shape_cast %132 : vector<1x2x72x32xf32> to vector<2x72x32xf32>
      %c0_84 = arith.constant 0 : index
      %c0_85 = arith.constant 0 : index
      %c0_86 = arith.constant 0 : index
      %134 = vector.load %arg15[%c0_84, %c0_85, %c0_86] : memref<2x72x32xf32, #tpu.memory_space<vmem>>, vector<2x72x32xf32>
      tpu.vector_store %arg15[%c0_84, %c0_85, %c0_86], %133 {strides = array<i32>} : memref<2x72x32xf32, #tpu.memory_space<vmem>>, vector<2x72x32xf32>,
    } else {
    }
    %c0 = arith.constant 0 : index
    %c0_1 = arith.constant 0 : index
    %c0_2 = arith.constant 0 : index
    %3 = vector.load %arg15[%c0, %c0_1, %c0_2] : memref<2x72x32xf32, #tpu.memory_space<vmem>>, vector<2x72x32xf32>
    %4 = vector.shape_cast %3 : vector<2x72x32xf32> to vector<144x32xf32>
    %c0_3 = arith.constant 0 : index
    %c0_4 = arith.constant 0 : index
    %c0_5 = arith.constant 0 : index
    %c0_6 = arith.constant 0 : index
    %5 = vector.load %arg12[%c0_3, %c0_4, %c0_5, %c0_6] : memref<1x1x4x32xf32, #tpu.memory_space<vmem>>, vector<1x1x4x32xf32>
    %6 = vector.shape_cast %5 : vector<1x1x4x32xf32> to vector<4x32xf32>
    %c0_7 = arith.constant 0 : index
    %c0_8 = arith.constant 0 : index
    %c0_9 = arith.constant 0 : index
    %c0_10 = arith.constant 0 : index
    %7 = vector.load %arg5[%c0_7, %c0_8, %c0_9, %c0_10] : memref<1x1x3x32xf32, #tpu.memory_space<vmem>>, vector<1x1x3x32xf32>
    %8 = vector.shape_cast %7 : vector<1x1x3x32xf32> to vector<3x32xf32>
    %9 = vector.extract_strided_slice %6 {offsets = [0, 0], sizes = [1, 32], strides = [1, 1]} : vector<4x32xf32> to vector<1x32xf32>
    %10 = vector.extract_strided_slice %6 {offsets = [1, 0], sizes = [1, 32], strides = [1, 1]} : vector<4x32xf32> to vector<1x32xf32>
    %cst = arith.constant dense<0.000000e+00> : vector<144xf32>
    %11 = vector.multi_reduction <add>, %4, %cst [1] : vector<144x32xf32> to vector<144xf32>
    %12 = vector.shape_cast %11 : vector<144xf32> to vector<144x1xf32>
    %cst_11 = arith.constant 3.200000e+01 : f32
    %13 = vector.broadcast %cst_11 : f32 to vector<144x1xf32>
    %14 = arith.divf %12, %13 : vector<144x1xf32>
    %15 = vector.broadcast %14 : vector<144x1xf32> to vector<144x32xf32>
    %16 = arith.subf %4, %15 : vector<144x32xf32>
    %17 = arith.mulf %16, %16 : vector<144x32xf32>
    %cst_12 = arith.constant dense<0.000000e+00> : vector<144xf32>
    %18 = vector.multi_reduction <add>, %17, %cst_12 [1] : vector<144x32xf32> to vector<144xf32>
    %19 = vector.shape_cast %18 : vector<144xf32> to vector<144x1xf32>
    %cst_13 = arith.constant 3.200000e+01 : f32
    %20 = vector.broadcast %cst_13 : f32 to vector<144x1xf32>
    %21 = arith.divf %19, %20 : vector<144x1xf32>
    %22 = vector.broadcast %14 : vector<144x1xf32> to vector<144x32xf32>
    %23 = arith.subf %4, %22 : vector<144x32xf32>
    %cst_14 = arith.constant 9.99999974E-6 : f32
    %24 = vector.broadcast %cst_14 : f32 to vector<144x1xf32>
    %25 = arith.addf %21, %24 : vector<144x1xf32>
    %26 = math.rsqrt %25 : vector<144x1xf32>
    %27 = vector.broadcast %26 : vector<144x1xf32> to vector<144x32xf32>
    %28 = arith.mulf %23, %27 : vector<144x32xf32>
    %29 = vector.broadcast %9 : vector<1x32xf32> to vector<144x32xf32>
    %30 = arith.mulf %28, %29 : vector<144x32xf32>
    %31 = vector.broadcast %10 : vector<1x32xf32> to vector<144x32xf32>
    %32 = arith.addf %30, %31 : vector<144x32xf32>
    %c0_15 = arith.constant 0 : index
    %c0_16 = arith.constant 0 : index
    %c0_17 = arith.constant 0 : index
    %c0_18 = arith.constant 0 : index
    %33 = vector.load %arg4[%c0_15, %c0_16, %c0_17, %c0_18] : memref<1x3x32x32xf32, #tpu.memory_space<vmem>>, vector<1x1x32x32xf32>
    %34 = vector.shape_cast %33 : vector<1x1x32x32xf32> to vector<32x32xf32>
    %cst_19 = arith.constant dense<0.000000e+00> : vector<144x32xf32>
    %35 = tpu.matmul %32, %34, %cst_19 {dimension_numbers = #tpu.dot_dimension_numbers<[1], [0], [0], [1], [0, 0, 1, 1], [], []>} : vector<144x32xf32>, vector<32x32xf32>, vector<144x32xf32> -> vector<144x32xf32>
    %36 = vector.extract_strided_slice %8 {offsets = [0, 0], sizes = [1, 32], strides = [1, 1]} : vector<3x32xf32> to vector<1x32xf32>
    %37 = vector.broadcast %36 : vector<1x32xf32> to vector<144x32xf32>
    %38 = arith.addf %35, %37 : vector<144x32xf32>
    %39 = vector.shape_cast %38 : vector<144x32xf32> to vector<2x72x32xf32>
    %c0_20 = arith.constant 0 : index
    %c1 = arith.constant 1 : index
    %c0_21 = arith.constant 0 : index
    %c0_22 = arith.constant 0 : index
    %40 = vector.load %arg4[%c0_20, %c1, %c0_21, %c0_22] : memref<1x3x32x32xf32, #tpu.memory_space<vmem>>, vector<1x1x32x32xf32>
    %41 = vector.shape_cast %40 : vector<1x1x32x32xf32> to vector<32x32xf32>
    %cst_23 = arith.constant dense<0.000000e+00> : vector<144x32xf32>
    %42 = tpu.matmul %32, %41, %cst_23 {dimension_numbers = #tpu.dot_dimension_numbers<[1], [0], [0], [1], [0, 0, 1, 1], [], []>} : vector<144x32xf32>, vector<32x32xf32>, vector<144x32xf32> -> vector<144x32xf32>
    %43 = vector.extract_strided_slice %8 {offsets = [1, 0], sizes = [1, 32], strides = [1, 1]} : vector<3x32xf32> to vector<1x32xf32>
    %44 = vector.broadcast %43 : vector<1x32xf32> to vector<144x32xf32>
    %45 = arith.addf %42, %44 : vector<144x32xf32>
    %46 = vector.shape_cast %45 : vector<144x32xf32> to vector<2x72x32xf32>
    %c0_24 = arith.constant 0 : index
    %c2 = arith.constant 2 : index
    %c0_25 = arith.constant 0 : index
    %c0_26 = arith.constant 0 : index
    %47 = vector.load %arg4[%c0_24, %c2, %c0_25, %c0_26] : memref<1x3x32x32xf32, #tpu.memory_space<vmem>>, vector<1x1x32x32xf32>
    %48 = vector.shape_cast %47 : vector<1x1x32x32xf32> to vector<32x32xf32>
    %cst_27 = arith.constant dense<0.000000e+00> : vector<144x32xf32>
    %49 = tpu.matmul %32, %48, %cst_27 {dimension_numbers = #tpu.dot_dimension_numbers<[1], [0], [0], [1], [0, 0, 1, 1], [], []>} : vector<144x32xf32>, vector<32x32xf32>, vector<144x32xf32> -> vector<144x32xf32>
    %50 = vector.extract_strided_slice %8 {offsets = [2, 0], sizes = [1, 32], strides = [1, 1]} : vector<3x32xf32> to vector<1x32xf32>
    %51 = vector.broadcast %50 : vector<1x32xf32> to vector<144x32xf32>
    %52 = arith.addf %49, %51 : vector<144x32xf32>
    %53 = vector.shape_cast %52 : vector<144x32xf32> to vector<2x72x32xf32>
    "tpu.trace_start"() <{level = 10 : i32, message = "bqd,bkd->bqk"}> : () -> ()
    %cst_28 = arith.constant dense<0.000000e+00> : vector<2x72x72xf32>
    %54 = tpu.matmul %39, %46, %cst_28 {dimension_numbers = #tpu.dot_dimension_numbers<[2], [2], [1], [1], [0, 0, 0, 1, 1, 1], [0], [0]>} : vector<2x72x32xf32>, vector<2x72x32xf32>, vector<2x72x72xf32> -> vector<2x72x72xf32>
    "tpu.trace_stop"() : () -> ()
    %cst_29 = arith.constant 0.176776692 : f32
    %55 = vector.broadcast %cst_29 : f32 to vector<2x72x72xf32>
    %56 = arith.mulf %54, %55 : vector<2x72x72xf32>
    %c0_30 = arith.constant 0 : index
    %c0_31 = arith.constant 0 : index
    %c0_32 = arith.constant 0 : index
    %57 = vector.load %arg3[%c0_30, %c0_31, %c0_32] : memref<1x1x72xf32, #tpu.memory_space<vmem>>, vector<1x1x72xf32>
    %58 = vector.broadcast %57 : vector<1x1x72xf32> to vector<2x72x72xf32>
    %59 = arith.addf %56, %58 : vector<2x72x72xf32>
    %cst_33 = arith.constant dense<0xFF800000> : vector<2x72xf32>
    %60 = vector.multi_reduction <maximumf>, %59, %cst_33 [2] : vector<2x72x72xf32> to vector<2x72xf32>
    %61 = vector.shape_cast %60 : vector<2x72xf32> to vector<2x72x1xf32>
    %62 = vector.broadcast %61 : vector<2x72x1xf32> to vector<2x72x72xf32>
    %63 = arith.subf %59, %62 : vector<2x72x72xf32>
    %64 = math.exp %63 : vector<2x72x72xf32>
    %cst_34 = arith.constant dense<0.000000e+00> : vector<2x72xf32>
    %65 = vector.multi_reduction <add>, %64, %cst_34 [2] : vector<2x72x72xf32> to vector<2x72xf32>
    %66 = vector.shape_cast %65 : vector<2x72xf32> to vector<2x72x1xf32>
    %67 = vector.broadcast %66 : vector<2x72x1xf32> to vector<2x72x72xf32>
    %68 = arith.divf %64, %67 : vector<2x72x72xf32>
    "tpu.trace_start"() <{level = 10 : i32, message = "bqk,bkd->bqd"}> : () -> ()
    %cst_35 = arith.constant dense<0.000000e+00> : vector<2x72x32xf32>
    %69 = tpu.matmul %68, %53, %cst_35 {dimension_numbers = #tpu.dot_dimension_numbers<[2], [1], [1], [2], [0, 0, 0, 1, 1, 2], [0], [0]>} : vector<2x72x72xf32>, vector<2x72x32xf32>, vector<2x72x32xf32> -> vector<2x72x32xf32>
    "tpu.trace_stop"() : () -> ()
    %70 = vector.shape_cast %69 : vector<2x72x32xf32> to vector<144x32xf32>
    %c0_36 = arith.constant 0 : index
    %c0_37 = arith.constant 0 : index
    %c0_38 = arith.constant 0 : index
    %c0_39 = arith.constant 0 : index
    %71 = vector.load %arg6[%c0_36, %c0_37, %c0_38, %c0_39] : memref<1x1x32x32xf32, #tpu.memory_space<vmem>>, vector<1x1x32x32xf32>
    %72 = vector.shape_cast %71 : vector<1x1x32x32xf32> to vector<32x32xf32>
    %cst_40 = arith.constant dense<0.000000e+00> : vector<144x32xf32>
    %73 = tpu.matmul %70, %72, %cst_40 {dimension_numbers = #tpu.dot_dimension_numbers<[1], [0], [0], [1], [0, 0, 1, 1], [], []>} : vector<144x32xf32>, vector<32x32xf32>, vector<144x32xf32> -> vector<144x32xf32>
    %c0_41 = arith.constant 0 : index
    %c0_42 = arith.constant 0 : index
    %c0_43 = arith.constant 0 : index
    %c0_44 = arith.constant 0 : index
    %74 = vector.load %arg7[%c0_41, %c0_42, %c0_43, %c0_44] : memref<1x1x1x32xf32, #tpu.memory_space<vmem>>, vector<1x1x1x32xf32>
    %75 = vector.shape_cast %74 : vector<1x1x1x32xf32> to vector<1x32xf32>
    %76 = vector.broadcast %75 : vector<1x32xf32> to vector<144x32xf32>
    %77 = arith.addf %73, %76 : vector<144x32xf32>
    %78 = arith.addf %4, %77 : vector<144x32xf32>
    %79 = vector.extract_strided_slice %6 {offsets = [2, 0], sizes = [1, 32], strides = [1, 1]} : vector<4x32xf32> to vector<1x32xf32>
    %80 = vector.extract_strided_slice %6 {offsets = [3, 0], sizes = [1, 32], strides = [1, 1]} : vector<4x32xf32> to vector<1x32xf32>
    %cst_45 = arith.constant dense<0.000000e+00> : vector<144xf32>
    %81 = vector.multi_reduction <add>, %78, %cst_45 [1] : vector<144x32xf32> to vector<144xf32>
    %82 = vector.shape_cast %81 : vector<144xf32> to vector<144x1xf32>
    %cst_46 = arith.constant 3.200000e+01 : f32
    %83 = vector.broadcast %cst_46 : f32 to vector<144x1xf32>
    %84 = arith.divf %82, %83 : vector<144x1xf32>
    %85 = vector.broadcast %84 : vector<144x1xf32> to vector<144x32xf32>
    %86 = arith.subf %78, %85 : vector<144x32xf32>
    %87 = arith.mulf %86, %86 : vector<144x32xf32>
    %cst_47 = arith.constant dense<0.000000e+00> : vector<144xf32>
    %88 = vector.multi_reduction <add>, %87, %cst_47 [1] : vector<144x32xf32> to vector<144xf32>
    %89 = vector.shape_cast %88 : vector<144xf32> to vector<144x1xf32>
    %cst_48 = arith.constant 3.200000e+01 : f32
    %90 = vector.broadcast %cst_48 : f32 to vector<144x1xf32>
    %91 = arith.divf %89, %90 : vector<144x1xf32>
    %92 = vector.broadcast %84 : vector<144x1xf32> to vector<144x32xf32>
    %93 = arith.subf %78, %92 : vector<144x32xf32>
    %cst_49 = arith.constant 9.99999974E-6 : f32
    %94 = vector.broadcast %cst_49 : f32 to vector<144x1xf32>
    %95 = arith.addf %91, %94 : vector<144x1xf32>
    %96 = math.rsqrt %95 : vector<144x1xf32>
    %97 = vector.broadcast %96 : vector<144x1xf32> to vector<144x32xf32>
    %98 = arith.mulf %93, %97 : vector<144x32xf32>
    %99 = vector.broadcast %79 : vector<1x32xf32> to vector<144x32xf32>
    %100 = arith.mulf %98, %99 : vector<144x32xf32>
    %101 = vector.broadcast %80 : vector<1x32xf32> to vector<144x32xf32>
    %102 = arith.addf %100, %101 : vector<144x32xf32>
    %c0_50 = arith.constant 0 : index
    %c0_51 = arith.constant 0 : index
    %c0_52 = arith.constant 0 : index
    %c0_53 = arith.constant 0 : index
    %103 = vector.load %arg8[%c0_50, %c0_51, %c0_52, %c0_53] : memref<1x1x32x64xf32, #tpu.memory_space<vmem>>, vector<1x1x32x64xf32>
    %104 = vector.shape_cast %103 : vector<1x1x32x64xf32> to vector<32x64xf32>
    %cst_54 = arith.constant dense<0.000000e+00> : vector<144x64xf32>
    %105 = tpu.matmul %102, %104, %cst_54 {dimension_numbers = #tpu.dot_dimension_numbers<[1], [0], [0], [1], [0, 0, 1, 1], [], []>} : vector<144x32xf32>, vector<32x64xf32>, vector<144x64xf32> -> vector<144x64xf32>
    %c0_55 = arith.constant 0 : index
    %c0_56 = arith.constant 0 : index
    %c0_57 = arith.constant 0 : index
    %c0_58 = arith.constant 0 : index
    %106 = vector.load %arg9[%c0_55, %c0_56, %c0_57, %c0_58] : memref<1x1x1x64xf32, #tpu.memory_space<vmem>>, vector<1x1x1x64xf32>
    %107 = vector.shape_cast %106 : vector<1x1x1x64xf32> to vector<1x64xf32>
    %108 = vector.broadcast %107 : vector<1x64xf32> to vector<144x64xf32>
    %109 = arith.addf %105, %108 : vector<144x64xf32>
    %cst_59 = arith.constant 0.000000e+00 : f32
    %110 = vector.broadcast %cst_59 : f32 to vector<144x64xf32>
    %111 = arith.maximumf %109, %110 : vector<144x64xf32>
    %c0_60 = arith.constant 0 : index
    %c0_61 = arith.constant 0 : index
    %c0_62 = arith.constant 0 : index
    %c0_63 = arith.constant 0 : index
    %112 = vector.load %arg10[%c0_60, %c0_61, %c0_62, %c0_63] : memref<1x1x64x32xf32, #tpu.memory_space<vmem>>, vector<1x1x64x32xf32>
    %113 = vector.shape_cast %112 : vector<1x1x64x32xf32> to vector<64x32xf32>
    %cst_64 = arith.constant dense<0.000000e+00> : vector<144x32xf32>
    %114 = tpu.matmul %111, %113, %cst_64 {dimension_numbers = #tpu.dot_dimension_numbers<[1], [0], [0], [1], [0, 0, 1, 1], [], []>} : vector<144x64xf32>, vector<64x32xf32>, vector<144x32xf32> -> vector<144x32xf32>
    %c0_65 = arith.constant 0 : index
    %c0_66 = arith.constant 0 : index
    %c0_67 = arith.constant 0 : index
    %c0_68 = arith.constant 0 : index
    %115 = vector.load %arg11[%c0_65, %c0_66, %c0_67, %c0_68] : memref<1x1x1x32xf32, #tpu.memory_space<vmem>>, vector<1x1x1x32xf32>
    %116 = vector.shape_cast %115 : vector<1x1x1x32xf32> to vector<1x32xf32>
    %117 = vector.broadcast %116 : vector<1x32xf32> to vector<144x32xf32>
    %118 = arith.addf %114, %117 : vector<144x32xf32>
    %119 = arith.addf %78, %118 : vector<144x32xf32>
    %120 = vector.shape_cast %119 : vector<144x32xf32> to vector<2x72x32xf32>
    %c0_69 = arith.constant 0 : index
    %c0_70 = arith.constant 0 : index
    %c0_71 = arith.constant 0 : index
    %121 = vector.load %arg15[%c0_69, %c0_70, %c0_71] : memref<2x72x32xf32, #tpu.memory_space<vmem>>, vector<2x72x32xf32>
    tpu.vector_store %arg15[%c0_69, %c0_70, %c0_71], %120 {strides = array<i32>} : memref<2x72x32xf32, #tpu.memory_space<vmem>>, vector<2x72x32xf32>,
    %122 = vector.extract_strided_slice %120 {offsets = [0, 0, 0], sizes = [2, 1, 32], strides = [1, 1, 1]} : vector<2x72x32xf32> to vector<2x1x32xf32>
    %123 = vector.shape_cast %122 : vector<2x1x32xf32> to vector<2x32xf32>
    %c0_72 = arith.constant 0 : index
    %c0_73 = arith.constant 0 : index
    %c0_74 = arith.constant 0 : index
    %c0_75 = arith.constant 0 : index
    %124 = vector.load %arg13[%c0_72, %c0_73, %c0_74, %c0_75] : memref<1x1x2x32xf32, #tpu.memory_space<vmem>>, vector<1x1x2x32xf32>
    %125 = vector.shape_cast %124 : vector<1x1x2x32xf32> to vector<2x32xf32>
    %126 = vector.shape_cast %123 : vector<2x32xf32> to vector<1x1x2x32xf32>
    tpu.vector_store %arg13[%c0_72, %c0_73, %c0_74, %c0_75], %126 {strides = array<i32>} : memref<1x1x2x32xf32, #tpu.memory_space<vmem>>, vector<1x1x2x32xf32>,
    %127 = vector.extract_strided_slice %120 {offsets = [0, 1, 0], sizes = [2, 4, 32], strides = [1, 1, 1]} : vector<2x72x32xf32> to vector<2x4x32xf32>
    %128 = vector.shape_cast %127 : vector<2x4x32xf32> to vector<8x32xf32>
    %c0_76 = arith.constant 0 : index
    %c0_77 = arith.constant 0 : index
    %c0_78 = arith.constant 0 : index
    %c0_79 = arith.constant 0 : index
    %129 = vector.load %arg14[%c0_76, %c0_77, %c0_78, %c0_79] : memref<1x1x8x32xf32, #tpu.memory_space<vmem>>, vector<1x1x8x32xf32>
    %130 = vector.shape_cast %129 : vector<1x1x8x32xf32> to vector<8x32xf32>
    %131 = vector.shape_cast %128 : vector<8x32xf32> to vector<1x1x8x32xf32>
    tpu.vector_store %arg14[%c0_76, %c0_77, %c0_78, %c0_79], %131 {strides = array<i32>} : memref<1x1x8x32xf32, #tpu.memory_space<vmem>>, vector<1x1x8x32xf32>,
    return
  }
  func.func @transform_0(%arg0: i32, %arg1: i32) -> (i32, i32, i32, i32) {
    %c0_i32 = arith.constant 0 : i32
    %c0_i32_0 = arith.constant 0 : i32
    %c0_i32_1 = arith.constant 0 : i32
    %c0_i32_2 = arith.constant 0 : i32
    return %arg0, %c0_i32, %c0_i32_0, %c0_i32_1 : i32, i32, i32, i32
  }
  func.func @transform_1(%arg0: i32, %arg1: i32) -> (i32, i32, i32) {
    %c0_i32 = arith.constant 0 : i32
    %c0_i32_0 = arith.constant 0 : i32
    %c0_i32_1 = arith.constant 0 : i32
    return %arg0, %c0_i32, %c0_i32_0 : i32, i32, i32
  }
  func.func @transform_2(%arg0: i32, %arg1: i32) -> (i32, i32, i32, i32) {
    %c0_i32 = arith.constant 0 : i32
    %c0_i32_0 = arith.constant 0 : i32
    %c0_i32_1 = arith.constant 0 : i32
    return %arg1, %arg0, %c0_i32, %c0_i32_0 : i32, i32, i32, i32
  }
  func.func @transform_3(%arg0: i32, %arg1: i32) -> (i32, i32, i32, i32) {
    %c0_i32 = arith.constant 0 : i32
    %c0_i32_0 = arith.constant 0 : i32
    %c0_i32_1 = arith.constant 0 : i32
    return %arg1, %arg0, %c0_i32, %c0_i32_0 : i32, i32, i32, i32
  }
  func.func @transform_4(%arg0: i32, %arg1: i32) -> (i32, i32, i32, i32) {
    %c0_i32 = arith.constant 0 : i32
    %c0_i32_0 = arith.constant 0 : i32
    %c0_i32_1 = arith.constant 0 : i32
    return %arg1, %arg0, %c0_i32, %c0_i32_0 : i32, i32, i32, i32
  }
  func.func @transform_5(%arg0: i32, %arg1: i32) -> (i32, i32, i32, i32) {
    %c0_i32 = arith.constant 0 : i32
    %c0_i32_0 = arith.constant 0 : i32
    %c0_i32_1 = arith.constant 0 : i32
    return %arg1, %arg0, %c0_i32, %c0_i32_0 : i32, i32, i32, i32
  }
  func.func @transform_6(%arg0: i32, %arg1: i32) -> (i32, i32, i32, i32) {
    %c0_i32 = arith.constant 0 : i32
    %c0_i32_0 = arith.constant 0 : i32
    %c0_i32_1 = arith.constant 0 : i32
    return %arg1, %arg0, %c0_i32, %c0_i32_0 : i32, i32, i32, i32
  }
  func.func @transform_7(%arg0: i32, %arg1: i32) -> (i32, i32, i32, i32) {
    %c0_i32 = arith.constant 0 : i32
    %c0_i32_0 = arith.constant 0 : i32
    %c0_i32_1 = arith.constant 0 : i32
    return %arg1, %arg0, %c0_i32, %c0_i32_0 : i32, i32, i32, i32
  }
  func.func @transform_8(%arg0: i32, %arg1: i32) -> (i32, i32, i32, i32) {
    %c0_i32 = arith.constant 0 : i32
    %c0_i32_0 = arith.constant 0 : i32
    %c0_i32_1 = arith.constant 0 : i32
    return %arg1, %arg0, %c0_i32, %c0_i32_0 : i32, i32, i32, i32
  }
  func.func @transform_9(%arg0: i32, %arg1: i32) -> (i32, i32, i32, i32) {
    %c0_i32 = arith.constant 0 : i32
    %c0_i32_0 = arith.constant 0 : i32
    %c0_i32_1 = arith.constant 0 : i32
    return %arg1, %arg0, %c0_i32, %c0_i32_0 : i32, i32, i32, i32
  }
  func.func @transform_10(%arg0: i32, %arg1: i32) -> (i32, i32, i32, i32) {
    %c0_i32 = arith.constant 0 : i32
    %c0_i32_0 = arith.constant 0 : i32
    %c0_i32_1 = arith.constant 0 : i32
    return %arg1, %arg0, %c0_i32, %c0_i32_0 : i32, i32, i32, i32
  }
  func.func @transform_11(%arg0: i32, %arg1: i32) -> (i32, i32, i32, i32) {
    %c0_i32 = arith.constant 0 : i32
    %c0_i32_0 = arith.constant 0 : i32
    %c0_i32_1 = arith.constant 0 : i32
    return %arg1, %arg0, %c0_i32, %c0_i32_0 : i32, i32, i32, i32
  }
  func.func @transform_12(%arg0: i32, %arg1: i32) -> (i32, i32, i32, i32) {
    %c0_i32 = arith.constant 0 : i32
    %c0_i32_0 = arith.constant 0 : i32
    %c0_i32_1 = arith.constant 0 : i32
    return %arg1, %arg0, %c0_i32, %c0_i32_0 : i32, i32, i32, i32
  }
}

module attributes {stable_mosaic.version = 11 : i64} {
  func.func @_linear_kernel(%arg0: i32, %arg1: memref<40x32xf32, #tpu.memory_space<vmem>>, %arg2: memref<32x33xf32, #tpu.memory_space<vmem>>, %arg3: memref<1x33xf32, #tpu.memory_space<vmem>>, %arg4: memref<40x33xf32, #tpu.memory_space<vmem>>) attributes {dimension_semantics = [#tpu.dimension_semantics<arbitrary>], iteration_bounds = array<i64: 1>, scalar_prefetch = 0 : i64, scratch_operands = 0 : i64, tpu.core_type = #tpu.core_type<tc>, window_params = [{pipeline_mode = #tpu.pipeline_mode<synchronous>, transform_indices = @transform_0, window_bounds = array<i64: 40, 32>}, {pipeline_mode = #tpu.pipeline_mode<synchronous>, transform_indices = @transform_1, window_bounds = array<i64: 32, 33>}, {pipeline_mode = #tpu.pipeline_mode<synchronous>, transform_indices = @transform_2, window_bounds = array<i64: 1, 33>}, {pipeline_mode = #tpu.pipeline_mode<synchronous>, transform_indices = @transform_3, window_bounds = array<i64: 40, 33>}]} {
    %c0 = arith.constant 0 : index
    %c0_0 = arith.constant 0 : index
    %0 = vector.load %arg1[%c0, %c0_0] : memref<40x32xf32, #tpu.memory_space<vmem>>, vector<40x32xf32>
    %c0_1 = arith.constant 0 : index
    %c0_2 = arith.constant 0 : index
    %1 = vector.load %arg2[%c0_1, %c0_2] : memref<32x33xf32, #tpu.memory_space<vmem>>, vector<32x33xf32>
    %cst = arith.constant dense<0.000000e+00> : vector<40x33xf32>
    %2 = tpu.matmul %0, %1, %cst {dimension_numbers = #tpu.dot_dimension_numbers<[1], [0], [0], [1], [0, 0, 1, 1], [], []>} : vector<40x32xf32>, vector<32x33xf32>, vector<40x33xf32> -> vector<40x33xf32>
    %c0_3 = arith.constant 0 : index
    %c0_4 = arith.constant 0 : index
    %3 = vector.load %arg3[%c0_3, %c0_4] : memref<1x33xf32, #tpu.memory_space<vmem>>, vector<1x33xf32>
    %4 = vector.broadcast %3 : vector<1x33xf32> to vector<40x33xf32>
    %5 = arith.addf %2, %4 : vector<40x33xf32>
    %c0_5 = arith.constant 0 : index
    %c0_6 = arith.constant 0 : index
    %6 = vector.load %arg4[%c0_5, %c0_6] : memref<40x33xf32, #tpu.memory_space<vmem>>, vector<40x33xf32>
    tpu.vector_store %arg4[%c0_5, %c0_6], %5 {strides = array<i32>} : memref<40x33xf32, #tpu.memory_space<vmem>>, vector<40x33xf32>,
    return
  }
  func.func @transform_0(%arg0: i32) -> (i32, i32) {
    %c0_i32 = arith.constant 0 : i32
    %c0_i32_0 = arith.constant 0 : i32
    %c0_i32_1 = arith.constant 0 : i32
    return %c0_i32, %c0_i32_0 : i32, i32
  }
  func.func @transform_1(%arg0: i32) -> (i32, i32) {
    %c0_i32 = arith.constant 0 : i32
    %c0_i32_0 = arith.constant 0 : i32
    %c0_i32_1 = arith.constant 0 : i32
    return %c0_i32, %c0_i32_0 : i32, i32
  }
  func.func @transform_2(%arg0: i32) -> (i32, i32) {
    %c0_i32 = arith.constant 0 : i32
    %c0_i32_0 = arith.constant 0 : i32
    %c0_i32_1 = arith.constant 0 : i32
    return %c0_i32, %c0_i32_0 : i32, i32
  }
  func.func @transform_3(%arg0: i32) -> (i32, i32) {
    %c0_i32 = arith.constant 0 : i32
    %c0_i32_0 = arith.constant 0 : i32
    %c0_i32_1 = arith.constant 0 : i32
    return %c0_i32, %c0_i32_0 : i32, i32
  }
}

</mosaic_0001>

<bundles_post_ra>
// kernel: _lambda_.7
= control target key start
LH: loop header
LB: loop body
LE: loop exit
PB: predicated region body
PF: predicated region fallthrough
CT: control target
= control target key end

     0   :  { %vm250_vm0 = vcmask 130048   ;;  %s4049_s2 = inlined_call_operand.vmem [shape: f32[2,272,272], index: 2, kind: input, shape index: {}]   ;;  %s4050_s0 = inlined_call_operand.vmem [shape: f32[32,272], index: 0, kind: input, shape index: {}]   ;;  %s4051_s1 = inlined_call_operand.vmem [shape: f32[272,272], index: 1, kind: input, shape index: {}]   ;;  %s4052_s3 = inlined_call_operand.vmem [shape: f32[2,1,272], index: 3, kind: input, shape index: {}]   ;;  %s4053_s4 = inlined_call_operand.vmem [shape: f32[32,272], index: 4, kind: output, shape index: {}]  }
   0x1   :  { %v132_v0 = vld [vmem:[%s4049_s2 + $0x8] sm:$0xff]  ;;  %v135_v1 = vld [vmem:[%s4049_s2 + $0x20] sm:$0xff]  ;;  %v134_v4 = vld [vmem:[%s4049_s2 + $0x18] sm:$0xff] }
   0x2   :  { %v131_v2 = vld [vmem:[%s4049_s2] sm:$0xff]  ;;  %v2227_v3 = vpack.c.bf16 %v135_v1, %v132_v0  ;;  %v138_v5 = vld [vmem:[%s4049_s2 + $0x38] sm:$0xff]  ;;  %v141_v6 = vld [vmem:[%s4049_s2 + $0x50] sm:$0xff] }
   0x3   :  { %v2229_v7 = vpack.c.bf16 %v134_v4, %v131_v2  ;;  %v2231_v8 = vpack.c.bf16 %v141_v6, %v138_v5  ;;  %v137_v9 = vld [vmem:[%s4049_s2 + $0x30] sm:$0xff]  ;;  %v140_v10 = vld [vmem:[%s4049_s2 + $0x48] sm:$0xff]  ;;  %v147_v12 = vld [vmem:[%s4049_s2 + $0x80] sm:$0xff] }
   0x4   :  { %v144_v11 = vld [vmem:[%s4049_s2 + $0x68] sm:$0xff]  ;;  %2228 = vmatprep.subr.bf16.mxu0 %v2227_v3  ;;  %v2233_v13 = vpack.c.bf16 %v140_v10, %v137_v9  ;;  %v143_v15 = vld [vmem:[%s4049_s2 + $0x60] sm:$0xff]  ;;  %v146_v16 = vld [vmem:[%s4049_s2 + $0x78] sm:$0xff] }
   0x5   :  { %2230 = vmatpush1.bf16.msra.mxu0 %v2229_v7  ;;  %v2235_v14 = vpack.c.bf16 %v147_v12, %v144_v11  ;;  %v150_v17 = vld [vmem:[%s4049_s2 + $0x98] sm:$0xff]  ;;  %v153_v18 = vld [vmem:[%s4049_s2 + $0xb0] sm:$0xff]  ;;  %v2237_v19 = vpack.c.bf16 %v146_v16, %v143_v15  ;;  %v152_v22 = vld [vmem:[%s4049_s2 + $0xa8] sm:$0xff] }
   0x6   :  { %2232 = vmatprep.subr.bf16.mxu0 %v2231_v8  ;;  %v2239_v20 = vpack.c.bf16 %v153_v18, %v150_v17  ;;  %v149_v21 = vld [vmem:[%s4049_s2 + $0x90] sm:$0xff]  ;;  %v156_v23 = vld [vmem:[%s4049_s2 + $0xc8] sm:$0xff]  ;;  %v159_v24 = vld [vmem:[%s4049_s2 + $0xe0] sm:$0xff] }
   0x7   :  { %v2241_v25 = vpack.c.bf16 %v152_v22, %v149_v21  ;;  %v155_v26 = vld [vmem:[%s4049_s2 + $0xc0] sm:$0xff]  ;;  %v158_v27 = vld [vmem:[%s4049_s2 + $0xd8] sm:$0xff]  ;;  %v2243_v28 = vpack.c.bf16 %v159_v24, %v156_v23  ;;  %v181_v30 = vld [vmem:[%s4049_s2 + $0x190] sm:$0xff] }
   0x8   :  { %v162_v29 = vld [vmem:[%s4049_s2 + $0xf8] sm:$0xff]  ;;  %v184_v31 = vld [vmem:[%s4049_s2 + $0x1a8] sm:$0xff]  ;;  %v165_v32 = vld [vmem:[%s4049_s2 + $0x110] sm:$0xff]  ;;  %v2245_v37 = vpack.c.bf16 %v158_v27, %v155_v26 }
   0x9   :  { %2234 = vmatpush1.bf16.msra.mxu0 %v2233_v13  ;;  %v2295_v33 = vpack.c.bf16 %v184_v31, %v181_v30  ;;  %v133_v34 = vld [vmem:[%s4049_s2 + $0x10] sm:$0xff]  ;;  %v136_v35 = vld [vmem:[%s4049_s2 + $0x28] sm:$0xff]  ;;  %v187_v38 = vld [vmem:[%s4049_s2 + $0x1c0] sm:$0xff]  ;;  %v2247_v41 = vpack.c.bf16 %v165_v32, %v162_v29 }
   0xa   :  { %2236 = vmatprep.subr.bf16.mxu0 %v2235_v14  ;;  %v2297_v36 = vpack.c.bf16 %v136_v35, %v133_v34  ;;  %v190_v39 = vld [vmem:[%s4049_s2 + $0x1d8] sm:$0xff]  ;;  %v139_v40 = vld [vmem:[%s4049_s2 + $0x40] sm:$0xff]  ;;  %v161_v42 = vld [vmem:[%s4049_s2 + $0xf0] sm:$0xff] }
   0xb   :  { %2296 = vmatprep.subr.bf16.mxu1 %v2295_v33  ;;  %v164_v43 = vld [vmem:[%s4049_s2 + $0x108] sm:$0xff]  ;;  %v2299_v44 = vpack.c.bf16 %v190_v39, %v187_v38  ;;  %v142_v45 = vld [vmem:[%s4049_s2 + $0x58] sm:$0xff]  ;;  %v171_v47 = vld [vmem:[%s4049_s2 + $0x140] sm:$0xff] }
   0xc   :  { %2298 = vmatpush3.bf16.msra.mxu1 %v2297_v36  ;;  %v168_v46 = vld [vmem:[%s4049_s2 + $0x128] sm:$0xff]  ;;  %v2301_v48 = vpack.c.bf16 %v142_v45, %v139_v40  ;;  %v193_v49 = vld [vmem:[%s4049_s2 + $0x1f0] sm:$0xff]  ;;  %v2249_v53 = vpack.c.bf16 %v164_v43, %v161_v42  ;;  %v167_v54 = vld [vmem:[%s4049_s2 + $0x120] sm:$0xff] }
   0xd   :  { %2238 = vmatpush1.bf16.msra.mxu0 %v2237_v19  ;;  %2300 = vmatprep.subr.bf16.mxu1 %v2299_v44  ;;  %v196_v50 = vld [vmem:[%s4049_s2 + $0x208] sm:$0xff]  ;;  %v145_v51 = vld [vmem:[%s4049_s2 + $0x70] sm:$0xff]  ;;  %v170_v55 = vld [vmem:[%s4049_s2 + $0x138] sm:$0xff]  ;;  %v2251_v57 = vpack.c.bf16 %v171_v47, %v168_v46 }
   0xe   :  { %2240 = vmatprep.subr.bf16.mxu0 %v2239_v20  ;;  %v148_v52 = vld [vmem:[%s4049_s2 + $0x88] sm:$0xff]  ;;  %v2303_v56 = vpack.c.bf16 %v196_v50, %v193_v49  ;;  %v174_v58 = vld [vmem:[%s4049_s2 + $0x158] sm:$0xff]  ;;  %v199_v60 = vld [vmem:[%s4049_s2 + $0x220] sm:$0xff]  ;;  %v2253_v2 = vpack.c.bf16 %v170_v55, %v167_v54 }
   0xf   :  { %v2305_v59 = vpack.c.bf16 %v148_v52, %v145_v51  ;;  %v202_v61 = vld [vmem:[%s4049_s2 + $0x238] sm:$0xff]  ;;  %v177_v62 = vld [vmem:[%s4049_s2 + $0x170] sm:$0xff]  ;;  %v151_v0 = vld [vmem:[%s4049_s2 + $0xa0] sm:$0xff] }
  0x10   :  { %2302 = vmatpush3.bf16.msra.mxu1 %v2301_v48  ;;  %v2307_v63 = vpack.c.bf16 %v202_v61, %v199_v60  ;;  %v154_v1 = vld [vmem:[%s4049_s2 + $0xb8] sm:$0xff]  ;;  %v205_v3 = vld [vmem:[%s4049_s2 + $0x250] sm:$0xff]  ;;  %v208_v4 = vld [vmem:[%s4049_s2 + $0x268] sm:$0xff]  ;;  %v2255_v5 = vpack.c.bf16 %v177_v62, %v174_v58 }
  0x11   :  { %2242 = vmatpush1.bf16.msra.mxu0 %v2241_v25  ;;  %2304 = vmatprep.subr.bf16.mxu1 %v2303_v56  ;;  %v173_v6 = vld [vmem:[%s4049_s2 + $0x150] sm:$0xff]  ;;  %v176_v7 = vld [vmem:[%s4049_s2 + $0x168] sm:$0xff]  ;;  %v2309_v9 = vpack.c.bf16 %v154_v1, %v151_v0  ;;  %v183_v10 = vld [vmem:[%s4049_s2 + $0x1a0] sm:$0xff]  ;;  %v2311_v11 = vpack.c.bf16 %v208_v4, %v205_v3 }
  0x12   :  { %2244 = vmatprep.subr.bf16.mxu0 %v2243_v28  ;;  %v180_v8 = vld [vmem:[%s4049_s2 + $0x188] sm:$0xff]  ;;  %v157_v12 = vld [vmem:[%s4049_s2 + $0xd0] sm:$0xff]  ;;  %v211_v14 = vld [vmem:[%s4049_s2 + $0x280] sm:$0xff]  ;;  %v2257_v16 = vpack.c.bf16 %v176_v7, %v173_v6 }
  0x13   :  { %v160_v13 = vld [vmem:[%s4049_s2 + $0xe8] sm:$0xff]  ;;  %v214_v15 = vld [vmem:[%s4049_s2 + $0x298] sm:$0xff]  ;;  %v179_v17 = vld [vmem:[%s4049_s2 + $0x180] sm:$0xff]  ;;  %v2259_v18 = vpack.c.bf16 %v183_v10, %v180_v8 }
  0x14   :  { %2306 = vmatpush3.bf16.msra.mxu1 %v2305_v59  ;;  %v182_v19 = vld [vmem:[%s4049_s2 + $0x198] sm:$0xff]  ;;  %v189_v21 = vld [vmem:[%s4049_s2 + $0x1d0] sm:$0xff]  ;;  %v2313_v22 = vpack.c.bf16 %v160_v13, %v157_v12  ;;  %v2315_v23 = vpack.c.bf16 %v214_v15, %v211_v14  ;;  %v163_v24 = vld [vmem:[%s4049_s2 + $0x100] sm:$0xff] }
  0x15   :  { %2246 = vmatpush1.bf16.msra.mxu0 %v2245_v37  ;;  %2308 = vmatprep.subr.bf16.mxu1 %v2307_v63  ;;  %v186_v20 = vld [vmem:[%s4049_s2 + $0x1b8] sm:$0xff]  ;;  %v18_v26 = vld [vmem:[%s4050_s0 + $0x8] sm:$0xff]  ;;  %v217_v27 = vld [vmem:[%s4049_s2 + $0x2b0] sm:$0xff]  ;;  %v2261_v29 = vpack.c.bf16 %v182_v19, %v179_v17 }
  0x16   :  { %2248 = vmatprep.subr.bf16.mxu0 %v2247_v41  ;;  %v166_v25 = vld [vmem:[%s4049_s2 + $0x118] sm:$0xff]  ;;  %v220_v28 = vld [vmem:[%s4049_s2 + $0x2c8] sm:$0xff]  ;;  %327 = vmatprep.mubr.f32.mxu0 %v18_v26  ;;  %v2263_v30 = vpack.c.bf16 %v189_v21, %v186_v20  ;;  %v185_v31 = vld [vmem:[%s4049_s2 + $0x1b0] sm:$0xff] }
  0x17   :  { %505 = vmatprep.mubr.f32.mxu1 %v18_v26  ;;  %v188_v32 = vld [vmem:[%s4049_s2 + $0x1c8] sm:$0xff]  ;;  %v2317_v34 = vpack.c.bf16 %v166_v25, %v163_v24  ;;  %v195_v35 = vld [vmem:[%s4049_s2 + $0x200] sm:$0xff]  ;;  %v2319_v36 = vpack.c.bf16 %v220_v28, %v217_v27  ;;  %v169_v37 = vld [vmem:[%s4049_s2 + $0x130] sm:$0xff] }
  0x18   :  { %2310 = vmatpush3.bf16.msra.mxu1 %v2309_v9  ;;  %v192_v33 = vld [vmem:[%s4049_s2 + $0x1e8] sm:$0xff]  ;;  %v223_v39 = vld [vmem:[%s4049_s2 + $0x2e0] sm:$0xff]  ;;  %v226_v40 = vld [vmem:[%s4049_s2 + $0x2f8] sm:$0xff]  ;;  %v2265_v41 = vpack.c.bf16 %v188_v32, %v185_v31 }
  0x19   :  { %2250 = vmatpush1.bf16.msra.mxu0 %v2249_v53  ;;  %2312 = vmatprep.subr.bf16.mxu1 %v2311_v11  ;;  %v172_v38 = vld [vmem:[%s4049_s2 + $0x148] sm:$0xff]  ;;  %v2267_v42 = vpack.c.bf16 %v195_v35, %v192_v33  ;;  %v191_v43 = vld [vmem:[%s4049_s2 + $0x1e0] sm:$0xff]  ;;  %v194_v44 = vld [vmem:[%s4049_s2 + $0x1f8] sm:$0xff]  ;;  %v2323_v48 = vpack.c.bf16 %v226_v40, %v223_v39 }
  0x1a   :  { %2252 = vmatprep.subr.bf16.mxu0 %v2251_v57  ;;  %v198_v45 = vld [vmem:[%s4049_s2 + $0x218] sm:$0xff]  ;;  %v2321_v46 = vpack.c.bf16 %v172_v38, %v169_v37  ;;  %v201_v47 = vld [vmem:[%s4049_s2 + $0x230] sm:$0xff]  ;;  %v175_v49 = vld [vmem:[%s4049_s2 + $0x160] sm:$0xff]  ;;  %v2269_v53 = vpack.c.bf16 %v194_v44, %v191_v43 }
  0x1b   :  { %v178_v50 = vld [vmem:[%s4049_s2 + $0x178] sm:$0xff]  ;;  %v229_v51 = vld [vmem:[%s4049_s2 + $0x310] sm:$0xff]  ;;  %v232_v52 = vld [vmem:[%s4049_s2 + $0x328] sm:$0xff]  ;;  %v2271_v54 = vpack.c.bf16 %v201_v47, %v198_v45 }
  0x1c   :  { %2314 = vmatpush3.bf16.msra.mxu1 %v2313_v22  ;;  %v197_v55 = vld [vmem:[%s4049_s2 + $0x210] sm:$0xff]  ;;  %v200_v56 = vld [vmem:[%s4049_s2 + $0x228] sm:$0xff]  ;;  %v2325_v57 = vpack.c.bf16 %v178_v50, %v175_v49  ;;  %v207_v59 = vld [vmem:[%s4049_s2 + $0x260] sm:$0xff]  ;;  %v2327_v60 = vpack.c.bf16 %v232_v52, %v229_v51 }
  0x1d   :  { %2254 = vmatpush1.bf16.msra.mxu0 %v2253_v2  ;;  %2316 = vmatprep.subr.bf16.mxu1 %v2315_v23  ;;  %v204_v58 = vld [vmem:[%s4049_s2 + $0x248] sm:$0xff]  ;;  %v2273_v61 = vpack.c.bf16 %v200_v56, %v197_v55  ;;  %v33_v63 = vld [vmem:[%s4051_s1 + $0x20] sm:$0xff]  ;;  %v206_v2 = vld [vmem:[%s4049_s2 + $0x258] sm:$0xff] }
  0x1e   :  { %2256 = vmatprep.subr.bf16.mxu0 %v2255_v5  ;;  %v30_v62 = vld [vmem:[%s4051_s1 + $0x8] sm:$0xff]  ;;  %v2275_v0 = vpack.c.bf16 %v207_v59, %v204_v58  ;;  %v203_v1 = vld [vmem:[%s4049_s2 + $0x240] sm:$0xff]  ;;  %v210_v3 = vld [vmem:[%s4049_s2 + $0x278] sm:$0xff] }
  0x1f   :  { %v213_v4 = vld [vmem:[%s4049_s2 + $0x290] sm:$0xff]  ;;  %v2994_v5 = vld [vmem:[%s4050_s0] sm:$0xff]  ;;  %v2996_v6 = vpack.c.bf16 %v33_v63, %v30_v62  ;;  %v2277_v7 = vpack.c.bf16 %v206_v2, %v203_v1  ;;  %v212_v11 = vld [vmem:[%s4049_s2 + $0x288] sm:$0xff] }
  0x20   :  { %2318 = vmatpush3.bf16.msra.mxu1 %v2317_v34  ;;  %v3001_v8 = vld [vmem:[%s4050_s0 + $0x20] sm:$0xff]  ;;  %v2279_v9 = vpack.c.bf16 %v213_v4, %v210_v3  ;;  %v209_v10 = vld [vmem:[%s4049_s2 + $0x270] sm:$0xff]  ;;  %v216_v12 = vld [vmem:[%s4049_s2 + $0x2a8] sm:$0xff] }
  0x21   :  { %2258 = vmatpush1.bf16.msra.mxu0 %v2257_v16  ;;  %2320 = vmatprep.subr.bf16.mxu1 %v2319_v36  ;;  %v219_v13 = vld [vmem:[%s4049_s2 + $0x2c0] sm:$0xff]  ;;  %v3020_v14 = vld [vmem:[%s4050_s0 + $0x18] sm:$0xff]  ;;  %v2281_v15 = vpack.c.bf16 %v212_v11, %v209_v10  ;;  %v225_v21 = vld [vmem:[%s4049_s2 + $0x2f0] sm:$0xff] }
  0x22   :  { %2260 = vmatprep.subr.bf16.mxu0 %v2259_v18  ;;  %v3026_v16 = vld [vmem:[%s4050_s0 + $0x38] sm:$0xff]  ;;  %v2283_v17 = vpack.c.bf16 %v219_v13, %v216_v12  ;;  %v215_v18 = vld [vmem:[%s4049_s2 + $0x2a0] sm:$0xff]  ;;  %v3045_v22 = vld [vmem:[%s4050_s0 + $0x30] sm:$0xff] }
  0x23   :  { %v218_v19 = vld [vmem:[%s4049_s2 + $0x2b8] sm:$0xff]  ;;  %v3050_v24 = vld [vmem:[%s4050_s0 + $0x50] sm:$0xff]  ;;  %v224_v27 = vld [vmem:[%s4049_s2 + $0x2e8] sm:$0xff] }
  0x24   :  { %2322 = vmatpush3.bf16.msra.mxu1 %v2321_v46  ;;  %v222_v20 = vld [vmem:[%s4049_s2 + $0x2d8] sm:$0xff]  ;;  %v2285_v23 = vpack.c.bf16 %v218_v19, %v215_v18  ;;  %v221_v26 = vld [vmem:[%s4049_s2 + $0x2d0] sm:$0xff]  ;;  %v228_v28 = vld [vmem:[%s4049_s2 + $0x308] sm:$0xff] }
  0x25   :  { %2262 = vmatpush1.bf16.msra.mxu0 %v2261_v29  ;;  %2324 = vmatprep.subr.bf16.mxu1 %v2323_v48  ;;  %v2287_v25 = vpack.c.bf16 %v225_v21, %v222_v20  ;;  %v231_v29 = vld [vmem:[%s4049_s2 + $0x320] sm:$0xff]  ;;  %v32_v32 = vld [vmem:[%s4051_s1 + $0x18] sm:$0xff]  ;;  %v2289_v33 = vpack.c.bf16 %v224_v27, %v221_v26  ;;  %v3080_v34 = vld [vmem:[%s4050_s0 + $0x10] sm:$0xff] }
  0x26   :  { %2264 = vmatprep.subr.bf16.mxu0 %v2263_v30  ;;  %v3069_v30 = vld [vmem:[%s4050_s0 + $0x48] sm:$0xff]  ;;  %v29_v31 = vld [vmem:[%s4051_s1] sm:$0xff]  ;;  %v36_v35 = vld [vmem:[%s4051_s1 + $0x38] sm:$0xff]  ;;  %v2291_v37 = vpack.c.bf16 %v231_v29, %v228_v28 }
  0x27   :  { %v39_v36 = vld [vmem:[%s4051_s1 + $0x50] sm:$0xff]  ;;  %v227_v38 = vld [vmem:[%s4049_s2 + $0x300] sm:$0xff]  ;;  %v230_v39 = vld [vmem:[%s4049_s2 + $0x318] sm:$0xff] }
  0x28   :  { %2326 = vmatpush3.bf16.msra.mxu1 %v2325_v57  ;;  %v3098_v40 = vld [vmem:[%s4050_s0 + $0x28] sm:$0xff]  ;;  %v3110_v44 = vpack.c.bf16 %v39_v36, %v36_v35  ;;  %v35_v45 = vld [vmem:[%s4051_s1 + $0x30] sm:$0xff]  ;;  %v2293_v47 = vpack.c.bf16 %v230_v39, %v227_v38  ;;  %v3123_v48 = vld [vmem:[%s4050_s0 + $0x40] sm:$0xff] }
  0x29   :  { %2266 = vmatpush1.bf16.msra.mxu0 %v2265_v41  ;;  %2328 = vmatprep.subr.bf16.mxu1 %v2327_v60  ;;  %v3102_v41 = vpack.c.bf16 %v32_v32, %v29_v31  ;;  %v82_v43 = vld [vmem:[%s4051_s1 + $0x1a8] sm:$0xff]  ;;  %v45_v50 = vld [vmem:[%s4051_s1 + $0x80] sm:$0xff]  ;;  %v3138_v52 = vld [vmem:[%s4050_s0 + $0x58] sm:$0xff] }
  0x2a   :  { %2268 = vmatprep.subr.bf16.mxu0 %v2267_v42  ;;  %v79_v42 = vld [vmem:[%s4051_s1 + $0x190] sm:$0xff]  ;;  %v38_v46 = vld [vmem:[%s4051_s1 + $0x48] sm:$0xff]  ;;  %v41_v55 = vld [vmem:[%s4051_s1 + $0x60] sm:$0xff] }
  0x2b   :  { %506 = vmatmul.mubr.f32.vlgmr.msra.gmra.mrb[0].mxu1 %v2994_v5  ;;  %v42_v49 = vld [vmem:[%s4051_s1 + $0x68] sm:$0xff]  ;;  %v3133_v51 = vpack.c.bf16 %v82_v43, %v79_v42  ;;  %v44_v56 = vld [vmem:[%s4051_s1 + $0x78] sm:$0xff]  ;;  %v51_v58 = vld [vmem:[%s4051_s1 + $0xb0] sm:$0xff] }
  0x2c   :  { %510 = vmatprep.mubr.f32.mxu1 %v3001_v8  ;;  %2330 = vmatpush3.bf16.msra.mxu1 %v2327_v60  ;;  %v48_v57 = vld [vmem:[%s4051_s1 + $0x98] sm:$0xff]  ;;  %v3164_v59 = vpack.c.bf16 %v44_v56, %v41_v55  ;;  %v50_v62 = vld [vmem:[%s4051_s1 + $0xa8] sm:$0xff]  ;;  %v53_v3 = vld [vmem:[%s4051_s1 + $0xc0] sm:$0xff] }
  0x2d   :  { %2270 = vmatpush1.bf16.msra.mxu0 %v2269_v53  ;;  %2332 = vmatprep.subr.bf16.mxu1 %v2996_v6  ;;  %v3141_v53 = vpack.c.bf16 %v38_v46, %v35_v45  ;;  %v3168_v60 = vpack.c.bf16 %v51_v58, %v48_v57  ;;  %v54_v63 = vld [vmem:[%s4051_s1 + $0xc8] sm:$0xff]  ;;  %v56_v4 = vld [vmem:[%s4051_s1 + $0xd8] sm:$0xff]  ;;  %v85_v11 = vld [vmem:[%s4051_s1 + $0x1c0] sm:$0xff] }
  0x2e   :  { %2272 = vmatprep.subr.bf16.mxu0 %v2271_v54  ;;  %v3145_v54 = vpack.c.bf16 %v45_v50, %v42_v49  ;;  %v3210_v10 = vpack.c.bf16 %v56_v4, %v53_v3  ;;  %v88_v12 = vld [vmem:[%s4051_s1 + $0x1d8] sm:$0xff]  ;;  %v69_v18 = vld [vmem:[%s4051_s1 + $0x140] sm:$0xff]  ;;  %v71_v39 = vld [vmem:[%s4051_s1 + $0x150] sm:$0xff] }
  0x2f   :  { %511 = vmatmul.mubr.f32.gmra.mrb[2].mxu1 %v3020_v14  ;;  %v3237_v20 = vpack.c.bf16 %v88_v12, %v85_v11  ;;  %v37_v21 = vld [vmem:[%s4051_s1 + $0x40] sm:$0xff]  ;;  %v68_v28 = vld [vmem:[%s4051_s1 + $0x138] sm:$0xff]  ;;  %v74_v42 = vld [vmem:[%s4051_s1 + $0x168] sm:$0xff] }
  0x30   :  { %515 = vmatprep.mubr.f32.mxu1 %v3026_v16  ;;  %v65_v27 = vld [vmem:[%s4051_s1 + $0x120] sm:$0xff]  ;;  %v72_v29 = vld [vmem:[%s4051_s1 + $0x158] sm:$0xff]  ;;  %v78_v43 = vld [vmem:[%s4051_s1 + $0x188] sm:$0xff]  ;;  %v3324_v50 = vpack.c.bf16 %v74_v42, %v71_v39 }
  0x31   :  { %2274 = vmatpush1.bf16.msra.mxu0 %v2273_v61  ;;  %v47_v61 = vld [vmem:[%s4051_s1 + $0x90] sm:$0xff]  ;;  %v3285_v35 = vpack.c.bf16 %v68_v28, %v65_v27  ;;  %v97_v36 = vld [vmem:[%s4051_s1 + $0x220] sm:$0xff]  ;;  %v52_v49 = vld [vmem:[%s4051_s1 + $0xb8] sm:$0xff] }
  0x32   :  { %2276 = vmatprep.subr.bf16.mxu0 %v2275_v0  ;;  %v57_v0 = vld [vmem:[%s4051_s1 + $0xe0] sm:$0xff]  ;;  %v3184_v1 = vpack.c.bf16 %v50_v62, %v47_v61  ;;  %v103_v55 = vld [vmem:[%s4051_s1 + $0x250] sm:$0xff]  ;;  %v106_v56 = vld [vmem:[%s4051_s1 + $0x268] sm:$0xff] }
  0x33   :  { %516 = vmatmul.mubr.f32.gmra.mrb[4].mxu1 %v3045_v22  ;;  %v3188_v2 = vpack.c.bf16 %v57_v0, %v54_v63  ;;  %v77_v58 = vld [vmem:[%s4051_s1 + $0x180] sm:$0xff]  ;;  %v80_v61 = vld [vmem:[%s4051_s1 + $0x198] sm:$0xff]  ;;  %v3354_v0 = vpack.c.bf16 %v106_v56, %v103_v55  ;;  %v55_v3 = vld [vmem:[%s4051_s1 + $0xd0] sm:$0xff] }
  0x34   :  { %520 = vmatprep.mubr.f32.mxu1 %v3050_v24  ;;  %v84_v62 = vld [vmem:[%s4051_s1 + $0x1b8] sm:$0xff]  ;;  %v58_v4 = vld [vmem:[%s4051_s1 + $0xe8] sm:$0xff]  ;;  %v83_v11 = vld [vmem:[%s4051_s1 + $0x1b0] sm:$0xff] }
  0x35   :  { %2278 = vmatpush1.bf16.msra.mxu0 %v2277_v7  ;;  %v63_v7 = vld [vmem:[%s4051_s1 + $0x110] sm:$0xff]  ;;  %v86_v12 = vld [vmem:[%s4051_s1 + $0x1c8] sm:$0xff]  ;;  %v92_v27 = vld [vmem:[%s4051_s1 + $0x1f8] sm:$0xff] }
  0x36   :  { %2280 = vmatprep.subr.bf16.mxu0 %v2279_v9  ;;  %v34_v9 = vld [vmem:[%s4051_s1 + $0x28] sm:$0xff]  ;;  %v96_v28 = vld [vmem:[%s4051_s1 + $0x218] sm:$0xff]  ;;  %v105_v42 = vld [vmem:[%s4051_s1 + $0x260] sm:$0xff] }
  0x37   :  { %521 = vmatmul.mubr.f32.gmra.mrb[6].mxu1 %v3069_v30  ;;  %v102_v39 = vld [vmem:[%s4051_s1 + $0x248] sm:$0xff]  ;;  %v108_v55 = vld [vmem:[%s4051_s1 + $0x278] sm:$0xff]  ;;  %v111_v56 = vld [vmem:[%s4051_s1 + $0x290] sm:$0xff] }
  0x38   :  { %2191 = vmatprep.mubr.msk.f32.mxu1 %vm250_vm0, %v3080_v34 }
  0x39   :  { %2282 = vmatpush1.bf16.msra.mxu0 %v2281_v15  ;;  %v62_v15 = vld [vmem:[%s4051_s1 + $0x108] sm:$0xff] }
  0x3a   :  { %2284 = vmatprep.subr.bf16.mxu0 %v2283_v17  ;;  %v66_v17 = vld [vmem:[%s4051_s1 + $0x128] sm:$0xff] }
  0x3b   :  { %2192 = vmatmul.mubr.msk.f32.vlgmr.msra.gmra.mrb[8].mxu1 %vm250_vm0, %v3098_v40  ;;  %v3257_v26 = vpack.c.bf16 %v69_v18, %v66_v17  ;;  %v61_v18 = vld [vmem:[%s4051_s1 + $0x100] sm:$0xff] }
  0x3c   :  { %2194 = vmatprep.mubr.msk.f32.mxu1 %vm250_vm0, %v3123_v48  ;;  %2334 = vmatpush1.bf16.msra.mxu1 %v3102_v41 }
  0x3d   :  { %2286 = vmatpush1.bf16.msra.mxu0 %v2285_v23  ;;  %2336 = vmatprep.subr.bf16.mxu1 %v3110_v44 }
  0x3e   :  { %2288 = vmatprep.subr.bf16.mxu0 %v2287_v25  ;;  %v94_v25 = vld [vmem:[%s4051_s1 + $0x208] sm:$0xff] }
  0x3f   :  { %2195 = vmatmul.mubr.msk.f32.gmra.mrb[10].mxu1 %vm250_vm0, %v3138_v52 }
  0x40   :  { %2338 = vmatpush1.bf16.msra.mxu1 %v3141_v53 }
  0x41   :  { %2290 = vmatpush1.bf16.msra.mxu0 %v2289_v33  ;;  %2340 = vmatprep.subr.bf16.mxu1 %v3145_v54  ;;  %v43_v33 = vld [vmem:[%s4051_s1 + $0x70] sm:$0xff] }
  0x42   :  { %2292 = vmatprep.subr.bf16.mxu0 %v2291_v37  ;;  %v100_v37 = vld [vmem:[%s4051_s1 + $0x238] sm:$0xff] }
  0x43   :  { %v3315_v46 = vpack.c.bf16 %v100_v37, %v97_v36  ;;  %v95_v36 = vld [vmem:[%s4051_s1 + $0x210] sm:$0xff]  ;;  %v98_v37 = vld [vmem:[%s4051_s1 + $0x228] sm:$0xff] }
  0x44   :  { %328 = vmatmul.mubr.f32.vlgmr.msra.gmra.mrb[0].mxu0 %v2994_v5  ;;  %2342 = vmatpush1.bf16.msra.mxu1 %v3164_v59  ;;  %v60_v5 = vld [vmem:[%s4051_s1 + $0xf8] sm:$0xff] }
  0x45   :  { %2294 = vmatpush1.bf16.msra.mxu0 %v2293_v47  ;;  %333 = vmatprep.mubr.f32.mxu0 %v3001_v8  ;;  %v31_v8 = vld [vmem:[%s4051_s1 + $0x10] sm:$0xff]  ;;  %v3220_v13 = vpack.c.bf16 %v63_v7, %v60_v5  ;;  %v49_v47 = vld [vmem:[%s4051_s1 + $0xa0] sm:$0xff]  ;;  %v3363_v5 = vpack.c.bf16 %v80_v61, %v77_v58  ;;  %v3463_v61 = vpack.c.bf16 %v111_v56, %v108_v55 }
  0x46   :  { %2400 = vmatprep.subr.bf16.mxu0 %v3133_v51  ;;  %2344 = vmatprep.subr.bf16.mxu1 %v3168_v60  ;;  %v3235_v19 = vpack.c.bf16 %v34_v9, %v31_v8  ;;  %v3351_v63 = vpack.c.bf16 %v52_v49, %v49_v47  ;;  %v109_v7 = vld [vmem:[%s4051_s1 + $0x280] sm:$0xff]  ;;  %v112_v8 = vld [vmem:[%s4051_s1 + $0x298] sm:$0xff] }
  0x47   :  { %v3392_v17 = vpack.c.bf16 %v112_v8, %v109_v7  ;;  %v101_v47 = vld [vmem:[%s4051_s1 + $0x240] sm:$0xff]  ;;  %v104_v49 = vld [vmem:[%s4051_s1 + $0x258] sm:$0xff]  ;;  %4075 = vst [vmem:[#allocation5_spill] sm:$0xff] %v3463_v61  ;;  %v115_v8 = vld [vmem:[%s4051_s1 + $0x2b0] sm:$0xff] }
  0x48   :  { %334 = vmatmul.mubr.f32.gmra.mrb[2].mxu0 %v3020_v14  ;;  %2346 = vmatpush1.bf16.msra.mxu1 %v3184_v1  ;;  %v59_v14 = vld [vmem:[%s4051_s1 + $0xf0] sm:$0xff]  ;;  %v3460_v58 = vpack.c.bf16 %v104_v49, %v101_v47  ;;  %v117_v7 = vld [vmem:[%s4051_s1 + $0x2c0] sm:$0xff]  ;;  %v122_v49 = vld [vmem:[%s4051_s1 + $0x2e8] sm:$0xff] }
  0x49   :  { %339 = vmatprep.mubr.f32.mxu0 %v3026_v16  ;;  %2348 = vmatprep.subr.bf16.mxu1 %v3188_v2  ;;  %v4054_v16 = vmov 0.0   ;;  %v3246_v23 = vpack.c.bf16 %v62_v15, %v59_v14  ;;  %v90_v14 = vld [vmem:[%s4051_s1 + $0x1e8] sm:$0xff]  ;;  %v3389_v15 = vpack.c.bf16 %v58_v4, %v55_v3  ;;  %v119_v47 = vld [vmem:[%s4051_s1 + $0x2d0] sm:$0xff] }
  0x4a   :  { %4074 = vst [vmem:[#allocation4_spill] sm:$0xff] %v3460_v58  ;;  %v114_v4 = vld [vmem:[%s4051_s1 + $0x2a8] sm:$0xff]  ;;  %v3534_v56 = vpack.c.bf16 %v122_v49, %v119_v47 }
  0x4c   :  { %340 = vmatmul.mubr.f32.gmra.mrb[4].mxu0 %v3045_v22  ;;  %v40_v22 = vld [vmem:[%s4051_s1 + $0x58] sm:$0xff]  ;;  %2350 = vmatpush1.bf16.msra.mxu1 %v3210_v10  ;;  %4080 = vst [vmem:[#allocation10_spill] sm:$0xff] %v3534_v56 }
  0x4d   :  { %345 = vmatprep.mubr.f32.mxu0 %v3050_v24  ;;  %v91_v24 = vld [vmem:[%s4051_s1 + $0x1f0] sm:$0xff]  ;;  %2352 = vmatprep.subr.bf16.mxu1 %v3220_v13  ;;  %v3273_v31 = vpack.c.bf16 %v40_v22, %v37_v21  ;;  %v64_v21 = vld [vmem:[%s4051_s1 + $0x118] sm:$0xff]  ;;  %v3401_v22 = vpack.c.bf16 %v86_v12, %v83_v11  ;;  %v3485_v11 = vpack.c.bf16 %v117_v7, %v114_v4  ;;  %v118_v12 = vld [vmem:[%s4051_s1 + $0x2c8] sm:$0xff] }
  0x4e   :  { %v3276_v32 = vpack.c.bf16 %v94_v25, %v91_v24  ;;  %v89_v25 = vld [vmem:[%s4051_s1 + $0x1e0] sm:$0xff]  ;;  %v126_v7 = vld [vmem:[%s4051_s1 + $0x308] sm:$0xff] }
  0x4f   :  { %4077 = vst [vmem:[#allocation7_spill] sm:$0xff] %v3485_v11 }
  0x50   :  { %346 = vmatmul.mubr.f32.gmra.mrb[6].mxu0 %v3069_v30  ;;  %v75_v30 = vld [vmem:[%s4051_s1 + $0x170] sm:$0xff]  ;;  %2354 = vmatpush1.bf16.msra.mxu1 %v3246_v23 }
  0x51   :  { %416 = vmatprep.mubr.f32.mxu0 %v4054_v16  ;;  %2356 = vmatprep.subr.bf16.mxu1 %v3257_v26  ;;  %v3296_v38 = vpack.c.bf16 %v75_v30, %v72_v29  ;;  %v99_v29 = vld [vmem:[%s4051_s1 + $0x230] sm:$0xff]  ;;  %v3419_v30 = vpack.c.bf16 %v64_v21, %v61_v18  ;;  %v116_v18 = vld [vmem:[%s4051_s1 + $0x2b8] sm:$0xff] }
  0x52   :  { %v67_v21 = vld [vmem:[%s4051_s1 + $0x130] sm:$0xff] }
  0x54   :  { %1852 = vmatmul.mubr.msk.f32.vlgmr.msra.gmra.mrb[0].mxu0 %vm250_vm0, %v3080_v34  ;;  %v46_v34 = vld [vmem:[%s4051_s1 + $0x88] sm:$0xff]  ;;  %2358 = vmatpush1.bf16.msra.mxu1 %v3285_v35 }
  0x55   :  { %422 = vmatprep.mubr.f32.mxu0 %v4054_v16  ;;  %2402 = vmatpush3.bf16.msra.mxu0 %v3235_v19  ;;  %v3312_v45 = vpack.c.bf16 %v46_v34, %v43_v33  ;;  %v3423_v33 = vpack.c.bf16 %v92_v27, %v89_v25  ;;  %v3426_v34 = vpack.c.bf16 %v99_v29, %v96_v28  ;;  %v70_v27 = vld [vmem:[%s4051_s1 + $0x148] sm:$0xff]  ;;  %v120_v29 = vld [vmem:[%s4051_s1 + $0x2d8] sm:$0xff] }
  0x56   :  { %2404 = vmatprep.subr.bf16.mxu0 %v3237_v20  ;;  %2360 = vmatprep.subr.bf16.mxu1 %v3296_v38  ;;  %v3508_v28 = vpack.c.bf16 %v70_v27, %v67_v21 }
  0x58   :  { %1853 = vmatmul.mubr.msk.f32.gmra.mrb[2].mxu0 %vm250_vm0, %v3098_v40  ;;  %v81_v40 = vld [vmem:[%s4051_s1 + $0x1a0] sm:$0xff]  ;;  %2362 = vmatpush1.bf16.msra.mxu1 %v3324_v50 }
  0x59   :  { %428 = vmatprep.mubr.f32.mxu0 %v4054_v16  ;;  %2406 = vmatpush3.bf16.msra.mxu0 %v3273_v31  ;;  %v3335_v57 = vpack.c.bf16 %v81_v40, %v78_v43  ;;  %v3442_v43 = vpack.c.bf16 %v98_v37, %v95_v36  ;;  %v3445_v40 = vpack.c.bf16 %v105_v42, %v102_v39  ;;  %v123_v36 = vld [vmem:[%s4051_s1 + $0x2f0] sm:$0xff]  ;;  %v121_v37 = vld [vmem:[%s4051_s1 + $0x2e0] sm:$0xff]  ;;  %v124_v42 = vld [vmem:[%s4051_s1 + $0x2f8] sm:$0xff] }
  0x5a   :  { %2408 = vmatprep.subr.bf16.mxu0 %v3276_v32  ;;  %v3521_v39 = vpack.c.bf16 %v123_v36, %v120_v29  ;;  %v3532_v55 = vpack.c.bf16 %v124_v42, %v121_v37  ;;  %v235_v29 = vlaneseq }
  0x5b   :  { %2364 = vmatprep.subr.bf16.mxu1 %v3335_v57  ;;  %4072 = vst [vmem:[#allocation2_spill] sm:$0xff] %v3442_v43  ;;  %4073 = vst [vmem:[#allocation3_spill] sm:$0xff] %v3445_v40 }
  0x5c   :  { %1854 = vmatmul.mubr.msk.f32.gmra.mrb[4].mxu0 %vm250_vm0, %v3123_v48  ;;  %v87_v48 = vld [vmem:[%s4051_s1 + $0x1d0] sm:$0xff]  ;;  %2366 = vmatpush1.bf16.msra.mxu1 %v3363_v5  ;;  %4079 = vst [vmem:[#allocation9_spill] sm:$0xff] %v3521_v39  ;;  %v3566_v47 = vshrl.u32 %v235_v29, 7 }
  0x5d   :  { %434 = vmatprep.mubr.f32.mxu0 %v4054_v16  ;;  %2410 = vmatpush3.bf16.msra.mxu0 %v3312_v45  ;;  %v3374_v9 = vpack.c.bf16 %v87_v48, %v84_v62  ;;  %v107_v62 = vld [vmem:[%s4051_s1 + $0x270] sm:$0xff]  ;;  %v110_v48 = vld [vmem:[%s4051_s1 + $0x288] sm:$0xff] }
  0x5e   :  { %2412 = vmatprep.subr.bf16.mxu0 %v3315_v46  ;;  %v3472_v3 = vpack.c.bf16 %v110_v48, %v107_v62  ;;  %v73_v62 = vld [vmem:[%s4051_s1 + $0x160] sm:$0xff]  ;;  %v76_v48 = vld [vmem:[%s4051_s1 + $0x178] sm:$0xff]  ;;  %4082 = vst [vmem:[#allocation12_spill] sm:$0xff] %v3566_v47 }
  0x5f   :  { %2368 = vmatprep.subr.bf16.mxu1 %v3374_v9  ;;  %v3543_v4 = vpack.c.bf16 %v76_v48, %v73_v62  ;;  %v4064_v48 = vsub.s32 2, %v3566_v47 }
  0x60   :  { %1855 = vmatmul.mubr.msk.f32.gmra.mrb[6].mxu0 %vm250_vm0, %v3138_v52  ;;  %v93_v52 = vld [vmem:[%s4051_s1 + $0x200] sm:$0xff]  ;;  %2370 = vmatpush1.bf16.msra.mxu1 %v3401_v22  ;;  %4076 = vst [vmem:[#allocation6_spill] sm:$0xff] %v3472_v3 }
  0x61   :  { %2414 = vmatpush3.bf16.msra.mxu0 %v3351_v63  ;;  %v3404_v24 = vpack.c.bf16 %v93_v52, %v90_v14  ;;  %v3490_v14 = vpack.c.bf16 %v118_v12, %v115_v8  ;;  %v113_v52 = vld [vmem:[%s4051_s1 + $0x2a0] sm:$0xff] }
  0x62   :  { %2416 = vmatprep.subr.bf16.mxu0 %v3354_v0  ;;  %v3502_v25 = vpack.c.bf16 %v116_v18, %v113_v52  ;;  %v129_v8 = vld [vmem:[%s4051_s1 + $0x320] sm:$0xff]  ;;  %v127_v52 = vld [vmem:[%s4051_s1 + $0x310] sm:$0xff]  ;;  %v130_v18 = vld [vmem:[%s4051_s1 + $0x328] sm:$0xff] }
  0x63   :  { %2372 = vmatprep.subr.bf16.mxu1 %v3404_v24  ;;  %v3554_v12 = vpack.c.bf16 %v129_v8, %v126_v7  ;;  %v3563_v21 = vpack.c.bf16 %v130_v18, %v127_v52  ;;  %v233_v8 = vld [vmem:[%s4052_s3] sm:$0x7] }
  0x64   :  { %2374 = vmatpush1.bf16.msra.mxu1 %v3423_v33  ;;  %4078 = vst [vmem:[#allocation8_spill] sm:$0xff] %v3502_v25  ;;  %v246_v16 = vrot.slane %v233_v8, %v4064_v48  ;;  %v4066_v48 = vsub.s32 1, %v3566_v47 }
  0x65   :  { %2418 = vmatpush3.bf16.msra.mxu0 %v3389_v15  ;;  %2376 = vmatprep.subr.bf16.mxu1 %v3426_v34  ;;  %4081 = vst [vmem:[#allocation11_spill] sm:$0xff] %v3554_v12 }
  0x66   :  { %2420 = vmatprep.subr.bf16.mxu0 %v3392_v17 }
  0x68   :  { %2378 = vmatpush1.bf16.msra.mxu1 %v3442_v43 }
  0x69   :  { %2422 = vmatpush3.bf16.msra.mxu0 %v3419_v30  ;;  %2380 = vmatprep.subr.bf16.mxu1 %v3445_v40 }
  0x6a   :  { %2424 = vmatprep.subr.bf16.mxu0 %v3490_v14 }
  0x6c   :  { %2382 = vmatpush1.bf16.msra.mxu1 %v3460_v58 }
  0x6d   :  { %2384 = vmatprep.subr.bf16.mxu1 %v3463_v61  ;;  %2426 = vmatpush3.bf16.msra.mxu0 %v3508_v28 }
  0x6e   :  { %2428 = vmatprep.subr.bf16.mxu0 %v3532_v55 }
  0x70   :  { %2386 = vmatpush1.bf16.msra.mxu1 %v3472_v3 }
  0x71   :  { %2388 = vmatprep.subr.bf16.mxu1 %v3485_v11  ;;  %2430 = vmatpush3.bf16.msra.mxu0 %v3543_v4 }
  0x72   :  { %2432 = vmatprep.subr.bf16.mxu0 %v3563_v21 }
  0x74   :  { %2390 = vmatpush1.bf16.msra.mxu1 %v3502_v25 }
  0x75   :  { %2392 = vmatprep.subr.bf16.mxu1 %v3521_v39 }
  0x78   :  { %2394 = vmatpush1.bf16.msra.mxu1 %v3534_v56 }
  0x79   :  { %2396 = vmatprep.subr.bf16.mxu1 %v3554_v12 }
  0xfe   :  { %v2019_v27 = vpop.f32.mrb[0].mxu1 }
  0xff   :  { %v2020_v36 = vpop.f32.mrb[1].mxu1 }
 0x100   :  { %v2021_v37 = vadd.f32 %v2020_v36, %v2019_v27 }
 0x102   :  { %v2022_v42 = vpop.f32.mrb[2].mxu1  ;;  %v508_v29 = vadd.f32 %v2021_v37, %v246_v16  ;;  %v1918_v37 = vld [vmem:[%s4049_s2 + $0x4c0] sm:$0xff] }
 0x103   :  { %v2023_v49 = vpop.f32.mrb[3].mxu1 }
 0x104   :  { %v2024_v62 = vadd.f32 %v2023_v49, %v2022_v42 }
 0x106   :  { %v2025_v7 = vpop.f32.mrb[4].mxu1  ;;  %v513_v27 = vadd.f32 %v2024_v62, %v246_v16  ;;  %v4065_v62 = vsub.s32 0, %v3566_v47 }
 0x107   :  { %v2026_v52 = vpop.f32.mrb[5].mxu1 }
 0x108   :  { %v2027_v18 = vadd.f32 %v2026_v52, %v2025_v7 }
 0x10a   :  { %v2028_v12 = vpop.f32.mrb[6].mxu1  ;;  %v518_v3 = vadd.f32 %v2027_v18, %v246_v16 }
 0x10b   :  { %v2029_v56 = vpop.f32.mrb[7].mxu1 }
 0x10c   :  { %v2030_v36 = vadd.f32 %v2029_v56, %v2028_v12  ;;  %v242_v56 = vrot.slane %v233_v8, %v4066_v48  ;;  %v1872_v12 = vld [vmem:[%s4049_s2 + $0x350] sm:$0xff] }
 0x10e   :  { %v2193_v39 = vpop.f32.mrb[8].mxu1  ;;  %v523_v11 = vadd.f32 %v2030_v36, %v246_v16  ;;  %v125_v16 = vld [vmem:[%s4051_s1 + $0x300] sm:$0xff] }
 0x10f   :  { %v3574_v25 = vadd.f32 %v2193_v39, %v513_v27  ;;  %v592_v42 = vpop.f32.mrb[9].mxu1  ;;  %v238_v39 = vrot.slane %v233_v8, %v4065_v62  ;;  %v1921_v8 = vld [vmem:[%s4049_s2 + $0x4d8] sm:$0xff] }
 0x110   :  { %v3576_v49 = vadd.f32 %v592_v42, %v508_v29 }
 0x112   :  { %v2196_v61 = vpop.f32.mrb[10].mxu1 }
 0x113   :  { %v3578_v58 = vadd.f32 %v2196_v61, %v523_v11  ;;  %v602_v7 = vpop.f32.mrb[11].mxu1  ;;  %v128_v61 = vld [vmem:[%s4051_s1 + $0x318] sm:$0xff] }
 0x114   :  { %v3580_v52 = vadd.f32 %v602_v7, %v518_v3  ;;  %v1869_v3 = vld [vmem:[%s4049_s2 + $0x338] sm:$0xff]  ;;  %v3606_v36 = vpack.c.bf16 %v128_v61, %v125_v16  ;;  %v2503_v7 = vpack.c.bf16 %v1921_v8, %v1918_v37  ;;  %v1870_v8 = vld [vmem:[%s4049_s2 + $0x340] sm:$0xff] }
 0x115   :  { %v2435_v42 = vpack.c.bf16 %v1872_v12, %v1869_v3 }
 0x116   :  { %4083 = vst [vmem:[#allocation13_spill] sm:$0xff] %v3606_v36 }
 0x127   :  { %v418_v11 = vpop.f32.mrb[0].mxu0 }
 0x128   :  { %v420_v18 = vpop.f32.mrb[1].mxu0  ;;  %v2643_v29 = vadd.f32 %v418_v11, %v238_v39 }
 0x129   :  { %v2644_v27 = vadd.f32 %v420_v18, %v242_v56 }
 0x12b   :  { %v424_v62 = vpop.f32.mrb[2].mxu0  ;;  %687 = vmatprep.mubr.f32.mxu1 %v2644_v27  ;;  %865 = vmatprep.mubr.f32.mxu0 %v2644_v27  ;;  %v1924_v27 = vld [vmem:[%s4049_s2 + $0x4f0] sm:$0xff] }
 0x12c   :  { %v426_v48 = vpop.f32.mrb[3].mxu0  ;;  %688 = vmatmul.mubr.f32.vlgmr.msra.gmra.mrb[12].mxu1 %v2643_v29  ;;  %866 = vmatmul.mubr.f32.vlgmr.msra.gmra.mrb[8].mxu0 %v2643_v29  ;;  %v2645_v40 = vadd.f32 %v424_v62, %v238_v39  ;;  %v1868_v62 = vld [vmem:[%s4049_s2 + $0x330] sm:$0xff]  ;;  %v1927_v29 = vld [vmem:[%s4049_s2 + $0x508] sm:$0xff] }
 0x12d   :  { %v2646_v47 = vadd.f32 %v426_v48, %v242_v56  ;;  %2398 = vmatpush1.bf16.msra.mxu1 %v3606_v36  ;;  %2434 = vmatpush3.bf16.msra.mxu0 %v3563_v21  ;;  %v1882_v36 = vld [vmem:[%s4049_s2 + $0x3a0] sm:$0xff] }
 0x12e   :  { %2436 = vmatprep.subr.bf16.mxu0 %v2435_v42  ;;  %2504 = vmatprep.subr.bf16.mxu1 %v2503_v7  ;;  %v4084_v42 = vmov 0.0  }
 0x12f   :  { %v430_v18 = vpop.f32.mrb[4].mxu0  ;;  %693 = vmatprep.mubr.f32.mxu1 %v2646_v47  ;;  %870 = vmatprep.mubr.f32.mxu0 %v2646_v47  ;;  %v1871_v47 = vld [vmem:[%s4049_s2 + $0x348] sm:$0xff] }
 0x130   :  { %v432_v16 = vpop.f32.mrb[5].mxu0  ;;  %694 = vmatmul.mubr.f32.gmra.mrb[14].mxu1 %v2645_v40  ;;  %871 = vmatmul.mubr.f32.gmra.mrb[10].mxu0 %v2645_v40  ;;  %v2647_v3 = vadd.f32 %v430_v18, %v238_v39  ;;  %v1875_v40 = vld [vmem:[%s4049_s2 + $0x368] sm:$0xff]  ;;  %v2437_v7 = vpack.c.bf16 %v1871_v47, %v1868_v62  ;;  %v1874_v18 = vld [vmem:[%s4049_s2 + $0x360] sm:$0xff]  ;;  %v1884_v62 = vld [vmem:[%s4049_s2 + $0x3b0] sm:$0xff] }
 0x131   :  { %v2648_v61 = vadd.f32 %v432_v16, %v242_v56  ;;  %v1877_v16 = vld [vmem:[%s4049_s2 + $0x378] sm:$0xff]  ;;  %v1930_v47 = vld [vmem:[%s4049_s2 + $0x520] sm:$0xff] }
 0x133   :  { %v436_v11 = vpop.f32.mrb[6].mxu0  ;;  %699 = vmatprep.mubr.f32.mxu1 %v2648_v61  ;;  %875 = vmatprep.mubr.f32.mxu0 %v2648_v61 }
 0x134   :  { %v438_v12 = vpop.f32.mrb[7].mxu0  ;;  %700 = vmatmul.mubr.f32.gmra.mrb[16].mxu1 %v2647_v3  ;;  %876 = vmatmul.mubr.f32.gmra.mrb[12].mxu0 %v2647_v3  ;;  %v2649_v37 = vadd.f32 %v436_v11, %v238_v39  ;;  %v1878_v39 = vld [vmem:[%s4049_s2 + $0x380] sm:$0xff]  ;;  %v1881_v11 = vld [vmem:[%s4049_s2 + $0x398] sm:$0xff] }
 0x135   :  { %v2650_v48 = vadd.f32 %v438_v12, %v242_v56  ;;  %v1873_v56 = vld [vmem:[%s4049_s2 + $0x358] sm:$0xff]  ;;  %v2439_v3 = vpack.c.bf16 %v1878_v39, %v1875_v40  ;;  %v2507_v12 = vpack.c.bf16 %v1927_v29, %v1924_v27  ;;  %v2443_v39 = vpack.c.bf16 %v1884_v62, %v1881_v11  ;;  %v1883_v27 = vld [vmem:[%s4049_s2 + $0x3a8] sm:$0xff] }
 0x136   :  { %v2505_v61 = vpack.c.bf16 %v1873_v56, %v1870_v8  ;;  %v1933_v40 = vld [vmem:[%s4049_s2 + $0x538] sm:$0xff]  ;;  %v1880_v8 = vld [vmem:[%s4049_s2 + $0x390] sm:$0xff] }
 0x137   :  { %705 = vmatprep.mubr.f32.mxu1 %v2650_v48  ;;  %880 = vmatprep.mubr.f32.mxu0 %v2650_v48  ;;  %v1876_v48 = vld [vmem:[%s4049_s2 + $0x370] sm:$0xff]  ;;  %v2511_v29 = vpack.c.bf16 %v1933_v40, %v1930_v47  ;;  %v1899_v40 = vld [vmem:[%s4049_s2 + $0x428] sm:$0xff] }
 0x138   :  { %706 = vmatmul.mubr.f32.gmra.mrb[18].mxu1 %v2649_v37  ;;  %881 = vmatmul.mubr.f32.gmra.mrb[14].mxu0 %v2649_v37  ;;  %v1879_v37 = vld [vmem:[%s4049_s2 + $0x388] sm:$0xff]  ;;  %v1892_v47 = vld [vmem:[%s4049_s2 + $0x3f0] sm:$0xff] }
 0x139   :  { %2201 = vmatprep.mubr.msk.f32.mxu0 %vm250_vm0, %v3576_v49  ;;  %776 = vmatprep.mubr.f32.mxu1 %v4084_v42  ;;  %v2509_v56 = vpack.c.bf16 %v1879_v37, %v1876_v48  ;;  %v1893_v48 = vld [vmem:[%s4049_s2 + $0x3f8] sm:$0xff] }
 0x13c   :  { %1860 = vmatmul.mubr.msk.f32.vlgmr.msra.gmra.mrb[12].mxu1 %vm250_vm0, %v3576_v49  ;;  %2202 = vmatmul.mubr.msk.f32.vlgmr.msra.gmra.mrb[16].mxu0 %vm250_vm0, %v3574_v25  ;;  %v2441_v49 = vpack.c.bf16 %v1877_v16, %v1874_v18  ;;  %v1887_v18 = vld [vmem:[%s4049_s2 + $0x3c8] sm:$0xff]  ;;  %v1890_v16 = vld [vmem:[%s4049_s2 + $0x3e0] sm:$0xff] }
 0x13d   :  { %2204 = vmatprep.mubr.msk.f32.mxu0 %vm250_vm0, %v3580_v52  ;;  %782 = vmatprep.mubr.f32.mxu1 %v4084_v42  ;;  %v2447_v11 = vpack.c.bf16 %v1890_v16, %v1887_v18  ;;  %v1904_v16 = vld [vmem:[%s4049_s2 + $0x450] sm:$0xff] }
 0x13e   :  { %2438 = vmatpush1.bf16.msra.mxu0 %v2437_v7  ;;  %2506 = vmatpush3.bf16.msra.mxu1 %v2505_v61  ;;  %v1885_v7 = vld [vmem:[%s4049_s2 + $0x3b8] sm:$0xff]  ;;  %v2445_v61 = vpack.c.bf16 %v1883_v27, %v1880_v8 }
 0x13f   :  { %2440 = vmatprep.subr.bf16.mxu0 %v2439_v3  ;;  %2508 = vmatprep.subr.bf16.mxu1 %v2507_v12  ;;  %v2513_v3 = vpack.c.bf16 %v1885_v7, %v1882_v36  ;;  %v1889_v12 = vld [vmem:[%s4049_s2 + $0x3d8] sm:$0xff]  ;;  %v1896_v36 = vld [vmem:[%s4049_s2 + $0x410] sm:$0xff] }
 0x140   :  { %1861 = vmatmul.mubr.msk.f32.gmra.mrb[14].mxu1 %vm250_vm0, %v3574_v25  ;;  %2205 = vmatmul.mubr.msk.f32.gmra.mrb[18].mxu0 %vm250_vm0, %v3578_v58  ;;  %v1886_v25 = vld [vmem:[%s4049_s2 + $0x3c0] sm:$0xff]  ;;  %v2451_v62 = vpack.c.bf16 %v1896_v36, %v1893_v48  ;;  %v1905_v27 = vld [vmem:[%s4049_s2 + $0x458] sm:$0xff] }
 0x141   :  { %788 = vmatprep.mubr.f32.mxu1 %v4084_v42  ;;  %v2449_v37 = vpack.c.bf16 %v1889_v12, %v1886_v25  ;;  %v1910_v48 = vld [vmem:[%s4049_s2 + $0x480] sm:$0xff]  ;;  %v1913_v36 = vld [vmem:[%s4049_s2 + $0x498] sm:$0xff] }
 0x142   :  { %2442 = vmatpush1.bf16.msra.mxu0 %v2441_v49  ;;  %2510 = vmatpush3.bf16.msra.mxu1 %v2509_v56  ;;  %v1902_v49 = vld [vmem:[%s4049_s2 + $0x440] sm:$0xff] }
 0x143   :  { %2444 = vmatprep.subr.bf16.mxu0 %v2443_v39  ;;  %2512 = vmatprep.subr.bf16.mxu1 %v2511_v29  ;;  %v2455_v56 = vpack.c.bf16 %v1902_v49, %v1899_v40  ;;  %v1898_v39 = vld [vmem:[%s4049_s2 + $0x420] sm:$0xff]  ;;  %v1908_v29 = vld [vmem:[%s4049_s2 + $0x470] sm:$0xff]  ;;  %v1919_v49 = vld [vmem:[%s4049_s2 + $0x4c8] sm:$0xff] }
 0x144   :  { %1862 = vmatmul.mubr.msk.f32.gmra.mrb[16].mxu1 %vm250_vm0, %v3580_v52  ;;  %v1895_v52 = vld [vmem:[%s4049_s2 + $0x408] sm:$0xff]  ;;  %v2459_v18 = vpack.c.bf16 %v1908_v29, %v1905_v27  ;;  %v1916_v40 = vld [vmem:[%s4049_s2 + $0x4b0] sm:$0xff]  ;;  %v1922_v27 = vld [vmem:[%s4049_s2 + $0x4e0] sm:$0xff] }
 0x145   :  { %794 = vmatprep.mubr.f32.mxu1 %v4084_v42  ;;  %v2453_v8 = vpack.c.bf16 %v1895_v52, %v1892_v47  ;;  %v2465_v47 = vpack.c.bf16 %v1913_v36, %v1910_v48  ;;  %v1925_v29 = vld [vmem:[%s4049_s2 + $0x4f8] sm:$0xff]  ;;  %v1938_v48 = vld [vmem:[%s4049_s2 + $0x560] sm:$0xff]  ;;  %v1936_v36 = vld [vmem:[%s4049_s2 + $0x550] sm:$0xff] }
 0x146   :  { %2446 = vmatpush1.bf16.msra.mxu0 %v2445_v61  ;;  %2514 = vmatpush3.bf16.msra.mxu1 %v2513_v3  ;;  %v1907_v61 = vld [vmem:[%s4049_s2 + $0x468] sm:$0xff] }
 0x147   :  { %2448 = vmatprep.subr.bf16.mxu0 %v2447_v11  ;;  %v1911_v3 = vld [vmem:[%s4049_s2 + $0x488] sm:$0xff]  ;;  %v1914_v11 = vld [vmem:[%s4049_s2 + $0x4a0] sm:$0xff]  ;;  %v2461_v25 = vpack.c.bf16 %v1907_v61, %v1904_v16  ;;  %v2473_v16 = vpack.c.bf16 %v1925_v29, %v1922_v27  ;;  %v1944_v27 = vld [vmem:[%s4049_s2 + $0x590] sm:$0xff] }
 0x148   :  { %1863 = vmatmul.mubr.msk.f32.gmra.mrb[18].mxu1 %vm250_vm0, %v3578_v58  ;;  %v1901_v58 = vld [vmem:[%s4049_s2 + $0x438] sm:$0xff]  ;;  %v2463_v12 = vpack.c.bf16 %v1914_v11, %v1911_v3  ;;  %v1928_v3 = vld [vmem:[%s4049_s2 + $0x510] sm:$0xff]  ;;  %v1931_v11 = vld [vmem:[%s4049_s2 + $0x528] sm:$0xff] }
 0x149   :  { %v2457_v7 = vpack.c.bf16 %v1901_v58, %v1898_v39  ;;  %v2469_v39 = vpack.c.bf16 %v1919_v49, %v1916_v40  ;;  %v1942_v29 = vld [vmem:[%s4049_s2 + $0x580] sm:$0xff] }
 0x14a   :  { %2450 = vmatpush1.bf16.msra.mxu0 %v2449_v37  ;;  %v1917_v37 = vld [vmem:[%s4049_s2 + $0x4b8] sm:$0xff] }
 0x14b   :  { %2452 = vmatprep.subr.bf16.mxu0 %v2451_v62  ;;  %v1920_v62 = vld [vmem:[%s4049_s2 + $0x4d0] sm:$0xff] }
 0x14c   :  { %v2467_v52 = vpack.c.bf16 %v1920_v62, %v1917_v37  ;;  %v1939_v62 = vld [vmem:[%s4049_s2 + $0x568] sm:$0xff] }
 0x14d   :  { %v2515_v40 = vpack.c.bf16 %v1939_v62, %v1936_v36  ;;  %v1947_v36 = vld [vmem:[%s4049_s2 + $0x5a8] sm:$0xff]  ;;  %v1948_v62 = vld [vmem:[%s4049_s2 + $0x5b0] sm:$0xff] }
 0x14e   :  { %2454 = vmatpush1.bf16.msra.mxu0 %v2453_v8  ;;  %v1923_v8 = vld [vmem:[%s4049_s2 + $0x4e8] sm:$0xff] }
 0x14f   :  { %2456 = vmatprep.subr.bf16.mxu0 %v2455_v56  ;;  %v1926_v56 = vld [vmem:[%s4049_s2 + $0x500] sm:$0xff]  ;;  %2516 = vmatprep.subr.bf16.mxu1 %v2515_v40 }
 0x150   :  { %v2471_v58 = vpack.c.bf16 %v1926_v56, %v1923_v8  ;;  %v1888_v8 = vld [vmem:[%s4049_s2 + $0x3d0] sm:$0xff]  ;;  %v1891_v56 = vld [vmem:[%s4049_s2 + $0x3e8] sm:$0xff]  ;;  %v1946_v40 = vld [vmem:[%s4049_s2 + $0x5a0] sm:$0xff] }
 0x152   :  { %2458 = vmatpush1.bf16.msra.mxu0 %v2457_v7  ;;  %v1929_v7 = vld [vmem:[%s4049_s2 + $0x518] sm:$0xff] }
 0x153   :  { %2460 = vmatprep.subr.bf16.mxu0 %v2459_v18  ;;  %v1932_v18 = vld [vmem:[%s4049_s2 + $0x530] sm:$0xff] }
 0x154   :  { %v2475_v61 = vpack.c.bf16 %v1932_v18, %v1929_v7  ;;  %v1945_v18 = vld [vmem:[%s4049_s2 + $0x598] sm:$0xff] }
 0x156   :  { %2462 = vmatpush1.bf16.msra.mxu0 %v2461_v25  ;;  %v2477_v25 = vpack.c.bf16 %v1931_v11, %v1928_v3  ;;  %v2519_v3 = vpack.c.bf16 %v1945_v18, %v1942_v29  ;;  %v1953_v29 = vld [vmem:[%s4049_s2 + $0x5d8] sm:$0xff]  ;;  %v1954_v18 = vld [vmem:[%s4049_s2 + $0x5e0] sm:$0xff] }
 0x157   :  { %2464 = vmatprep.subr.bf16.mxu0 %v2463_v12  ;;  %v1935_v12 = vld [vmem:[%s4049_s2 + $0x548] sm:$0xff] }
 0x158   :  { %v2479_v37 = vpack.c.bf16 %v1938_v48, %v1935_v12  ;;  %v1897_v12 = vld [vmem:[%s4049_s2 + $0x418] sm:$0xff] }
 0x15a   :  { %2466 = vmatpush1.bf16.msra.mxu0 %v2465_v47  ;;  %v1934_v47 = vld [vmem:[%s4049_s2 + $0x540] sm:$0xff] }
 0x15b   :  { %2468 = vmatprep.subr.bf16.mxu0 %v2467_v52  ;;  %v1937_v52 = vld [vmem:[%s4049_s2 + $0x558] sm:$0xff] }
 0x15c   :  { %v2481_v49 = vpack.c.bf16 %v1937_v52, %v1934_v47  ;;  %v1951_v52 = vld [vmem:[%s4049_s2 + $0x5c8] sm:$0xff] }
 0x15e   :  { %2470 = vmatpush1.bf16.msra.mxu0 %v2469_v39  ;;  %v2517_v39 = vpack.c.bf16 %v1891_v56, %v1888_v8  ;;  %v2523_v8 = vpack.c.bf16 %v1951_v52, %v1948_v62  ;;  %v1959_v62 = vld [vmem:[%s4049_s2 + $0x608] sm:$0xff]  ;;  %v1960_v52 = vld [vmem:[%s4049_s2 + $0x610] sm:$0xff] }
 0x15f   :  { %2472 = vmatprep.subr.bf16.mxu0 %v2471_v58  ;;  %v1941_v58 = vld [vmem:[%s4049_s2 + $0x578] sm:$0xff] }
 0x160   :  { %2518 = vmatpush3.bf16.msra.mxu1 %v2517_v39  ;;  %v2483_v7 = vpack.c.bf16 %v1944_v27, %v1941_v58  ;;  %v1900_v39 = vld [vmem:[%s4049_s2 + $0x430] sm:$0xff]  ;;  %v1903_v58 = vld [vmem:[%s4049_s2 + $0x448] sm:$0xff] }
 0x161   :  { %2520 = vmatprep.subr.bf16.mxu1 %v2519_v3  ;;  %v2525_v27 = vpack.c.bf16 %v1903_v58, %v1900_v39  ;;  %v1952_v3 = vld [vmem:[%s4049_s2 + $0x5d0] sm:$0xff] }
 0x162   :  { %2474 = vmatpush1.bf16.msra.mxu0 %v2473_v16  ;;  %v1940_v16 = vld [vmem:[%s4049_s2 + $0x570] sm:$0xff] }
 0x163   :  { %2476 = vmatprep.subr.bf16.mxu0 %v2475_v61  ;;  %v1943_v61 = vld [vmem:[%s4049_s2 + $0x588] sm:$0xff] }
 0x164   :  { %v2485_v11 = vpack.c.bf16 %v1943_v61, %v1940_v16  ;;  %v1957_v61 = vld [vmem:[%s4049_s2 + $0x5f8] sm:$0xff] }
 0x166   :  { %2478 = vmatpush1.bf16.msra.mxu0 %v2477_v25  ;;  %v1894_v25 = vld [vmem:[%s4049_s2 + $0x400] sm:$0xff] }
 0x167   :  { %2480 = vmatprep.subr.bf16.mxu0 %v2479_v37  ;;  %v2521_v48 = vpack.c.bf16 %v1897_v12, %v1894_v25  ;;  %v1950_v37 = vld [vmem:[%s4049_s2 + $0x5c0] sm:$0xff]  ;;  %v2527_v25 = vpack.c.bf16 %v1957_v61, %v1954_v18  ;;  %v1965_v18 = vld [vmem:[%s4049_s2 + $0x638] sm:$0xff] }
 0x168   :  { %v2487_v47 = vpack.c.bf16 %v1950_v37, %v1947_v36  ;;  %v1909_v36 = vld [vmem:[%s4049_s2 + $0x478] sm:$0xff] }
 0x169   :  { %2522 = vmatpush3.bf16.msra.mxu1 %v2521_v48  ;;  %v1906_v48 = vld [vmem:[%s4049_s2 + $0x460] sm:$0xff] }
 0x16a   :  { %2482 = vmatpush1.bf16.msra.mxu0 %v2481_v49  ;;  %v1949_v49 = vld [vmem:[%s4049_s2 + $0x5b8] sm:$0xff]  ;;  %2524 = vmatprep.subr.bf16.mxu1 %v2523_v8  ;;  %v2529_v37 = vpack.c.bf16 %v1909_v36, %v1906_v48  ;;  %v1958_v8 = vld [vmem:[%s4049_s2 + $0x600] sm:$0xff] }
 0x16b   :  { %2484 = vmatprep.subr.bf16.mxu0 %v2483_v7  ;;  %v2489_v56 = vpack.c.bf16 %v1949_v49, %v1946_v40  ;;  %v1956_v7 = vld [vmem:[%s4049_s2 + $0x5f0] sm:$0xff]  ;;  %v1963_v49 = vld [vmem:[%s4049_s2 + $0x628] sm:$0xff] }
 0x16c   :  { %v2491_v16 = vpack.c.bf16 %v1956_v7, %v1953_v29  ;;  %v2531_v39 = vpack.c.bf16 %v1963_v49, %v1960_v52  ;;  %v1915_v29 = vld [vmem:[%s4049_s2 + $0x4a8] sm:$0xff] }
 0x16d   :  { %2526 = vmatpush3.bf16.msra.mxu1 %v2525_v27  ;;  %v1912_v27 = vld [vmem:[%s4049_s2 + $0x490] sm:$0xff] }
 0x16e   :  { %2486 = vmatpush1.bf16.msra.mxu0 %v2485_v11  ;;  %v1955_v11 = vld [vmem:[%s4049_s2 + $0x5e8] sm:$0xff]  ;;  %2528 = vmatprep.subr.bf16.mxu1 %v2527_v25  ;;  %v2533_v7 = vpack.c.bf16 %v1915_v29, %v1912_v27 }
 0x16f   :  { %2488 = vmatprep.subr.bf16.mxu0 %v2487_v47  ;;  %v2493_v12 = vpack.c.bf16 %v1955_v11, %v1952_v3  ;;  %v1962_v47 = vld [vmem:[%s4049_s2 + $0x620] sm:$0xff]  ;;  %v1969_v11 = vld [vmem:[%s4049_s2 + $0x658] sm:$0xff]  ;;  %v1967_v27 = vld [vmem:[%s4049_s2 + $0x648] sm:$0xff] }
 0x170   :  { %v2495_v40 = vpack.c.bf16 %v1962_v47, %v1959_v62  ;;  %v1966_v3 = vld [vmem:[%s4049_s2 + $0x640] sm:$0xff] }
 0x171   :  { %2530 = vmatpush3.bf16.msra.mxu1 %v2529_v37  ;;  %v2535_v25 = vpack.c.bf16 %v1969_v11, %v1966_v3 }
 0x172   :  { %2490 = vmatpush1.bf16.msra.mxu0 %v2489_v56  ;;  %v1961_v56 = vld [vmem:[%s4049_s2 + $0x618] sm:$0xff]  ;;  %2532 = vmatprep.subr.bf16.mxu1 %v2531_v39 }
 0x173   :  { %2492 = vmatprep.subr.bf16.mxu0 %v2491_v16  ;;  %v2497_v58 = vpack.c.bf16 %v1961_v56, %v1958_v8  ;;  %v1968_v16 = vld [vmem:[%s4049_s2 + $0x650] sm:$0xff] }
 0x174   :  { %v2499_v61 = vpack.c.bf16 %v1968_v16, %v1965_v18 }
 0x175   :  { %2534 = vmatpush3.bf16.msra.mxu1 %v2533_v7 }
 0x176   :  { %2494 = vmatpush1.bf16.msra.mxu0 %v2493_v12  ;;  %2536 = vmatprep.subr.bf16.mxu1 %v2535_v25 }
 0x177   :  { %2496 = vmatprep.subr.bf16.mxu0 %v2495_v40 }
 0x17a   :  { %2498 = vmatpush1.bf16.msra.mxu0 %v2497_v58  ;;  %v1964_v58 = vld [vmem:[%s4049_s2 + $0x630] sm:$0xff] }
 0x17b   :  { %2500 = vmatprep.subr.bf16.mxu0 %v2499_v61 }
 0x1ff   :  { %v2069_v12 = vpop.f32.mrb[8].mxu0 }
 0x200   :  { %v2070_v48 = vpop.f32.mrb[9].mxu0 }
 0x201   :  { %v2071_v36 = vadd.f32 %v2070_v48, %v2069_v12  ;;  %v2501_v12 = vpack.c.bf16 %v1967_v27, %v1964_v58 }
 0x203   :  { %v2072_v37 = vpop.f32.mrb[10].mxu0 }
 0x204   :  { %v2073_v62 = vpop.f32.mrb[11].mxu0 }
 0x205   :  { %v2074_v47 = vadd.f32 %v2073_v62, %v2072_v37 }
 0x207   :  { %v2075_v52 = vpop.f32.mrb[12].mxu0 }
 0x208   :  { %v2076_v40 = vpop.f32.mrb[13].mxu0 }
 0x209   :  { %v2077_v49 = vadd.f32 %v2076_v40, %v2075_v52 }
 0x20b   :  { %v2078_v8 = vpop.f32.mrb[14].mxu0 }
 0x20c   :  { %v2079_v56 = vpop.f32.mrb[15].mxu0 }
 0x20d   :  { %v2080_v39 = vadd.f32 %v2079_v56, %v2078_v8 }
 0x20f   :  { %v778_v29 = vpop.f32.mrb[12].mxu1  ;;  %v2203_v7 = vpop.f32.mrb[16].mxu0 }
 0x210   :  { %v958_v18 = vadd.f32 %v2203_v7, %v2074_v47  ;;  %v780_v16 = vpop.f32.mrb[13].mxu1  ;;  %v952_v61 = vpop.f32.mrb[17].mxu0  ;;  %v971_v48 = vmax.f32 %v778_v29, 0.0 }
 0x211   :  { %v972_v3 = vmax.f32 %v780_v16, 0.0  ;;  %v953_v11 = vadd.f32 %v2071_v36, %v952_v61 }
 0x213   :  { %v784_v37 = vpop.f32.mrb[14].mxu1  ;;  %v2206_v62 = vpop.f32.mrb[18].mxu0  ;;  %1180 = vmatprep.mubr.f32.mxu0 %v972_v3  ;;  %1358 = vmatprep.mubr.f32.mxu1 %v972_v3  ;;  %v973_v16 = vmax.f32 %v953_v11, 0.0 }
 0x214   :  { %v968_v52 = vadd.f32 %v2206_v62, %v2080_v39  ;;  %v786_v40 = vpop.f32.mrb[15].mxu1  ;;  %v962_v8 = vpop.f32.mrb[19].mxu0  ;;  %1181 = vmatmul.mubr.f32.vlgmr.msra.gmra.mrb[20].mxu0 %v971_v48  ;;  %1359 = vmatmul.mubr.f32.vlgmr.msra.gmra.mrb[20].mxu1 %v971_v48  ;;  %v974_v47 = vmax.f32 %v784_v37, 0.0 }
 0x215   :  { %v975_v56 = vmax.f32 %v786_v40, 0.0  ;;  %v963_v43 = vadd.f32 %v2077_v49, %v962_v8  ;;  %2502 = vmatpush1.bf16.msra.mxu0 %v2501_v12  ;;  %2538 = vmatpush3.bf16.msra.mxu1 %v2535_v25 }
 0x216   :  { %2540 = vmatprep.subr.bf16.mxu1 %v2996_v6  ;;  %2608 = vmatprep.subr.bf16.mxu0 %v3133_v51  ;;  %v976_v6 = vmax.f32 %v958_v18, 0.0  ;;  %v982_v61 = vmax.f32 %v968_v52, 0.0 }
 0x217   :  { %v790_v36 = vpop.f32.mrb[16].mxu1  ;;  %1186 = vmatprep.mubr.f32.mxu0 %v975_v56  ;;  %1363 = vmatprep.mubr.f32.mxu1 %v975_v56  ;;  %v979_v51 = vmax.f32 %v963_v43, 0.0 }
 0x218   :  { %v792_v58 = vpop.f32.mrb[17].mxu1  ;;  %1187 = vmatmul.mubr.f32.gmra.mrb[22].mxu0 %v974_v47  ;;  %1364 = vmatmul.mubr.f32.gmra.mrb[22].mxu1 %v974_v47  ;;  %v977_v27 = vmax.f32 %v790_v36, 0.0  ;;  %v4099_v47 = vld [vmem:[#allocation13_spill] sm:$0xff] }
 0x219   :  { %v978_v39 = vmax.f32 %v792_v58, 0.0 }
 0x21b   :  { %v796_v29 = vpop.f32.mrb[18].mxu1  ;;  %1192 = vmatprep.mubr.f32.mxu0 %v978_v39  ;;  %1368 = vmatprep.mubr.f32.mxu1 %v978_v39 }
 0x21c   :  { %v798_v7 = vpop.f32.mrb[19].mxu1  ;;  %1193 = vmatmul.mubr.f32.gmra.mrb[24].mxu0 %v977_v27  ;;  %1369 = vmatmul.mubr.f32.gmra.mrb[24].mxu1 %v977_v27  ;;  %v980_v49 = vmax.f32 %v796_v29, 0.0 }
 0x21d   :  { %v981_v25 = vmax.f32 %v798_v7, 0.0 }
 0x21f   :  { %1198 = vmatprep.mubr.f32.mxu0 %v981_v25  ;;  %1373 = vmatprep.mubr.f32.mxu1 %v981_v25 }
 0x220   :  { %1199 = vmatmul.mubr.f32.gmra.mrb[26].mxu0 %v980_v49  ;;  %1374 = vmatmul.mubr.f32.gmra.mrb[26].mxu1 %v980_v49 }
 0x221   :  { %2211 = vmatprep.mubr.msk.f32.mxu1 %vm250_vm0, %v973_v16  ;;  %1269 = vmatprep.mubr.f32.mxu0 %v4084_v42 }
 0x224   :  { %1971 = vmatmul.mubr.msk.f32.vlgmr.msra.gmra.mrb[20].mxu0 %vm250_vm0, %v973_v16  ;;  %2212 = vmatmul.mubr.msk.f32.vlgmr.msra.gmra.mrb[28].mxu1 %vm250_vm0, %v976_v6 }
 0x225   :  { %2214 = vmatprep.mubr.msk.f32.mxu1 %vm250_vm0, %v979_v51  ;;  %1275 = vmatprep.mubr.f32.mxu0 %v4084_v42 }
 0x226   :  { %2542 = vmatpush1.bf16.msra.mxu1 %v3102_v41  ;;  %2610 = vmatpush3.bf16.msra.mxu0 %v3235_v19  ;;  %v4085_v41 = vld [vmem:[#allocation2_spill] sm:$0xff] }
 0x227   :  { %2544 = vmatprep.subr.bf16.mxu1 %v3110_v44  ;;  %2612 = vmatprep.subr.bf16.mxu0 %v3237_v20  ;;  %v4086_v44 = vld [vmem:[#allocation3_spill] sm:$0xff] }
 0x228   :  { %1972 = vmatmul.mubr.msk.f32.gmra.mrb[22].mxu0 %vm250_vm0, %v976_v6  ;;  %2215 = vmatmul.mubr.msk.f32.gmra.mrb[30].mxu1 %vm250_vm0, %v982_v61 }
 0x229   :  { %1281 = vmatprep.mubr.f32.mxu0 %v4084_v42 }
 0x22a   :  { %2546 = vmatpush1.bf16.msra.mxu1 %v3141_v53  ;;  %2614 = vmatpush3.bf16.msra.mxu0 %v3273_v31  ;;  %v4087_v53 = vld [vmem:[#allocation4_spill] sm:$0xff] }
 0x22b   :  { %2548 = vmatprep.subr.bf16.mxu1 %v3145_v54  ;;  %2616 = vmatprep.subr.bf16.mxu0 %v3276_v32  ;;  %v4088_v54 = vld [vmem:[#allocation5_spill] sm:$0xff] }
 0x22c   :  { %1973 = vmatmul.mubr.msk.f32.gmra.mrb[24].mxu0 %vm250_vm0, %v979_v51 }
 0x22d   :  { %1287 = vmatprep.mubr.f32.mxu0 %v4084_v42 }
 0x22e   :  { %2550 = vmatpush1.bf16.msra.mxu1 %v3164_v59  ;;  %2618 = vmatpush3.bf16.msra.mxu0 %v3312_v45  ;;  %v4089_v59 = vld [vmem:[#allocation6_spill] sm:$0xff] }
 0x22f   :  { %2552 = vmatprep.subr.bf16.mxu1 %v3168_v60  ;;  %2620 = vmatprep.subr.bf16.mxu0 %v3315_v46  ;;  %v4090_v60 = vld [vmem:[#allocation7_spill] sm:$0xff]  ;;  %v1970_v45 = vld [vmem:[%s4052_s3 + $0x3] sm:$0x7] }
 0x230   :  { %1974 = vmatmul.mubr.msk.f32.gmra.mrb[26].mxu0 %vm250_vm0, %v982_v61 }
 0x232   :  { %2554 = vmatpush1.bf16.msra.mxu1 %v3184_v1  ;;  %2622 = vmatpush3.bf16.msra.mxu0 %v3351_v63  ;;  %v4091_v1 = vld [vmem:[#allocation8_spill] sm:$0xff] }
 0x233   :  { %2556 = vmatprep.subr.bf16.mxu1 %v3188_v2  ;;  %2624 = vmatprep.subr.bf16.mxu0 %v3354_v0  ;;  %v4092_v2 = vld [vmem:[#allocation9_spill] sm:$0xff] }
 0x236   :  { %2558 = vmatpush1.bf16.msra.mxu1 %v3210_v10  ;;  %2626 = vmatpush3.bf16.msra.mxu0 %v3389_v15  ;;  %v4093_v10 = vld [vmem:[#allocation10_spill] sm:$0xff] }
 0x237   :  { %2560 = vmatprep.subr.bf16.mxu1 %v3220_v13  ;;  %2628 = vmatprep.subr.bf16.mxu0 %v3392_v17  ;;  %v4094_v13 = vld [vmem:[#allocation11_spill] sm:$0xff] }
 0x23a   :  { %2562 = vmatpush1.bf16.msra.mxu1 %v3246_v23  ;;  %2630 = vmatpush3.bf16.msra.mxu0 %v3419_v30 }
 0x23b   :  { %2564 = vmatprep.subr.bf16.mxu1 %v3257_v26  ;;  %2632 = vmatprep.subr.bf16.mxu0 %v3490_v14 }
 0x23e   :  { %2566 = vmatpush1.bf16.msra.mxu1 %v3285_v35  ;;  %2634 = vmatpush3.bf16.msra.mxu0 %v3508_v28 }
 0x23f   :  { %2568 = vmatprep.subr.bf16.mxu1 %v3296_v38  ;;  %2636 = vmatprep.subr.bf16.mxu0 %v3532_v55 }
 0x242   :  { %2570 = vmatpush1.bf16.msra.mxu1 %v3324_v50  ;;  %2638 = vmatpush3.bf16.msra.mxu0 %v3543_v4 }
 0x243   :  { %2572 = vmatprep.subr.bf16.mxu1 %v3335_v57  ;;  %2640 = vmatprep.subr.bf16.mxu0 %v3563_v21  ;;  %v4095_v57 = vld [vmem:[#allocation12_spill] sm:$0xff] }
 0x244   :  { %v4096_v63 = vsub.s32 2, %v4095_v57  ;;  %v4097_v15 = vsub.s32 1, %v4095_v57 }
 0x246   :  { %2574 = vmatpush1.bf16.msra.mxu1 %v3363_v5  ;;  %v1100_v0 = vrot.slane %v1970_v45, %v4096_v63  ;;  %v1096_v17 = vrot.slane %v1970_v45, %v4097_v15 }
 0x247   :  { %2576 = vmatprep.subr.bf16.mxu1 %v3374_v9 }
 0x24a   :  { %2578 = vmatpush1.bf16.msra.mxu1 %v3401_v22  ;;  %v4098_v22 = vsub.s32 0, %v4095_v57 }
 0x24b   :  { %2580 = vmatprep.subr.bf16.mxu1 %v3404_v24 }
 0x24c   :  { %v1092_v24 = vrot.slane %v1970_v45, %v4098_v22 }
 0x24e   :  { %2582 = vmatpush1.bf16.msra.mxu1 %v3423_v33 }
 0x24f   :  { %2584 = vmatprep.subr.bf16.mxu1 %v3426_v34 }
 0x252   :  { %2586 = vmatpush1.bf16.msra.mxu1 %v4085_v41 }
 0x253   :  { %2588 = vmatprep.subr.bf16.mxu1 %v4086_v44 }
 0x256   :  { %2590 = vmatpush1.bf16.msra.mxu1 %v4087_v53 }
 0x257   :  { %2592 = vmatprep.subr.bf16.mxu1 %v4088_v54 }
 0x25a   :  { %2594 = vmatpush1.bf16.msra.mxu1 %v4089_v59 }
 0x25b   :  { %2596 = vmatprep.subr.bf16.mxu1 %v4090_v60 }
 0x25e   :  { %2598 = vmatpush1.bf16.msra.mxu1 %v4091_v1 }
 0x25f   :  { %2600 = vmatprep.subr.bf16.mxu1 %v4092_v2 }
 0x262   :  { %2602 = vmatpush1.bf16.msra.mxu1 %v4093_v10 }
 0x263   :  { %2604 = vmatprep.subr.bf16.mxu1 %v4094_v13 }
 0x2e7   :  { %v2119_v19 = vpop.f32.mrb[20].mxu1 }
 0x2e8   :  { %v2120_v20 = vpop.f32.mrb[21].mxu1 }
 0x2e9   :  { %v2121_v23 = vadd.f32 %v2120_v20, %v2119_v19 }
 0x2eb   :  { %v2122_v26 = vpop.f32.mrb[22].mxu1  ;;  %v1361_v43 = vadd.f32 %v2121_v23, %v1100_v0 }
 0x2ec   :  { %v2123_v31 = vpop.f32.mrb[23].mxu1 }
 0x2ed   :  { %v2124_v32 = vadd.f32 %v2123_v31, %v2122_v26 }
 0x2ef   :  { %v2125_v35 = vpop.f32.mrb[24].mxu1  ;;  %v1366_v30 = vadd.f32 %v2124_v32, %v1100_v0 }
 0x2f0   :  { %v2126_v38 = vpop.f32.mrb[25].mxu1 }
 0x2f1   :  { %v2127_v46 = vadd.f32 %v2126_v38, %v2125_v35 }
 0x2f3   :  { %v2128_v50 = vpop.f32.mrb[26].mxu1  ;;  %v1371_v37 = vadd.f32 %v2127_v46, %v1100_v0 }
 0x2f4   :  { %v2129_v5 = vpop.f32.mrb[27].mxu1 }
 0x2f5   :  { %v2130_v9 = vadd.f32 %v2129_v5, %v2128_v50 }
 0x2f7   :  { %v1271_v33 = vpop.f32.mrb[20].mxu0  ;;  %v2213_v34 = vpop.f32.mrb[28].mxu1  ;;  %v1376_v11 = vadd.f32 %v2130_v9, %v1100_v0 }
 0x2f8   :  { %v1451_v14 = vadd.f32 %v2213_v34, %v1366_v30  ;;  %v1273_v28 = vpop.f32.mrb[21].mxu0  ;;  %v1445_v55 = vpop.f32.mrb[29].mxu1  ;;  %v2651_v3 = vadd.f32 %v1271_v33, %v1092_v24 }
 0x2f9   :  { %v2652_v4 = vadd.f32 %v1273_v28, %v1096_v17  ;;  %v1446_v18 = vadd.f32 %v1445_v55, %v1361_v43 }
 0x2fb   :  { %v1277_v12 = vpop.f32.mrb[22].mxu0  ;;  %v2216_v48 = vpop.f32.mrb[30].mxu1  ;;  %1540 = vmatprep.mubr.f32.mxu1 %v2652_v4  ;;  %1718 = vmatprep.mubr.f32.mxu0 %v2652_v4 }
 0x2fc   :  { %v1461_v62 = vadd.f32 %v2216_v48, %v1376_v11  ;;  %v1279_v52 = vpop.f32.mrb[23].mxu0  ;;  %v1455_v40 = vpop.f32.mrb[31].mxu1  ;;  %1541 = vmatmul.mubr.f32.vlgmr.msra.gmra.mrb[32].mxu1 %v2651_v3  ;;  %1719 = vmatmul.mubr.f32.vlgmr.msra.gmra.mrb[28].mxu0 %v2651_v3  ;;  %v2653_v36 = vadd.f32 %v1277_v12, %v1092_v24 }
 0x2fd   :  { %v2654_v8 = vadd.f32 %v1279_v52, %v1096_v17  ;;  %v1456_v56 = vadd.f32 %v1455_v40, %v1371_v37  ;;  %2606 = vmatpush1.bf16.msra.mxu1 %v4099_v47  ;;  %2642 = vmatpush3.bf16.msra.mxu0 %v3563_v21 }
 0x2ff   :  { %v1283_v58 = vpop.f32.mrb[24].mxu0  ;;  %1546 = vmatprep.mubr.f32.mxu1 %v2654_v8  ;;  %1723 = vmatprep.mubr.f32.mxu0 %v2654_v8 }
 0x300   :  { %v1285_v39 = vpop.f32.mrb[25].mxu0  ;;  %1547 = vmatmul.mubr.f32.gmra.mrb[34].mxu1 %v2653_v36  ;;  %1724 = vmatmul.mubr.f32.gmra.mrb[30].mxu0 %v2653_v36  ;;  %v2655_v29 = vadd.f32 %v1283_v58, %v1092_v24 }
 0x301   :  { %v2656_v27 = vadd.f32 %v1285_v39, %v1096_v17 }
 0x303   :  { %v1289_v7 = vpop.f32.mrb[26].mxu0  ;;  %1552 = vmatprep.mubr.f32.mxu1 %v2656_v27  ;;  %1728 = vmatprep.mubr.f32.mxu0 %v2656_v27 }
 0x304   :  { %v1291_v25 = vpop.f32.mrb[27].mxu0  ;;  %1553 = vmatmul.mubr.f32.gmra.mrb[36].mxu1 %v2655_v29  ;;  %1729 = vmatmul.mubr.f32.gmra.mrb[32].mxu0 %v2655_v29  ;;  %v2657_v16 = vadd.f32 %v1289_v7, %v1092_v24 }
 0x305   :  { %v2658_v49 = vadd.f32 %v1291_v25, %v1096_v17 }
 0x307   :  { %1558 = vmatprep.mubr.f32.mxu1 %v2658_v49  ;;  %1733 = vmatprep.mubr.f32.mxu0 %v2658_v49 }
 0x308   :  { %1559 = vmatmul.mubr.f32.gmra.mrb[38].mxu1 %v2657_v16  ;;  %1734 = vmatmul.mubr.f32.gmra.mrb[34].mxu0 %v2657_v16 }
 0x309   :  { %2221 = vmatprep.mubr.msk.f32.mxu0 %vm250_vm0, %v1446_v18  ;;  %1629 = vmatprep.mubr.f32.mxu1 %v4084_v42 }
 0x30c   :  { %1979 = vmatmul.mubr.msk.f32.vlgmr.msra.gmra.mrb[32].mxu1 %vm250_vm0, %v1446_v18  ;;  %2222 = vmatmul.mubr.msk.f32.vlgmr.msra.gmra.mrb[36].mxu0 %vm250_vm0, %v1451_v14 }
 0x30d   :  { %2224 = vmatprep.mubr.msk.f32.mxu0 %vm250_vm0, %v1456_v56  ;;  %1635 = vmatprep.mubr.f32.mxu1 %v4084_v42 }
 0x310   :  { %1980 = vmatmul.mubr.msk.f32.gmra.mrb[34].mxu1 %vm250_vm0, %v1451_v14  ;;  %2225 = vmatmul.mubr.msk.f32.gmra.mrb[38].mxu0 %vm250_vm0, %v1461_v62 }
 0x311   :  { %1641 = vmatprep.mubr.f32.mxu1 %v4084_v42 }
 0x314   :  { %1981 = vmatmul.mubr.msk.f32.gmra.mrb[36].mxu1 %vm250_vm0, %v1456_v56 }
 0x315   :  { %1647 = vmatprep.mubr.f32.mxu1 %v4084_v42 }
 0x318   :  { %1982 = vmatmul.mubr.msk.f32.gmra.mrb[38].mxu1 %vm250_vm0, %v1461_v62 }
 0x3cf   :  { %v2169_v21 = vpop.f32.mrb[28].mxu0 }
 0x3d0   :  { %v2170_v6 = vpop.f32.mrb[29].mxu0 }
 0x3d1   :  { %v2171_v51 = vadd.f32 %v2170_v6, %v2169_v21 }
 0x3d3   :  { %v2172_v61 = vpop.f32.mrb[30].mxu0 }
 0x3d4   :  { %v2173_v41 = vpop.f32.mrb[31].mxu0 }
 0x3d5   :  { %v2174_v44 = vadd.f32 %v2173_v41, %v2172_v61 }
 0x3d7   :  { %v2175_v53 = vpop.f32.mrb[32].mxu0 }
 0x3d8   :  { %v2176_v54 = vpop.f32.mrb[33].mxu0 }
 0x3d9   :  { %v2177_v59 = vadd.f32 %v2176_v54, %v2175_v53 }
 0x3db   :  { %v2178_v60 = vpop.f32.mrb[34].mxu0 }
 0x3dc   :  { %v2179_v1 = vpop.f32.mrb[35].mxu0 }
 0x3dd   :  { %v2180_v2 = vadd.f32 %v2179_v1, %v2178_v60 }
 0x3df   :  { %v1631_v10 = vpop.f32.mrb[32].mxu1  ;;  %v2223_v13 = vpop.f32.mrb[36].mxu0 }
 0x3e0   :  { %v1824_v19 = vmax.f32 %v1631_v10, 0.0  ;;  %v1811_v20 = vadd.f32 %v2223_v13, %v2174_v44  ;;  %v1633_v23 = vpop.f32.mrb[33].mxu1  ;;  %v1805_v42 = vpop.f32.mrb[37].mxu0 }
 0x3e1   :  { %v1825_v26 = vmax.f32 %v1633_v23, 0.0  ;;  %v1806_v31 = vadd.f32 %v2171_v51, %v1805_v42 }
 0x3e2   :  { %1836 = vst [vmem:[%s4053_s4] sm:$0xff] %v1824_v19  ;;  %v1829_v32 = vmax.f32 %v1811_v20, 0.0 }
 0x3e3   :  { %1837 = vst [vmem:[%s4053_s4 + $0x8] sm:$0xff] %v1825_v26  ;;  %v1826_v35 = vmax.f32 %v1806_v31, 0.0  ;;  %v1637_v38 = vpop.f32.mrb[34].mxu1  ;;  %v2226_v45 = vpop.f32.mrb[38].mxu0 }
 0x3e4   :  { %1841 = vst.msk [vmem:[%s4053_s4 + $0x28] sm:$0xff] %vm250_vm0, %v1829_v32  ;;  %v1827_v46 = vmax.f32 %v1637_v38, 0.0  ;;  %v1821_v50 = vadd.f32 %v2226_v45, %v2180_v2  ;;  %v1639_v57 = vpop.f32.mrb[35].mxu1  ;;  %v1815_v63 = vpop.f32.mrb[39].mxu0 }
 0x3e5   :  { %1838 = vst.msk [vmem:[%s4053_s4 + $0x10] sm:$0xff] %vm250_vm0, %v1826_v35  ;;  %v1828_v0 = vmax.f32 %v1639_v57, 0.0  ;;  %v1816_v5 = vadd.f32 %v2177_v59, %v1815_v63 }
 0x3e6   :  { %1839 = vst [vmem:[%s4053_s4 + $0x18] sm:$0xff] %v1827_v46  ;;  %v1835_v9 = vmax.f32 %v1821_v50, 0.0 }
 0x3e7   :  { %1840 = vst [vmem:[%s4053_s4 + $0x20] sm:$0xff] %v1828_v0  ;;  %v1832_v15 = vmax.f32 %v1816_v5, 0.0  ;;  %v1643_v17 = vpop.f32.mrb[36].mxu1 }
 0x3e8   :  { %1847 = vst.msk [vmem:[%s4053_s4 + $0x58] sm:$0xff] %vm250_vm0, %v1835_v9  ;;  %v1830_v22 = vmax.f32 %v1643_v17, 0.0  ;;  %v1645_v24 = vpop.f32.mrb[37].mxu1 }
 0x3e9   :  { %1844 = vst.msk [vmem:[%s4053_s4 + $0x40] sm:$0xff] %vm250_vm0, %v1832_v15  ;;  %v1831_v30 = vmax.f32 %v1645_v24, 0.0 }
 0x3ea   :  { %1842 = vst [vmem:[%s4053_s4 + $0x30] sm:$0xff] %v1830_v22 }
 0x3eb   :  { %1843 = vst [vmem:[%s4053_s4 + $0x38] sm:$0xff] %v1831_v30  ;;  %v1649_v33 = vpop.f32.mrb[38].mxu1 }
 0x3ec   :  { %v1833_v34 = vmax.f32 %v1649_v33, 0.0  ;;  %v1651_v43 = vpop.f32.mrb[39].mxu1 }
 0x3ed   :  { %v1834_v14 = vmax.f32 %v1651_v43, 0.0 }
 0x3ee   :  { %1845 = vst [vmem:[%s4053_s4 + $0x48] sm:$0xff] %v1833_v34 }
 0x3ef   :  { %1846 = vst [vmem:[%s4053_s4 + $0x50] sm:$0xff] %v1834_v14 }

// kernel: _lambda_.8
= control target key start
LH: loop header
LB: loop body
LE: loop exit
PB: predicated region body
PF: predicated region fallthrough
CT: control target
= control target key end

     0   :  { %v650_v0 = vmov 0.0|0.0   ;;  %vm651_vm0 = vmmov 0   ;;  %vm271_vm1 = vcmask 261120   ;;  %s1074_s1 = inlined_call_operand.vmem [shape: f32[256,32], index: 1, kind: input, shape index: {}]   ;;  %s1075_s0 = inlined_call_operand.vmem [shape: f32[136,256], index: 0, kind: input, shape index: {}]   ;;  %s1076_s3 = inlined_call_operand.vmem [shape: f32[32,32], index: 3, kind: input, shape index: {}]   ;;  %s1077_s2 = inlined_call_operand.vmem [shape: f32[1,32], index: 2, kind: input, shape index: {}]   ;;  %s1078_s4 = inlined_call_operand.vmem [shape: f32[1,32], index: 4, kind: input, shape index: {}]   ;;  %s1079_s5 = inlined_call_operand.vmem [shape: f32[136,32], index: 5, kind: output, shape index: {}]  }
   0x1   :  { %593 = vmatprep.subr.bf16.mxu0 %v650_v0  ;;  %v54_v1 = vld [vmem:[%s1074_s1] sm:$0xff]  ;;  %v55_v2 = vld [vmem:[%s1074_s1 + $0x8] sm:$0xff]  ;;  %v56_v3 = vld [vmem:[%s1074_s1 + $0x10] sm:$0xff]  ;;  %641 = vmatprep.subr.bf16.mxu1 %v650_v0 }
   0x2   :  { %v594_v4 = vpack.c.bf16 %v55_v2, %v54_v1  ;;  %v57_v5 = vld [vmem:[%s1074_s1 + $0x18] sm:$0xff]  ;;  %v58_v7 = vld [vmem:[%s1074_s1 + $0x20] sm:$0xff]  ;;  %v59_v8 = vld [vmem:[%s1074_s1 + $0x28] sm:$0xff] }
   0x3   :  { %v597_v6 = vpack.c.bf16 %v57_v5, %v56_v3  ;;  %v600_v9 = vpack.c.bf16 %v59_v8, %v58_v7  ;;  %v60_v10 = vld [vmem:[%s1074_s1 + $0x30] sm:$0xff]  ;;  %v61_v11 = vld [vmem:[%s1074_s1 + $0x38] sm:$0xff]  ;;  %v21_v12 = vld [vmem:[%s1075_s0 + $0x8] sm:$0xff] }
   0x4   :  { %595 = vmatpush1.bf16.msra.mxu0 %v594_v4  ;;  %v603_v13 = vpack.c.bf16 %v61_v11, %v60_v10  ;;  %157 = vmatprep.mubr.f32.mxu0 %v21_v12  ;;  %v62_v14 = vld [vmem:[%s1074_s1 + $0x40] sm:$0xff]  ;;  %v63_v15 = vld [vmem:[%s1074_s1 + $0x48] sm:$0xff]  ;;  %v64_v17 = vld [vmem:[%s1074_s1 + $0x50] sm:$0xff] }
   0x5   :  { %596 = vmatprep.subr.bf16.mxu0 %v650_v0  ;;  %v606_v16 = vpack.c.bf16 %v63_v15, %v62_v14  ;;  %v65_v18 = vld [vmem:[%s1074_s1 + $0x58] sm:$0xff]  ;;  %v66_v20 = vld [vmem:[%s1074_s1 + $0x60] sm:$0xff]  ;;  %v67_v21 = vld [vmem:[%s1074_s1 + $0x68] sm:$0xff] }
   0x6   :  { %v609_v19 = vpack.c.bf16 %v65_v18, %v64_v17  ;;  %v260_v22 = vld [vmem:[%s1076_s3] sm:$0xff]  ;;  %v261_v23 = vld [vmem:[%s1076_s3 + $0x8] sm:$0xff]  ;;  %v612_v24 = vpack.c.bf16 %v67_v21, %v66_v20  ;;  %v68_v26 = vld [vmem:[%s1074_s1 + $0x70] sm:$0xff] }
   0x7   :  { %v642_v25 = vpack.c.bf16 %v261_v23, %v260_v22  ;;  %v69_v27 = vld [vmem:[%s1074_s1 + $0x78] sm:$0xff]  ;;  %v70_v29 = vld [vmem:[%s1074_s1 + $0x80] sm:$0xff]  ;;  %v71_v30 = vld [vmem:[%s1074_s1 + $0x88] sm:$0xff] }
   0x8   :  { %598 = vmatpush1.bf16.msra.mxu0 %v597_v6  ;;  %v615_v28 = vpack.c.bf16 %v69_v27, %v68_v26  ;;  %v618_v31 = vpack.c.bf16 %v71_v30, %v70_v29  ;;  %v72_v32 = vld [vmem:[%s1074_s1 + $0x90] sm:$0xff]  ;;  %v73_v33 = vld [vmem:[%s1074_s1 + $0x98] sm:$0xff]  ;;  %v74_v35 = vld [vmem:[%s1074_s1 + $0xa0] sm:$0xff] }
   0x9   :  { %599 = vmatprep.subr.bf16.mxu0 %v650_v0  ;;  %643 = vmatpush3.bf16.msra.mxu1 %v642_v25  ;;  %v621_v34 = vpack.c.bf16 %v73_v33, %v72_v32  ;;  %v75_v36 = vld [vmem:[%s1074_s1 + $0xa8] sm:$0xff]  ;;  %v76_v38 = vld [vmem:[%s1074_s1 + $0xb0] sm:$0xff]  ;;  %v77_v39 = vld [vmem:[%s1074_s1 + $0xb8] sm:$0xff]  ;;  %v652_v25 = vmov 0.0  }
   0xa   :  { %644 = vmatprep.subr.bf16.mxu1 %v650_v0  ;;  %v624_v37 = vpack.c.bf16 %v75_v36, %v74_v35  ;;  %v627_v40 = vpack.c.bf16 %v77_v39, %v76_v38  ;;  %v78_v41 = vld [vmem:[%s1074_s1 + $0xc0] sm:$0xff]  ;;  %v79_v42 = vld [vmem:[%s1074_s1 + $0xc8] sm:$0xff]  ;;  %v80_v44 = vld [vmem:[%s1074_s1 + $0xd0] sm:$0xff]  ;;  %542 = vmatprep.mubr.msk.f32.mxu1 %vm651_vm0, %v652_v25 }
   0xb   :  { %v630_v43 = vpack.c.bf16 %v79_v42, %v78_v41  ;;  %v81_v45 = vld [vmem:[%s1074_s1 + $0xd8] sm:$0xff]  ;;  %v82_v47 = vld [vmem:[%s1074_s1 + $0xe0] sm:$0xff]  ;;  %v83_v48 = vld [vmem:[%s1074_s1 + $0xe8] sm:$0xff] }
   0xc   :  { %601 = vmatpush1.bf16.msra.mxu0 %v600_v9  ;;  %v633_v46 = vpack.c.bf16 %v81_v45, %v80_v44  ;;  %v636_v49 = vpack.c.bf16 %v83_v48, %v82_v47  ;;  %v84_v50 = vld [vmem:[%s1074_s1 + $0xf0] sm:$0xff]  ;;  %v85_v51 = vld [vmem:[%s1074_s1 + $0xf8] sm:$0xff]  ;;  %v20_v53 = vld [vmem:[%s1075_s0] sm:$0xff] }
   0xd   :  { %602 = vmatprep.subr.bf16.mxu0 %v650_v0  ;;  %v639_v52 = vpack.c.bf16 %v85_v51, %v84_v50  ;;  %v23_v54 = vld [vmem:[%s1075_s0 + $0x18] sm:$0xff]  ;;  %v22_v55 = vld [vmem:[%s1075_s0 + $0x10] sm:$0xff]  ;;  %v25_v56 = vld [vmem:[%s1075_s0 + $0x28] sm:$0xff] }
   0xe   :  { %v24_v57 = vld [vmem:[%s1075_s0 + $0x20] sm:$0xff]  ;;  %v27_v58 = vld [vmem:[%s1075_s0 + $0x38] sm:$0xff]  ;;  %v26_v59 = vld [vmem:[%s1075_s0 + $0x30] sm:$0xff] }
   0xf   :  { %v29_v60 = vld [vmem:[%s1075_s0 + $0x48] sm:$0xff]  ;;  %v28_v61 = vld [vmem:[%s1075_s0 + $0x40] sm:$0xff]  ;;  %v31_v62 = vld [vmem:[%s1075_s0 + $0x58] sm:$0xff] }
  0x10   :  { %604 = vmatpush1.bf16.msra.mxu0 %v603_v13  ;;  %v30_v63 = vld [vmem:[%s1075_s0 + $0x50] sm:$0xff]  ;;  %v32_v1 = vld [vmem:[%s1075_s0 + $0x60] sm:$0xff]  ;;  %v35_v2 = vld [vmem:[%s1075_s0 + $0x78] sm:$0xff] }
  0x11   :  { %605 = vmatprep.subr.bf16.mxu0 %v650_v0  ;;  %v34_v3 = vld [vmem:[%s1075_s0 + $0x70] sm:$0xff]  ;;  %v37_v4 = vld [vmem:[%s1075_s0 + $0x88] sm:$0xff]  ;;  %v36_v5 = vld [vmem:[%s1075_s0 + $0x80] sm:$0xff] }
  0x12   :  { %v39_v6 = vld [vmem:[%s1075_s0 + $0x98] sm:$0xff]  ;;  %v38_v7 = vld [vmem:[%s1075_s0 + $0x90] sm:$0xff]  ;;  %v41_v8 = vld [vmem:[%s1075_s0 + $0xa8] sm:$0xff] }
  0x13   :  { %v40_v9 = vld [vmem:[%s1075_s0 + $0xa0] sm:$0xff]  ;;  %v43_v10 = vld [vmem:[%s1075_s0 + $0xb8] sm:$0xff]  ;;  %v42_v11 = vld [vmem:[%s1075_s0 + $0xb0] sm:$0xff] }
  0x14   :  { %607 = vmatpush1.bf16.msra.mxu0 %v606_v16  ;;  %v45_v12 = vld [vmem:[%s1075_s0 + $0xc8] sm:$0xff]  ;;  %v44_v13 = vld [vmem:[%s1075_s0 + $0xc0] sm:$0xff]  ;;  %v47_v14 = vld [vmem:[%s1075_s0 + $0xd8] sm:$0xff] }
  0x15   :  { %608 = vmatprep.subr.bf16.mxu0 %v650_v0  ;;  %v46_v15 = vld [vmem:[%s1075_s0 + $0xd0] sm:$0xff]  ;;  %v49_v16 = vld [vmem:[%s1075_s0 + $0xe8] sm:$0xff]  ;;  %v48_v17 = vld [vmem:[%s1075_s0 + $0xe0] sm:$0xff] }
  0x16   :  { %v51_v18 = vld [vmem:[%s1075_s0 + $0xf8] sm:$0xff]  ;;  %v53_v20 = vld [vmem:[%s1075_s0 + $0x108] sm:$0xff]  ;;  %v52_v21 = vld [vmem:[%s1075_s0 + $0x100] sm:$0xff] }
  0x17   :  { %v262_v22 = vld [vmem:[%s1076_s3 + $0x10] sm:$0xff]  ;;  %v263_v23 = vld [vmem:[%s1076_s3 + $0x18] sm:$0xff]  ;;  %v916_v26 = vld [vmem:[%s1077_s2] ss:$0 sm:$0xff] }
  0x18   :  { %610 = vmatpush1.bf16.msra.mxu0 %v609_v19  ;;  %v50_v19 = vld [vmem:[%s1075_s0 + $0xf0] sm:$0xff] }
  0x19   :  { %611 = vmatprep.subr.bf16.mxu0 %v650_v0 }
  0x1c   :  { %613 = vmatpush1.bf16.msra.mxu0 %v612_v24  ;;  %v645_v24 = vpack.c.bf16 %v263_v23, %v262_v22 }
  0x1d   :  { %614 = vmatprep.subr.bf16.mxu0 %v650_v0 }
  0x1e   :  { %646 = vmatpush3.bf16.msra.mxu1 %v645_v24 }
  0x20   :  { %616 = vmatpush1.bf16.msra.mxu0 %v615_v28 }
  0x21   :  { %617 = vmatprep.subr.bf16.mxu0 %v650_v0 }
  0x24   :  { %619 = vmatpush1.bf16.msra.mxu0 %v618_v31 }
  0x25   :  { %620 = vmatprep.subr.bf16.mxu0 %v650_v0 }
  0x28   :  { %622 = vmatpush1.bf16.msra.mxu0 %v621_v34 }
  0x29   :  { %623 = vmatprep.subr.bf16.mxu0 %v650_v0 }
  0x2c   :  { %625 = vmatpush1.bf16.msra.mxu0 %v624_v37 }
  0x2d   :  { %626 = vmatprep.subr.bf16.mxu0 %v650_v0 }
  0x30   :  { %628 = vmatpush1.bf16.msra.mxu0 %v627_v40 }
  0x31   :  { %629 = vmatprep.subr.bf16.mxu0 %v650_v0 }
  0x34   :  { %631 = vmatpush1.bf16.msra.mxu0 %v630_v43 }
  0x35   :  { %632 = vmatprep.subr.bf16.mxu0 %v650_v0 }
  0x38   :  { %634 = vmatpush1.bf16.msra.mxu0 %v633_v46 }
  0x39   :  { %635 = vmatprep.subr.bf16.mxu0 %v650_v0 }
  0x3c   :  { %637 = vmatpush1.bf16.msra.mxu0 %v636_v49 }
  0x3d   :  { %638 = vmatprep.subr.bf16.mxu0 %v650_v0  ;;  %v33_v0 = vld [vmem:[%s1075_s0 + $0x68] sm:$0xff] }
  0x40   :  { %640 = vmatpush1.bf16.msra.mxu0 %v639_v52 }
  0x43   :  { %158 = vmatmul.mubr.f32.vlgmr.msra.gmra.mrb[0].mxu0 %v20_v53 }
  0x44   :  { %162 = vmatprep.mubr.f32.mxu0 %v23_v54 }
  0x47   :  { %163 = vmatmul.mubr.f32.gmra.mrb[2].mxu0 %v22_v55 }
  0x48   :  { %167 = vmatprep.mubr.f32.mxu0 %v25_v56 }
  0x4b   :  { %168 = vmatmul.mubr.f32.gmra.mrb[4].mxu0 %v24_v57 }
  0x4c   :  { %172 = vmatprep.mubr.f32.mxu0 %v27_v58 }
  0x4f   :  { %173 = vmatmul.mubr.f32.gmra.mrb[6].mxu0 %v26_v59 }
  0x50   :  { %177 = vmatprep.mubr.f32.mxu0 %v29_v60 }
  0x53   :  { %178 = vmatmul.mubr.f32.gmra.mrb[8].mxu0 %v28_v61 }
  0x54   :  { %182 = vmatprep.mubr.f32.mxu0 %v31_v62 }
  0x57   :  { %183 = vmatmul.mubr.f32.gmra.mrb[10].mxu0 %v30_v63 }
  0x58   :  { %187 = vmatprep.mubr.f32.mxu0 %v33_v0 }
  0x5b   :  { %188 = vmatmul.mubr.f32.gmra.mrb[12].mxu0 %v32_v1 }
  0x5c   :  { %192 = vmatprep.mubr.f32.mxu0 %v35_v2 }
  0x5f   :  { %193 = vmatmul.mubr.f32.gmra.mrb[14].mxu0 %v34_v3 }
  0x60   :  { %197 = vmatprep.mubr.f32.mxu0 %v37_v4 }
  0x63   :  { %198 = vmatmul.mubr.f32.gmra.mrb[16].mxu0 %v36_v5 }
  0x64   :  { %202 = vmatprep.mubr.f32.mxu0 %v39_v6 }
  0x67   :  { %203 = vmatmul.mubr.f32.gmra.mrb[18].mxu0 %v38_v7 }
  0x68   :  { %207 = vmatprep.mubr.f32.mxu0 %v41_v8 }
  0x6b   :  { %208 = vmatmul.mubr.f32.gmra.mrb[20].mxu0 %v40_v9 }
  0x6c   :  { %212 = vmatprep.mubr.f32.mxu0 %v43_v10 }
  0x6f   :  { %213 = vmatmul.mubr.f32.gmra.mrb[22].mxu0 %v42_v11 }
  0x70   :  { %217 = vmatprep.mubr.f32.mxu0 %v45_v12 }
  0x73   :  { %218 = vmatmul.mubr.f32.gmra.mrb[24].mxu0 %v44_v13 }
  0x74   :  { %222 = vmatprep.mubr.f32.mxu0 %v47_v14 }
  0x77   :  { %223 = vmatmul.mubr.f32.gmra.mrb[26].mxu0 %v46_v15 }
  0x78   :  { %227 = vmatprep.mubr.f32.mxu0 %v49_v16 }
  0x7b   :  { %228 = vmatmul.mubr.f32.gmra.mrb[28].mxu0 %v48_v17 }
  0x7c   :  { %232 = vmatprep.mubr.f32.mxu0 %v51_v18 }
  0x7f   :  { %233 = vmatmul.mubr.f32.gmra.mrb[30].mxu0 %v50_v19 }
  0x80   :  { %237 = vmatprep.mubr.f32.mxu0 %v53_v20 }
  0x83   :  { %238 = vmatmul.mubr.f32.gmra.mrb[32].mxu0 %v52_v21 }
 0x116   :  { %v159_v27 = vpop.f32.mrb[0].mxu0 }
 0x117   :  { %v160_v28 = vadd.f32 %v916_v26, %v159_v27  ;;  %v161_v29 = vpop.f32.mrb[1].mxu0 }
 0x119   :  { %v243_v30 = vmax.f32 %v160_v28, 0.0 }
 0x11a   :  { %v164_v31 = vpop.f32.mrb[2].mxu0 }
 0x11b   :  { %v165_v32 = vadd.f32 %v916_v26, %v164_v31  ;;  %v166_v33 = vpop.f32.mrb[3].mxu0  ;;  %543 = vmatmul.mubr.msk.f32.vlgmr.msra.gmra.mrb[0].mxu1 %vm271_vm1, %v243_v30 }
 0x11c   :  { %545 = vmatprep.mubr.msk.f32.mxu1 %vm651_vm0, %v652_v25  ;;  %v987_v33 = vld [vmem:[%s1078_s4] ss:$0 sm:$0xff] }
 0x11d   :  { %v244_v34 = vmax.f32 %v165_v32, 0.0 }
 0x11e   :  { %v169_v35 = vpop.f32.mrb[4].mxu0 }
 0x11f   :  { %v170_v36 = vadd.f32 %v916_v26, %v169_v35  ;;  %v171_v37 = vpop.f32.mrb[5].mxu0  ;;  %546 = vmatmul.mubr.msk.f32.gmra.mrb[2].mxu1 %vm271_vm1, %v244_v34 }
 0x120   :  { %548 = vmatprep.mubr.msk.f32.mxu1 %vm651_vm0, %v652_v25 }
 0x121   :  { %v245_v38 = vmax.f32 %v170_v36, 0.0 }
 0x122   :  { %v174_v39 = vpop.f32.mrb[6].mxu0 }
 0x123   :  { %v175_v40 = vadd.f32 %v916_v26, %v174_v39  ;;  %v176_v41 = vpop.f32.mrb[7].mxu0  ;;  %549 = vmatmul.mubr.msk.f32.gmra.mrb[4].mxu1 %vm271_vm1, %v245_v38 }
 0x124   :  { %551 = vmatprep.mubr.msk.f32.mxu1 %vm651_vm0, %v652_v25 }
 0x125   :  { %v246_v42 = vmax.f32 %v175_v40, 0.0 }
 0x126   :  { %v179_v43 = vpop.f32.mrb[8].mxu0 }
 0x127   :  { %v180_v44 = vadd.f32 %v916_v26, %v179_v43  ;;  %v181_v45 = vpop.f32.mrb[9].mxu0  ;;  %552 = vmatmul.mubr.msk.f32.gmra.mrb[6].mxu1 %vm271_vm1, %v246_v42 }
 0x128   :  { %554 = vmatprep.mubr.msk.f32.mxu1 %vm651_vm0, %v652_v25 }
 0x129   :  { %v247_v46 = vmax.f32 %v180_v44, 0.0 }
 0x12a   :  { %v184_v47 = vpop.f32.mrb[10].mxu0 }
 0x12b   :  { %v185_v48 = vadd.f32 %v916_v26, %v184_v47  ;;  %v186_v49 = vpop.f32.mrb[11].mxu0  ;;  %555 = vmatmul.mubr.msk.f32.gmra.mrb[8].mxu1 %vm271_vm1, %v247_v46 }
 0x12c   :  { %557 = vmatprep.mubr.msk.f32.mxu1 %vm651_vm0, %v652_v25 }
 0x12d   :  { %v248_v50 = vmax.f32 %v185_v48, 0.0 }
 0x12e   :  { %v189_v51 = vpop.f32.mrb[12].mxu0 }
 0x12f   :  { %v190_v52 = vadd.f32 %v916_v26, %v189_v51  ;;  %v191_v53 = vpop.f32.mrb[13].mxu0  ;;  %558 = vmatmul.mubr.msk.f32.gmra.mrb[10].mxu1 %vm271_vm1, %v248_v50 }
 0x130   :  { %560 = vmatprep.mubr.msk.f32.mxu1 %vm651_vm0, %v652_v25 }
 0x131   :  { %v249_v54 = vmax.f32 %v190_v52, 0.0 }
 0x132   :  { %v194_v55 = vpop.f32.mrb[14].mxu0 }
 0x133   :  { %v195_v56 = vadd.f32 %v916_v26, %v194_v55  ;;  %v196_v57 = vpop.f32.mrb[15].mxu0  ;;  %561 = vmatmul.mubr.msk.f32.gmra.mrb[12].mxu1 %vm271_vm1, %v249_v54 }
 0x134   :  { %563 = vmatprep.mubr.msk.f32.mxu1 %vm651_vm0, %v652_v25 }
 0x135   :  { %v250_v58 = vmax.f32 %v195_v56, 0.0 }
 0x136   :  { %v199_v59 = vpop.f32.mrb[16].mxu0 }
 0x137   :  { %v200_v60 = vadd.f32 %v916_v26, %v199_v59  ;;  %v201_v61 = vpop.f32.mrb[17].mxu0  ;;  %564 = vmatmul.mubr.msk.f32.gmra.mrb[14].mxu1 %vm271_vm1, %v250_v58 }
 0x138   :  { %566 = vmatprep.mubr.msk.f32.mxu1 %vm651_vm0, %v652_v25 }
 0x139   :  { %v251_v62 = vmax.f32 %v200_v60, 0.0 }
 0x13a   :  { %v204_v63 = vpop.f32.mrb[18].mxu0 }
 0x13b   :  { %v205_v0 = vadd.f32 %v916_v26, %v204_v63  ;;  %v206_v1 = vpop.f32.mrb[19].mxu0  ;;  %567 = vmatmul.mubr.msk.f32.gmra.mrb[16].mxu1 %vm271_vm1, %v251_v62 }
 0x13c   :  { %569 = vmatprep.mubr.msk.f32.mxu1 %vm651_vm0, %v652_v25 }
 0x13d   :  { %v252_v2 = vmax.f32 %v205_v0, 0.0 }
 0x13e   :  { %v209_v3 = vpop.f32.mrb[20].mxu0 }
 0x13f   :  { %v210_v4 = vadd.f32 %v916_v26, %v209_v3  ;;  %v211_v5 = vpop.f32.mrb[21].mxu0  ;;  %570 = vmatmul.mubr.msk.f32.gmra.mrb[18].mxu1 %vm271_vm1, %v252_v2 }
 0x140   :  { %572 = vmatprep.mubr.msk.f32.mxu1 %vm651_vm0, %v652_v25 }
 0x141   :  { %v253_v6 = vmax.f32 %v210_v4, 0.0 }
 0x142   :  { %v214_v7 = vpop.f32.mrb[22].mxu0 }
 0x143   :  { %v215_v8 = vadd.f32 %v916_v26, %v214_v7  ;;  %v216_v9 = vpop.f32.mrb[23].mxu0  ;;  %573 = vmatmul.mubr.msk.f32.gmra.mrb[20].mxu1 %vm271_vm1, %v253_v6 }
 0x144   :  { %575 = vmatprep.mubr.msk.f32.mxu1 %vm651_vm0, %v652_v25 }
 0x145   :  { %v254_v10 = vmax.f32 %v215_v8, 0.0 }
 0x146   :  { %v219_v11 = vpop.f32.mrb[24].mxu0 }
 0x147   :  { %v220_v12 = vadd.f32 %v916_v26, %v219_v11  ;;  %v221_v13 = vpop.f32.mrb[25].mxu0  ;;  %576 = vmatmul.mubr.msk.f32.gmra.mrb[22].mxu1 %vm271_vm1, %v254_v10 }
 0x148   :  { %578 = vmatprep.mubr.msk.f32.mxu1 %vm651_vm0, %v652_v25 }
 0x149   :  { %v255_v14 = vmax.f32 %v220_v12, 0.0 }
 0x14a   :  { %v224_v15 = vpop.f32.mrb[26].mxu0 }
 0x14b   :  { %v225_v16 = vadd.f32 %v916_v26, %v224_v15  ;;  %v226_v17 = vpop.f32.mrb[27].mxu0  ;;  %579 = vmatmul.mubr.msk.f32.gmra.mrb[24].mxu1 %vm271_vm1, %v255_v14 }
 0x14c   :  { %581 = vmatprep.mubr.msk.f32.mxu1 %vm651_vm0, %v652_v25 }
 0x14d   :  { %v256_v18 = vmax.f32 %v225_v16, 0.0 }
 0x14e   :  { %v229_v19 = vpop.f32.mrb[28].mxu0 }
 0x14f   :  { %v230_v20 = vadd.f32 %v916_v26, %v229_v19  ;;  %v231_v21 = vpop.f32.mrb[29].mxu0  ;;  %582 = vmatmul.mubr.msk.f32.gmra.mrb[26].mxu1 %vm271_vm1, %v256_v18 }
 0x150   :  { %584 = vmatprep.mubr.msk.f32.mxu1 %vm651_vm0, %v652_v25 }
 0x151   :  { %v257_v22 = vmax.f32 %v230_v20, 0.0 }
 0x152   :  { %v234_v23 = vpop.f32.mrb[30].mxu0 }
 0x153   :  { %v235_v24 = vadd.f32 %v916_v26, %v234_v23  ;;  %v236_v27 = vpop.f32.mrb[31].mxu0  ;;  %585 = vmatmul.mubr.msk.f32.gmra.mrb[28].mxu1 %vm271_vm1, %v257_v22 }
 0x154   :  { %587 = vmatprep.mubr.msk.f32.mxu1 %vm651_vm0, %v652_v25 }
 0x155   :  { %v258_v28 = vmax.f32 %v235_v24, 0.0 }
 0x156   :  { %v239_v29 = vpop.f32.mrb[32].mxu0 }
 0x157   :  { %v240_v30 = vadd.f32 %v916_v26, %v239_v29  ;;  %v241_v31 = vpop.f32.mrb[33].mxu0  ;;  %588 = vmatmul.mubr.msk.f32.gmra.mrb[30].mxu1 %vm271_vm1, %v258_v28 }
 0x158   :  { %590 = vmatprep.mubr.msk.f32.mxu1 %vm651_vm0, %v652_v25 }
 0x159   :  { %v259_v32 = vmax.f32 %v240_v30, 0.0 }
 0x15b   :  { %591 = vmatmul.mubr.msk.f32.gmra.mrb[32].mxu1 %vm271_vm1, %v259_v32 }
 0x1ee   :  { %v389_v34 = vpop.f32.mrb[0].mxu1 }
 0x1ef   :  { %v390_v35 = vadd.f32 %v987_v33, %v389_v34  ;;  %v544_v36 = vpop.f32.mrb[1].mxu1 }
 0x1f1   :  { %473 = vst.msk [vmem:[%s1079_s5] sm:$0xff] %vm271_vm1, %v390_v35 }
 0x1f2   :  { %v394_v26 = vpop.f32.mrb[2].mxu1 }
 0x1f3   :  { %v395_v25 = vadd.f32 %v987_v33, %v394_v26  ;;  %v547_v37 = vpop.f32.mrb[3].mxu1 }
 0x1f5   :  { %474 = vst.msk [vmem:[%s1079_s5 + $0x8] sm:$0xff] %vm271_vm1, %v395_v25 }
 0x1f6   :  { %v399_v38 = vpop.f32.mrb[4].mxu1 }
 0x1f7   :  { %v400_v39 = vadd.f32 %v987_v33, %v399_v38  ;;  %v550_v40 = vpop.f32.mrb[5].mxu1 }
 0x1f9   :  { %475 = vst.msk [vmem:[%s1079_s5 + $0x10] sm:$0xff] %vm271_vm1, %v400_v39 }
 0x1fa   :  { %v404_v41 = vpop.f32.mrb[6].mxu1 }
 0x1fb   :  { %v405_v42 = vadd.f32 %v987_v33, %v404_v41  ;;  %v553_v43 = vpop.f32.mrb[7].mxu1 }
 0x1fd   :  { %476 = vst.msk [vmem:[%s1079_s5 + $0x18] sm:$0xff] %vm271_vm1, %v405_v42 }
 0x1fe   :  { %v409_v44 = vpop.f32.mrb[8].mxu1 }
 0x1ff   :  { %v410_v45 = vadd.f32 %v987_v33, %v409_v44  ;;  %v556_v46 = vpop.f32.mrb[9].mxu1 }
 0x201   :  { %477 = vst.msk [vmem:[%s1079_s5 + $0x20] sm:$0xff] %vm271_vm1, %v410_v45 }
 0x202   :  { %v414_v47 = vpop.f32.mrb[10].mxu1 }
 0x203   :  { %v415_v48 = vadd.f32 %v987_v33, %v414_v47  ;;  %v559_v49 = vpop.f32.mrb[11].mxu1 }
 0x205   :  { %478 = vst.msk [vmem:[%s1079_s5 + $0x28] sm:$0xff] %vm271_vm1, %v415_v48 }
 0x206   :  { %v419_v50 = vpop.f32.mrb[12].mxu1 }
 0x207   :  { %v420_v51 = vadd.f32 %v987_v33, %v419_v50  ;;  %v562_v52 = vpop.f32.mrb[13].mxu1 }
 0x209   :  { %479 = vst.msk [vmem:[%s1079_s5 + $0x30] sm:$0xff] %vm271_vm1, %v420_v51 }
 0x20a   :  { %v424_v53 = vpop.f32.mrb[14].mxu1 }
 0x20b   :  { %v425_v54 = vadd.f32 %v987_v33, %v424_v53  ;;  %v565_v55 = vpop.f32.mrb[15].mxu1 }
 0x20d   :  { %480 = vst.msk [vmem:[%s1079_s5 + $0x38] sm:$0xff] %vm271_vm1, %v425_v54 }
 0x20e   :  { %v429_v56 = vpop.f32.mrb[16].mxu1 }
 0x20f   :  { %v430_v57 = vadd.f32 %v987_v33, %v429_v56  ;;  %v568_v58 = vpop.f32.mrb[17].mxu1 }
 0x211   :  { %481 = vst.msk [vmem:[%s1079_s5 + $0x40] sm:$0xff] %vm271_vm1, %v430_v57 }
 0x212   :  { %v434_v59 = vpop.f32.mrb[18].mxu1 }
 0x213   :  { %v435_v60 = vadd.f32 %v987_v33, %v434_v59  ;;  %v571_v61 = vpop.f32.mrb[19].mxu1 }
 0x215   :  { %482 = vst.msk [vmem:[%s1079_s5 + $0x48] sm:$0xff] %vm271_vm1, %v435_v60 }
 0x216   :  { %v439_v62 = vpop.f32.mrb[20].mxu1 }
 0x217   :  { %v440_v63 = vadd.f32 %v987_v33, %v439_v62  ;;  %v574_v0 = vpop.f32.mrb[21].mxu1 }
 0x219   :  { %483 = vst.msk [vmem:[%s1079_s5 + $0x50] sm:$0xff] %vm271_vm1, %v440_v63 }
 0x21a   :  { %v444_v1 = vpop.f32.mrb[22].mxu1 }
 0x21b   :  { %v445_v2 = vadd.f32 %v987_v33, %v444_v1  ;;  %v577_v3 = vpop.f32.mrb[23].mxu1 }
 0x21d   :  { %484 = vst.msk [vmem:[%s1079_s5 + $0x58] sm:$0xff] %vm271_vm1, %v445_v2 }
 0x21e   :  { %v449_v4 = vpop.f32.mrb[24].mxu1 }
 0x21f   :  { %v450_v5 = vadd.f32 %v987_v33, %v449_v4  ;;  %v580_v6 = vpop.f32.mrb[25].mxu1 }
 0x221   :  { %485 = vst.msk [vmem:[%s1079_s5 + $0x60] sm:$0xff] %vm271_vm1, %v450_v5 }
 0x222   :  { %v454_v7 = vpop.f32.mrb[26].mxu1 }
 0x223   :  { %v455_v8 = vadd.f32 %v987_v33, %v454_v7  ;;  %v583_v9 = vpop.f32.mrb[27].mxu1 }
 0x225   :  { %486 = vst.msk [vmem:[%s1079_s5 + $0x68] sm:$0xff] %vm271_vm1, %v455_v8 }
 0x226   :  { %v459_v10 = vpop.f32.mrb[28].mxu1 }
 0x227   :  { %v460_v11 = vadd.f32 %v987_v33, %v459_v10  ;;  %v586_v12 = vpop.f32.mrb[29].mxu1 }
 0x229   :  { %487 = vst.msk [vmem:[%s1079_s5 + $0x70] sm:$0xff] %vm271_vm1, %v460_v11 }
 0x22a   :  { %v464_v13 = vpop.f32.mrb[30].mxu1 }
 0x22b   :  { %v465_v14 = vadd.f32 %v987_v33, %v464_v13  ;;  %v589_v15 = vpop.f32.mrb[31].mxu1 }
 0x22d   :  { %488 = vst.msk [vmem:[%s1079_s5 + $0x78] sm:$0xff] %vm271_vm1, %v465_v14 }
 0x22e   :  { %v469_v16 = vpop.f32.mrb[32].mxu1 }
 0x22f   :  { %v470_v17 = vadd.f32 %v987_v33, %v469_v16  ;;  %v592_v18 = vpop.f32.mrb[33].mxu1 }
 0x231   :  { %489 = vst.msk [vmem:[%s1079_s5 + $0x80] sm:$0xff] %vm271_vm1, %v470_v17 }

// kernel: _lambda_.9
= control target key start
LH: loop header
LB: loop body
LE: loop exit
PB: predicated region body
PF: predicated region fallthrough
CT: control target
= control target key end

     0   :  { %vm204_vm0 = vcmask 1043456   ;;  %vm1100_vm1 = vmmov 1   ;;  %vm1101_vm3 = vmmov 0   ;;  %vm200_vm4 = vcmask 97280   ;;  %s1677_s1 = inlined_call_operand.vmem [shape: f32[1292,32], index: 1, kind: input, shape index: {}]   ;;  %s1678_s0 = inlined_call_operand.vmem [shape: f32[8,1292], index: 0, kind: input, shape index: {}]   ;;  %s1679_s3 = inlined_call_operand.vmem [shape: f32[32,32], index: 3, kind: input, shape index: {}]   ;;  %s1680_s2 = inlined_call_operand.vmem [shape: f32[1,32], index: 2, kind: input, shape index: {}]   ;;  %s1681_s4 = inlined_call_operand.vmem [shape: f32[1,32], index: 4, kind: input, shape index: {}]   ;;  %s1682_s5 = inlined_call_operand.vmem [shape: f32[8,32], index: 5, kind: output, shape index: {}]  }
   0x1   :  { %v47_v0 = vld [vmem:[%s1677_s1 + $0x80] sm:$0xff]  ;;  %v48_v1 = vld [vmem:[%s1677_s1 + $0x88] sm:$0xff]  ;;  %v49_v11 = vld [vmem:[%s1677_s1 + $0x90] sm:$0xff]  ;;  %vm640_vm5 = vcmask 261120  }
   0x2   :  { %v31_v2 = vld [vmem:[%s1677_s1] sm:$0xff]  ;;  %v925_v3 = vpack.c.bf16 %v48_v1, %v47_v0  ;;  %v32_v4 = vld [vmem:[%s1677_s1 + $0x8] sm:$0xff]  ;;  %v50_v13 = vld [vmem:[%s1677_s1 + $0x98] sm:$0xff] }
   0x3   :  { %v79_v5 = vld [vmem:[%s1677_s1 + $0x180] sm:$0xff]  ;;  %v80_v6 = vld [vmem:[%s1677_s1 + $0x188] sm:$0xff]  ;;  %v927_v7 = vpack.c.bf16 %v32_v4, %v31_v2  ;;  %v33_v14 = vld [vmem:[%s1677_s1 + $0x10] sm:$0xff]  ;;  %v929_v16 = vpack.c.bf16 %v50_v13, %v49_v11 }
   0x4   :  { %v957_v8 = vpack.c.bf16 %v80_v6, %v79_v5  ;;  %v63_v9 = vld [vmem:[%s1677_s1 + $0x100] sm:$0xff]  ;;  %v64_v10 = vld [vmem:[%s1677_s1 + $0x108] sm:$0xff]  ;;  %926 = vmatprep.subr.bf16.mxu0 %v925_v3  ;;  %v34_v15 = vld [vmem:[%s1677_s1 + $0x18] sm:$0xff] }
   0x5   :  { %v959_v12 = vpack.c.bf16 %v64_v10, %v63_v9  ;;  %928 = vmatpush3.bf16.msra.mxu0 %v927_v7  ;;  %v931_v17 = vpack.c.bf16 %v34_v15, %v33_v14  ;;  %v81_v18 = vld [vmem:[%s1677_s1 + $0x190] sm:$0xff]  ;;  %v82_v19 = vld [vmem:[%s1677_s1 + $0x198] sm:$0xff]  ;;  %v51_v23 = vld [vmem:[%s1677_s1 + $0xa0] sm:$0xff] }
   0x6   :  { %958 = vmatprep.subr.bf16.mxu1 %v957_v8  ;;  %v65_v20 = vld [vmem:[%s1677_s1 + $0x110] sm:$0xff]  ;;  %v961_v21 = vpack.c.bf16 %v82_v19, %v81_v18  ;;  %v66_v22 = vld [vmem:[%s1677_s1 + $0x118] sm:$0xff]  ;;  %v52_v24 = vld [vmem:[%s1677_s1 + $0xa8] sm:$0xff]  ;;  %930 = vmatprep.subr.bf16.mxu0 %v929_v16 }
   0x7   :  { %960 = vmatpush3.bf16.msra.mxu1 %v959_v12  ;;  %v963_v25 = vpack.c.bf16 %v66_v22, %v65_v20  ;;  %v933_v26 = vpack.c.bf16 %v52_v24, %v51_v23  ;;  %v35_v27 = vld [vmem:[%s1677_s1 + $0x20] sm:$0xff]  ;;  %v36_v28 = vld [vmem:[%s1677_s1 + $0x28] sm:$0xff]  ;;  %v53_v35 = vld [vmem:[%s1677_s1 + $0xb0] sm:$0xff] }
   0x8   :  { %v83_v29 = vld [vmem:[%s1677_s1 + $0x1a0] sm:$0xff]  ;;  %962 = vmatprep.subr.bf16.mxu1 %v961_v21  ;;  %v84_v30 = vld [vmem:[%s1677_s1 + $0x1a8] sm:$0xff]  ;;  %v935_v33 = vpack.c.bf16 %v36_v28, %v35_v27  ;;  %v54_v36 = vld [vmem:[%s1677_s1 + $0xb8] sm:$0xff] }
   0x9   :  { %v67_v31 = vld [vmem:[%s1677_s1 + $0x120] sm:$0xff]  ;;  %v68_v32 = vld [vmem:[%s1677_s1 + $0x128] sm:$0xff]  ;;  %932 = vmatpush3.bf16.msra.mxu0 %v931_v17  ;;  %v965_v34 = vpack.c.bf16 %v84_v30, %v83_v29  ;;  %v37_v37 = vld [vmem:[%s1677_s1 + $0x30] sm:$0xff]  ;;  %v937_v39 = vpack.c.bf16 %v54_v36, %v53_v35 }
   0xa   :  { %934 = vmatprep.subr.bf16.mxu0 %v933_v26  ;;  %v967_v38 = vpack.c.bf16 %v68_v32, %v67_v31  ;;  %v38_v40 = vld [vmem:[%s1677_s1 + $0x38] sm:$0xff]  ;;  %v85_v41 = vld [vmem:[%s1677_s1 + $0x1b0] sm:$0xff]  ;;  %v55_v46 = vld [vmem:[%s1677_s1 + $0xc0] sm:$0xff] }
   0xb   :  { %964 = vmatpush3.bf16.msra.mxu1 %v963_v25  ;;  %v86_v42 = vld [vmem:[%s1677_s1 + $0x1b8] sm:$0xff]  ;;  %v69_v44 = vld [vmem:[%s1677_s1 + $0x130] sm:$0xff]  ;;  %v56_v47 = vld [vmem:[%s1677_s1 + $0xc8] sm:$0xff]  ;;  %v939_v48 = vpack.c.bf16 %v38_v40, %v37_v37 }
   0xc   :  { %966 = vmatprep.subr.bf16.mxu1 %v965_v34  ;;  %v969_v43 = vpack.c.bf16 %v86_v42, %v85_v41  ;;  %v70_v45 = vld [vmem:[%s1677_s1 + $0x138] sm:$0xff]  ;;  %v87_v49 = vld [vmem:[%s1677_s1 + $0x1c0] sm:$0xff]  ;;  %v88_v50 = vld [vmem:[%s1677_s1 + $0x1c8] sm:$0xff]  ;;  %v941_v52 = vpack.c.bf16 %v56_v47, %v55_v46 }
   0xd   :  { %936 = vmatpush3.bf16.msra.mxu0 %v935_v33  ;;  %v971_v51 = vpack.c.bf16 %v70_v45, %v69_v44  ;;  %v39_v53 = vld [vmem:[%s1677_s1 + $0x40] sm:$0xff]  ;;  %v40_v54 = vld [vmem:[%s1677_s1 + $0x48] sm:$0xff]  ;;  %v973_v56 = vpack.c.bf16 %v88_v50, %v87_v49  ;;  %v57_v58 = vld [vmem:[%s1677_s1 + $0xd0] sm:$0xff] }
   0xe   :  { %938 = vmatprep.subr.bf16.mxu0 %v937_v39  ;;  %v71_v55 = vld [vmem:[%s1677_s1 + $0x140] sm:$0xff]  ;;  %v72_v57 = vld [vmem:[%s1677_s1 + $0x148] sm:$0xff]  ;;  %v58_v59 = vld [vmem:[%s1677_s1 + $0xd8] sm:$0xff]  ;;  %v943_v62 = vpack.c.bf16 %v40_v54, %v39_v53 }
   0xf   :  { %968 = vmatpush3.bf16.msra.mxu1 %v967_v38  ;;  %v89_v60 = vld [vmem:[%s1677_s1 + $0x1d0] sm:$0xff]  ;;  %v90_v61 = vld [vmem:[%s1677_s1 + $0x1d8] sm:$0xff]  ;;  %v975_v63 = vpack.c.bf16 %v72_v57, %v71_v55  ;;  %v945_v0 = vpack.c.bf16 %v58_v59, %v57_v58  ;;  %v59_v6 = vld [vmem:[%s1677_s1 + $0xe0] sm:$0xff] }
  0x10   :  { %970 = vmatprep.subr.bf16.mxu1 %v969_v43  ;;  %v41_v1 = vld [vmem:[%s1677_s1 + $0x50] sm:$0xff]  ;;  %v42_v2 = vld [vmem:[%s1677_s1 + $0x58] sm:$0xff]  ;;  %v977_v4 = vpack.c.bf16 %v90_v61, %v89_v60  ;;  %v60_v7 = vld [vmem:[%s1677_s1 + $0xe8] sm:$0xff] }
  0x11   :  { %940 = vmatpush3.bf16.msra.mxu0 %v939_v48  ;;  %v73_v3 = vld [vmem:[%s1677_s1 + $0x150] sm:$0xff]  ;;  %v74_v5 = vld [vmem:[%s1677_s1 + $0x158] sm:$0xff]  ;;  %v91_v8 = vld [vmem:[%s1677_s1 + $0x1e0] sm:$0xff]  ;;  %v947_v10 = vpack.c.bf16 %v42_v2, %v41_v1  ;;  %v949_v14 = vpack.c.bf16 %v60_v7, %v59_v6 }
  0x12   :  { %942 = vmatprep.subr.bf16.mxu0 %v941_v52  ;;  %v92_v9 = vld [vmem:[%s1677_s1 + $0x1e8] sm:$0xff]  ;;  %v43_v11 = vld [vmem:[%s1677_s1 + $0x60] sm:$0xff]  ;;  %v979_v13 = vpack.c.bf16 %v74_v5, %v73_v3  ;;  %v61_v19 = vld [vmem:[%s1677_s1 + $0xf0] sm:$0xff] }
  0x13   :  { %972 = vmatpush3.bf16.msra.mxu1 %v971_v51  ;;  %v21_v12 = vld [vmem:[%s1678_s0 + $0x8] sm:$0xff]  ;;  %v75_v16 = vld [vmem:[%s1677_s1 + $0x160] sm:$0xff]  ;;  %v981_v18 = vpack.c.bf16 %v92_v9, %v91_v8  ;;  %v62_v20 = vld [vmem:[%s1677_s1 + $0xf8] sm:$0xff] }
  0x14   :  { %974 = vmatprep.subr.bf16.mxu1 %v973_v56  ;;  %v44_v15 = vld [vmem:[%s1677_s1 + $0x68] sm:$0xff]  ;;  %272 = vmatprep.mubr.f32.mxu0 %v21_v12  ;;  %v23_v21 = vld [vmem:[%s1678_s0 + $0x18] sm:$0xff]  ;;  %v93_v22 = vld [vmem:[%s1677_s1 + $0x1f0] sm:$0xff]  ;;  %v953_v26 = vpack.c.bf16 %v62_v20, %v61_v19 }
  0x15   :  { %944 = vmatpush3.bf16.msra.mxu0 %v943_v62  ;;  %v76_v17 = vld [vmem:[%s1677_s1 + $0x168] sm:$0xff]  ;;  %v94_v23 = vld [vmem:[%s1677_s1 + $0x1f8] sm:$0xff]  ;;  %342 = vmatprep.mubr.f32.mxu1 %v23_v21  ;;  %v951_v24 = vpack.c.bf16 %v44_v15, %v43_v11  ;;  %v45_v27 = vld [vmem:[%s1677_s1 + $0x70] sm:$0xff] }
  0x16   :  { %946 = vmatprep.subr.bf16.mxu0 %v945_v0  ;;  %v983_v25 = vpack.c.bf16 %v76_v17, %v75_v16  ;;  %v46_v28 = vld [vmem:[%s1677_s1 + $0x78] sm:$0xff]  ;;  %v77_v29 = vld [vmem:[%s1677_s1 + $0x170] sm:$0xff]  ;;  %v985_v30 = vpack.c.bf16 %v94_v23, %v93_v22  ;;  %v111_v32 = vld [vmem:[%s1677_s1 + $0x280] sm:$0xff] }
  0x17   :  { %976 = vmatpush3.bf16.msra.mxu1 %v975_v63  ;;  %v78_v31 = vld [vmem:[%s1677_s1 + $0x178] sm:$0xff]  ;;  %v112_v33 = vld [vmem:[%s1677_s1 + $0x288] sm:$0xff]  ;;  %v143_v34 = vld [vmem:[%s1677_s1 + $0x380] sm:$0xff]  ;;  %v955_v36 = vpack.c.bf16 %v46_v28, %v45_v27 }
  0x18   :  { %978 = vmatprep.subr.bf16.mxu1 %v977_v4  ;;  %v144_v35 = vld [vmem:[%s1677_s1 + $0x388] sm:$0xff]  ;;  %v987_v37 = vpack.c.bf16 %v78_v31, %v77_v29  ;;  %v989_v38 = vpack.c.bf16 %v112_v33, %v111_v32  ;;  %v95_v39 = vld [vmem:[%s1677_s1 + $0x200] sm:$0xff]  ;;  %v113_v44 = vld [vmem:[%s1677_s1 + $0x290] sm:$0xff] }
  0x19   :  { %948 = vmatpush3.bf16.msra.mxu0 %v947_v10  ;;  %v96_v40 = vld [vmem:[%s1677_s1 + $0x208] sm:$0xff]  ;;  %v127_v41 = vld [vmem:[%s1677_s1 + $0x300] sm:$0xff]  ;;  %v1021_v42 = vpack.c.bf16 %v144_v35, %v143_v34  ;;  %v114_v45 = vld [vmem:[%s1677_s1 + $0x298] sm:$0xff] }
  0x1a   :  { %950 = vmatprep.subr.bf16.mxu0 %v949_v14  ;;  %v128_v43 = vld [vmem:[%s1677_s1 + $0x308] sm:$0xff]  ;;  %v145_v46 = vld [vmem:[%s1677_s1 + $0x390] sm:$0xff]  ;;  %v146_v47 = vld [vmem:[%s1677_s1 + $0x398] sm:$0xff]  ;;  %v991_v49 = vpack.c.bf16 %v96_v40, %v95_v39  ;;  %v993_v52 = vpack.c.bf16 %v114_v45, %v113_v44 }
  0x1b   :  { %980 = vmatpush3.bf16.msra.mxu1 %v979_v13  ;;  %v20_v48 = vld [vmem:[%s1678_s0] sm:$0xff]  ;;  %v22_v50 = vld [vmem:[%s1678_s0 + $0x10] sm:$0xff]  ;;  %v1023_v51 = vpack.c.bf16 %v128_v43, %v127_v41  ;;  %v98_v54 = vld [vmem:[%s1677_s1 + $0x218] sm:$0xff]  ;;  %v1025_v56 = vpack.c.bf16 %v146_v47, %v145_v46 }
  0x1c   :  { %982 = vmatprep.subr.bf16.mxu1 %v981_v18  ;;  %v97_v53 = vld [vmem:[%s1677_s1 + $0x210] sm:$0xff]  ;;  %v130_v57 = vld [vmem:[%s1677_s1 + $0x318] sm:$0xff]  ;;  %v115_v58 = vld [vmem:[%s1677_s1 + $0x2a0] sm:$0xff] }
  0x1d   :  { %952 = vmatpush3.bf16.msra.mxu0 %v951_v24  ;;  %v129_v55 = vld [vmem:[%s1677_s1 + $0x310] sm:$0xff]  ;;  %v116_v59 = vld [vmem:[%s1677_s1 + $0x2a8] sm:$0xff]  ;;  %v147_v60 = vld [vmem:[%s1677_s1 + $0x3a0] sm:$0xff]  ;;  %v995_v62 = vpack.c.bf16 %v98_v54, %v97_v53 }
  0x1e   :  { %954 = vmatprep.subr.bf16.mxu0 %v953_v26  ;;  %v148_v61 = vld [vmem:[%s1677_s1 + $0x3a8] sm:$0xff]  ;;  %v1027_v63 = vpack.c.bf16 %v130_v57, %v129_v55  ;;  %v997_v0 = vpack.c.bf16 %v116_v59, %v115_v58  ;;  %v99_v1 = vld [vmem:[%s1677_s1 + $0x220] sm:$0xff]  ;;  %v117_v6 = vld [vmem:[%s1677_s1 + $0x2b0] sm:$0xff] }
  0x1f   :  { %984 = vmatpush3.bf16.msra.mxu1 %v983_v25  ;;  %v100_v2 = vld [vmem:[%s1677_s1 + $0x228] sm:$0xff]  ;;  %v131_v3 = vld [vmem:[%s1677_s1 + $0x320] sm:$0xff]  ;;  %v1029_v4 = vpack.c.bf16 %v148_v61, %v147_v60  ;;  %v118_v7 = vld [vmem:[%s1677_s1 + $0x2b8] sm:$0xff] }
  0x20   :  { %986 = vmatprep.subr.bf16.mxu1 %v985_v30  ;;  %v132_v5 = vld [vmem:[%s1677_s1 + $0x328] sm:$0xff]  ;;  %v149_v8 = vld [vmem:[%s1677_s1 + $0x3b0] sm:$0xff]  ;;  %v150_v9 = vld [vmem:[%s1677_s1 + $0x3b8] sm:$0xff]  ;;  %v999_v10 = vpack.c.bf16 %v100_v2, %v99_v1  ;;  %v1001_v12 = vpack.c.bf16 %v118_v7, %v117_v6 }
  0x21   :  { %956 = vmatpush3.bf16.msra.mxu0 %v955_v36  ;;  %v1031_v11 = vpack.c.bf16 %v132_v5, %v131_v3  ;;  %v101_v13 = vld [vmem:[%s1677_s1 + $0x230] sm:$0xff]  ;;  %v102_v14 = vld [vmem:[%s1677_s1 + $0x238] sm:$0xff]  ;;  %v1033_v16 = vpack.c.bf16 %v150_v9, %v149_v8  ;;  %v119_v18 = vld [vmem:[%s1677_s1 + $0x2c0] sm:$0xff] }
  0x22   :  { %990 = vmatprep.subr.bf16.mxu0 %v989_v38  ;;  %v133_v15 = vld [vmem:[%s1677_s1 + $0x330] sm:$0xff]  ;;  %v134_v17 = vld [vmem:[%s1677_s1 + $0x338] sm:$0xff]  ;;  %v120_v19 = vld [vmem:[%s1677_s1 + $0x2c8] sm:$0xff]  ;;  %v1003_v23 = vpack.c.bf16 %v102_v14, %v101_v13 }
  0x23   :  { %988 = vmatpush3.bf16.msra.mxu1 %v987_v37  ;;  %v151_v20 = vld [vmem:[%s1677_s1 + $0x3c0] sm:$0xff]  ;;  %v152_v21 = vld [vmem:[%s1677_s1 + $0x3c8] sm:$0xff]  ;;  %v1035_v25 = vpack.c.bf16 %v134_v17, %v133_v15  ;;  %v1005_v26 = vpack.c.bf16 %v120_v19, %v119_v18  ;;  %v27_v29 = vld [vmem:[%s1678_s0 + $0x38] sm:$0xff] }
  0x24   :  { %1022 = vmatprep.subr.bf16.mxu1 %v1021_v42  ;;  %273 = vmatmul.mubr.f32.vlgmr.msra.gmra.mrb[0].mxu0 %v20_v48  ;;  %v25_v22 = vld [vmem:[%s1678_s0 + $0x28] sm:$0xff]  ;;  %v103_v24 = vld [vmem:[%s1677_s1 + $0x240] sm:$0xff]  ;;  %v1037_v30 = vpack.c.bf16 %v152_v21, %v151_v20  ;;  %v121_v32 = vld [vmem:[%s1677_s1 + $0x2d0] sm:$0xff] }
  0x25   :  { %992 = vmatpush3.bf16.msra.mxu0 %v991_v49  ;;  %412 = vmatprep.mubr.f32.mxu0 %v25_v22  ;;  %v104_v27 = vld [vmem:[%s1677_s1 + $0x248] sm:$0xff]  ;;  %v135_v28 = vld [vmem:[%s1677_s1 + $0x340] sm:$0xff]  ;;  %v122_v33 = vld [vmem:[%s1677_s1 + $0x2d8] sm:$0xff] }
  0x26   :  { %343 = vmatmul.mubr.f32.vlgmr.msra.gmra.mrb[0].mxu1 %v22_v50  ;;  %994 = vmatprep.subr.bf16.mxu0 %v993_v52  ;;  %v136_v31 = vld [vmem:[%s1677_s1 + $0x348] sm:$0xff]  ;;  %v153_v34 = vld [vmem:[%s1677_s1 + $0x3d0] sm:$0xff]  ;;  %v154_v35 = vld [vmem:[%s1677_s1 + $0x3d8] sm:$0xff]  ;;  %v1007_v36 = vpack.c.bf16 %v104_v27, %v103_v24  ;;  %v1009_v38 = vpack.c.bf16 %v122_v33, %v121_v32  ;;  %v1099_v24 = vmov 0.0|0.0   ;;  %v1102_v32 = vmov 0.0  }
  0x27   :  { %1024 = vmatpush3.bf16.msra.mxu1 %v1023_v51  ;;  %482 = vmatprep.mubr.f32.mxu1 %v27_v29  ;;  %v1039_v37 = vpack.c.bf16 %v136_v31, %v135_v28  ;;  %v105_v39 = vld [vmem:[%s1677_s1 + $0x250] sm:$0xff]  ;;  %v106_v40 = vld [vmem:[%s1677_s1 + $0x258] sm:$0xff]  ;;  %v1041_v42 = vpack.c.bf16 %v154_v35, %v153_v34  ;;  %v123_v44 = vld [vmem:[%s1677_s1 + $0x2e0] sm:$0xff] }
  0x28   :  { %1026 = vmatprep.subr.bf16.mxu1 %v1025_v56  ;;  %v137_v41 = vld [vmem:[%s1677_s1 + $0x350] sm:$0xff]  ;;  %v138_v43 = vld [vmem:[%s1677_s1 + $0x358] sm:$0xff]  ;;  %v124_v45 = vld [vmem:[%s1677_s1 + $0x2e8] sm:$0xff]  ;;  %v1011_v48 = vpack.c.bf16 %v106_v40, %v105_v39 }
  0x29   :  { %996 = vmatpush3.bf16.msra.mxu0 %v995_v62  ;;  %v155_v46 = vld [vmem:[%s1677_s1 + $0x3e0] sm:$0xff]  ;;  %v156_v47 = vld [vmem:[%s1677_s1 + $0x3e8] sm:$0xff]  ;;  %v1043_v49 = vpack.c.bf16 %v138_v43, %v137_v41  ;;  %v1013_v50 = vpack.c.bf16 %v124_v45, %v123_v44  ;;  %v125_v56 = vld [vmem:[%s1677_s1 + $0x2f0] sm:$0xff] }
  0x2a   :  { %998 = vmatprep.subr.bf16.mxu0 %v997_v0  ;;  %v107_v51 = vld [vmem:[%s1677_s1 + $0x260] sm:$0xff]  ;;  %v108_v52 = vld [vmem:[%s1677_s1 + $0x268] sm:$0xff]  ;;  %v1045_v54 = vpack.c.bf16 %v156_v47, %v155_v46  ;;  %v126_v57 = vld [vmem:[%s1677_s1 + $0x2f8] sm:$0xff] }
  0x2b   :  { %1028 = vmatpush3.bf16.msra.mxu1 %v1027_v63  ;;  %v139_v53 = vld [vmem:[%s1677_s1 + $0x360] sm:$0xff]  ;;  %v140_v55 = vld [vmem:[%s1677_s1 + $0x368] sm:$0xff]  ;;  %v157_v58 = vld [vmem:[%s1677_s1 + $0x3f0] sm:$0xff]  ;;  %v1015_v60 = vpack.c.bf16 %v108_v52, %v107_v51  ;;  %v1017_v62 = vpack.c.bf16 %v126_v57, %v125_v56 }
  0x2c   :  { %1030 = vmatprep.subr.bf16.mxu1 %v1029_v4  ;;  %v158_v59 = vld [vmem:[%s1677_s1 + $0x3f8] sm:$0xff]  ;;  %v1047_v61 = vpack.c.bf16 %v140_v55, %v139_v53  ;;  %v109_v63 = vld [vmem:[%s1677_s1 + $0x270] sm:$0xff]  ;;  %v175_v4 = vld [vmem:[%s1677_s1 + $0x480] sm:$0xff] }
  0x2d   :  { %1000 = vmatpush3.bf16.msra.mxu0 %v999_v10  ;;  %v110_v0 = vld [vmem:[%s1677_s1 + $0x278] sm:$0xff]  ;;  %v141_v1 = vld [vmem:[%s1677_s1 + $0x370] sm:$0xff]  ;;  %v1049_v2 = vpack.c.bf16 %v158_v59, %v157_v58  ;;  %v176_v5 = vld [vmem:[%s1677_s1 + $0x488] sm:$0xff] }
  0x2e   :  { %1002 = vmatprep.subr.bf16.mxu0 %v1001_v12  ;;  %v142_v3 = vld [vmem:[%s1677_s1 + $0x378] sm:$0xff]  ;;  %v1019_v6 = vpack.c.bf16 %v110_v0, %v109_v63  ;;  %v1053_v8 = vpack.c.bf16 %v176_v5, %v175_v4  ;;  %v159_v9 = vld [vmem:[%s1677_s1 + $0x400] sm:$0xff]  ;;  %v160_v10 = vld [vmem:[%s1677_s1 + $0x408] sm:$0xff] }
  0x2f   :  { %1032 = vmatpush3.bf16.msra.mxu1 %v1031_v11  ;;  %v1051_v7 = vpack.c.bf16 %v142_v3, %v141_v1  ;;  %v177_v11 = vld [vmem:[%s1677_s1 + $0x490] sm:$0xff]  ;;  %v178_v12 = vld [vmem:[%s1677_s1 + $0x498] sm:$0xff]  ;;  %v191_v13 = vld [vmem:[%s1677_s1 + $0x500] sm:$0xff] }
  0x30   :  { %1034 = vmatprep.subr.bf16.mxu1 %v1033_v16  ;;  %v192_v14 = vld [vmem:[%s1677_s1 + $0x508] sm:$0xf]  ;;  %v24_v15 = vld [vmem:[%s1678_s0 + $0x20] sm:$0xff]  ;;  %v1055_v16 = vpack.c.bf16 %v160_v10, %v159_v9  ;;  %v26_v17 = vld [vmem:[%s1678_s0 + $0x30] sm:$0xff]  ;;  %v1057_v18 = vpack.c.bf16 %v178_v12, %v177_v11 }
  0x31   :  { %1004 = vmatpush3.bf16.msra.mxu0 %v1003_v23  ;;  %v161_v19 = vld [vmem:[%s1677_s1 + $0x410] sm:$0xff]  ;;  %v162_v20 = vld [vmem:[%s1677_s1 + $0x418] sm:$0xff]  ;;  %v179_v21 = vld [vmem:[%s1677_s1 + $0x4a0] sm:$0xff] }
  0x32   :  { %1006 = vmatprep.subr.bf16.mxu0 %v1005_v26  ;;  %v180_v22 = vld [vmem:[%s1677_s1 + $0x4a8] sm:$0xff]  ;;  %vm1087_vm2 = vmpackc.low %vm204_vm0, %vm1100_vm1  ;;  %v1059_v26 = vpack.c.bf16 %v162_v20, %v161_v19  ;;  %v163_v28 = vld [vmem:[%s1677_s1 + $0x420] sm:$0xff] }
  0x33   :  { %1036 = vmatpush3.bf16.msra.mxu1 %v1035_v25  ;;  %v29_v23 = vld [vmem:[%s1678_s0 + $0x48] sm:$0xff]  ;;  %v1086_v25 = vpack.c.bf16 %v192_v14, %v191_v13  ;;  %v1061_v27 = vpack.c.bf16 %v180_v22, %v179_v21  ;;  %v182_v31 = vld [vmem:[%s1677_s1 + $0x4b8] sm:$0xff]  ;;  %v30_v33 = vld [vmem:[%s1678_s0 + $0x50] sm:$0xff] }
  0x34   :  { %1038 = vmatprep.subr.bf16.mxu1 %v1037_v30  ;;  %v164_v29 = vld [vmem:[%s1677_s1 + $0x428] sm:$0xff]  ;;  %v181_v30 = vld [vmem:[%s1677_s1 + $0x4b0] sm:$0xff]  ;;  %v186_v45 = vld [vmem:[%s1677_s1 + $0x4d8] sm:$0xff] }
  0x35   :  { %1008 = vmatpush3.bf16.msra.mxu0 %v1007_v36  ;;  %v1063_v34 = vpack.c.bf16 %v164_v29, %v163_v28  ;;  %v1065_v35 = vpack.c.bf16 %v182_v31, %v181_v30  ;;  %v165_v36 = vld [vmem:[%s1677_s1 + $0x430] sm:$0xff]  ;;  %v184_v39 = vld [vmem:[%s1677_s1 + $0x4c8] sm:$0xff]  ;;  %v190_v57 = vld [vmem:[%s1677_s1 + $0x4f8] sm:$0xff] }
  0x36   :  { %1010 = vmatprep.subr.bf16.mxu0 %v1009_v38  ;;  %v183_v38 = vld [vmem:[%s1677_s1 + $0x4c0] sm:$0xff]  ;;  %v168_v43 = vld [vmem:[%s1677_s1 + $0x448] sm:$0xff]  ;;  %v185_v44 = vld [vmem:[%s1677_s1 + $0x4d0] sm:$0xff] }
  0x37   :  { %1040 = vmatpush3.bf16.msra.mxu1 %v1039_v37  ;;  %v166_v37 = vld [vmem:[%s1677_s1 + $0x438] sm:$0xff]  ;;  %v1069_v41 = vpack.c.bf16 %v184_v39, %v183_v38  ;;  %v1073_v47 = vpack.c.bf16 %v186_v45, %v185_v44  ;;  %v188_v51 = vld [vmem:[%s1677_s1 + $0x4e8] sm:$0xff]  ;;  %v189_v56 = vld [vmem:[%s1677_s1 + $0x4f0] sm:$0xff] }
  0x38   :  { %1042 = vmatprep.subr.bf16.mxu1 %v1041_v42  ;;  %v1067_v40 = vpack.c.bf16 %v166_v37, %v165_v36  ;;  %v167_v42 = vld [vmem:[%s1677_s1 + $0x440] sm:$0xff]  ;;  %v172_v55 = vld [vmem:[%s1677_s1 + $0x468] sm:$0xff]  ;;  %v1081_v59 = vpack.c.bf16 %v190_v57, %v189_v56  ;;  %v631_v3 = vld [vmem:[%s1679_s3 + $0x10] sm:$0xff] }
  0x39   :  { %1012 = vmatpush3.bf16.msra.mxu0 %v1011_v48  ;;  %v1071_v46 = vpack.c.bf16 %v168_v43, %v167_v42  ;;  %v169_v48 = vld [vmem:[%s1677_s1 + $0x450] sm:$0xff]  ;;  %v28_v63 = vld [vmem:[%s1678_s0 + $0x40] sm:$0xff]  ;;  %v630_v1 = vld [vmem:[%s1679_s3 + $0x8] sm:$0xff] }
  0x3a   :  { %1014 = vmatprep.subr.bf16.mxu0 %v1013_v50  ;;  %v187_v50 = vld [vmem:[%s1677_s1 + $0x4e0] sm:$0xff]  ;;  %v632_v4 = vld [vmem:[%s1679_s3 + $0x18] sm:$0xff] }
  0x3b   :  { %1044 = vmatpush3.bf16.msra.mxu1 %v1043_v49  ;;  %v170_v49 = vld [vmem:[%s1677_s1 + $0x458] sm:$0xff]  ;;  %v1077_v53 = vpack.c.bf16 %v188_v51, %v187_v50  ;;  %v629_v0 = vld [vmem:[%s1679_s3] sm:$0xff]  ;;  %v1093_v5 = vpack.c.bf16 %v632_v4, %v631_v3 }
  0x3c   :  { %1046 = vmatprep.subr.bf16.mxu1 %v1045_v54  ;;  %v1075_v52 = vpack.c.bf16 %v170_v49, %v169_v48  ;;  %v171_v54 = vld [vmem:[%s1677_s1 + $0x460] sm:$0xff] }
  0x3d   :  { %1016 = vmatpush3.bf16.msra.mxu0 %v1015_v60  ;;  %v1079_v58 = vpack.c.bf16 %v172_v55, %v171_v54  ;;  %v173_v60 = vld [vmem:[%s1677_s1 + $0x470] sm:$0xff]  ;;  %v722_v31 = vld [vmem:[%s1681_s4] ss:$0 sm:$0xff] }
  0x3e   :  { %1018 = vmatprep.subr.bf16.mxu0 %v1017_v62 }
  0x3f   :  { %1048 = vmatpush3.bf16.msra.mxu1 %v1047_v61  ;;  %v174_v61 = vld [vmem:[%s1677_s1 + $0x478] sm:$0xff] }
  0x40   :  { %1050 = vmatprep.subr.bf16.mxu1 %v1049_v2  ;;  %v1083_v62 = vpack.c.bf16 %v174_v61, %v173_v60  ;;  %v1090_v2 = vpack.c.bf16 %v630_v1, %v629_v0 }
  0x41   :  { %1020 = vmatpush3.bf16.msra.mxu0 %v1019_v6 }
  0x42   :  { %1054 = vmatprep.subr.bf16.mxu0 %v1053_v8 }
  0x43   :  { %1052 = vmatpush3.bf16.msra.mxu1 %v1051_v7  ;;  %v719_v7 = vld [vmem:[%s1680_s2] ss:$0 sm:$0xff] }
  0x44   :  { %1085 = vmatprep.subr.bf16.mxu1 %v1099_v24  ;;  %413 = vmatmul.mubr.f32.vlgmr.msra.gmra.mrb[2].mxu0 %v24_v15 }
  0x45   :  { %1056 = vmatpush3.bf16.msra.mxu0 %v1055_v16  ;;  %552 = vmatprep.mubr.f32.mxu0 %v29_v23 }
  0x46   :  { %483 = vmatmul.mubr.f32.vlgmr.msra.gmra.mrb[2].mxu1 %v26_v17  ;;  %1058 = vmatprep.subr.bf16.mxu0 %v1057_v18 }
  0x47   :  { %1088 = vmatpush3.bf16.msk.msra.mxu1 %vm1087_vm2, %v1086_v25  ;;  %911 = vmatprep.mubr.msk.f32.mxu1 %vm1101_vm3, %v1102_v32 }
  0x48   :  { %1089 = vmatprep.subr.bf16.mxu1 %v1099_v24 }
  0x49   :  { %1060 = vmatpush3.bf16.msra.mxu0 %v1059_v26 }
  0x4a   :  { %1062 = vmatprep.subr.bf16.mxu0 %v1061_v27  ;;  %912 = vmatmul.mubr.msk.f32.vlgmr.msra.gmra.mrb[4].mxu1 %vm200_vm4, %v30_v33 }
  0x4b   :  { %922 = vmatprep.mubr.msk.f32.mxu1 %vm1101_vm3, %v1102_v32  ;;  %1091 = vmatpush3.bf16.msra.mxu1 %v1090_v2 }
  0x4c   :  { %1092 = vmatprep.subr.bf16.mxu1 %v1099_v24 }
  0x4d   :  { %1064 = vmatpush3.bf16.msra.mxu0 %v1063_v34 }
  0x4e   :  { %1066 = vmatprep.subr.bf16.mxu0 %v1065_v35 }
  0x4f   :  { %1094 = vmatpush3.bf16.msra.mxu1 %v1093_v5 }
  0x51   :  { %1068 = vmatpush3.bf16.msra.mxu0 %v1067_v40 }
  0x52   :  { %1070 = vmatprep.subr.bf16.mxu0 %v1069_v41 }
  0x55   :  { %1072 = vmatpush3.bf16.msra.mxu0 %v1071_v46 }
  0x56   :  { %1074 = vmatprep.subr.bf16.mxu0 %v1073_v47 }
  0x59   :  { %1076 = vmatpush3.bf16.msra.mxu0 %v1075_v52 }
  0x5a   :  { %1078 = vmatprep.subr.bf16.mxu0 %v1077_v53 }
  0x5d   :  { %1080 = vmatpush3.bf16.msra.mxu0 %v1079_v58 }
  0x5e   :  { %1082 = vmatprep.subr.bf16.mxu0 %v1081_v59 }
  0x61   :  { %1084 = vmatpush3.bf16.msra.mxu0 %v1083_v62 }
  0x64   :  { %553 = vmatmul.mubr.f32.vlgmr.msra.gmra.mrb[4].mxu0 %v28_v63 }
  0xf7   :  { %v756_v6 = vpop.f32.mrb[0].mxu0 }
  0xf8   :  { %v757_v8 = vpop.f32.mrb[1].mxu0 }
  0xf9   :  { %v791_v9 = vpop.f32.mrb[0].mxu1  ;;  %v758_v10 = vadd.f32 %v757_v8, %v756_v6 }
  0xfa   :  { %v792_v11 = vpop.f32.mrb[1].mxu1 }
  0xfb   :  { %v793_v12 = vadd.f32 %v792_v11, %v791_v9  ;;  %v275_v13 = vadd.f32 %v758_v10, %v719_v7 }
  0xfd   :  { %v345_v14 = vadd.f32 %v793_v12, %v275_v13 }
 0x117   :  { %v826_v15 = vpop.f32.mrb[2].mxu0 }
 0x118   :  { %v827_v16 = vpop.f32.mrb[3].mxu0 }
 0x119   :  { %v861_v17 = vpop.f32.mrb[2].mxu1  ;;  %v828_v18 = vadd.f32 %v827_v16, %v826_v15 }
 0x11a   :  { %v862_v19 = vpop.f32.mrb[3].mxu1 }
 0x11b   :  { %v863_v20 = vadd.f32 %v862_v19, %v861_v17  ;;  %v415_v21 = vadd.f32 %v828_v18, %v345_v14 }
 0x11d   :  { %v485_v22 = vadd.f32 %v863_v20, %v415_v21  ;;  %v624_v23 = vpop.f32.mrb[4].mxu1 }
 0x11e   :  { %v913_v24 = vpop.f32.mrb[5].mxu1 }
 0x137   :  { %v896_v25 = vpop.f32.mrb[4].mxu0 }
 0x138   :  { %v897_v26 = vpop.f32.mrb[5].mxu0 }
 0x139   :  { %v898_v27 = vadd.f32 %v897_v26, %v896_v25 }
 0x13b   :  { %v555_v28 = vadd.f32 %v898_v27, %v485_v22 }
 0x13d   :  { %v625_v29 = vadd.f32 %v624_v23, %v555_v28 }
 0x13f   :  { %v628_v30 = vmax.f32 %v625_v29, 0.0 }
 0x141   :  { %923 = vmatmul.mubr.msk.f32.vlgmr.msra.gmra.mrb[6].mxu1 %vm640_vm5, %v628_v30 }
 0x214   :  { %v710_v32 = vpop.f32.mrb[6].mxu1 }
 0x215   :  { %v711_v33 = vadd.f32 %v722_v31, %v710_v32  ;;  %v924_v34 = vpop.f32.mrb[7].mxu1 }
 0x217   :  { %714 = vst.msk [vmem:[%s1682_s5] sm:$0xff] %vm640_vm5, %v711_v33 }

// kernel: _lambda_.10
= control target key start
LH: loop header
LB: loop body
LE: loop exit
PB: predicated region body
PF: predicated region fallthrough
CT: control target
= control target key end

     0   :  { %v328_v0 = vmov 0.0|0.0   ;;  %vm329_vm0 = vmmov 0   ;;  %v330_v4 = vmov 0.0   ;;  %vm38_vm1 = vcmask 523264   ;;  %s433_s1 = inlined_call_operand.vmem [shape: f32[64,32], index: 1, kind: input, shape index: {}]   ;;  %s434_s3 = inlined_call_operand.vmem [shape: f32[32,32], index: 3, kind: input, shape index: {}]   ;;  %s435_s0 = inlined_call_operand.vmem [shape: f32[24,64], index: 0, kind: input, shape index: {}]   ;;  %s436_s2 = inlined_call_operand.vmem [shape: f32[1,32], index: 2, kind: input, shape index: {}]   ;;  %s437_s4 = inlined_call_operand.vmem [shape: f32[1,32], index: 4, kind: input, shape index: {}]   ;;  %s438_s5 = inlined_call_operand.vmem [shape: f32[24,32], index: 5, kind: output, shape index: {}]  }
   0x1   :  { %307 = vmatprep.subr.bf16.mxu0 %v328_v0  ;;  %v23_v1 = vld [vmem:[%s433_s1] sm:$0xff]  ;;  %v24_v2 = vld [vmem:[%s433_s1 + $0x8] sm:$0xff]  ;;  %v25_v3 = vld [vmem:[%s433_s1 + $0x10] sm:$0xff]  ;;  %281 = vmatprep.mubr.msk.f32.mxu0 %vm329_vm0, %v330_v4  ;;  %vm142_vm2 = vcmask 261120  }
   0x2   :  { %v308_v5 = vpack.c.bf16 %v24_v2, %v23_v1  ;;  %v26_v6 = vld [vmem:[%s433_s1 + $0x18] sm:$0xff]  ;;  %319 = vmatprep.subr.bf16.mxu1 %v328_v0  ;;  %298 = vmatprep.mubr.msk.f32.mxu1 %vm329_vm0, %v330_v4  ;;  %v131_v8 = vld [vmem:[%s434_s3] sm:$0xff]  ;;  %v28_v10 = vld [vmem:[%s433_s1 + $0x28] sm:$0xff] }
   0x3   :  { %v311_v7 = vpack.c.bf16 %v26_v6, %v25_v3  ;;  %v27_v9 = vld [vmem:[%s433_s1 + $0x20] sm:$0xff]  ;;  %v132_v11 = vld [vmem:[%s434_s3 + $0x8] sm:$0xff]  ;;  %v29_v14 = vld [vmem:[%s433_s1 + $0x30] sm:$0xff] }
   0x4   :  { %309 = vmatpush3.bf16.msra.mxu0 %v308_v5  ;;  %v320_v12 = vpack.c.bf16 %v132_v11, %v131_v8  ;;  %v314_v13 = vpack.c.bf16 %v28_v10, %v27_v9  ;;  %v30_v15 = vld [vmem:[%s433_s1 + $0x38] sm:$0xff]  ;;  %v20_v17 = vld [vmem:[%s435_s0] sm:$0xff]  ;;  %v21_v18 = vld [vmem:[%s435_s0 + $0x8] sm:$0xff] }
   0x5   :  { %310 = vmatprep.subr.bf16.mxu0 %v328_v0  ;;  %v317_v16 = vpack.c.bf16 %v30_v15, %v29_v14  ;;  %v22_v19 = vld [vmem:[%s435_s0 + $0x10] sm:$0xff]  ;;  %v134_v21 = vld [vmem:[%s434_s3 + $0x18] sm:$0xff]  ;;  %v239_v23 = vld [vmem:[%s436_s2] ss:$0 sm:$0xff] }
   0x6   :  { %321 = vmatpush3.bf16.msra.mxu1 %v320_v12  ;;  %v133_v20 = vld [vmem:[%s434_s3 + $0x10] sm:$0xff]  ;;  %v243_v36 = vld [vmem:[%s437_s4] ss:$0 sm:$0xff] }
   0x7   :  { %322 = vmatprep.subr.bf16.mxu1 %v328_v0  ;;  %v323_v22 = vpack.c.bf16 %v134_v21, %v133_v20 }
   0x8   :  { %312 = vmatpush3.bf16.msra.mxu0 %v311_v7 }
   0x9   :  { %313 = vmatprep.subr.bf16.mxu0 %v328_v0 }
   0xa   :  { %324 = vmatpush3.bf16.msra.mxu1 %v323_v22 }
   0xc   :  { %315 = vmatpush3.bf16.msra.mxu0 %v314_v13 }
   0xd   :  { %316 = vmatprep.subr.bf16.mxu0 %v328_v0 }
  0x10   :  { %318 = vmatpush3.bf16.msra.mxu0 %v317_v16 }
  0x13   :  { %282 = vmatmul.mubr.msk.f32.vlgmr.msra.gmra.mrb[0].mxu0 %vm38_vm1, %v20_v17 }
  0x14   :  { %284 = vmatprep.mubr.msk.f32.mxu0 %vm329_vm0, %v330_v4 }
  0x17   :  { %285 = vmatmul.mubr.msk.f32.gmra.mrb[2].mxu0 %vm38_vm1, %v21_v18 }
  0x18   :  { %287 = vmatprep.mubr.msk.f32.mxu0 %vm329_vm0, %v330_v4 }
  0x1b   :  { %288 = vmatmul.mubr.msk.f32.gmra.mrb[4].mxu0 %vm38_vm1, %v22_v19 }
  0xe6   :  { %v114_v24 = vpop.f32.mrb[0].mxu0 }
  0xe7   :  { %v115_v25 = vadd.f32 %v239_v23, %v114_v24  ;;  %v283_v26 = vpop.f32.mrb[1].mxu0 }
  0xe9   :  { %v128_v27 = vmax.f32 %v115_v25, 0.0 }
  0xea   :  { %v119_v28 = vpop.f32.mrb[2].mxu0 }
  0xeb   :  { %v120_v29 = vadd.f32 %v239_v23, %v119_v28  ;;  %v286_v30 = vpop.f32.mrb[3].mxu0  ;;  %299 = vmatmul.mubr.msk.f32.vlgmr.msra.gmra.mrb[0].mxu1 %vm142_vm2, %v128_v27 }
  0xec   :  { %301 = vmatprep.mubr.msk.f32.mxu1 %vm329_vm0, %v330_v4 }
  0xed   :  { %v129_v31 = vmax.f32 %v120_v29, 0.0 }
  0xee   :  { %v124_v32 = vpop.f32.mrb[4].mxu0 }
  0xef   :  { %v125_v33 = vadd.f32 %v239_v23, %v124_v32  ;;  %v289_v34 = vpop.f32.mrb[5].mxu0  ;;  %302 = vmatmul.mubr.msk.f32.gmra.mrb[2].mxu1 %vm142_vm2, %v129_v31 }
  0xf0   :  { %304 = vmatprep.mubr.msk.f32.mxu1 %vm329_vm0, %v330_v4 }
  0xf1   :  { %v130_v35 = vmax.f32 %v125_v33, 0.0 }
  0xf3   :  { %305 = vmatmul.mubr.msk.f32.gmra.mrb[4].mxu1 %vm142_vm2, %v130_v35 }
 0x1be   :  { %v218_v37 = vpop.f32.mrb[0].mxu1 }
 0x1bf   :  { %v219_v38 = vadd.f32 %v243_v36, %v218_v37  ;;  %v300_v39 = vpop.f32.mrb[1].mxu1 }
 0x1c1   :  { %232 = vst.msk [vmem:[%s438_s5] sm:$0xff] %vm142_vm2, %v219_v38 }
 0x1c2   :  { %v223_v40 = vpop.f32.mrb[2].mxu1 }
 0x1c3   :  { %v224_v41 = vadd.f32 %v243_v36, %v223_v40  ;;  %v303_v42 = vpop.f32.mrb[3].mxu1 }
 0x1c5   :  { %233 = vst.msk [vmem:[%s438_s5 + $0x8] sm:$0xff] %vm142_vm2, %v224_v41 }
 0x1c6   :  { %v228_v43 = vpop.f32.mrb[4].mxu1 }
 0x1c7   :  { %v229_v44 = vadd.f32 %v243_v36, %v228_v43  ;;  %v306_v45 = vpop.f32.mrb[5].mxu1 }
 0x1c9   :  { %234 = vst.msk [vmem:[%s438_s5 + $0x10] sm:$0xff] %vm142_vm2, %v229_v44 }

// kernel: _lambda_.11
= control target key start
LH: loop header
LB: loop body
LE: loop exit
PB: predicated region body
PF: predicated region fallthrough
CT: control target
= control target key end

     0   :  { %v271_v0 = vmov 0.0|0.0   ;;  %vm272_vm0 = vmmov 0   ;;  %v273_v4 = vmov 0.0   ;;  %vm36_vm1 = vcmask 523264   ;;  %s352_s1 = inlined_call_operand.vmem [shape: f32[64,32], index: 1, kind: input, shape index: {}]   ;;  %s353_s3 = inlined_call_operand.vmem [shape: f32[32,32], index: 3, kind: input, shape index: {}]   ;;  %s354_s0 = inlined_call_operand.vmem [shape: f32[4,64], index: 0, kind: input, shape index: {}]   ;;  %s355_s2 = inlined_call_operand.vmem [shape: f32[1,32], index: 2, kind: input, shape index: {}]   ;;  %s356_s4 = inlined_call_operand.vmem [shape: f32[1,32], index: 4, kind: input, shape index: {}]   ;;  %s357_s5 = inlined_call_operand.vmem [shape: f32[4,32], index: 5, kind: output, shape index: {}]  }
   0x1   :  { %250 = vmatprep.subr.bf16.mxu0 %v271_v0  ;;  %v21_v1 = vld [vmem:[%s352_s1] sm:$0xff]  ;;  %v22_v2 = vld [vmem:[%s352_s1 + $0x8] sm:$0xff]  ;;  %v23_v3 = vld [vmem:[%s352_s1 + $0x10] sm:$0xff]  ;;  %236 = vmatprep.mubr.msk.f32.mxu0 %vm272_vm0, %v273_v4  ;;  %vm122_vm2 = vcmask 261120   ;;  %vm196_vm3 = vcmask 257024  }
   0x2   :  { %v251_v5 = vpack.c.bf16 %v22_v2, %v21_v1  ;;  %v24_v6 = vld [vmem:[%s352_s1 + $0x18] sm:$0xff]  ;;  %262 = vmatprep.subr.bf16.mxu1 %v271_v0  ;;  %247 = vmatprep.mubr.msk.f32.mxu1 %vm272_vm0, %v273_v4  ;;  %v111_v8 = vld [vmem:[%s353_s3] sm:$0xff]  ;;  %v112_v9 = vld [vmem:[%s353_s3 + $0x8] sm:$0xff] }
   0x3   :  { %v254_v7 = vpack.c.bf16 %v24_v6, %v23_v3  ;;  %v25_v10 = vld [vmem:[%s352_s1 + $0x20] sm:$0xff]  ;;  %v26_v11 = vld [vmem:[%s352_s1 + $0x28] sm:$0xff]  ;;  %v263_v12 = vpack.c.bf16 %v112_v9, %v111_v8  ;;  %v27_v14 = vld [vmem:[%s352_s1 + $0x30] sm:$0xff] }
   0x4   :  { %252 = vmatpush3.bf16.msra.mxu0 %v251_v5  ;;  %v257_v13 = vpack.c.bf16 %v26_v11, %v25_v10  ;;  %v28_v15 = vld [vmem:[%s352_s1 + $0x38] sm:$0xff]  ;;  %v20_v17 = vld [vmem:[%s354_s0] sm:$0xf]  ;;  %v113_v18 = vld [vmem:[%s353_s3 + $0x10] sm:$0xff] }
   0x5   :  { %253 = vmatprep.subr.bf16.mxu0 %v271_v0  ;;  %264 = vmatpush3.bf16.msra.mxu1 %v263_v12  ;;  %v260_v16 = vpack.c.bf16 %v28_v15, %v27_v14  ;;  %v114_v19 = vld [vmem:[%s353_s3 + $0x18] sm:$0xff]  ;;  %v202_v21 = vld [vmem:[%s355_s2] ss:$0 sm:$0xff] }
   0x6   :  { %265 = vmatprep.subr.bf16.mxu1 %v271_v0  ;;  %v266_v20 = vpack.c.bf16 %v114_v19, %v113_v18  ;;  %v204_v26 = vld [vmem:[%s356_s4] ss:$0 sm:$0xff] }
   0x8   :  { %255 = vmatpush3.bf16.msra.mxu0 %v254_v7 }
   0x9   :  { %256 = vmatprep.subr.bf16.mxu0 %v271_v0  ;;  %267 = vmatpush3.bf16.msra.mxu1 %v266_v20 }
   0xc   :  { %258 = vmatpush3.bf16.msra.mxu0 %v257_v13 }
   0xd   :  { %259 = vmatprep.subr.bf16.mxu0 %v271_v0 }
  0x10   :  { %261 = vmatpush3.bf16.msra.mxu0 %v260_v16 }
  0x13   :  { %237 = vmatmul.mubr.msk.f32.vlgmr.msra.gmra.mrb[0].mxu0 %vm36_vm1, %v20_v17 }
  0xe6   :  { %v106_v22 = vpop.f32.mrb[0].mxu0 }
  0xe7   :  { %v107_v23 = vadd.f32 %v202_v21, %v106_v22  ;;  %v238_v24 = vpop.f32.mrb[1].mxu0 }
  0xe9   :  { %v110_v25 = vmax.f32 %v107_v23, 0.0 }
  0xeb   :  { %248 = vmatmul.mubr.msk.f32.vlgmr.msra.gmra.mrb[0].mxu1 %vm122_vm2, %v110_v25 }
 0x1be   :  { %v192_v27 = vpop.f32.mrb[0].mxu1 }
 0x1bf   :  { %v193_v28 = vadd.f32 %v204_v26, %v192_v27  ;;  %v249_v29 = vpop.f32.mrb[1].mxu1 }
 0x1c1   :  { %197 = vst.msk [vmem:[%s357_s5] sm:$0xf] %vm196_vm3, %v193_v28 }

// kernel: _lambda_.13
= control target key start
LH: loop header
LB: loop body
LE: loop exit
PB: predicated region body
PF: predicated region fallthrough
CT: control target
= control target key end

     0   :  { %v197_v0 = vmov 0.0|0.0   ;;  %vm198_vm0 = vmmov 0   ;;  %v199_v6 = vmov 0.0   ;;  %vm30_vm1 = vcmask 261120   ;;  %s275_s1 = inlined_call_operand.vmem [shape: f32[32,33], index: 1, kind: input, shape index: {}]   ;;  %s276_s0 = inlined_call_operand.vmem [shape: f32[40,32], index: 0, kind: input, shape index: {}]   ;;  %s277_s2 = inlined_call_operand.vmem [shape: f32[1,33], index: 2, kind: input, shape index: {}]   ;;  %s278_s3 = inlined_call_operand.vmem [shape: f32[40,33], index: 3, kind: output, shape index: {}]  }
   0x1   :  { %184 = vmatprep.subr.bf16.mxu0 %v197_v0  ;;  %v19_v1 = vld [vmem:[%s275_s1] sm:$0xff]  ;;  %v20_v2 = vld [vmem:[%s275_s1 + $0x8] sm:$0xff]  ;;  %190 = vmatprep.subr.bf16.mxu1 %v197_v0  ;;  %v21_v3 = vld [vmem:[%s275_s1 + $0x10] sm:$0xff]  ;;  %vm136_vm2 = vcmask 269312  }
   0x2   :  { %v185_v4 = vpack.c.bf16 %v20_v2, %v19_v1  ;;  %v22_v5 = vld [vmem:[%s275_s1 + $0x18] sm:$0xff]  ;;  %169 = vmatprep.mubr.msk.f32.mxu0 %vm198_vm0, %v199_v6  ;;  %178 = vmatprep.mubr.msk.f32.mxu1 %vm198_vm0, %v199_v6  ;;  %v14_v8 = vld [vmem:[%s276_s0] sm:$0xff]  ;;  %v15_v10 = vld [vmem:[%s276_s0 + $0x8] sm:$0xff] }
   0x3   :  { %v188_v7 = vpack.c.bf16 %v22_v5, %v21_v3  ;;  %v17_v9 = vld [vmem:[%s276_s0 + $0x18] sm:$0xff]  ;;  %v18_v11 = vld [vmem:[%s276_s0 + $0x20] sm:$0xff]  ;;  %v16_v12 = vld [vmem:[%s276_s0 + $0x10] sm:$0xff] }
   0x4   :  { %186 = vmatpush3.bf16.msra.mxu0 %v185_v4  ;;  %192 = vmatpush3.bf16.msra.mxu1 %v185_v4  ;;  %v146_v13 = vld [vmem:[%s277_s2] ss:$0 sm:$0xff] }
   0x5   :  { %187 = vmatprep.subr.bf16.mxu0 %v197_v0  ;;  %191 = vmatprep.subr.bf16.mxu1 %v197_v0 }
   0x8   :  { %189 = vmatpush3.bf16.msra.mxu0 %v188_v7  ;;  %193 = vmatpush3.bf16.msra.mxu1 %v188_v7 }
   0xb   :  { %170 = vmatmul.mubr.msk.f32.vlgmr.msra.gmra.mrb[0].mxu0 %vm30_vm1, %v14_v8  ;;  %179 = vmatmul.mubr.msk.f32.vlgmr.msra.gmra.mrb[0].mxu1 %vm30_vm1, %v17_v9 }
   0xc   :  { %172 = vmatprep.mubr.msk.f32.mxu0 %vm198_vm0, %v199_v6  ;;  %181 = vmatprep.mubr.msk.f32.mxu1 %vm198_vm0, %v199_v6 }
   0xf   :  { %173 = vmatmul.mubr.msk.f32.gmra.mrb[2].mxu0 %vm30_vm1, %v15_v10  ;;  %182 = vmatmul.mubr.msk.f32.gmra.mrb[2].mxu1 %vm30_vm1, %v18_v11 }
  0x10   :  { %175 = vmatprep.mubr.msk.f32.mxu0 %vm198_vm0, %v199_v6 }
  0x13   :  { %176 = vmatmul.mubr.msk.f32.gmra.mrb[4].mxu0 %vm30_vm1, %v16_v12 }
  0xde   :  { %v112_v14 = vpop.f32.mrb[0].mxu0  ;;  %v127_v15 = vpop.f32.mrb[0].mxu1 }
  0xdf   :  { %v113_v16 = vadd.f32 %v146_v13, %v112_v14  ;;  %v171_v17 = vpop.f32.mrb[1].mxu0  ;;  %v128_v18 = vadd.f32 %v146_v13, %v127_v15  ;;  %v180_v19 = vpop.f32.mrb[1].mxu1 }
  0xe1   :  { %137 = vst.msk [vmem:[%s278_s3] sm:$0xff] %vm136_vm2, %v113_v16  ;;  %140 = vst.msk [vmem:[%s278_s3 + $0x18] sm:$0xff] %vm136_vm2, %v128_v18 }
  0xe2   :  { %v117_v20 = vpop.f32.mrb[2].mxu0  ;;  %v132_v21 = vpop.f32.mrb[2].mxu1 }
  0xe3   :  { %v118_v22 = vadd.f32 %v146_v13, %v117_v20  ;;  %v174_v23 = vpop.f32.mrb[3].mxu0  ;;  %v133_v24 = vadd.f32 %v146_v13, %v132_v21  ;;  %v183_v25 = vpop.f32.mrb[3].mxu1 }
  0xe5   :  { %138 = vst.msk [vmem:[%s278_s3 + $0x8] sm:$0xff] %vm136_vm2, %v118_v22  ;;  %141 = vst.msk [vmem:[%s278_s3 + $0x20] sm:$0xff] %vm136_vm2, %v133_v24 }
  0xe6   :  { %v122_v26 = vpop.f32.mrb[4].mxu0 }
  0xe7   :  { %v123_v27 = vadd.f32 %v146_v13, %v122_v26  ;;  %v177_v28 = vpop.f32.mrb[5].mxu0 }
  0xe9   :  { %139 = vst.msk [vmem:[%s278_s3 + $0x10] sm:$0xff] %vm136_vm2, %v123_v27 }

// kernel: _lambda_.12
= control target key start
LH: loop header
LB: loop body
LE: loop exit
PB: predicated region body
PF: predicated region fallthrough
CT: control target
= control target key end

     0   :  { %s5067_s21 = smov 0   ;;  %s5069_s22 = smov 0   ;;  %s6486_s0 = inlined_call_operand.vmem [shape: f32[4,2,72,32], index: 0, kind: input, shape index: {}]   ;;  %s6487_s1 = inlined_call_operand.vmem [shape: f32[4,1,72], index: 1, kind: input, shape index: {}]   ;;  %s6488_s2 = inlined_call_operand.vmem [shape: f32[2,12,32,32], index: 2, kind: input, shape index: {}]   ;;  %s6489_s3 = inlined_call_operand.vmem [shape: f32[2,4,3,32], index: 3, kind: input, shape index: {}]   ;;  %s6490_s4 = inlined_call_operand.vmem [shape: f32[2,4,32,32], index: 4, kind: input, shape index: {}]   ;;  %s6491_s5 = inlined_call_operand.vmem [shape: f32[2,4,1,32], index: 5, kind: input, shape index: {}]   ;;  %s6492_s6 = inlined_call_operand.vmem [shape: f32[2,4,32,64], index: 6, kind: input, shape index: {}]   ;;  %s6493_s7 = inlined_call_operand.vmem [shape: f32[2,4,1,64], index: 7, kind: input, shape index: {}]   ;;  %s6494_s8 = inlined_call_operand.vmem [shape: f32[2,4,64,32], index: 8, kind: input, shape index: {}]   ;;  %s6495_s9 = inlined_call_operand.vmem [shape: f32[2,4,1,32], index: 9, kind: input, shape index: {}]   ;;  %s6496_s10 = inlined_call_operand.vmem [shape: f32[2,4,4,32], index: 10, kind: input, shape index: {}]   ;;  %s6497_s11 = inlined_call_operand.vmem [shape: f32[2,4,2,32], index: 11, kind: output, shape index: {0}]   ;;  %s6498_s12 = inlined_call_operand.vmem [shape: f32[2,4,8,32], index: 12, kind: output, shape index: {1}]  }
   0x1   :  { %6504 = sst [smem:[#allocation10_spill]] %s6486_s0  ;;  %s5071_s23 = smov 0  }
   0x2   :  { %6505 = sst [smem:[#allocation11_spill]] %s6487_s1  ;;  %s5073_s24 = smov 0  }
   0x3   :  { %6506 = sst [smem:[#allocation12_spill]] %s6488_s2  ;;  %s5075_s25 = smov 0  }
   0x4   :  { %6507 = sst [smem:[#allocation13_spill]] %s6489_s3 }
   0x5   :  { %6508 = sst [smem:[#allocation14_spill]] %s6490_s4 }
   0x6   :  { %6509 = sst [smem:[#allocation15_spill]] %s6492_s6 }
   0x7   :  { %6510 = sst [smem:[#allocation16_spill]] %s6498_s12 }
   0x8 LB: > { %6511 = sst [smem:[#allocation3_spill]] %s4981_s21  ;;  %s32_s26 = sadd.s32 1, %s4989_s23  ;;  %s4997_s25 = sphi %s5075_s25, %s23_s25   ;;  %s4993_s24 = sphi %s5073_s24, %s6537_s24   ;;  %s4989_s23 = sphi %s5071_s23, %s6536_s23   ;;  %s4985_s22 = sphi %s5069_s22, %s6535_s22   ;;  %s4981_s21 = sphi %s5067_s21, %s6534_s21  }
   0x9   : > { %6512 = sst [smem:[#allocation4_spill]] %s4989_s23  ;;  %s35_s27 = sadd.s32 1, %s4993_s24 }
   0xa   : > { %6513 = sst [smem:[#allocation5_spill]] %s4993_s24  ;;  %p33_p0 = scmp.ge.s32.totalorder %s32_s26, 2 }
   0xb   : > { %6514 = sst [smem:[#allocation6_spill]] %s4997_s25  ;;  %p3830_p1 = scmp.ge.s32.totalorder %s4997_s25, 1 }
   0xc   : > { %p527_p2 = scmp.lt.s32.totalorder %s4997_s25, 9  ;;  %s6539_s26 = smov (%p33_p0, %s32_s26), 0 }
   0xd   : > { %6515 = sst [smem:[#allocation7_spill]] %s6539_s26  ;;  %s6541_s27 = smov (!%p33_p0, %s35_s27), %s4993_s24 }
   0xe   : > { %p528_p3 = pnand %p3830_p1, %p527_p2  ;;  %p37_p4 = scmp.ge.s32.totalorder %s6541_s27, 4 }
  0x10   : > { %s6543_s27 = smov (%p37_p4, %s6541_s27), 0  ;;  %531 = sbr.rel (%p528_p3) target bundleno = 2406 (0x966), region = 64 }
  0x11   : > { %6516 = sst [smem:[#allocation8_spill]] %s6543_s27 }
  0x17   : > { %p657_p5 = scmp.lt.s32.totalorder %s4985_s22, 3  ;;  %s665_s28 = smul.u32 3, %s4985_s22 }
  0x18   : > { %p666_p6 = scmp.lt.s32.totalorder %s4981_s21, 1  ;;  %s6518_s0 = sld [smem:[#allocation10_spill]] }
  0x19   : > { %s6545_s22 = smov (!%p657_p5, %s4985_s22), 3  ;;  %p668_p7 = scmp.lt.s32.totalorder %s665_s28, 11 }
  0x1a   : > { %s667_s29 = scalar_select %p666_p6, %s4981_s21, 1 }
  0x1b   : > { %s4751_s30 = smul.u32 144, %s6545_s22  ;;  %s6547_s28 = smov (!%p668_p7, %s665_s28), 11 }
  0x1c   : > { %s4752_s16 = smul.u32 48, %s667_s29  ;;  %s3834_s20 = sshll.u32 %s667_s29, 2 }
  0x1d   : > { %s5114_s27 = sadd.s32 %s3834_s20, %s6545_s22  ;;  %s3836_s26 = sshll.u32 %s6545_s22, 2 }
  0x1e   : > { %s5111_s19 = scalar_lea.vmem %s6518_s0, %s4751_s30  ;;  %s3832_s24 = sshll.u32 %s6547_s28, 2 }
  0x1f   : > { %6519 = sst [smem:[#allocation9_spill]] %s5111_s19  ;;  %s3835_s13 = sshll.u32 %s5114_s27, 2 }
  0x20   : > { %s672_s14 = sadd.s32 %s4752_s16, %s3832_s24  ;;  %s6520_s3 = sld [smem:[#allocation13_spill]] }
  0x21   : > { %s3833_s30 = sshll.u32 %s672_s14, 3  ;;  %s3837_s17 = sshll.u32 %s667_s29, 4 }
  0x22   : > { %s6521_s2 = sld [smem:[#allocation12_spill]]  ;;  %s690_s1 = sadd.s32 %s3837_s17, %s3836_s26 }
  0x23   : > { %s3838_s19 = sshll.u32 %s690_s1, 3  ;;  %s6522_s4 = sld [smem:[#allocation14_spill]] }
  0x24   : > { %s6523_s6 = sld [smem:[#allocation15_spill]]  ;;  %s715_s18 = scalar_lea.vmem %s6493_s7, %s5114_s27 }
  0x25   : > { %s3844_s26 = sshll.u32 %s6545_s22, 3  ;;  %s3845_s1 = sshll.u32 %s667_s29, 5 }
  0x26   : > { %s5121_s25 = scalar_lea.vmem %s6520_s3, %s3835_s13  ;;  %s722_s28 = sadd.s32 %s3845_s1, %s3844_s26 }
  0x27   : > { %s5154_s16 = scalar_lea.vmem %s6496_s10, %s3835_s13  ;;  %s3851_s15 = sshll.u32 %s5114_s27, 1 }
  0x28   : > { %s5126_s20 = scalar_lea.vmem %s6521_s2, %s3833_s30  ;;  %s5165_s29 = scalar_lea.vmem %s6497_s11, %s3851_s15 }
  0x29   : > { %s5135_s23 = scalar_lea.vmem %s6522_s4, %s3838_s19  ;;  %s3846_s4 = sshll.u32 %s722_s28, 3 }
  0x2a   : > { %s5140_s3 = scalar_lea.vmem %s6523_s6, %s3838_s19  ;;  %s5160_s6 = scalar_lea.vmem %s6494_s8, %s3846_s4 }
  0x2b   : > { %s3853_s2 = sshll.u32 %s5114_s27, 3  ;;  %s6524_s1 = sld [smem:[#allocation16_spill]] }
  0x2c   : > { %s6525_s13 = sld [smem:[#allocation3_spill]] }
  0x31   : > { %s5171_s21 = scalar_lea.vmem %s6524_s1, %s3853_s2 }
  0x32   : > { %p3854_p8 = scmp.ne.s32.totalorder %s6525_s13, 0 }
  0x33   : > { %s6526_s24 = sld [smem:[#allocation9_spill]] (!%p3854_p8)  ;;  %vm778_vm0 = vcmask (!%p3854_p8), 261120  }
  0x34   : > { %759 = sbr.rel (%p3854_p8) target bundleno = 67 (0x43), region = 68 }
  0x39   : > { %v760_v0 = vld [vmem:[%s6526_s24] sm:$0xff] (!%p3854_p8)  ;;  %v761_v1 = vld [vmem:[%s6526_s24 + $0x8] sm:$0xff] (!%p3854_p8)  ;;  %v762_v2 = vld [vmem:[%s6526_s24 + $0x10] sm:$0xff] (!%p3854_p8) }
  0x3a   : > { %779 = vst.msk [vmem:[#allocation2] sm:$0xff] (!%p3854_p8), %vm778_vm0, %v760_v0  ;;  %780 = vst.msk [vmem:[#allocation2 + $0x8] sm:$0xff] (!%p3854_p8), %vm778_vm0, %v761_v1  ;;  %v763_v3 = vld [vmem:[%s6526_s24 + $0x18] sm:$0xff] (!%p3854_p8)  ;;  %v764_v4 = vld [vmem:[%s6526_s24 + $0x20] sm:$0xff] (!%p3854_p8) }
  0x3b   : > { %781 = vst.msk [vmem:[#allocation2 + $0x10] sm:$0xff] %vm778_vm0, %v762_v2  ;;  %v765_v5 = vld [vmem:[%s6526_s24 + $0x28] sm:$0xff]  ;;  %782 = vst.msk [vmem:[#allocation2 + $0x18] sm:$0xff] %vm778_vm0, %v763_v3  ;;  %v766_v6 = vld [vmem:[%s6526_s24 + $0x30] sm:$0xff] }
  0x3c   : > { %783 = vst.msk [vmem:[#allocation2 + $0x20] sm:$0xff] %vm778_vm0, %v764_v4  ;;  %784 = vst.msk [vmem:[#allocation2 + $0x28] sm:$0xff] %vm778_vm0, %v765_v5  ;;  %v767_v7 = vld [vmem:[%s6526_s24 + $0x38] sm:$0xff]  ;;  %v768_v8 = vld [vmem:[%s6526_s24 + $0x40] sm:$0xff] }
  0x3d   : > { %785 = vst.msk [vmem:[#allocation2 + $0x30] sm:$0xff] %vm778_vm0, %v766_v6  ;;  %786 = vst.msk [vmem:[#allocation2 + $0x38] sm:$0xff] %vm778_vm0, %v767_v7  ;;  %v769_v9 = vld [vmem:[%s6526_s24 + $0x48] sm:$0xff]  ;;  %v770_v10 = vld [vmem:[%s6526_s24 + $0x50] sm:$0xff] }
  0x3e   : > { %787 = vst.msk [vmem:[#allocation2 + $0x40] sm:$0xff] %vm778_vm0, %v768_v8  ;;  %v771_v11 = vld [vmem:[%s6526_s24 + $0x58] sm:$0xff]  ;;  %788 = vst.msk [vmem:[#allocation2 + $0x48] sm:$0xff] %vm778_vm0, %v769_v9  ;;  %v772_v12 = vld [vmem:[%s6526_s24 + $0x60] sm:$0xff] }
  0x3f   : > { %789 = vst.msk [vmem:[#allocation2 + $0x50] sm:$0xff] %vm778_vm0, %v770_v10  ;;  %790 = vst.msk [vmem:[#allocation2 + $0x58] sm:$0xff] %vm778_vm0, %v771_v11  ;;  %v773_v13 = vld [vmem:[%s6526_s24 + $0x68] sm:$0xff]  ;;  %v774_v14 = vld [vmem:[%s6526_s24 + $0x70] sm:$0xff] }
  0x40   : > { %791 = vst.msk [vmem:[#allocation2 + $0x60] sm:$0xff] %vm778_vm0, %v772_v12  ;;  %792 = vst.msk [vmem:[#allocation2 + $0x68] sm:$0xff] %vm778_vm0, %v773_v13  ;;  %v775_v15 = vld [vmem:[%s6526_s24 + $0x78] sm:$0xff]  ;;  %v776_v16 = vld [vmem:[%s6526_s24 + $0x80] sm:$0xff] }
  0x41   : > { %793 = vst.msk [vmem:[#allocation2 + $0x70] sm:$0xff] %vm778_vm0, %v774_v14  ;;  %v777_v17 = vld [vmem:[%s6526_s24 + $0x88] sm:$0xff]  ;;  %794 = vst.msk [vmem:[#allocation2 + $0x78] sm:$0xff] %vm778_vm0, %v775_v15 }
  0x42   : > { %795 = vst.msk [vmem:[#allocation2 + $0x80] sm:$0xff] %vm778_vm0, %v776_v16  ;;  %796 = vst.msk [vmem:[#allocation2 + $0x88] sm:$0xff] %vm778_vm0, %v777_v17 }
  0x43 PF: > { %vm817_vm1 = vcmask 261120   ;;  %v5217_v26 = vld [vmem:[#allocation2 + $0x20] sm:$0xff]  ;;  %v5219_v27 = vld [vmem:[#allocation2 + $0x28] sm:$0xff]  ;;  %vm5000_vm2 = vmmov 0   ;;  %vm2013_vm4 = vcmask 588800   ;;  %s6531_s12 = scalar_lea.vmem %s6491_s5, %s5114_s27  ;;  %vm3255_vm5 = vcmask 523264   ;;  %s6532_s15 = scalar_lea.vmem %s6495_s9, %s5114_s27 }
  0x44   : > { %v830_v28 = vsel %vm817_vm1, %v5217_v26, 0.0  ;;  %v833_v29 = vsel %vm817_vm1, %v5219_v27, 0.0  ;;  %v5225_v30 = vld [vmem:[#allocation2 + $0x30] sm:$0xff]  ;;  %v5227_v31 = vld [vmem:[#allocation2 + $0x38] sm:$0xff]  ;;  %vm5582_vm3 = vmpackc.low %vm817_vm1, %vm817_vm1  ;;  %vm3511_vm6 = vcmask 1042432   ;;  %vm3512_vm7 = vcmask 1046532  }
  0x45   : > { %v836_v32 = vsel %vm817_vm1, %v5225_v30, 0.0  ;;  %v839_v33 = vsel %vm817_vm1, %v5227_v31, 0.0  ;;  %v5233_v34 = vld [vmem:[#allocation2 + $0x40] sm:$0xff]  ;;  %v5235_v35 = vld [vmem:[#allocation2 + $0x48] sm:$0xff]  ;;  %vm3504_vm8 = vcmask 1041409   ;;  %vm3507_vm9 = vcmask 254976   ;;  %vm3513_vm10 = vmor %vm3511_vm6, %vm3512_vm7 }
  0x46   : > { %v842_v36 = vsel %vm817_vm1, %v5233_v34, 0.0  ;;  %v845_v37 = vsel %vm817_vm1, %v5235_v35, 0.0  ;;  %v5241_v38 = vld [vmem:[#allocation2 + $0x50] sm:$0xff]  ;;  %v5243_v39 = vld [vmem:[#allocation2 + $0x58] sm:$0xff] }
  0x47   : > { %v848_v40 = vsel %vm817_vm1, %v5241_v38, 0.0  ;;  %v851_v41 = vsel %vm817_vm1, %v5243_v39, 0.0  ;;  %v5249_v42 = vld [vmem:[#allocation2 + $0x60] sm:$0xff]  ;;  %v5251_v43 = vld [vmem:[#allocation2 + $0x68] sm:$0xff] }
  0x48   : > { %v854_v44 = vsel %vm817_vm1, %v5249_v42, 0.0  ;;  %v857_v45 = vsel %vm817_vm1, %v5251_v43, 0.0  ;;  %v5257_v46 = vld [vmem:[#allocation2 + $0x70] sm:$0xff]  ;;  %v5259_v47 = vld [vmem:[#allocation2 + $0x78] sm:$0xff] }
  0x49   : > { %v797_v18 = vld [vmem:[#allocation2] sm:$0xff]  ;;  %v5210_v20 = vld [vmem:[#allocation2 + $0x8] sm:$0xff]  ;;  %v860_v48 = vsel %vm817_vm1, %v5257_v46, 0.0  ;;  %v863_v49 = vsel %vm817_vm1, %v5259_v47, 0.0 }
  0x4a   : > { %v799_v19 = vld [vmem:[#allocation2 + $0x10] sm:$0xff]  ;;  %v818_v21 = vsel %vm817_vm1, %v797_v18, 0.0  ;;  %v800_v23 = vld [vmem:[#allocation2 + $0x18] sm:$0xff]  ;;  %v821_v24 = vsel %vm817_vm1, %v5210_v20, 0.0  ;;  %v5265_v50 = vld [vmem:[#allocation2 + $0x80] sm:$0xff] }
  0x4b   : > { %v824_v22 = vsel %vm817_vm1, %v799_v19, 0.0  ;;  %819 = vadd.xlane.f32.xlu0 %v818_v21  ;;  %v827_v25 = vsel %vm817_vm1, %v800_v23, 0.0  ;;  %v5267_v51 = vld [vmem:[#allocation2 + $0x88] sm:$0xff]  ;;  %v866_v52 = vsel %vm817_vm1, %v5265_v50, 0.0 }
  0x4c   : > { %825 = vadd.xlane.f32.xlu1 %v824_v22  ;;  %v869_v53 = vsel %vm817_vm1, %v5267_v51, 0.0 }
  0x4f   : > { %822 = vadd.xlane.f32.xlu0 %v821_v24 }
  0x50   : > { %828 = vadd.xlane.f32.xlu1 %v827_v25 }
  0x53   : > { %831 = vadd.xlane.f32.xlu0 %v830_v28 }
  0x54   : > { %834 = vadd.xlane.f32.xlu1 %v833_v29 }
  0x57   : > { %837 = vadd.xlane.f32.xlu0 %v836_v32 }
  0x58   : > { %840 = vadd.xlane.f32.xlu1 %v839_v33 }
  0x5b   : > { %843 = vadd.xlane.f32.xlu0 %v842_v36 }
  0x5c   : > { %846 = vadd.xlane.f32.xlu1 %v845_v37 }
  0x5f   : > { %849 = vadd.xlane.f32.xlu0 %v848_v40 }
  0x60   : > { %852 = vadd.xlane.f32.xlu1 %v851_v41 }
  0x63   : > { %855 = vadd.xlane.f32.xlu0 %v854_v44 }
  0x64   : > { %858 = vadd.xlane.f32.xlu1 %v857_v45 }
  0x67   : > { %861 = vadd.xlane.f32.xlu0 %v860_v48 }
  0x68   : > { %864 = vadd.xlane.f32.xlu1 %v863_v49 }
  0x6b   : > { %867 = vadd.xlane.f32.xlu0 %v866_v52 }
  0x6c   : > { %870 = vadd.xlane.f32.xlu1 %v869_v53 }
  0xd8   : > { %v820_v54 = vpop.xlane.xlu0 %819 }
  0xd9   : > { %v826_v55 = vpop.xlane.xlu1 %825  ;;  %v873_v56 = vmul.f32 0.03125, %v820_v54 }
  0xda   : > { %v875_v57 = vmul.f32 0.03125, %v826_v55 }
  0xdb   : > { %v5273_v58 = vsub.f32 %v797_v18, %v873_v56 }
  0xdc   : > { %v5275_v59 = vsub.f32 %v799_v19, %v875_v57  ;;  %v823_v60 = vpop.xlane.xlu0 %822 }
  0xdd   : > { %v829_v61 = vpop.xlane.xlu1 %828  ;;  %v874_v62 = vmul.f32 0.03125, %v823_v60  ;;  %v909_v0 = vmul.f32 %v5273_v58, %v5273_v58 }
  0xde   : > { %v876_v63 = vmul.f32 0.03125, %v829_v61  ;;  %v911_v1 = vmul.f32 %v5275_v59, %v5275_v59 }
  0xdf   : > { %v5282_v2 = vsub.f32 %v5210_v20, %v874_v62  ;;  %v927_v4 = vsel %vm817_vm1, %v909_v0, 0.0 }
  0xe0   : > { %v5284_v3 = vsub.f32 %v800_v23, %v876_v63  ;;  %928 = vadd.xlane.f32.xlu0 %v927_v4  ;;  %v832_v5 = vpop.xlane.xlu0 %831  ;;  %v933_v7 = vsel %vm817_vm1, %v911_v1, 0.0 }
  0xe1   : > { %v835_v6 = vpop.xlane.xlu1 %834  ;;  %v877_v8 = vmul.f32 0.03125, %v832_v5  ;;  %v910_v10 = vmul.f32 %v5282_v2, %v5282_v2 }
  0xe2   : > { %v878_v9 = vmul.f32 0.03125, %v835_v6  ;;  %v912_v11 = vmul.f32 %v5284_v3, %v5284_v3 }
  0xe3   : > { %v5293_v12 = vsub.f32 %v5217_v26, %v877_v8  ;;  %v930_v14 = vsel %vm817_vm1, %v910_v10, 0.0 }
  0xe4   : > { %v5296_v13 = vsub.f32 %v5219_v27, %v878_v9  ;;  %934 = vadd.xlane.f32.xlu0 %v933_v7  ;;  %931 = vadd.xlane.f32.xlu1 %v930_v14  ;;  %v838_v15 = vpop.xlane.xlu0 %837  ;;  %v936_v17 = vsel %vm817_vm1, %v912_v11, 0.0 }
  0xe5   : > { %v841_v16 = vpop.xlane.xlu1 %840  ;;  %v879_v18 = vmul.f32 0.03125, %v838_v15  ;;  %v913_v20 = vmul.f32 %v5293_v12, %v5293_v12 }
  0xe6   : > { %v880_v19 = vmul.f32 0.03125, %v841_v16  ;;  %v914_v21 = vmul.f32 %v5296_v13, %v5296_v13 }
  0xe7   : > { %v5305_v22 = vsub.f32 %v5225_v30, %v879_v18  ;;  %v939_v24 = vsel %vm817_vm1, %v913_v20, 0.0 }
  0xe8   : > { %v5308_v23 = vsub.f32 %v5227_v31, %v880_v19  ;;  %937 = vadd.xlane.f32.xlu1 %v936_v17  ;;  %940 = vadd.xlane.f32.xlu0 %v939_v24  ;;  %v844_v25 = vpop.xlane.xlu0 %843  ;;  %v942_v27 = vsel %vm817_vm1, %v914_v21, 0.0  ;;  %v1098_v24 = vld [vmem:[%s5126_s20 + $0x8] sm:$0xff] }
  0xe9   : > { %v847_v26 = vpop.xlane.xlu1 %846  ;;  %v881_v28 = vmul.f32 0.03125, %v844_v25  ;;  %v915_v32 = vmul.f32 %v5305_v22, %v5305_v22  ;;  %v3873_v25 = vld [vmem:[%s5126_s20 + $0x20] sm:$0xff] }
  0xea   : > { %v882_v29 = vmul.f32 0.03125, %v847_v26  ;;  %v916_v30 = vmul.f32 %v5308_v23, %v5308_v23  ;;  %v3874_v26 = vld [vmem:[%s5126_s20 + $0x28] sm:$0xff] }
  0xeb   : > { %v5317_v33 = vsub.f32 %v5233_v34, %v881_v28  ;;  %v945_v36 = vsel %vm817_vm1, %v915_v32, 0.0  ;;  %v4647_v28 = vpack.c.bf16 %v3874_v26, %v3873_v25  ;;  %v1099_v32 = vld [vmem:[%s5126_s20 + $0x10] sm:$0xff] }
  0xec   : > { %v5320_v31 = vsub.f32 %v5235_v35, %v882_v29  ;;  %943 = vadd.xlane.f32.xlu1 %v942_v27  ;;  %946 = vadd.xlane.f32.xlu0 %v945_v36  ;;  %v850_v37 = vpop.xlane.xlu0 %849  ;;  %v948_v41 = vsel %vm817_vm1, %v916_v30, 0.0  ;;  %v1100_v30 = vld [vmem:[%s5126_s20 + $0x18] sm:$0xff]  ;;  %v3875_v36 = vld [vmem:[%s5126_s20 + $0x30] sm:$0xff] }
  0xed   : > { %v853_v40 = vpop.xlane.xlu1 %852  ;;  %v883_v44 = vmul.f32 0.03125, %v850_v37  ;;  %v917_v48 = vmul.f32 %v5317_v33, %v5317_v33  ;;  %4648 = vmatprep.subr.bf16.mxu1 %v4647_v28  ;;  %v4643_v37 = vpack.c.bf16 %v1100_v30, %v1099_v32 }
  0xee   : > { %v884_v45 = vmul.f32 0.03125, %v853_v40  ;;  %v918_v34 = vmul.f32 %v5320_v31, %v5320_v31  ;;  %4650 = vmatpush3.bf16.msra.mxu1 %v4647_v28  ;;  %v3876_v40 = vld [vmem:[%s5126_s20 + $0x38] sm:$0xff] }
  0xef   : > { %v5329_v49 = vsub.f32 %v5241_v38, %v883_v44  ;;  %v951_v52 = vsel %vm817_vm1, %v917_v48, 0.0  ;;  %v3895_v44 = vld [vmem:[%s5126_s20 + $0x40] sm:$0xff] }
  0xf0   : > { %v5332_v35 = vsub.f32 %v5243_v39, %v884_v45  ;;  %949 = vadd.xlane.f32.xlu1 %v948_v41  ;;  %952 = vadd.xlane.f32.xlu0 %v951_v52  ;;  %v856_v53 = vpop.xlane.xlu0 %855  ;;  %v954_v55 = vsel %vm817_vm1, %v918_v34, 0.0  ;;  %v4651_v41 = vpack.c.bf16 %v3876_v40, %v3875_v36  ;;  %v3896_v45 = vld [vmem:[%s5126_s20 + $0x48] sm:$0xff] }
  0xf1   : > { %v859_v54 = vpop.xlane.xlu1 %858  ;;  %v885_v56 = vmul.f32 0.03125, %v856_v53  ;;  %v919_v60 = vmul.f32 %v5329_v49, %v5329_v49  ;;  %v5388_v48 = vpack.c.bf16 %v3896_v45, %v3895_v44  ;;  %v1053_v53 = vlaneseq }
  0xf2   : > { %v886_v57 = vmul.f32 0.03125, %v859_v54  ;;  %v920_v38 = vmul.f32 %v5332_v35, %v5332_v35  ;;  %4652 = vmatprep.subr.bf16.mxu1 %v4651_v41 }
  0xf3   : > { %v5341_v61 = vsub.f32 %v5249_v42, %v885_v56  ;;  %v957_v62 = vsel %vm817_vm1, %v919_v60, 0.0  ;;  %4654 = vmatpush3.bf16.msra.mxu1 %v4651_v41 }
  0xf4   : > { %v5344_v39 = vsub.f32 %v5251_v43, %v886_v57  ;;  %955 = vadd.xlane.f32.xlu1 %v954_v55  ;;  %958 = vadd.xlane.f32.xlu0 %v957_v62  ;;  %v862_v63 = vpop.xlane.xlu0 %861  ;;  %v960_v1 = vsel %vm817_vm1, %v920_v38, 0.0  ;;  %v5391_v38 = vshrl.u32 %v1053_v53, 7 }
  0xf5   : > { %v865_v0 = vpop.xlane.xlu1 %864  ;;  %v887_v4 = vmul.f32 0.03125, %v862_v63  ;;  %v921_v6 = vmul.f32 %v5341_v61, %v5341_v61 }
  0xf6   : > { %v888_v5 = vmul.f32 0.03125, %v865_v0  ;;  %v922_v42 = vmul.f32 %v5344_v39, %v5344_v39 }
  0xf7   : > { %v5353_v7 = vsub.f32 %v5257_v46, %v887_v4  ;;  %v963_v8 = vsel %vm817_vm1, %v921_v6, 0.0  ;;  %v1055_v6 = vsub.s32 0, %v5391_v38 }
  0xf8   : > { %v5356_v43 = vsub.f32 %v5259_v47, %v888_v5  ;;  %961 = vadd.xlane.f32.xlu1 %v960_v1  ;;  %964 = vadd.xlane.f32.xlu0 %v963_v8  ;;  %v868_v9 = vpop.xlane.xlu0 %867  ;;  %v966_v11 = vsel %vm817_vm1, %v922_v42, 0.0 }
  0xf9   : > { %v871_v10 = vpop.xlane.xlu1 %870  ;;  %v889_v14 = vmul.f32 0.03125, %v868_v9  ;;  %v923_v46 = vmul.f32 %v5353_v7, %v5353_v7  ;;  %v815_v9 = vld [vmem:[%s5154_s16] sm:$0xf] }
  0xfa   : > { %v890_v15 = vmul.f32 0.03125, %v871_v10  ;;  %v924_v47 = vmul.f32 %v5356_v43, %v5356_v43 }
  0xfb   : > { %v5365_v16 = vsub.f32 %v5265_v50, %v889_v14  ;;  %v969_v18 = vsel %vm817_vm1, %v923_v46, 0.0  ;;  %v1097_v50 = vld [vmem:[%s5126_s20] sm:$0xff]  ;;  %v1077_v14 = vsub.s32 1, %v5391_v38 }
  0xfc   : > { %v5368_v17 = vsub.f32 %v5267_v51, %v890_v15  ;;  %967 = vadd.xlane.f32.xlu1 %v966_v11  ;;  %970 = vadd.xlane.f32.xlu0 %v969_v18  ;;  %v972_v19 = vsel %vm817_vm1, %v924_v47, 0.0  ;;  %v4639_v51 = vpack.c.bf16 %v1098_v24, %v1097_v50  ;;  %v5398_v47 = vrot.slane %v815_v9, %v1055_v6 }
  0xfd   : > { %v925_v20 = vmul.f32 %v5365_v16, %v5365_v16  ;;  %v5403_v25 = vrot.slane %v815_v9, %v1077_v14 }
  0xfe   : > { %v926_v21 = vmul.f32 %v5368_v17, %v5368_v17  ;;  %4640 = vmatprep.subr.bf16.mxu0 %v4639_v51 }
  0xff   : > { %v975_v27 = vsel %vm817_vm1, %v925_v20, 0.0  ;;  %4642 = vmatpush3.bf16.msra.mxu0 %v4639_v51 }
 0x100   : > { %973 = vadd.xlane.f32.xlu1 %v972_v19  ;;  %976 = vadd.xlane.f32.xlu0 %v975_v27  ;;  %v978_v29 = vsel %vm817_vm1, %v926_v21, 0.0 }
 0x101   : > { %4644 = vmatprep.subr.bf16.mxu0 %v4643_v37 }
 0x103   : > { %4646 = vmatpush3.bf16.msra.mxu0 %v4643_v37 }
 0x104   : > { %979 = vadd.xlane.f32.xlu1 %v978_v29  ;;  %4656 = vmatprep.subr.bf16.mxu0 %v5388_v48 }
 0x16d   : > { %v929_v34 = vpop.xlane.xlu0 %928 }
 0x16e   : > { %v981_v52 = vmul.f32 0.03125, %v929_v34  ;;  %v3897_v34 = vld [vmem:[%s5126_s20 + $0x50] sm:$0xff] }
 0x170   : > { %v999_v54 = vadd.f32 1e-05, %v981_v52  ;;  %v3898_v52 = vld [vmem:[%s5126_s20 + $0x58] sm:$0xff]  ;;  %s6529_s20 = sld [smem:[#allocation11_spill]] }
 0x171   : > { %v932_v55 = vpop.xlane.xlu1 %931  ;;  %v935_v56 = vpop.xlane.xlu0 %934 }
 0x172   : > { %4796 = vrsqrt.f32 %v999_v54  ;;  %v982_v57 = vmul.f32 0.03125, %v932_v55  ;;  %v983_v60 = vmul.f32 0.03125, %v935_v56 }
 0x174   : > { %v1000_v62 = vadd.f32 1e-05, %v982_v57  ;;  %v1001_v63 = vadd.f32 1e-05, %v983_v60 }
 0x175   : > { %v938_v0 = vpop.xlane.xlu1 %937  ;;  %v941_v1 = vpop.xlane.xlu0 %940 }
 0x176   : > { %4798 = vrsqrt.f32 %v1000_v62  ;;  %v984_v4 = vmul.f32 0.03125, %v938_v0  ;;  %v985_v5 = vmul.f32 0.03125, %v941_v1  ;;  %v4659_v0 = vpack.c.bf16 %v3898_v52, %v3897_v34  ;;  %s6530_s28 = scalar_lea.vmem %s6529_s20, %s6545_s22 }
 0x177   : > { %4800 = vrsqrt.f32 %v1001_v63 }
 0x178   : > { %v1002_v42 = vadd.f32 1e-05, %v984_v4  ;;  %v1003_v8 = vadd.f32 1e-05, %v985_v5 }
 0x179   : > { %v944_v10 = vpop.xlane.xlu1 %943  ;;  %v947_v11 = vpop.xlane.xlu0 %946 }
 0x17a   : > { %4802 = vrsqrt.f32 %v1002_v42  ;;  %v986_v15 = vmul.f32 0.03125, %v944_v10  ;;  %v987_v46 = vmul.f32 0.03125, %v947_v11 }
 0x17b   : > { %4804 = vrsqrt.f32 %v1003_v8 }
 0x17c   : > { %v4797_v18 = vpop.eup %4796  ;;  %v1004_v19 = vadd.f32 1e-05, %v986_v15  ;;  %v1005_v20 = vadd.f32 1e-05, %v987_v46 }
 0x17d   : > { %v950_v21 = vpop.xlane.xlu1 %949  ;;  %v953_v50 = vpop.xlane.xlu0 %952  ;;  %v1035_v24 = vmul.f32 %v4797_v18, %v5273_v58 }
 0x17e   : > { %4806 = vrsqrt.f32 %v1004_v19  ;;  %v988_v51 = vmul.f32 0.03125, %v950_v21  ;;  %v989_v26 = vmul.f32 0.03125, %v953_v50 }
 0x17f   : > { %4808 = vrsqrt.f32 %v1005_v20  ;;  %v1057_v27 = vmul.f32 %v5398_v47, %v1035_v24 }
 0x180   : > { %v4799_v28 = vpop.eup %4798  ;;  %v1006_v29 = vadd.f32 1e-05, %v988_v51  ;;  %v1007_v32 = vadd.f32 1e-05, %v989_v26 }
 0x181   : > { %v4801_v30 = vpop.eup %4800  ;;  %v956_v36 = vpop.xlane.xlu1 %955  ;;  %v5407_v58 = vadd.f32 %v5403_v25, %v1057_v27  ;;  %v1036_v40 = vmul.f32 %v4799_v28, %v5282_v2 }
 0x182   : > { %v959_v37 = vpop.xlane.xlu0 %958  ;;  %4810 = vrsqrt.f32 %v1006_v29  ;;  %v990_v41 = vmul.f32 0.03125, %v956_v36  ;;  %v1037_v45 = vmul.f32 %v4801_v30, %v5275_v59 }
 0x183   : > { %v991_v44 = vmul.f32 0.03125, %v959_v37  ;;  %4812 = vrsqrt.f32 %v1007_v32  ;;  %4249 = vmatprep.mubr.msk.f32.mxu0 %vm817_vm1, %v5407_v58  ;;  %4284 = vmatprep.mubr.msk.f32.mxu1 %vm817_vm1, %v5407_v58  ;;  %v1058_v53 = vmul.f32 %v5398_v47, %v1036_v40 }
 0x184   : > { %v4803_v54 = vpop.eup %4802  ;;  %v1008_v55 = vadd.f32 1e-05, %v990_v41  ;;  %v1059_v2 = vmul.f32 %v5398_v47, %v1037_v45 }
 0x185   : > { %v1009_v56 = vadd.f32 1e-05, %v991_v44  ;;  %v4805_v57 = vpop.eup %4804  ;;  %v962_v60 = vpop.xlane.xlu1 %961  ;;  %v5420_v59 = vadd.f32 %v5403_v25, %v1058_v53  ;;  %v1038_v63 = vmul.f32 %v4803_v54, %v5284_v3 }
 0x186   : > { %v965_v62 = vpop.xlane.xlu0 %964  ;;  %4814 = vrsqrt.f32 %v1008_v55  ;;  %v992_v1 = vmul.f32 0.03125, %v962_v60  ;;  %v5424_v5 = vadd.f32 %v5403_v25, %v1059_v2  ;;  %v1039_v8 = vmul.f32 %v4805_v57, %v5293_v12 }
 0x187   : > { %v993_v4 = vmul.f32 0.03125, %v965_v62  ;;  %4816 = vrsqrt.f32 %v1009_v56  ;;  %4250 = vmatmul.mubr.msk.f32.vlgmr.msra.gmra.mrb[0].mxu0 %vm817_vm1, %v5420_v59  ;;  %4285 = vmatmul.mubr.msk.f32.vlgmr.msra.gmra.mrb[0].mxu1 %vm817_vm1, %v5420_v59  ;;  %v1060_v42 = vmul.f32 %v5398_v47, %v1038_v63 }
 0x188   : > { %v4807_v9 = vpop.eup %4806  ;;  %v1010_v3 = vadd.f32 1e-05, %v992_v1  ;;  %4252 = vmatprep.mubr.msk.f32.mxu0 %vm817_vm1, %v5424_v5  ;;  %4287 = vmatprep.mubr.msk.f32.mxu1 %vm817_vm1, %v5424_v5  ;;  %v1061_v19 = vmul.f32 %v5398_v47, %v1039_v8 }
 0x189   : > { %v1011_v10 = vadd.f32 1e-05, %v993_v4  ;;  %v4809_v11 = vpop.eup %4808  ;;  %v968_v15 = vpop.xlane.xlu1 %967  ;;  %v5437_v18 = vadd.f32 %v5403_v25, %v1060_v42  ;;  %v1040_v20 = vmul.f32 %v4807_v9, %v5296_v13  ;;  %4658 = vmatpush3.bf16.msra.mxu0 %v5388_v48 }
 0x18a   : > { %v971_v46 = vpop.xlane.xlu0 %970  ;;  %4818 = vrsqrt.f32 %v1010_v3  ;;  %v994_v12 = vmul.f32 0.03125, %v968_v15  ;;  %v1041_v50 = vmul.f32 %v4809_v11, %v5305_v22  ;;  %4660 = vmatprep.subr.bf16.mxu0 %v4659_v0  ;;  %v5448_v24 = vadd.f32 %v5403_v25, %v1061_v19 }
 0x18b   : > { %v995_v21 = vmul.f32 0.03125, %v971_v46  ;;  %4820 = vrsqrt.f32 %v1011_v10  ;;  %4253 = vmatmul.mubr.msk.f32.gmra.mrb[2].mxu0 %vm817_vm1, %v5437_v18  ;;  %4288 = vmatmul.mubr.msk.f32.gmra.mrb[2].mxu1 %vm817_vm1, %v5437_v18  ;;  %v1062_v13 = vmul.f32 %v5398_v47, %v1040_v20 }
 0x18c   : > { %v4811_v51 = vpop.eup %4810  ;;  %v1012_v48 = vadd.f32 1e-05, %v994_v12  ;;  %v1063_v27 = vmul.f32 %v5398_v47, %v1041_v50  ;;  %4255 = vmatprep.mubr.msk.f32.mxu0 %vm817_vm1, %v5448_v24  ;;  %4290 = vmatprep.mubr.msk.f32.mxu1 %vm817_vm1, %v5448_v24 }
 0x18d   : > { %v1013_v26 = vadd.f32 1e-05, %v995_v21  ;;  %v4813_v28 = vpop.eup %4812  ;;  %v974_v22 = vpop.xlane.xlu1 %973  ;;  %v5457_v32 = vadd.f32 %v5403_v25, %v1062_v13  ;;  %v1042_v30 = vmul.f32 %v4811_v51, %v5308_v23  ;;  %4662 = vmatpush3.bf16.msra.mxu0 %v4659_v0 }
 0x18e   : > { %v977_v29 = vpop.xlane.xlu0 %976  ;;  %4822 = vrsqrt.f32 %v1012_v48  ;;  %v996_v36 = vmul.f32 0.03125, %v974_v22  ;;  %v5461_v40 = vadd.f32 %v5403_v25, %v1063_v27  ;;  %v1043_v44 = vmul.f32 %v4813_v28, %v5317_v33 }
 0x18f   : > { %v997_v37 = vmul.f32 0.03125, %v977_v29  ;;  %4824 = vrsqrt.f32 %v1013_v26  ;;  %4256 = vmatmul.mubr.msk.f32.gmra.mrb[4].mxu0 %vm817_vm1, %v5457_v32  ;;  %4291 = vmatmul.mubr.msk.f32.gmra.mrb[4].mxu1 %vm817_vm1, %v5457_v32  ;;  %v1064_v41 = vmul.f32 %v5398_v47, %v1042_v30 }
 0x190   : > { %v4815_v45 = vpop.eup %4814  ;;  %v1014_v23 = vadd.f32 1e-05, %v996_v36  ;;  %4258 = vmatprep.mubr.msk.f32.mxu0 %vm817_vm1, %v5461_v40  ;;  %4293 = vmatprep.mubr.msk.f32.mxu1 %vm817_vm1, %v5461_v40  ;;  %v1065_v55 = vmul.f32 %v5398_v47, %v1043_v44 }
 0x191   : > { %v1015_v34 = vadd.f32 1e-05, %v997_v37  ;;  %v4817_v52 = vpop.eup %4816  ;;  %v980_v53 = vpop.xlane.xlu1 %979  ;;  %v5474_v54 = vadd.f32 %v5403_v25, %v1064_v41  ;;  %v1044_v56 = vmul.f32 %v4815_v45, %v5320_v31 }
 0x192   : > { %4826 = vrsqrt.f32 %v1014_v23  ;;  %v998_v33 = vmul.f32 0.03125, %v980_v53  ;;  %v1045_v2 = vmul.f32 %v4817_v52, %v5329_v49  ;;  %v5484_v57 = vadd.f32 %v5403_v25, %v1065_v55 }
 0x193   : > { %4828 = vrsqrt.f32 %v1015_v34  ;;  %4259 = vmatmul.mubr.msk.f32.gmra.mrb[6].mxu0 %vm817_vm1, %v5474_v54  ;;  %4294 = vmatmul.mubr.msk.f32.gmra.mrb[6].mxu1 %vm817_vm1, %v5474_v54  ;;  %v1066_v60 = vmul.f32 %v5398_v47, %v1044_v56 }
 0x194   : > { %v4819_v62 = vpop.eup %4818  ;;  %v1016_v63 = vadd.f32 1e-05, %v998_v33  ;;  %v1067_v31 = vmul.f32 %v5398_v47, %v1045_v2  ;;  %4261 = vmatprep.mubr.msk.f32.mxu0 %vm817_vm1, %v5484_v57  ;;  %4296 = vmatprep.mubr.msk.f32.mxu1 %vm817_vm1, %v5484_v57 }
 0x195   : > { %v4821_v0 = vpop.eup %4820  ;;  %v1088_v49 = vadd.f32 %v5403_v25, %v1066_v60  ;;  %v1046_v1 = vmul.f32 %v4819_v62, %v5332_v35 }
 0x196   : > { %4830 = vrsqrt.f32 %v1016_v63  ;;  %v1089_v4 = vadd.f32 %v5403_v25, %v1067_v31  ;;  %v1047_v42 = vmul.f32 %v4821_v0, %v5341_v61 }
 0x197   : > { %4262 = vmatmul.mubr.msk.f32.gmra.mrb[8].mxu0 %vm817_vm1, %v1088_v49  ;;  %4297 = vmatmul.mubr.msk.f32.gmra.mrb[8].mxu1 %vm817_vm1, %v1088_v49  ;;  %v1068_v8 = vmul.f32 %v5398_v47, %v1046_v1 }
 0x198   : > { %v4823_v9 = vpop.eup %4822  ;;  %4264 = vmatprep.mubr.msk.f32.mxu0 %vm817_vm1, %v1089_v4  ;;  %4299 = vmatprep.mubr.msk.f32.mxu1 %vm817_vm1, %v1089_v4  ;;  %v1069_v3 = vmul.f32 %v5398_v47, %v1047_v42 }
 0x199   : > { %v4825_v10 = vpop.eup %4824  ;;  %v1090_v35 = vadd.f32 %v5403_v25, %v1068_v8  ;;  %v1048_v11 = vmul.f32 %v4823_v9, %v5344_v39 }
 0x19a   : > { %v1091_v61 = vadd.f32 %v5403_v25, %v1069_v3  ;;  %v1049_v15 = vmul.f32 %v4825_v10, %v5353_v7 }
 0x19b   : > { %4265 = vmatmul.mubr.msk.f32.gmra.mrb[10].mxu0 %vm817_vm1, %v1090_v35  ;;  %4300 = vmatmul.mubr.msk.f32.gmra.mrb[10].mxu1 %vm817_vm1, %v1090_v35  ;;  %v1070_v46 = vmul.f32 %v5398_v47, %v1048_v11 }
 0x19c   : > { %v4827_v19 = vpop.eup %4826  ;;  %4267 = vmatprep.mubr.msk.f32.mxu0 %vm817_vm1, %v1091_v61  ;;  %4302 = vmatprep.mubr.msk.f32.mxu1 %vm817_vm1, %v1091_v61  ;;  %v1071_v20 = vmul.f32 %v5398_v47, %v1049_v15 }
 0x19d   : > { %v4829_v12 = vpop.eup %4828  ;;  %v1092_v39 = vadd.f32 %v5403_v25, %v1070_v46  ;;  %v1050_v21 = vmul.f32 %v4827_v19, %v5356_v43 }
 0x19e   : > { %v1093_v7 = vadd.f32 %v5403_v25, %v1071_v20  ;;  %v1051_v50 = vmul.f32 %v4829_v12, %v5365_v16 }
 0x19f   : > { %4268 = vmatmul.mubr.msk.f32.gmra.mrb[12].mxu0 %vm817_vm1, %v1092_v39  ;;  %4303 = vmatmul.mubr.msk.f32.gmra.mrb[12].mxu1 %vm817_vm1, %v1092_v39  ;;  %v1072_v13 = vmul.f32 %v5398_v47, %v1050_v21 }
 0x1a0   : > { %v4831_v51 = vpop.eup %4830  ;;  %4270 = vmatprep.mubr.msk.f32.mxu0 %vm817_vm1, %v1093_v7  ;;  %4305 = vmatprep.mubr.msk.f32.mxu1 %vm817_vm1, %v1093_v7  ;;  %v1073_v48 = vmul.f32 %v5398_v47, %v1051_v50  ;;  %v1485_v50 = vsub.s32 2, %v5391_v38 }
 0x1a1   : > { %v1094_v26 = vadd.f32 %v5403_v25, %v1072_v13  ;;  %v1052_v43 = vmul.f32 %v4831_v51, %v5368_v17  ;;  %v4999_v17 = vmov 0.0|0.0  }
 0x1a2   : > { %v1095_v27 = vadd.f32 %v5403_v25, %v1073_v48  ;;  %4663 = vmatprep.subr.bf16.mxu1 %v4999_v17  ;;  %4679 = vmatprep.subr.bf16.mxu0 %v4999_v17 }
 0x1a3   : > { %4271 = vmatmul.mubr.msk.f32.gmra.mrb[14].mxu0 %vm817_vm1, %v1094_v26  ;;  %4306 = vmatmul.mubr.msk.f32.gmra.mrb[14].mxu1 %vm817_vm1, %v1094_v26  ;;  %v1074_v16 = vmul.f32 %v5398_v47, %v1052_v43  ;;  %v5001_v47 = vmov 0.0  }
 0x1a4   : > { %4273 = vmatprep.mubr.msk.f32.mxu0 %vm817_vm1, %v1095_v27  ;;  %4308 = vmatprep.mubr.msk.f32.mxu1 %vm817_vm1, %v1095_v27 }
 0x1a5   : > { %v1096_v28 = vadd.f32 %v5403_v25, %v1074_v16  ;;  %v5567_v25 = vld [vmem:[%s5121_s25] sm:$0x7] }
 0x1a7   : > { %4274 = vmatmul.mubr.msk.f32.gmra.mrb[16].mxu0 %vm817_vm1, %v1096_v28  ;;  %4309 = vmatmul.mubr.msk.f32.gmra.mrb[16].mxu1 %vm817_vm1, %v1096_v28 }
 0x1a8   : > { %4319 = vmatprep.mubr.msk.f32.mxu0 %vm817_vm1, %v5407_v58  ;;  %4364 = vmatprep.mubr.msk.f32.mxu1 %vm5000_vm2, %v5001_v47  ;;  %v5572_v58 = vrot.slane %v5567_v25, %v1077_v14 }
 0x1ab   : > { %4320 = vmatmul.mubr.msk.f32.vlgmr.msra.gmra.mrb[18].mxu0 %vm817_vm1, %v5420_v59 }
 0x1ac   : > { %4322 = vmatprep.mubr.msk.f32.mxu0 %vm817_vm1, %v5424_v5 }
 0x1af   : > { %4323 = vmatmul.mubr.msk.f32.gmra.mrb[20].mxu0 %vm817_vm1, %v5437_v18 }
 0x1b0   : > { %4325 = vmatprep.mubr.msk.f32.mxu0 %vm817_vm1, %v5448_v24 }
 0x1b3   : > { %4326 = vmatmul.mubr.msk.f32.gmra.mrb[22].mxu0 %vm817_vm1, %v5457_v32 }
 0x1b4   : > { %4328 = vmatprep.mubr.msk.f32.mxu0 %vm817_vm1, %v5461_v40 }
 0x1b7   : > { %4329 = vmatmul.mubr.msk.f32.gmra.mrb[24].mxu0 %vm817_vm1, %v5474_v54 }
 0x1b8   : > { %4331 = vmatprep.mubr.msk.f32.mxu0 %vm817_vm1, %v5484_v57 }
 0x1bb   : > { %4332 = vmatmul.mubr.msk.f32.gmra.mrb[26].mxu0 %vm817_vm1, %v1088_v49 }
 0x1bc   : > { %4334 = vmatprep.mubr.msk.f32.mxu0 %vm817_vm1, %v1089_v4 }
 0x1bf   : > { %4335 = vmatmul.mubr.msk.f32.gmra.mrb[28].mxu0 %vm817_vm1, %v1090_v35 }
 0x1c0   : > { %4337 = vmatprep.mubr.msk.f32.mxu0 %vm817_vm1, %v1091_v61 }
 0x1c3   : > { %4338 = vmatmul.mubr.msk.f32.gmra.mrb[30].mxu0 %vm817_vm1, %v1092_v39 }
 0x1c4   : > { %4340 = vmatprep.mubr.msk.f32.mxu0 %vm817_vm1, %v1093_v7 }
 0x1c7   : > { %4341 = vmatmul.mubr.msk.f32.gmra.mrb[32].mxu0 %vm817_vm1, %v1094_v26 }
 0x1c8   : > { %4343 = vmatprep.mubr.msk.f32.mxu0 %vm817_vm1, %v1095_v27 }
 0x1cb   : > { %4344 = vmatmul.mubr.msk.f32.gmra.mrb[34].mxu0 %vm817_vm1, %v1096_v28 }
 0x1cc   : > { %4409 = vmatprep.mubr.msk.f32.mxu0 %vm5000_vm2, %v5001_v47 }
 0x25a   : > { %v5574_v59 = vpop.f32.mrb[0].mxu0  ;;  %v4286_v5 = vpop.f32.mrb[0].mxu1 }
 0x25b   : > { %v1395_v18 = vadd.f32 %v4286_v5, %v5572_v58  ;;  %v5577_v24 = vpop.f32.mrb[1].mxu0  ;;  %v1389_v22 = vpop.f32.mrb[1].mxu1 }
 0x25c   : > { %v1390_v29 = vadd.f32 %v1389_v22, %v5572_v58 }
 0x25e   : > { %v4664_v30 = vpack.c.bf16 %v1395_v18, %v1390_v29  ;;  %v5586_v36 = vpop.f32.mrb[2].mxu0  ;;  %v4289_v14 = vpop.f32.mrb[2].mxu1  ;;  %v5649_v18 = vrot.slane %v5567_v25, %v1485_v50 }
 0x25f   : > { %v1405_v37 = vadd.f32 %v4289_v14, %v5572_v58  ;;  %v5589_v40 = vpop.f32.mrb[3].mxu0  ;;  %v1399_v41 = vpop.f32.mrb[3].mxu1 }
 0x260   : > { %v1400_v44 = vadd.f32 %v1399_v41, %v5572_v58  ;;  %4666 = vmatpush3.bf16.xpose.msk.msra.mxu1 %vm5582_vm3, %v4664_v30  ;;  %v5658_v30 = vrot.slane %v5567_v25, %v1055_v6 }
 0x261   : > { %4667 = vmatprep.subr.bf16.mxu1 %v4999_v17 }
 0x262   : > { %v4668_v45 = vpack.c.bf16 %v1405_v37, %v1400_v44  ;;  %v5595_v23 = vpop.f32.mrb[4].mxu0  ;;  %v4292_v34 = vpop.f32.mrb[4].mxu1 }
 0x263   : > { %v1415_v52 = vadd.f32 %v4292_v34, %v5572_v58  ;;  %v5598_v53 = vpop.f32.mrb[5].mxu0  ;;  %v1409_v54 = vpop.f32.mrb[5].mxu1 }
 0x264   : > { %v1410_v55 = vadd.f32 %v1409_v54, %v5572_v58  ;;  %v1246_v32 = vadd.f32 %v5598_v53, %v5658_v30  ;;  %v1251_v53 = vadd.f32 %v5595_v23, %v5658_v30 }
 0x266   : > { %v4672_v56 = vpack.c.bf16 %v1415_v52, %v1410_v55  ;;  %v5601_v33 = vpop.f32.mrb[6].mxu0  ;;  %v4295_v2 = vpop.f32.mrb[6].mxu1  ;;  %v1226_v52 = vadd.f32 %v5577_v24, %v5658_v30 }
 0x267   : > { %v1425_v57 = vadd.f32 %v4295_v2, %v5572_v58  ;;  %v5604_v60 = vpop.f32.mrb[7].mxu0  ;;  %v1419_v62 = vpop.f32.mrb[7].mxu1  ;;  %v1231_v2 = vadd.f32 %v5574_v59, %v5658_v30  ;;  %v1236_v59 = vadd.f32 %v5589_v40, %v5658_v30 }
 0x268   : > { %v1420_v63 = vadd.f32 %v1419_v62, %v5572_v58  ;;  %4670 = vmatpush3.bf16.xpose.msk.msra.mxu1 %vm5582_vm3, %v4668_v45  ;;  %v1256_v23 = vadd.f32 %v5604_v60, %v5658_v30  ;;  %v1261_v60 = vadd.f32 %v5601_v33, %v5658_v30 }
 0x269   : > { %4671 = vmatprep.subr.bf16.mxu1 %v4999_v17 }
 0x26a   : > { %v4676_v31 = vpack.c.bf16 %v1425_v57, %v1420_v63  ;;  %v5610_v0 = vpop.f32.mrb[8].mxu0  ;;  %v4298_v49 = vpop.f32.mrb[8].mxu1 }
 0x26b   : > { %v5612_v1 = vpop.f32.mrb[9].mxu0  ;;  %v1429_v4 = vpop.f32.mrb[9].mxu1  ;;  %v1435_v10 = vadd.f32 %v4298_v49, %v5572_v58 }
 0x26c   : > { %v1430_v14 = vadd.f32 %v1429_v4, %v5572_v58  ;;  %v1266_v33 = vadd.f32 %v5612_v1, %v5658_v30 }
 0x26e   : > { %v5614_v42 = vpop.f32.mrb[10].mxu0  ;;  %v4301_v8 = vpop.f32.mrb[10].mxu1 }
 0x26f   : > { %v5616_v9 = vpop.f32.mrb[11].mxu0  ;;  %v1439_v3 = vpop.f32.mrb[11].mxu1  ;;  %v1445_v20 = vadd.f32 %v4301_v8, %v5572_v58 }
 0x270   : > { %v1440_v35 = vadd.f32 %v1439_v3, %v5572_v58  ;;  %4674 = vmatpush3.bf16.xpose.msk.msra.mxu1 %vm5582_vm3, %v4672_v56 }
 0x271   : > { %4675 = vmatprep.subr.bf16.mxu1 %v4999_v17 }
 0x272   : > { %v4680_v11 = vpack.c.bf16 %v1440_v35, %v1435_v10  ;;  %v5623_v61 = vpop.f32.mrb[12].mxu0  ;;  %v4304_v15 = vpop.f32.mrb[12].mxu1  ;;  %v1241_v35 = vadd.f32 %v5586_v36, %v5658_v30 }
 0x273   : > { %v5625_v46 = vpop.f32.mrb[13].mxu0  ;;  %v1449_v19 = vpop.f32.mrb[13].mxu1  ;;  %v1455_v48 = vadd.f32 %v4304_v15, %v5572_v58  ;;  %v1291_v1 = vadd.f32 %v5623_v61, %v5658_v30 }
 0x274   : > { %v1450_v12 = vadd.f32 %v1449_v19, %v5572_v58  ;;  %4682 = vmatpush3.bf16.xpose.msk.msra.mxu0 %vm5582_vm3, %v4680_v11 }
 0x275   : > { %4683 = vmatprep.subr.bf16.mxu0 %v4999_v17 }
 0x276   : > { %v4684_v39 = vpack.c.bf16 %v1450_v12, %v1445_v20  ;;  %v5632_v21 = vpop.f32.mrb[14].mxu0  ;;  %v4307_v7 = vpop.f32.mrb[14].mxu1 }
 0x277   : > { %v5635_v13 = vpop.f32.mrb[15].mxu0  ;;  %v1459_v51 = vpop.f32.mrb[15].mxu1  ;;  %v1465_v22 = vadd.f32 %v4307_v7, %v5572_v58  ;;  %v1301_v61 = vadd.f32 %v5632_v21, %v5658_v30 }
 0x278   : > { %v1460_v26 = vadd.f32 %v1459_v51, %v5572_v58  ;;  %4678 = vmatpush3.bf16.xpose.msk.msra.mxu1 %vm5582_vm3, %v4676_v31  ;;  %v1271_v51 = vadd.f32 %v5610_v0, %v5658_v30  ;;  %v1276_v0 = vadd.f32 %v5616_v9, %v5658_v30  ;;  %v1281_v9 = vadd.f32 %v5614_v42, %v5658_v30 }
 0x279   : > { %4362 = vmatprep.subr.mxu1 %v5001_v47  ;;  %v1286_v42 = vadd.f32 %v5625_v46, %v5658_v30 }
 0x27a   : > { %v4688_v43 = vpack.c.bf16 %v1460_v26, %v1455_v48  ;;  %v5642_v27 = vpop.f32.mrb[16].mxu0  ;;  %v4310_v16 = vpop.f32.mrb[16].mxu1 }
 0x27b   : > { %v5644_v28 = vpop.f32.mrb[17].mxu0  ;;  %v1469_v5 = vpop.f32.mrb[17].mxu1  ;;  %v1475_v36 = vadd.f32 %v4310_v16, %v5572_v58 }
 0x27c   : > { %v1470_v29 = vadd.f32 %v1469_v5, %v5572_v58  ;;  %4686 = vmatpush3.bf16.xpose.msk.msra.mxu0 %vm5582_vm3, %v4684_v39 }
 0x27d   : > { %4687 = vmatprep.subr.bf16.mxu0 %v4999_v17 }
 0x27e   : > { %v4692_v37 = vpack.c.bf16 %v1470_v29, %v1465_v22  ;;  %v4321_v41 = vpop.f32.mrb[18].mxu0 }
 0x27f   : > { %v1559_v44 = vadd.f32 %v4321_v41, %v5649_v18  ;;  %v1553_v45 = vpop.f32.mrb[19].mxu0 }
 0x280   : > { %v1554_v34 = vadd.f32 %v1553_v45, %v5649_v18  ;;  %4363 = vmatpush3.xpose.msk.msra.mxu1 %vm817_vm1, %v1430_v14 }
 0x281   : > { %4695 = vmatprep.subr.bf16.mxu1 %v4999_v17 }
 0x282   : > { %v4696_v6 = vpack.c.bf16 %v1559_v44, %v1554_v34  ;;  %v4324_v25 = vpop.f32.mrb[20].mxu0 }
 0x283   : > { %v1569_v54 = vadd.f32 %v4324_v25, %v5649_v18  ;;  %v1563_v55 = vpop.f32.mrb[21].mxu0  ;;  %4365 = vmatmul.mubr.msk.f32.vlgmr.msra.gmra.mrb[18].mxu1 %vm817_vm1, %v1226_v52  ;;  %v5794_v25 = vld [vmem:[%s6530_s28] ss:$0 sm:$0xff] }
 0x284   : > { %v1564_v56 = vadd.f32 %v1563_v55, %v5649_v18  ;;  %4690 = vmatpush3.bf16.xpose.msk.msra.mxu0 %vm5582_vm3, %v4688_v43  ;;  %4697 = vmatpush3.bf16.msra.mxu1 %v4696_v6 }
 0x285   : > { %4367 = vmatprep.mubr.msk.f32.mxu1 %vm5000_vm2, %v5001_v47  ;;  %4698 = vmatprep.subr.bf16.mxu1 %v4999_v17 }
 0x286   : > { %v4699_v24 = vpack.c.bf16 %v1569_v54, %v1564_v56  ;;  %v4327_v57 = vpop.f32.mrb[22].mxu0  ;;  %4691 = vmatprep.subr.bf16.mxu0 %v4999_v17 }
 0x287   : > { %v1579_v62 = vadd.f32 %v4327_v57, %v5649_v18  ;;  %v1573_v63 = vpop.f32.mrb[23].mxu0  ;;  %4368 = vmatmul.mubr.msk.f32.gmra.mrb[20].mxu1 %vm817_vm1, %v1231_v2 }
 0x288   : > { %v1574_v31 = vadd.f32 %v1573_v63, %v5649_v18  ;;  %4700 = vmatpush3.bf16.msra.mxu1 %v4699_v24  ;;  %4370 = vmatprep.mubr.msk.f32.mxu1 %vm5000_vm2, %v5001_v47 }
 0x289   : > { %4701 = vmatprep.subr.bf16.mxu1 %v4999_v17 }
 0x28a   : > { %v4702_v49 = vpack.c.bf16 %v1579_v62, %v1574_v31  ;;  %v4330_v4 = vpop.f32.mrb[24].mxu0 }
 0x28b   : > { %v1589_v8 = vadd.f32 %v4330_v4, %v5649_v18  ;;  %v1583_v3 = vpop.f32.mrb[25].mxu0  ;;  %4371 = vmatmul.mubr.msk.f32.gmra.mrb[22].mxu1 %vm817_vm1, %v1236_v59 }
 0x28c   : > { %v1584_v10 = vadd.f32 %v1583_v3, %v5649_v18  ;;  %4694 = vmatpush3.bf16.xpose.msk.msra.mxu0 %vm5582_vm3, %v4692_v37  ;;  %4703 = vmatpush3.bf16.msra.mxu1 %v4702_v49 }
 0x28d   : > { %4373 = vmatprep.mubr.msk.f32.mxu1 %vm5000_vm2, %v5001_v47  ;;  %4704 = vmatprep.subr.bf16.mxu1 %v4999_v17 }
 0x28e   : > { %v4705_v40 = vpack.c.bf16 %v1589_v8, %v1584_v10  ;;  %v4333_v11 = vpop.f32.mrb[26].mxu0  ;;  %4407 = vmatprep.subr.mxu0 %v5001_v47 }
 0x28f   : > { %v1593_v15 = vpop.f32.mrb[27].mxu0  ;;  %4374 = vmatmul.mubr.msk.f32.gmra.mrb[24].mxu1 %vm817_vm1, %v1241_v35  ;;  %v1599_v39 = vadd.f32 %v4333_v11, %v5649_v18 }
 0x290   : > { %4706 = vmatpush3.bf16.msra.mxu1 %v4705_v40  ;;  %4376 = vmatprep.mubr.msk.f32.mxu1 %vm5000_vm2, %v5001_v47  ;;  %v1594_v19 = vadd.f32 %v1593_v15, %v5649_v18 }
 0x291   : > { %4452 = vmatprep.subr.mxu1 %v5001_v47 }
 0x292   : > { %v4336_v20 = vpop.f32.mrb[28].mxu0 }
 0x293   : > { %v1603_v12 = vpop.f32.mrb[29].mxu0  ;;  %4377 = vmatmul.mubr.msk.f32.gmra.mrb[26].mxu1 %vm817_vm1, %v1246_v32  ;;  %v1609_v43 = vadd.f32 %v4336_v20, %v5649_v18 }
 0x294   : > { %v1604_v7 = vadd.f32 %v1603_v12, %v5649_v18  ;;  %4408 = vmatpush3.xpose.msk.msra.mxu0 %vm817_vm1, %v1475_v36  ;;  %4453 = vmatpush3.msra.mxu1 %v1594_v19 }
 0x295   : > { %4379 = vmatprep.mubr.msk.f32.mxu1 %vm5000_vm2, %v5001_v47  ;;  %4707 = vmatprep.subr.bf16.mxu0 %v4999_v17 }
 0x296   : > { %v4708_v58 = vpack.c.bf16 %v1604_v7, %v1599_v39  ;;  %v4339_v48 = vpop.f32.mrb[30].mxu0 }
 0x297   : > { %v1613_v26 = vpop.f32.mrb[31].mxu0  ;;  %4380 = vmatmul.mubr.msk.f32.gmra.mrb[28].mxu1 %vm817_vm1, %v1251_v53  ;;  %4410 = vmatmul.mubr.msk.f32.vlgmr.msra.gmra.mrb[36].mxu0 %vm817_vm1, %v1271_v51  ;;  %v1619_v14 = vadd.f32 %v4339_v48, %v5649_v18 }
 0x298   : > { %v1614_v16 = vadd.f32 %v1613_v26, %v5649_v18  ;;  %4709 = vmatpush3.bf16.msra.mxu0 %v4708_v58  ;;  %4382 = vmatprep.mubr.msk.f32.mxu1 %vm5000_vm2, %v5001_v47 }
 0x299   : > { %4412 = vmatprep.mubr.msk.f32.mxu0 %vm5000_vm2, %v5001_v47  ;;  %4710 = vmatprep.subr.bf16.mxu0 %v4999_v17 }
 0x29a   : > { %v4711_v5 = vpack.c.bf16 %v1614_v16, %v1609_v43  ;;  %v4342_v22 = vpop.f32.mrb[32].mxu0 }
 0x29b   : > { %v1623_v29 = vpop.f32.mrb[33].mxu0  ;;  %4383 = vmatmul.mubr.msk.f32.gmra.mrb[30].mxu1 %vm817_vm1, %v1256_v23  ;;  %4413 = vmatmul.mubr.msk.f32.gmra.mrb[38].mxu0 %vm817_vm1, %v1276_v0  ;;  %v1629_v34 = vadd.f32 %v4342_v22, %v5649_v18 }
 0x29c   : > { %v1624_v37 = vadd.f32 %v1623_v29, %v5649_v18  ;;  %4712 = vmatpush3.bf16.msra.mxu0 %v4711_v5  ;;  %4385 = vmatprep.mubr.msk.f32.mxu1 %vm5000_vm2, %v5001_v47 }
 0x29d   : > { %4415 = vmatprep.mubr.msk.f32.mxu0 %vm5000_vm2, %v5001_v47  ;;  %4713 = vmatprep.subr.bf16.mxu0 %v4999_v17 }
 0x29e   : > { %v4714_v41 = vpack.c.bf16 %v1624_v37, %v1619_v14  ;;  %v4345_v44 = vpop.f32.mrb[34].mxu0 }
 0x29f   : > { %v1633_v45 = vpop.f32.mrb[35].mxu0  ;;  %4386 = vmatmul.mubr.msk.f32.gmra.mrb[32].mxu1 %vm817_vm1, %v1261_v60  ;;  %4416 = vmatmul.mubr.msk.f32.gmra.mrb[40].mxu0 %vm817_vm1, %v1281_v9  ;;  %v1639_v46 = vadd.f32 %v4345_v44, %v5649_v18 }
 0x2a0   : > { %v1634_v52 = vadd.f32 %v1633_v45, %v5649_v18  ;;  %4715 = vmatpush3.bf16.msra.mxu0 %v4714_v41  ;;  %4388 = vmatprep.mubr.msk.f32.mxu1 %vm5000_vm2, %v5001_v47  ;;  %v1306_v18 = vadd.f32 %v5644_v28, %v5658_v30 }
 0x2a1   : > { %4418 = vmatprep.mubr.msk.f32.mxu0 %vm5000_vm2, %v5001_v47  ;;  %4716 = vmatprep.subr.bf16.mxu0 %v4999_v17  ;;  %v1296_v17 = vadd.f32 %v5635_v13, %v5658_v30  ;;  %v1311_v13 = vadd.f32 %v5642_v27, %v5658_v30 }
 0x2a2   : > { %v4717_v6 = vpack.c.bf16 %v1634_v52, %v1629_v34 }
 0x2a3   : > { %4389 = vmatmul.mubr.msk.f32.gmra.mrb[34].mxu1 %vm817_vm1, %v1266_v33  ;;  %4419 = vmatmul.mubr.msk.f32.gmra.mrb[42].mxu0 %vm817_vm1, %v1286_v42 }
 0x2a4   : > { %4718 = vmatpush3.bf16.msra.mxu0 %v4717_v6  ;;  %4421 = vmatprep.mubr.msk.f32.mxu0 %vm5000_vm2, %v5001_v47 }
 0x2a5   : > { %4497 = vmatprep.subr.mxu0 %v5001_v47  ;;  %4454 = vmatprep.mubr.msk.f32.mxu1 %vm5000_vm2, %v5001_v47 }
 0x2a7   : > { %4422 = vmatmul.mubr.msk.f32.gmra.mrb[44].mxu0 %vm817_vm1, %v1291_v1 }
 0x2a8   : > { %4498 = vmatpush3.msra.mxu0 %v1639_v46  ;;  %4424 = vmatprep.mubr.msk.f32.mxu0 %vm5000_vm2, %v5001_v47 }
 0x2ab   : > { %4425 = vmatmul.mubr.msk.f32.gmra.mrb[46].mxu0 %vm817_vm1, %v1296_v17 }
 0x2ac   : > { %4427 = vmatprep.mubr.msk.f32.mxu0 %vm5000_vm2, %v5001_v47 }
 0x2af   : > { %4428 = vmatmul.mubr.msk.f32.gmra.mrb[48].mxu0 %vm817_vm1, %v1301_v61 }
 0x2b0   : > { %4430 = vmatprep.mubr.msk.f32.mxu0 %vm5000_vm2, %v5001_v47 }
 0x2b3   : > { %4431 = vmatmul.mubr.msk.f32.gmra.mrb[50].mxu0 %vm817_vm1, %v1306_v18 }
 0x2b4   : > { %4433 = vmatprep.mubr.msk.f32.mxu0 %vm5000_vm2, %v5001_v47 }
 0x2b7   : > { %4434 = vmatmul.mubr.msk.f32.gmra.mrb[52].mxu0 %vm817_vm1, %v1311_v13 }
 0x2b8   : > { %4499 = vmatprep.mubr.msk.f32.mxu0 %vm5000_vm2, %v5001_v47 }
 0x356   : > { %v1762_v21 = vpop.f32.mrb[18].mxu1 }
 0x357   : > { %v1970_v28 = vmul.f32 0.17677669, %v1762_v21  ;;  %v4366_v54 = vpop.f32.mrb[19].mxu1 }
 0x359   : > { %v5797_v55 = vadd.f32 %v5794_v25, %v1970_v28 }
 0x35a   : > { %v1767_v56 = vpop.f32.mrb[20].mxu1 }
 0x35b   : > { %v1971_v27 = vmul.f32 0.17677669, %v1767_v56  ;;  %v4369_v30 = vpop.f32.mrb[21].mxu1  ;;  %v2014_v2 = vsel %vm2013_vm4, %v5797_v55, -inf }
 0x35c   : > { %2015 = vmax.xlane.f32.xlu0 %v2014_v2 }
 0x35d   : > { %v5802_v24 = vadd.f32 %v5794_v25, %v1971_v27 }
 0x35e   : > { %v1772_v57 = vpop.f32.mrb[22].mxu1 }
 0x35f   : > { %v1972_v62 = vmul.f32 0.17677669, %v1772_v57  ;;  %v4372_v63 = vpop.f32.mrb[23].mxu1  ;;  %v2017_v31 = vsel %vm2013_vm4, %v5802_v24, -inf }
 0x360   : > { %2018 = vmax.xlane.f32.xlu1 %v2017_v31 }
 0x361   : > { %v5807_v59 = vadd.f32 %v5794_v25, %v1972_v62 }
 0x362   : > { %v1777_v49 = vpop.f32.mrb[24].mxu1 }
 0x363   : > { %v1973_v4 = vmul.f32 0.17677669, %v1777_v49  ;;  %v4375_v8 = vpop.f32.mrb[25].mxu1  ;;  %v2020_v3 = vsel %vm2013_vm4, %v5807_v59, -inf }
 0x364   : > { %2021 = vmax.xlane.f32.xlu0 %v2020_v3 }
 0x365   : > { %v5812_v10 = vadd.f32 %v5794_v25, %v1973_v4 }
 0x366   : > { %v1782_v35 = vpop.f32.mrb[26].mxu1 }
 0x367   : > { %v1974_v40 = vmul.f32 0.17677669, %v1782_v35  ;;  %v4378_v11 = vpop.f32.mrb[27].mxu1  ;;  %v2023_v15 = vsel %vm2013_vm4, %v5812_v10, -inf }
 0x368   : > { %2024 = vmax.xlane.f32.xlu1 %v2023_v15 }
 0x369   : > { %v5817_v32 = vadd.f32 %v5794_v25, %v1974_v40 }
 0x36a   : > { %v1787_v36 = vpop.f32.mrb[28].mxu1  ;;  %v1926_v19 = vpop.f32.mrb[36].mxu0 }
 0x36b   : > { %v1975_v20 = vmul.f32 0.17677669, %v1787_v36  ;;  %v1979_v12 = vmul.f32 0.17677669, %v1926_v19  ;;  %v4381_v39 = vpop.f32.mrb[29].mxu1  ;;  %v4411_v7 = vpop.f32.mrb[37].mxu0 }
 0x36c   : > { %v2026_v53 = vsel %vm2013_vm4, %v5817_v32, -inf }
 0x36d   : > { %2027 = vmax.xlane.f32.xlu0 %v2026_v53  ;;  %v5822_v51 = vadd.f32 %v5794_v25, %v1975_v20  ;;  %v5825_v58 = vadd.f32 %v5794_v25, %v1979_v12 }
 0x36e   : > { %v1792_v48 = vpop.f32.mrb[30].mxu1  ;;  %v1931_v26 = vpop.f32.mrb[38].mxu0 }
 0x36f   : > { %v1976_v43 = vmul.f32 0.17677669, %v1792_v48  ;;  %v1980_v16 = vmul.f32 0.17677669, %v1931_v26  ;;  %v4384_v23 = vpop.f32.mrb[31].mxu1  ;;  %v4414_v0 = vpop.f32.mrb[39].mxu0 }
 0x370   : > { %v2029_v5 = vsel %vm2013_vm4, %v5822_v51, -inf  ;;  %v2041_v22 = vsel %vm2013_vm4, %v5825_v58, -inf }
 0x371   : > { %2030 = vmax.xlane.f32.xlu0 %v2029_v5  ;;  %2042 = vmax.xlane.f32.xlu1 %v2041_v22  ;;  %v5832_v29 = vadd.f32 %v5794_v25, %v1976_v43  ;;  %v5835_v14 = vadd.f32 %v5794_v25, %v1980_v16 }
 0x372   : > { %v1797_v37 = vpop.f32.mrb[32].mxu1  ;;  %v1936_v60 = vpop.f32.mrb[40].mxu0 }
 0x373   : > { %v1977_v9 = vmul.f32 0.17677669, %v1797_v37  ;;  %v1981_v41 = vmul.f32 0.17677669, %v1936_v60  ;;  %v4387_v44 = vpop.f32.mrb[33].mxu1  ;;  %v4417_v45 = vpop.f32.mrb[41].mxu0 }
 0x374   : > { %v2032_v34 = vsel %vm2013_vm4, %v5832_v29, -inf  ;;  %v2044_v52 = vsel %vm2013_vm4, %v5835_v14, -inf }
 0x375   : > { %2033 = vmax.xlane.f32.xlu0 %v2032_v34  ;;  %2045 = vmax.xlane.f32.xlu1 %v2044_v52  ;;  %v5842_v33 = vadd.f32 %v5794_v25, %v1977_v9  ;;  %v5845_v42 = vadd.f32 %v5794_v25, %v1981_v41 }
 0x376   : > { %v1802_v6 = vpop.f32.mrb[34].mxu1  ;;  %v1941_v1 = vpop.f32.mrb[42].mxu0 }
 0x377   : > { %v1978_v46 = vmul.f32 0.17677669, %v1802_v6  ;;  %v1982_v17 = vmul.f32 0.17677669, %v1941_v1  ;;  %v4390_v61 = vpop.f32.mrb[35].mxu1  ;;  %v4420_v18 = vpop.f32.mrb[43].mxu0 }
 0x378   : > { %v2035_v13 = vsel %vm2013_vm4, %v5842_v33, -inf  ;;  %v2047_v21 = vsel %vm2013_vm4, %v5845_v42, -inf }
 0x379   : > { %2036 = vmax.xlane.f32.xlu0 %v2035_v13  ;;  %2048 = vmax.xlane.f32.xlu1 %v2047_v21  ;;  %v5852_v28 = vadd.f32 %v5794_v25, %v1978_v46  ;;  %v5855_v54 = vadd.f32 %v5794_v25, %v1982_v17 }
 0x37a   : > { %v1946_v56 = vpop.f32.mrb[44].mxu0 }
 0x37b   : > { %v1983_v27 = vmul.f32 0.17677669, %v1946_v56  ;;  %v4423_v30 = vpop.f32.mrb[45].mxu0  ;;  %v2038_v2 = vsel %vm2013_vm4, %v5852_v28, -inf  ;;  %v2050_v57 = vsel %vm2013_vm4, %v5855_v54, -inf }
 0x37d   : > { %2039 = vmax.xlane.f32.xlu0 %v2038_v2  ;;  %2051 = vmax.xlane.f32.xlu1 %v2050_v57  ;;  %v5862_v62 = vadd.f32 %v5794_v25, %v1983_v27 }
 0x37e   : > { %v1951_v63 = vpop.f32.mrb[46].mxu0 }
 0x37f   : > { %v1984_v31 = vmul.f32 0.17677669, %v1951_v63  ;;  %v4426_v49 = vpop.f32.mrb[47].mxu0  ;;  %v2053_v4 = vsel %vm2013_vm4, %v5862_v62, -inf }
 0x381   : > { %2054 = vmax.xlane.f32.xlu1 %v2053_v4  ;;  %v5867_v8 = vadd.f32 %v5794_v25, %v1984_v31 }
 0x382   : > { %v1956_v3 = vpop.f32.mrb[48].mxu0 }
 0x383   : > { %v1985_v35 = vmul.f32 0.17677669, %v1956_v3  ;;  %v4429_v40 = vpop.f32.mrb[49].mxu0  ;;  %v2056_v11 = vsel %vm2013_vm4, %v5867_v8, -inf }
 0x384   : > { %2057 = vmax.xlane.f32.xlu0 %v2056_v11 }
 0x385   : > { %v5872_v15 = vadd.f32 %v5794_v25, %v1985_v35 }
 0x386   : > { %v1961_v36 = vpop.f32.mrb[50].mxu0 }
 0x387   : > { %v1986_v19 = vmul.f32 0.17677669, %v1961_v36  ;;  %v4432_v20 = vpop.f32.mrb[51].mxu0  ;;  %v2059_v12 = vsel %vm2013_vm4, %v5872_v15, -inf }
 0x388   : > { %2060 = vmax.xlane.f32.xlu1 %v2059_v12 }
 0x389   : > { %v5877_v39 = vadd.f32 %v5794_v25, %v1986_v19 }
 0x38a   : > { %v1966_v7 = vpop.f32.mrb[52].mxu0 }
 0x38b   : > { %v1987_v53 = vmul.f32 0.17677669, %v1966_v7  ;;  %v4435_v48 = vpop.f32.mrb[53].mxu0  ;;  %v2062_v26 = vsel %vm2013_vm4, %v5877_v39, -inf }
 0x38c   : > { %2063 = vmax.xlane.f32.xlu0 %v2062_v26 }
 0x38d   : > { %v5882_v43 = vadd.f32 %v5794_v25, %v1987_v53 }
 0x38f   : > { %v2065_v16 = vsel %vm2013_vm4, %v5882_v43, -inf }
 0x390   : > { %2066 = vmax.xlane.f32.xlu1 %v2065_v16 }
 0x3e9   : > { %v2016_v23 = vpop.xlane.xlu0 %2015 }
 0x3ea   : > { %v2068_v0 = vsub.f32 %v5797_v55, %v2016_v23 }
 0x3ec   : > { %v2086_v5 = vmul.f32 1.442695, %v2068_v0 }
 0x3ed   : > { %v2019_v22 = vpop.xlane.xlu1 %2018 }
 0x3ee   : > { %4832 = vpow2.f32 %v2086_v5  ;;  %v2069_v37 = vsub.f32 %v5802_v24, %v2019_v22 }
 0x3f0   : > { %v2088_v60 = vmul.f32 1.442695, %v2069_v37 }
 0x3f1   : > { %v2022_v9 = vpop.xlane.xlu0 %2021 }
 0x3f2   : > { %4834 = vpow2.f32 %v2088_v60  ;;  %v2070_v41 = vsub.f32 %v5807_v59, %v2022_v9 }
 0x3f4   : > { %v2090_v44 = vmul.f32 1.442695, %v2070_v41 }
 0x3f5   : > { %v2025_v25 = vpop.xlane.xlu1 %2024 }
 0x3f6   : > { %4836 = vpow2.f32 %v2090_v44  ;;  %v2071_v45 = vsub.f32 %v5812_v10, %v2025_v25 }
 0x3f8   : > { %v5890_v34 = vpop.eup %4832  ;;  %v2092_v52 = vmul.f32 1.442695, %v2071_v45 }
 0x3f9   : > { %v2122_v55 = vsel %vm2013_vm4, %v5890_v34, 0.0 }
 0x3fa   : > { %4838 = vpow2.f32 %v2092_v52  ;;  %v2028_v6 = vpop.xlane.xlu0 %2027  ;;  %2123 = vadd.xlane.f32.xlu0 %v2122_v55 }
 0x3fb   : > { %v2072_v24 = vsub.f32 %v5817_v32, %v2028_v6 }
 0x3fc   : > { %v5895_v1 = vpop.eup %4834 }
 0x3fd   : > { %v2094_v46 = vmul.f32 1.442695, %v2072_v24  ;;  %v2125_v59 = vsel %vm2013_vm4, %v5895_v1, 0.0 }
 0x3fe   : > { %v2031_v17 = vpop.xlane.xlu0 %2030  ;;  %v2043_v61 = vpop.xlane.xlu1 %2042  ;;  %2126 = vadd.xlane.f32.xlu1 %v2125_v59 }
 0x3ff   : > { %4840 = vpow2.f32 %v2094_v46  ;;  %v2073_v10 = vsub.f32 %v5822_v51, %v2031_v17  ;;  %v2077_v18 = vsub.f32 %v5825_v58, %v2043_v61 }
 0x400   : > { %v5901_v13 = vpop.eup %4836 }
 0x401   : > { %v2096_v21 = vmul.f32 1.442695, %v2073_v10  ;;  %v2104_v56 = vmul.f32 1.442695, %v2077_v18  ;;  %v2128_v32 = vsel %vm2013_vm4, %v5901_v13, 0.0 }
 0x402   : > { %v2034_v27 = vpop.xlane.xlu0 %2033  ;;  %v2046_v30 = vpop.xlane.xlu1 %2045  ;;  %2129 = vadd.xlane.f32.xlu0 %v2128_v32 }
 0x403   : > { %4842 = vpow2.f32 %v2096_v21  ;;  %v2074_v2 = vsub.f32 %v5832_v29, %v2034_v27  ;;  %v2078_v57 = vsub.f32 %v5835_v14, %v2046_v30 }
 0x404   : > { %v5907_v63 = vpop.eup %4838  ;;  %4844 = vpow2.f32 %v2104_v56 }
 0x405   : > { %v2098_v51 = vmul.f32 1.442695, %v2074_v2  ;;  %v2106_v58 = vmul.f32 1.442695, %v2078_v57  ;;  %v2131_v31 = vsel %vm2013_vm4, %v5907_v63, 0.0 }
 0x406   : > { %v2037_v49 = vpop.xlane.xlu0 %2036  ;;  %v2049_v4 = vpop.xlane.xlu1 %2048  ;;  %2132 = vadd.xlane.f32.xlu1 %v2131_v31  ;;  %v2487_v31 = vld [vmem:[%s5135_s23 + $0x8] sm:$0xff] }
 0x407   : > { %4846 = vpow2.f32 %v2098_v51  ;;  %v2075_v3 = vsub.f32 %v5842_v33, %v2037_v49  ;;  %v2079_v35 = vsub.f32 %v5845_v42, %v2049_v4 }
 0x408   : > { %4848 = vpow2.f32 %v2106_v58  ;;  %v2486_v58 = vld [vmem:[%s5135_s23] sm:$0xff] }
 0x409   : > { %v5913_v29 = vpop.eup %4840  ;;  %v2100_v14 = vmul.f32 1.442695, %v2075_v3  ;;  %v2108_v40 = vmul.f32 1.442695, %v2079_v35  ;;  %v4719_v49 = vpack.c.bf16 %v2487_v31, %v2486_v58 }
 0x40a   : > { %v2040_v11 = vpop.xlane.xlu0 %2039  ;;  %v2052_v36 = vpop.xlane.xlu1 %2051  ;;  %v2134_v19 = vsel %vm2013_vm4, %v5913_v29, 0.0 }
 0x40b   : > { %4850 = vpow2.f32 %v2100_v14  ;;  %v2076_v20 = vsub.f32 %v5852_v28, %v2040_v11  ;;  %v2080_v12 = vsub.f32 %v5855_v54, %v2052_v36  ;;  %2135 = vadd.xlane.f32.xlu0 %v2134_v19  ;;  %4720 = vmatprep.subr.bf16.mxu1 %v4719_v49 }
 0x40c   : > { %4852 = vpow2.f32 %v2108_v40 }
 0x40d   : > { %v5919_v33 = vpop.eup %4842  ;;  %v2102_v42 = vmul.f32 1.442695, %v2076_v20  ;;  %v2110_v7 = vmul.f32 1.442695, %v2080_v12 }
 0x40e   : > { %v5921_v53 = vpop.eup %4844  ;;  %v2055_v48 = vpop.xlane.xlu1 %2054  ;;  %v2137_v26 = vsel %vm2013_vm4, %v5919_v33, 0.0 }
 0x40f   : > { %4854 = vpow2.f32 %v2102_v42  ;;  %v2081_v16 = vsub.f32 %v5862_v62, %v2055_v48  ;;  %2138 = vadd.xlane.f32.xlu0 %v2137_v26  ;;  %v2149_v28 = vsel %vm2013_vm4, %v5921_v53, 0.0 }
 0x410   : > { %4856 = vpow2.f32 %v2110_v7  ;;  %2150 = vadd.xlane.f32.xlu1 %v2149_v28 }
 0x411   : > { %v5928_v54 = vpop.eup %4846  ;;  %v2112_v23 = vmul.f32 1.442695, %v2081_v16  ;;  %v2058_v0 = vpop.xlane.xlu0 %2057 }
 0x412   : > { %v5930_v5 = vpop.eup %4848  ;;  %v2082_v22 = vsub.f32 %v5867_v8, %v2058_v0  ;;  %v2140_v37 = vsel %vm2013_vm4, %v5928_v54, 0.0 }
 0x413   : > { %4858 = vpow2.f32 %v2112_v23  ;;  %2141 = vadd.xlane.f32.xlu0 %v2140_v37  ;;  %v2152_v62 = vsel %vm2013_vm4, %v5930_v5, 0.0 }
 0x414   : > { %v2114_v60 = vmul.f32 1.442695, %v2082_v22  ;;  %2153 = vadd.xlane.f32.xlu1 %v2152_v62 }
 0x415   : > { %v5937_v9 = vpop.eup %4850  ;;  %v2061_v41 = vpop.xlane.xlu1 %2060 }
 0x416   : > { %v5939_v44 = vpop.eup %4852  ;;  %4860 = vpow2.f32 %v2114_v60  ;;  %v2083_v25 = vsub.f32 %v5872_v15, %v2061_v41  ;;  %v2143_v8 = vsel %vm2013_vm4, %v5937_v9, 0.0 }
 0x417   : > { %2144 = vadd.xlane.f32.xlu0 %v2143_v8  ;;  %v2155_v45 = vsel %vm2013_vm4, %v5939_v44, 0.0 }
 0x418   : > { %v2116_v52 = vmul.f32 1.442695, %v2083_v25  ;;  %2156 = vadd.xlane.f32.xlu1 %v2155_v45 }
 0x419   : > { %v5946_v55 = vpop.eup %4854  ;;  %v2064_v6 = vpop.xlane.xlu0 %2063 }
 0x41a   : > { %v5948_v24 = vpop.eup %4856  ;;  %4862 = vpow2.f32 %v2116_v52  ;;  %v2084_v46 = vsub.f32 %v5877_v39, %v2064_v6  ;;  %v2146_v15 = vsel %vm2013_vm4, %v5946_v55, 0.0 }
 0x41b   : > { %2147 = vadd.xlane.f32.xlu0 %v2146_v15  ;;  %v2158_v59 = vsel %vm2013_vm4, %v5948_v24, 0.0 }
 0x41c   : > { %v2118_v17 = vmul.f32 1.442695, %v2084_v46  ;;  %2159 = vadd.xlane.f32.xlu1 %v2158_v59 }
 0x41d   : > { %v5955_v61 = vpop.eup %4858  ;;  %v2067_v10 = vpop.xlane.xlu1 %2066 }
 0x41e   : > { %4864 = vpow2.f32 %v2118_v17  ;;  %v2085_v18 = vsub.f32 %v5882_v43, %v2067_v10  ;;  %v2161_v21 = vsel %vm2013_vm4, %v5955_v61, 0.0 }
 0x420   : > { %v5960_v39 = vpop.eup %4860  ;;  %v2120_v56 = vmul.f32 1.442695, %v2085_v18  ;;  %2162 = vadd.xlane.f32.xlu1 %v2161_v21 }
 0x421   : > { %v2164_v32 = vsel %vm2013_vm4, %v5960_v39, 0.0 }
 0x422   : > { %4866 = vpow2.f32 %v2120_v56  ;;  %2165 = vadd.xlane.f32.xlu0 %v2164_v32 }
 0x424   : > { %v5964_v27 = vpop.eup %4862 }
 0x425   : > { %v2167_v30 = vsel %vm2013_vm4, %v5964_v27, 0.0 }
 0x426   : > { %2168 = vadd.xlane.f32.xlu1 %v2167_v30 }
 0x428   : > { %v5968_v43 = vpop.eup %4864 }
 0x429   : > { %v2170_v2 = vsel %vm2013_vm4, %v5968_v43, 0.0 }
 0x42a   : > { %2171 = vadd.xlane.f32.xlu0 %v2170_v2 }
 0x42c   : > { %v5972_v57 = vpop.eup %4866 }
 0x42d   : > { %v2173_v51 = vsel %vm2013_vm4, %v5972_v57, 0.0 }
 0x42e   : > { %2174 = vadd.xlane.f32.xlu1 %v2173_v51  ;;  %v2489_v51 = vld [vmem:[%s5135_s23 + $0x18] sm:$0xff] }
 0x487   : > { %v2124_v4 = vpop.xlane.xlu0 %2123 }
 0x488   : > { %4868 = vrcp.f32 %v2124_v4 }
 0x48b   : > { %v2127_v3 = vpop.xlane.xlu1 %2126 }
 0x48c   : > { %4870 = vrcp.f32 %v2127_v3 }
 0x48f   : > { %v2130_v35 = vpop.xlane.xlu0 %2129 }
 0x490   : > { %4872 = vrcp.f32 %v2130_v35 }
 0x492   : > { %v4869_v14 = vpop.eup %4868 }
 0x493   : > { %v2177_v40 = vmul.f32 %v4869_v14, %v5890_v34  ;;  %v2133_v11 = vpop.xlane.xlu1 %2132 }
 0x494   : > { %4874 = vrcp.f32 %v2133_v11 }
 0x495   : > { %4455 = vmatmul.mubr.msk.f32.vlgmr.msra.gmra.mrb[36].mxu1 %vm2013_vm4, %v2177_v40 }
 0x496   : > { %v4871_v36 = vpop.eup %4870  ;;  %4457 = vmatprep.mubr.msk.f32.mxu1 %vm5000_vm2, %v5001_v47  ;;  %4722 = vmatpush3.bf16.msra.mxu1 %v4719_v49 }
 0x497   : > { %v2179_v19 = vmul.f32 %v4871_v36, %v5895_v1 }
 0x498   : > { %v2136_v20 = vpop.xlane.xlu0 %2135 }
 0x499   : > { %4876 = vrcp.f32 %v2136_v20  ;;  %4458 = vmatmul.mubr.msk.f32.gmra.mrb[38].mxu1 %vm2013_vm4, %v2179_v19 }
 0x49a   : > { %v4873_v12 = vpop.eup %4872  ;;  %4460 = vmatprep.mubr.msk.f32.mxu1 %vm5000_vm2, %v5001_v47 }
 0x49b   : > { %v2181_v34 = vmul.f32 %v4873_v12, %v5901_v13 }
 0x49c   : > { %v2139_v42 = vpop.xlane.xlu0 %2138 }
 0x49d   : > { %4878 = vrcp.f32 %v2139_v42  ;;  %v2151_v7 = vpop.xlane.xlu1 %2150  ;;  %4461 = vmatmul.mubr.msk.f32.gmra.mrb[40].mxu1 %vm2013_vm4, %v2181_v34 }
 0x49e   : > { %v4875_v48 = vpop.eup %4874  ;;  %4880 = vrcp.f32 %v2151_v7  ;;  %4463 = vmatprep.mubr.msk.f32.mxu1 %vm5000_vm2, %v5001_v47 }
 0x49f   : > { %v2183_v1 = vmul.f32 %v4875_v48, %v5907_v63 }
 0x4a0   : > { %v2142_v26 = vpop.xlane.xlu0 %2141 }
 0x4a1   : > { %4882 = vrcp.f32 %v2142_v26  ;;  %v2154_v16 = vpop.xlane.xlu1 %2153  ;;  %4464 = vmatmul.mubr.msk.f32.gmra.mrb[42].mxu1 %vm2013_vm4, %v2183_v1 }
 0x4a2   : > { %4884 = vrcp.f32 %v2154_v16  ;;  %4466 = vmatprep.mubr.msk.f32.mxu1 %vm5000_vm2, %v5001_v47 }
 0x4a3   : > { %v4877_v13 = vpop.eup %4876 }
 0x4a4   : > { %v2145_v28 = vpop.xlane.xlu0 %2144  ;;  %v2185_v23 = vmul.f32 %v4877_v13, %v5913_v29 }
 0x4a5   : > { %4886 = vrcp.f32 %v2145_v28  ;;  %v2157_v0 = vpop.xlane.xlu1 %2156 }
 0x4a6   : > { %4888 = vrcp.f32 %v2157_v0  ;;  %4467 = vmatmul.mubr.msk.f32.gmra.mrb[44].mxu1 %vm2013_vm4, %v2185_v23 }
 0x4a7   : > { %v4879_v22 = vpop.eup %4878  ;;  %4469 = vmatprep.mubr.msk.f32.mxu1 %vm5000_vm2, %v5001_v47 }
 0x4a8   : > { %v4881_v63 = vpop.eup %4880  ;;  %v2148_v37 = vpop.xlane.xlu0 %2147  ;;  %v2187_v62 = vmul.f32 %v4879_v22, %v5919_v33 }
 0x4a9   : > { %v2195_v60 = vmul.f32 %v4881_v63, %v5921_v53  ;;  %4890 = vrcp.f32 %v2148_v37  ;;  %v2160_v41 = vpop.xlane.xlu1 %2159 }
 0x4aa   : > { %4892 = vrcp.f32 %v2160_v41  ;;  %4470 = vmatmul.mubr.msk.f32.gmra.mrb[46].mxu1 %vm2013_vm4, %v2187_v62 }
 0x4ab   : > { %v4883_v29 = vpop.eup %4882  ;;  %4500 = vmatmul.mubr.msk.f32.vlgmr.msra.gmra.mrb[54].mxu0 %vm2013_vm4, %v2195_v60  ;;  %4472 = vmatprep.mubr.msk.f32.mxu1 %vm5000_vm2, %v5001_v47 }
 0x4ac   : > { %v4885_v25 = vpop.eup %4884  ;;  %4502 = vmatprep.mubr.msk.f32.mxu0 %vm5000_vm2, %v5001_v47  ;;  %v2189_v8 = vmul.f32 %v4883_v29, %v5928_v54 }
 0x4ad   : > { %v2163_v33 = vpop.xlane.xlu1 %2162  ;;  %v2197_v53 = vmul.f32 %v4885_v25, %v5930_v5 }
 0x4ae   : > { %4894 = vrcp.f32 %v2163_v33  ;;  %4473 = vmatmul.mubr.msk.f32.gmra.mrb[48].mxu1 %vm2013_vm4, %v2189_v8 }
 0x4af   : > { %v4887_v45 = vpop.eup %4886  ;;  %4503 = vmatmul.mubr.msk.f32.gmra.mrb[56].mxu0 %vm2013_vm4, %v2197_v53  ;;  %v2166_v52 = vpop.xlane.xlu0 %2165  ;;  %4475 = vmatprep.mubr.msk.f32.mxu1 %vm5000_vm2, %v5001_v47  ;;  %v6071_v53 = vld [vmem:[%s6531_s12] ss:$0 sm:$0xff] }
 0x4b0   : > { %v4889_v6 = vpop.eup %4888  ;;  %4896 = vrcp.f32 %v2166_v52  ;;  %4505 = vmatprep.mubr.msk.f32.mxu0 %vm5000_vm2, %v5001_v47  ;;  %v2191_v54 = vmul.f32 %v4887_v45, %v5937_v9 }
 0x4b1   : > { %v2199_v46 = vmul.f32 %v4889_v6, %v5939_v44 }
 0x4b2   : > { %4476 = vmatmul.mubr.msk.f32.gmra.mrb[50].mxu1 %vm2013_vm4, %v2191_v54 }
 0x4b3   : > { %v4891_v5 = vpop.eup %4890  ;;  %4506 = vmatmul.mubr.msk.f32.gmra.mrb[58].mxu0 %vm2013_vm4, %v2199_v46  ;;  %v2169_v15 = vpop.xlane.xlu1 %2168  ;;  %4478 = vmatprep.mubr.msk.f32.mxu1 %vm5000_vm2, %v5001_v47  ;;  %v4940_v46 = vld [vmem:[#allocation2 + $0x8] sm:$0xff] }
 0x4b4   : > { %v4893_v59 = vpop.eup %4892  ;;  %4898 = vrcp.f32 %v2169_v15  ;;  %4508 = vmatprep.mubr.msk.f32.mxu0 %vm5000_vm2, %v5001_v47  ;;  %v2193_v17 = vmul.f32 %v4891_v5, %v5946_v55  ;;  %v4941_v15 = vld [vmem:[#allocation2] sm:$0xff] }
 0x4b5   : > { %v2201_v9 = vmul.f32 %v4893_v59, %v5948_v24 }
 0x4b6   : > { %4479 = vmatmul.mubr.msk.f32.gmra.mrb[52].mxu1 %vm2013_vm4, %v2193_v17 }
 0x4b7   : > { %4509 = vmatmul.mubr.msk.f32.gmra.mrb[60].mxu0 %vm2013_vm4, %v2201_v9  ;;  %v2172_v44 = vpop.xlane.xlu0 %2171 }
 0x4b8   : > { %v4895_v10 = vpop.eup %4894  ;;  %4900 = vrcp.f32 %v2172_v44  ;;  %4511 = vmatprep.mubr.msk.f32.mxu0 %vm5000_vm2, %v5001_v47 }
 0x4b9   : > { %v2203_v18 = vmul.f32 %v4895_v10, %v5955_v61 }
 0x4ba   : > { %v4897_v21 = vpop.eup %4896 }
 0x4bb   : > { %4512 = vmatmul.mubr.msk.f32.gmra.mrb[62].mxu0 %vm2013_vm4, %v2203_v18  ;;  %v2175_v56 = vpop.xlane.xlu1 %2174  ;;  %v2205_v55 = vmul.f32 %v4897_v21, %v5960_v39 }
 0x4bc   : > { %4902 = vrcp.f32 %v2175_v56  ;;  %4514 = vmatprep.mubr.msk.f32.mxu0 %vm5000_vm2, %v5001_v47  ;;  %v4942_v56 = vld [vmem:[#allocation2 + $0x18] sm:$0xff] }
 0x4be   : > { %v4899_v24 = vpop.eup %4898 }
 0x4bf   : > { %4515 = vmatmul.mubr.msk.f32.gmra.mrb[64].mxu0 %vm2013_vm4, %v2205_v55  ;;  %v2207_v32 = vmul.f32 %v4899_v24, %v5964_v27  ;;  %v2488_v27 = vld [vmem:[%s5135_s23 + $0x10] sm:$0xff] }
 0x4c0   : > { %4517 = vmatprep.mubr.msk.f32.mxu0 %vm5000_vm2, %v5001_v47  ;;  %v4723_v58 = vpack.c.bf16 %v2489_v51, %v2488_v27  ;;  %v4943_v24 = vld [vmem:[#allocation2 + $0x10] sm:$0xff] }
 0x4c2   : > { %v4901_v61 = vpop.eup %4900  ;;  %4724 = vmatprep.subr.bf16.mxu1 %v4723_v58 }
 0x4c3   : > { %4518 = vmatmul.mubr.msk.f32.gmra.mrb[66].mxu0 %vm2013_vm4, %v2207_v32  ;;  %v2209_v30 = vmul.f32 %v4901_v61, %v5968_v43  ;;  %4726 = vmatpush3.bf16.msra.mxu1 %v4723_v58  ;;  %v4944_v58 = vld [vmem:[#allocation2 + $0x28] sm:$0xff] }
 0x4c4   : > { %4520 = vmatprep.mubr.msk.f32.mxu0 %vm5000_vm2, %v5001_v47 }
 0x4c6   : > { %v4903_v39 = vpop.eup %4902 }
 0x4c7   : > { %4521 = vmatmul.mubr.msk.f32.gmra.mrb[68].mxu0 %vm2013_vm4, %v2209_v30  ;;  %v2211_v2 = vmul.f32 %v4903_v39, %v5972_v57 }
 0x4c8   : > { %4523 = vmatprep.mubr.msk.f32.mxu0 %vm5000_vm2, %v5001_v47 }
 0x4cb   : > { %4524 = vmatmul.mubr.msk.f32.gmra.mrb[70].mxu0 %vm2013_vm4, %v2211_v2 }
 0x568   : > { %v2305_v31 = vpop.f32.mrb[36].mxu1 }
 0x569   : > { %v4456_v43 = vpop.f32.mrb[37].mxu1  ;;  %4534 = vmatprep.mubr.msk.f32.mxu1 %vm817_vm1, %v2305_v31 }
 0x56a   : > { %v4945_v43 = vld [vmem:[#allocation2 + $0x20] sm:$0xff] }
 0x56c   : > { %v2310_v49 = vpop.f32.mrb[38].mxu1 }
 0x56d   : > { %v4459_v4 = vpop.f32.mrb[39].mxu1  ;;  %4535 = vmatmul.mubr.msk.f32.vlgmr.msra.gmra.mrb[54].mxu1 %vm817_vm1, %v2310_v49 }
 0x570   : > { %v2315_v3 = vpop.f32.mrb[40].mxu1 }
 0x571   : > { %v4462_v57 = vpop.f32.mrb[41].mxu1  ;;  %4537 = vmatprep.mubr.msk.f32.mxu1 %vm817_vm1, %v2315_v3 }
 0x574   : > { %v2320_v47 = vpop.f32.mrb[42].mxu1 }
 0x575   : > { %v4465_v35 = vpop.f32.mrb[43].mxu1  ;;  %4538 = vmatmul.mubr.msk.f32.gmra.mrb[56].mxu1 %vm817_vm1, %v2320_v47 }
 0x579   : > { %v2325_v14 = vpop.f32.mrb[44].mxu1 }
 0x57a   : > { %v4468_v40 = vpop.f32.mrb[45].mxu1  ;;  %4540 = vmatprep.mubr.msk.f32.mxu1 %vm817_vm1, %v2325_v14 }
 0x57b   : > { %v4946_v40 = vld [vmem:[#allocation2 + $0x38] sm:$0xff] }
 0x57d   : > { %v2330_v11 = vpop.f32.mrb[46].mxu1 }
 0x57e   : > { %v2442_v36 = vpop.f32.mrb[54].mxu0  ;;  %v4471_v19 = vpop.f32.mrb[47].mxu1  ;;  %4541 = vmatmul.mubr.msk.f32.gmra.mrb[58].mxu1 %vm817_vm1, %v2330_v11 }
 0x57f   : > { %v4501_v20 = vpop.f32.mrb[55].mxu0 }
 0x581   : > { %v2335_v12 = vpop.f32.mrb[48].mxu1 }
 0x582   : > { %v2447_v34 = vpop.f32.mrb[56].mxu0  ;;  %v4474_v42 = vpop.f32.mrb[49].mxu1  ;;  %4543 = vmatprep.mubr.msk.f32.mxu1 %vm817_vm1, %v2335_v12 }
 0x583   : > { %v4504_v7 = vpop.f32.mrb[57].mxu0 }
 0x585   : > { %v2340_v48 = vpop.f32.mrb[50].mxu1 }
 0x586   : > { %v2452_v1 = vpop.f32.mrb[58].mxu0  ;;  %v4477_v26 = vpop.f32.mrb[51].mxu1  ;;  %4544 = vmatmul.mubr.msk.f32.gmra.mrb[60].mxu1 %vm817_vm1, %v2340_v48 }
 0x587   : > { %v4507_v16 = vpop.f32.mrb[59].mxu0 }
 0x588   : > { %v4949_v16 = vld [vmem:[#allocation2 + $0x40] sm:$0xff] }
 0x589   : > { %v2345_v13 = vpop.f32.mrb[52].mxu1 }
 0x58a   : > { %v2457_v28 = vpop.f32.mrb[60].mxu0  ;;  %v4480_v23 = vpop.f32.mrb[53].mxu1  ;;  %4546 = vmatprep.mubr.msk.f32.mxu1 %vm817_vm1, %v2345_v13 }
 0x58b   : > { %v4510_v0 = vpop.f32.mrb[61].mxu0  ;;  %4547 = vmatmul.mubr.msk.f32.gmra.mrb[62].mxu1 %vm817_vm1, %v2442_v36  ;;  %v4947_v36 = vld [vmem:[#allocation2 + $0x30] sm:$0xff] }
 0x58c   : > { %4549 = vmatprep.mubr.msk.f32.mxu1 %vm817_vm1, %v2447_v34 }
 0x58e   : > { %v2462_v22 = vpop.f32.mrb[62].mxu0 }
 0x58f   : > { %v4513_v63 = vpop.f32.mrb[63].mxu0  ;;  %4550 = vmatmul.mubr.msk.f32.gmra.mrb[64].mxu1 %vm817_vm1, %v2452_v1  ;;  %v4948_v1 = vld [vmem:[#allocation2 + $0x48] sm:$0xff] }
 0x590   : > { %4552 = vmatprep.mubr.msk.f32.mxu1 %vm817_vm1, %v2457_v28 }
 0x592   : > { %v2467_v37 = vpop.f32.mrb[64].mxu0 }
 0x593   : > { %v4516_v62 = vpop.f32.mrb[65].mxu0  ;;  %4553 = vmatmul.mubr.msk.f32.gmra.mrb[66].mxu1 %vm817_vm1, %v2462_v22 }
 0x594   : > { %4555 = vmatprep.mubr.msk.f32.mxu1 %vm817_vm1, %v2467_v37  ;;  %v4950_v62 = vld [vmem:[#allocation2 + $0x58] sm:$0xff] }
 0x596   : > { %v2472_v60 = vpop.f32.mrb[66].mxu0 }
 0x597   : > { %v4519_v41 = vpop.f32.mrb[67].mxu0  ;;  %4556 = vmatmul.mubr.msk.f32.gmra.mrb[68].mxu1 %vm817_vm1, %v2472_v60 }
 0x598   : > { %v4951_v41 = vld [vmem:[#allocation2 + $0x50] sm:$0xff] }
 0x59a   : > { %v2477_v29 = vpop.f32.mrb[68].mxu0 }
 0x59b   : > { %v4522_v25 = vpop.f32.mrb[69].mxu0  ;;  %4558 = vmatprep.mubr.msk.f32.mxu1 %vm817_vm1, %v2477_v29 }
 0x59e   : > { %v2482_v8 = vpop.f32.mrb[70].mxu0 }
 0x59f   : > { %v4525_v33 = vpop.f32.mrb[71].mxu0  ;;  %4559 = vmatmul.mubr.msk.f32.gmra.mrb[70].mxu1 %vm817_vm1, %v2482_v8 }
 0x640   : > { %v4536_v45 = vpop.f32.mrb[54].mxu1 }
 0x641   : > { %v2623_v52 = vadd.f32 %v4536_v45, %v6071_v53  ;;  %v2617_v6 = vpop.f32.mrb[55].mxu1 }
 0x642   : > { %v2618_v54 = vadd.f32 %v6071_v53, %v2617_v6 }
 0x643   : > { %v6075_v5 = vadd.f32 %v4940_v46, %v2623_v52 }
 0x644   : > { %v6077_v59 = vadd.f32 %v4941_v15, %v2618_v54  ;;  %v4952_v54 = vld [vmem:[#allocation2 + $0x68] sm:$0xff]  ;;  %v4953_v15 = vld [vmem:[#allocation2 + $0x60] sm:$0xff] }
 0x645   : > { %v2727_v17 = vsel %vm817_vm1, %v6075_v5, 0.0 }
 0x646   : > { %2728 = vadd.xlane.f32.xlu1 %v2727_v17  ;;  %v2724_v9 = vsel %vm817_vm1, %v6077_v59, 0.0 }
 0x647   : > { %2725 = vadd.xlane.f32.xlu0 %v2724_v9 }
 0x648   : > { %v4539_v44 = vpop.f32.mrb[56].mxu1 }
 0x649   : > { %v2633_v10 = vadd.f32 %v4539_v44, %v6071_v53  ;;  %v2627_v18 = vpop.f32.mrb[57].mxu1 }
 0x64a   : > { %v2628_v21 = vadd.f32 %v6071_v53, %v2627_v18 }
 0x64b   : > { %v6085_v55 = vadd.f32 %v4942_v56, %v2633_v10 }
 0x64c   : > { %v6087_v32 = vadd.f32 %v4943_v24, %v2628_v21  ;;  %v4954_v24 = vld [vmem:[#allocation2 + $0x78] sm:$0xff] }
 0x64d   : > { %v2733_v61 = vsel %vm817_vm1, %v6085_v55, 0.0 }
 0x64e   : > { %2734 = vadd.xlane.f32.xlu1 %v2733_v61  ;;  %v2730_v30 = vsel %vm817_vm1, %v6087_v32, 0.0 }
 0x64f   : > { %2731 = vadd.xlane.f32.xlu0 %v2730_v30  ;;  %v4955_v30 = vld [vmem:[#allocation2 + $0x70] sm:$0xff] }
 0x651   : > { %v4542_v39 = vpop.f32.mrb[58].mxu1 }
 0x652   : > { %v2643_v2 = vadd.f32 %v4542_v39, %v6071_v53  ;;  %v2637_v27 = vpop.f32.mrb[59].mxu1 }
 0x653   : > { %v2638_v51 = vadd.f32 %v6071_v53, %v2637_v27 }
 0x654   : > { %v6095_v31 = vadd.f32 %v4944_v58, %v2643_v2 }
 0x655   : > { %v6097_v49 = vadd.f32 %v4945_v43, %v2638_v51 }
 0x656   : > { %v2739_v4 = vsel %vm817_vm1, %v6095_v31, 0.0 }
 0x657   : > { %2740 = vadd.xlane.f32.xlu1 %v2739_v4  ;;  %v2736_v3 = vsel %vm817_vm1, %v6097_v49, 0.0 }
 0x658   : > { %2737 = vadd.xlane.f32.xlu0 %v2736_v3  ;;  %v4956_v3 = vld [vmem:[#allocation2 + $0x88] sm:$0xff] }
 0x659   : > { %v4545_v57 = vpop.f32.mrb[60].mxu1 }
 0x65a   : > { %v2653_v47 = vadd.f32 %v4545_v57, %v6071_v53  ;;  %v2647_v35 = vpop.f32.mrb[61].mxu1 }
 0x65b   : > { %v2648_v14 = vadd.f32 %v6071_v53, %v2647_v35 }
 0x65c   : > { %v6105_v11 = vadd.f32 %v4946_v40, %v2653_v47  ;;  %v4957_v47 = vld [vmem:[#allocation2 + $0x80] sm:$0xff] }
 0x65d   : > { %v6107_v19 = vadd.f32 %v4947_v36, %v2648_v14 }
 0x65e   : > { %v4548_v20 = vpop.f32.mrb[62].mxu1  ;;  %v2745_v12 = vsel %vm817_vm1, %v6105_v11, 0.0 }
 0x65f   : > { %v2663_v34 = vadd.f32 %v4548_v20, %v6071_v53  ;;  %2746 = vadd.xlane.f32.xlu1 %v2745_v12  ;;  %v2657_v42 = vpop.f32.mrb[63].mxu1  ;;  %v2742_v7 = vsel %vm817_vm1, %v6107_v19, 0.0 }
 0x660   : > { %v2658_v48 = vadd.f32 %v6071_v53, %v2657_v42  ;;  %2743 = vadd.xlane.f32.xlu0 %v2742_v7 }
 0x661   : > { %v6115_v26 = vadd.f32 %v4948_v1, %v2663_v34 }
 0x662   : > { %v6117_v13 = vadd.f32 %v4949_v16, %v2658_v48  ;;  %v4551_v28 = vpop.f32.mrb[64].mxu1 }
 0x663   : > { %v2673_v23 = vadd.f32 %v4551_v28, %v6071_v53  ;;  %v2667_v0 = vpop.f32.mrb[65].mxu1  ;;  %v2751_v22 = vsel %vm817_vm1, %v6115_v26, 0.0 }
 0x664   : > { %v2668_v63 = vadd.f32 %v6071_v53, %v2667_v0  ;;  %2752 = vadd.xlane.f32.xlu1 %v2751_v22  ;;  %v2748_v37 = vsel %vm817_vm1, %v6117_v13, 0.0 }
 0x665   : > { %v6125_v60 = vadd.f32 %v4950_v62, %v2673_v23  ;;  %2749 = vadd.xlane.f32.xlu0 %v2748_v37 }
 0x666   : > { %v6127_v29 = vadd.f32 %v4951_v41, %v2668_v63  ;;  %v4554_v25 = vpop.f32.mrb[66].mxu1 }
 0x667   : > { %v2683_v8 = vadd.f32 %v4554_v25, %v6071_v53  ;;  %v2677_v33 = vpop.f32.mrb[67].mxu1  ;;  %v2757_v45 = vsel %vm817_vm1, %v6125_v60, 0.0 }
 0x668   : > { %v2678_v52 = vadd.f32 %v6071_v53, %v2677_v33  ;;  %2758 = vadd.xlane.f32.xlu1 %v2757_v45  ;;  %v2754_v6 = vsel %vm817_vm1, %v6127_v29, 0.0 }
 0x669   : > { %v6135_v46 = vadd.f32 %v4952_v54, %v2683_v8  ;;  %2755 = vadd.xlane.f32.xlu0 %v2754_v6 }
 0x66a   : > { %v6137_v17 = vadd.f32 %v4953_v15, %v2678_v52  ;;  %v4557_v9 = vpop.f32.mrb[68].mxu1 }
 0x66b   : > { %v2693_v44 = vadd.f32 %v4557_v9, %v6071_v53  ;;  %v2687_v10 = vpop.f32.mrb[69].mxu1  ;;  %v2763_v18 = vsel %vm817_vm1, %v6135_v46, 0.0 }
 0x66c   : > { %v2688_v21 = vadd.f32 %v6071_v53, %v2687_v10  ;;  %2764 = vadd.xlane.f32.xlu1 %v2763_v18  ;;  %v2760_v56 = vsel %vm817_vm1, %v6137_v17, 0.0 }
 0x66d   : > { %v6145_v61 = vadd.f32 %v4954_v24, %v2693_v44  ;;  %2761 = vadd.xlane.f32.xlu0 %v2760_v56 }
 0x66e   : > { %v6147_v39 = vadd.f32 %v4955_v30, %v2688_v21 }
 0x66f   : > { %v2769_v2 = vsel %vm817_vm1, %v6145_v61, 0.0 }
 0x670   : > { %2770 = vadd.xlane.f32.xlu1 %v2769_v2  ;;  %v2766_v27 = vsel %vm817_vm1, %v6147_v39, 0.0 }
 0x671   : > { %2767 = vadd.xlane.f32.xlu0 %v2766_v27 }
 0x672   : > { %v4560_v51 = vpop.f32.mrb[70].mxu1 }
 0x673   : > { %v2703_v58 = vadd.f32 %v4560_v51, %v6071_v53  ;;  %v2697_v43 = vpop.f32.mrb[71].mxu1 }
 0x674   : > { %v2698_v4 = vadd.f32 %v6071_v53, %v2697_v43 }
 0x675   : > { %v6155_v57 = vadd.f32 %v4956_v3, %v2703_v58 }
 0x676   : > { %v6157_v35 = vadd.f32 %v4957_v47, %v2698_v4 }
 0x677   : > { %v2775_v14 = vsel %vm817_vm1, %v6155_v57, 0.0 }
 0x678   : > { %2776 = vadd.xlane.f32.xlu1 %v2775_v14  ;;  %v2772_v40 = vsel %vm817_vm1, %v6157_v35, 0.0 }
 0x679   : > { %2773 = vadd.xlane.f32.xlu0 %v2772_v40 }
 0x6d3   : > { %v2729_v36 = vpop.xlane.xlu1 %2728 }
 0x6d4   : > { %v2779_v20 = vmul.f32 0.03125, %v2729_v36  ;;  %v2726_v12 = vpop.xlane.xlu0 %2725 }
 0x6d5   : > { %v2778_v34 = vmul.f32 0.03125, %v2726_v12 }
 0x6d6   : > { %v6164_v53 = vsub.f32 %v6075_v5, %v2779_v20 }
 0x6d7   : > { %v6167_v42 = vsub.f32 %v6077_v59, %v2778_v34 }
 0x6d8   : > { %v2815_v7 = vmul.f32 %v6164_v53, %v6164_v53 }
 0x6d9   : > { %v2814_v48 = vmul.f32 %v6167_v42, %v6167_v42 }
 0x6da   : > { %v2835_v1 = vsel %vm817_vm1, %v2815_v7, 0.0 }
 0x6db   : > { %v2735_v16 = vpop.xlane.xlu1 %2734  ;;  %2836 = vadd.xlane.f32.xlu1 %v2835_v1  ;;  %v2832_v28 = vsel %vm817_vm1, %v2814_v48, 0.0 }
 0x6dc   : > { %v2781_v23 = vmul.f32 0.03125, %v2735_v16  ;;  %v2732_v0 = vpop.xlane.xlu0 %2731  ;;  %2833 = vadd.xlane.f32.xlu0 %v2832_v28  ;;  %v3002_v28 = vld [vmem:[%s5140_s3] sm:$0xff] }
 0x6dd   : > { %v2780_v22 = vmul.f32 0.03125, %v2732_v0 }
 0x6de   : > { %v6176_v63 = vsub.f32 %v6085_v55, %v2781_v23  ;;  %v3003_v23 = vld [vmem:[%s5140_s3 + $0x8] sm:$0xff] }
 0x6df   : > { %v6179_v37 = vsub.f32 %v6087_v32, %v2780_v22 }
 0x6e0   : > { %v2817_v62 = vmul.f32 %v6176_v63, %v6176_v63 }
 0x6e1   : > { %v2816_v41 = vmul.f32 %v6179_v37, %v6179_v37 }
 0x6e2   : > { %v2841_v25 = vsel %vm817_vm1, %v2817_v62, 0.0  ;;  %v4727_v62 = vpack.c.bf16 %v3003_v23, %v3002_v28 }
 0x6e3   : > { %2842 = vadd.xlane.f32.xlu1 %v2841_v25  ;;  %v2838_v8 = vsel %vm817_vm1, %v2816_v41, 0.0 }
 0x6e4   : > { %v2741_v33 = vpop.xlane.xlu1 %2740  ;;  %2839 = vadd.xlane.f32.xlu0 %v2838_v8  ;;  %4728 = vmatprep.subr.bf16.mxu0 %v4727_v62 }
 0x6e5   : > { %v2783_v45 = vmul.f32 0.03125, %v2741_v33  ;;  %v2738_v52 = vpop.xlane.xlu0 %2737  ;;  %4730 = vmatpush3.bf16.msra.mxu0 %v4727_v62 }
 0x6e6   : > { %v2782_v6 = vmul.f32 0.03125, %v2738_v52 }
 0x6e7   : > { %v6188_v54 = vsub.f32 %v6095_v31, %v2783_v45 }
 0x6e8   : > { %v6191_v15 = vsub.f32 %v6097_v49, %v2782_v6 }
 0x6e9   : > { %v2819_v9 = vmul.f32 %v6188_v54, %v6188_v54 }
 0x6ea   : > { %v2818_v44 = vmul.f32 %v6191_v15, %v6191_v15 }
 0x6eb   : > { %v2847_v10 = vsel %vm817_vm1, %v2819_v9, 0.0 }
 0x6ec   : > { %v2747_v18 = vpop.xlane.xlu1 %2746  ;;  %2848 = vadd.xlane.f32.xlu1 %v2847_v10  ;;  %v2844_v21 = vsel %vm817_vm1, %v2818_v44, 0.0  ;;  %v3004_v44 = vld [vmem:[%s5140_s3 + $0x10] sm:$0xff]  ;;  %v3005_v10 = vld [vmem:[%s5140_s3 + $0x18] sm:$0xff] }
 0x6ed   : > { %v2785_v56 = vmul.f32 0.03125, %v2747_v18  ;;  %v2744_v24 = vpop.xlane.xlu0 %2743  ;;  %2845 = vadd.xlane.f32.xlu0 %v2844_v21 }
 0x6ee   : > { %v2784_v30 = vmul.f32 0.03125, %v2744_v24 }
 0x6ef   : > { %v6200_v2 = vsub.f32 %v6105_v11, %v2785_v56  ;;  %v4731_v56 = vpack.c.bf16 %v3005_v10, %v3004_v44  ;;  %v3241_v44 = vld [vmem:[%s5160_s6 + $0x8] sm:$0xff]  ;;  %v3242_v10 = vld [vmem:[%s5160_s6 + $0x10] sm:$0xff] }
 0x6f0   : > { %v6203_v27 = vsub.f32 %v6107_v19, %v2784_v30 }
 0x6f1   : > { %v2753_v51 = vpop.xlane.xlu1 %2752  ;;  %v2821_v58 = vmul.f32 %v6200_v2, %v6200_v2  ;;  %4732 = vmatprep.subr.bf16.mxu0 %v4731_v56 }
 0x6f2   : > { %v2787_v43 = vmul.f32 0.03125, %v2753_v51  ;;  %v2750_v4 = vpop.xlane.xlu0 %2749  ;;  %v2820_v3 = vmul.f32 %v6203_v27, %v6203_v27  ;;  %4734 = vmatpush3.bf16.msra.mxu0 %v4731_v56  ;;  %v3243_v56 = vld [vmem:[%s5160_s6 + $0x18] sm:$0xff] }
 0x6f3   : > { %v2786_v47 = vmul.f32 0.03125, %v2750_v4  ;;  %v2853_v14 = vsel %vm817_vm1, %v2821_v58, 0.0 }
 0x6f4   : > { %v6211_v40 = vsub.f32 %v6115_v26, %v2787_v43  ;;  %2854 = vadd.xlane.f32.xlu1 %v2853_v14  ;;  %v2850_v36 = vsel %vm817_vm1, %v2820_v3, 0.0 }
 0x6f5   : > { %v6215_v20 = vsub.f32 %v6117_v13, %v2786_v47  ;;  %v2759_v12 = vpop.xlane.xlu1 %2758  ;;  %2851 = vadd.xlane.f32.xlu0 %v2850_v36 }
 0x6f6   : > { %v2789_v34 = vmul.f32 0.03125, %v2759_v12  ;;  %v2756_v7 = vpop.xlane.xlu0 %2755  ;;  %v2823_v48 = vmul.f32 %v6211_v40, %v6211_v40 }
 0x6f7   : > { %v2788_v1 = vmul.f32 0.03125, %v2756_v7  ;;  %v2822_v16 = vmul.f32 %v6215_v20, %v6215_v20 }
 0x6f8   : > { %v6224_v0 = vsub.f32 %v6125_v60, %v2789_v34  ;;  %v2859_v22 = vsel %vm817_vm1, %v2823_v48, 0.0 }
 0x6f9   : > { %v6228_v41 = vsub.f32 %v6127_v29, %v2788_v1  ;;  %v2765_v25 = vpop.xlane.xlu1 %2764  ;;  %2860 = vadd.xlane.f32.xlu1 %v2859_v22  ;;  %v2856_v8 = vsel %vm817_vm1, %v2822_v16, 0.0 }
 0x6fa   : > { %v2791_v33 = vmul.f32 0.03125, %v2765_v25  ;;  %v2762_v45 = vpop.xlane.xlu0 %2761  ;;  %2857 = vadd.xlane.f32.xlu0 %v2856_v8  ;;  %v2825_v52 = vmul.f32 %v6224_v0, %v6224_v0 }
 0x6fb   : > { %v2790_v6 = vmul.f32 0.03125, %v2762_v45  ;;  %v2824_v9 = vmul.f32 %v6228_v41, %v6228_v41 }
 0x6fc   : > { %v6238_v18 = vsub.f32 %v6135_v46, %v2791_v33  ;;  %v2865_v21 = vsel %vm817_vm1, %v2825_v52, 0.0 }
 0x6fd   : > { %v6242_v24 = vsub.f32 %v6137_v17, %v2790_v6  ;;  %v2771_v30 = vpop.xlane.xlu1 %2770  ;;  %2866 = vadd.xlane.f32.xlu1 %v2865_v21  ;;  %v2862_v51 = vsel %vm817_vm1, %v2824_v9, 0.0  ;;  %v3240_v9 = vld [vmem:[%s5160_s6] sm:$0xff] }
 0x6fe   : > { %v2793_v58 = vmul.f32 0.03125, %v2771_v30  ;;  %v2768_v43 = vpop.xlane.xlu0 %2767  ;;  %2863 = vadd.xlane.f32.xlu0 %v2862_v51  ;;  %v2827_v4 = vmul.f32 %v6238_v18, %v6238_v18  ;;  %v4735_v21 = vpack.c.bf16 %v3241_v44, %v3240_v9  ;;  %v4739_v30 = vpack.c.bf16 %v3243_v56, %v3242_v10  ;;  %v3244_v51 = vld [vmem:[%s5160_s6 + $0x20] sm:$0xff] }
 0x6ff   : > { %v2792_v3 = vmul.f32 0.03125, %v2768_v43  ;;  %v2826_v47 = vmul.f32 %v6242_v24, %v6242_v24 }
 0x700   : > { %v6250_v14 = vsub.f32 %v6145_v61, %v2793_v58  ;;  %v2871_v36 = vsel %vm817_vm1, %v2827_v4, 0.0  ;;  %v3245_v58 = vld [vmem:[%s5160_s6 + $0x28] sm:$0xff]  ;;  %4736 = vmatprep.subr.bf16.mxu1 %v4735_v21 }
 0x701   : > { %v6254_v12 = vsub.f32 %v6147_v39, %v2792_v3  ;;  %2872 = vadd.xlane.f32.xlu1 %v2871_v36  ;;  %v2868_v34 = vsel %vm817_vm1, %v2826_v47, 0.0  ;;  %4738 = vmatpush3.bf16.msra.mxu1 %v4735_v21  ;;  %v4743_v43 = vpack.c.bf16 %v3245_v58, %v3244_v51 }
 0x702   : > { %2869 = vadd.xlane.f32.xlu0 %v2868_v34  ;;  %v2829_v7 = vmul.f32 %v6250_v14, %v6250_v14  ;;  %4740 = vmatprep.subr.bf16.mxu1 %v4739_v30 }
 0x703   : > { %v2828_v48 = vmul.f32 %v6254_v12, %v6254_v12 }
 0x704   : > { %v2877_v1 = vsel %vm817_vm1, %v2829_v7, 0.0 }
 0x705   : > { %v2777_v16 = vpop.xlane.xlu1 %2776  ;;  %2878 = vadd.xlane.f32.xlu1 %v2877_v1  ;;  %v2874_v28 = vsel %vm817_vm1, %v2828_v48, 0.0  ;;  %4742 = vmatpush3.bf16.msra.mxu1 %v4739_v30 }
 0x706   : > { %v2795_v23 = vmul.f32 0.03125, %v2777_v16  ;;  %v2774_v22 = vpop.xlane.xlu0 %2773  ;;  %2875 = vadd.xlane.f32.xlu0 %v2874_v28  ;;  %4744 = vmatprep.subr.bf16.mxu1 %v4743_v43 }
 0x707   : > { %v2794_v62 = vmul.f32 0.03125, %v2774_v22 }
 0x708   : > { %v6264_v25 = vsub.f32 %v6155_v57, %v2795_v23 }
 0x709   : > { %v6267_v8 = vsub.f32 %v6157_v35, %v2794_v62  ;;  %4746 = vmatpush3.bf16.msra.mxu1 %v4743_v43  ;;  %v2982_v62 = vsub.s32 3, %v5391_v38 }
 0x70a   : > { %v2831_v33 = vmul.f32 %v6264_v25, %v6264_v25 }
 0x70b   : > { %v2830_v45 = vmul.f32 %v6267_v8, %v6267_v8 }
 0x70c   : > { %v2883_v52 = vsel %vm817_vm1, %v2831_v33, 0.0  ;;  %v4958_v33 = vld [vmem:[%s5154_s16] sm:$0xf] }
 0x70d   : > { %2884 = vadd.xlane.f32.xlu1 %v2883_v52  ;;  %v2880_v6 = vsel %vm817_vm1, %v2830_v45, 0.0  ;;  %v6285_v45 = vrot.slane %v4958_v33, %v1485_v50  ;;  %v6288_v44 = vrot.slane %v4958_v33, %v2982_v62 }
 0x70e   : > { %2881 = vadd.xlane.f32.xlu0 %v2880_v6 }
 0x768   : > { %v2837_v4 = vpop.xlane.xlu1 %2836 }
 0x769   : > { %v2887_v3 = vmul.f32 0.03125, %v2837_v4  ;;  %v2834_v47 = vpop.xlane.xlu0 %2833 }
 0x76a   : > { %v2886_v36 = vmul.f32 0.03125, %v2834_v47 }
 0x76b   : > { %v2905_v34 = vadd.f32 1e-05, %v2887_v3 }
 0x76c   : > { %v2904_v7 = vadd.f32 1e-05, %v2886_v36 }
 0x76d   : > { %4904 = vrsqrt.f32 %v2905_v34 }
 0x76e   : > { %4906 = vrsqrt.f32 %v2904_v7 }
 0x770   : > { %v2843_v48 = vpop.xlane.xlu1 %2842 }
 0x771   : > { %v2889_v1 = vmul.f32 0.03125, %v2843_v48  ;;  %v2840_v16 = vpop.xlane.xlu0 %2839 }
 0x772   : > { %v2888_v28 = vmul.f32 0.03125, %v2840_v16 }
 0x773   : > { %v2907_v23 = vadd.f32 1e-05, %v2889_v1 }
 0x774   : > { %v2906_v22 = vadd.f32 1e-05, %v2888_v28 }
 0x775   : > { %4908 = vrsqrt.f32 %v2907_v23 }
 0x776   : > { %4910 = vrsqrt.f32 %v2906_v22 }
 0x777   : > { %v4905_v52 = vpop.eup %4904 }
 0x778   : > { %v4907_v6 = vpop.eup %4906  ;;  %v2941_v9 = vmul.f32 %v4905_v52, %v6164_v53 }
 0x779   : > { %v2849_v10 = vpop.xlane.xlu1 %2848  ;;  %v2940_v21 = vmul.f32 %v4907_v6, %v6167_v42 }
 0x77a   : > { %v2963_v56 = vmul.f32 %v6285_v45, %v2941_v9  ;;  %v2891_v30 = vmul.f32 0.03125, %v2849_v10  ;;  %v2846_v51 = vpop.xlane.xlu0 %2845 }
 0x77b   : > { %v2890_v58 = vmul.f32 0.03125, %v2846_v51  ;;  %v2962_v43 = vmul.f32 %v6285_v45, %v2940_v21 }
 0x77c   : > { %v2909_v38 = vadd.f32 1e-05, %v2891_v30  ;;  %v2985_v3 = vadd.f32 %v6288_v44, %v2963_v56 }
 0x77d   : > { %v2908_v50 = vadd.f32 1e-05, %v2890_v58  ;;  %v2984_v4 = vadd.f32 %v6288_v44, %v2962_v43 }
 0x77e   : > { %4912 = vrsqrt.f32 %v2909_v38 }
 0x77f   : > { %v4909_v53 = vpop.eup %4908  ;;  %4914 = vrsqrt.f32 %v2908_v50  ;;  %4569 = vmatprep.mubr.msk.f32.mxu0 %vm817_vm1, %v2984_v4 }
 0x780   : > { %v4911_v47 = vpop.eup %4910  ;;  %4570 = vmatmul.mubr.msk.f32.vlgmr.msra.gmra.mrb[72].mxu0 %vm817_vm1, %v2985_v3  ;;  %v2943_v42 = vmul.f32 %v4909_v53, %v6176_v63 }
 0x781   : > { %v2855_v36 = vpop.xlane.xlu1 %2854  ;;  %v2942_v34 = vmul.f32 %v4911_v47, %v6179_v37 }
 0x782   : > { %v2893_v7 = vmul.f32 0.03125, %v2855_v36  ;;  %v2852_v48 = vpop.xlane.xlu0 %2851  ;;  %v2965_v1 = vmul.f32 %v6285_v45, %v2943_v42 }
 0x783   : > { %v2892_v16 = vmul.f32 0.03125, %v2852_v48  ;;  %v2964_v28 = vmul.f32 %v6285_v45, %v2942_v34 }
 0x784   : > { %v2911_v23 = vadd.f32 1e-05, %v2893_v7  ;;  %v2987_v52 = vadd.f32 %v6288_v44, %v2965_v1 }
 0x785   : > { %v2910_v22 = vadd.f32 1e-05, %v2892_v16  ;;  %v2986_v62 = vadd.f32 %v6288_v44, %v2964_v28 }
 0x786   : > { %4916 = vrsqrt.f32 %v2911_v23  ;;  %v2861_v33 = vpop.xlane.xlu1 %2860 }
 0x787   : > { %4918 = vrsqrt.f32 %v2910_v22  ;;  %v2895_v63 = vmul.f32 0.03125, %v2861_v33  ;;  %v2858_v6 = vpop.xlane.xlu0 %2857  ;;  %4572 = vmatprep.mubr.msk.f32.mxu0 %vm817_vm1, %v2986_v62 }
 0x788   : > { %v4913_v37 = vpop.eup %4912  ;;  %v2894_v9 = vmul.f32 0.03125, %v2858_v6  ;;  %4573 = vmatmul.mubr.msk.f32.gmra.mrb[74].mxu0 %vm817_vm1, %v2987_v52 }
 0x789   : > { %v4915_v10 = vpop.eup %4914  ;;  %v2913_v21 = vadd.f32 1e-05, %v2895_v63  ;;  %v2945_v56 = vmul.f32 %v4913_v37, %v6188_v54 }
 0x78a   : > { %v2912_v30 = vadd.f32 1e-05, %v2894_v9  ;;  %v2867_v51 = vpop.xlane.xlu1 %2866  ;;  %v2944_v58 = vmul.f32 %v4915_v10, %v6191_v15 }
 0x78b   : > { %4920 = vrsqrt.f32 %v2913_v21  ;;  %v2897_v43 = vmul.f32 0.03125, %v2867_v51  ;;  %v2864_v38 = vpop.xlane.xlu0 %2863  ;;  %v2967_v50 = vmul.f32 %v6285_v45, %v2945_v56 }
 0x78c   : > { %4922 = vrsqrt.f32 %v2912_v30  ;;  %v2896_v4 = vmul.f32 0.03125, %v2864_v38  ;;  %v2966_v3 = vmul.f32 %v6285_v45, %v2944_v58 }
 0x78d   : > { %v2915_v53 = vadd.f32 1e-05, %v2897_v43  ;;  %v2989_v7 = vadd.f32 %v6288_v44, %v2967_v50 }
 0x78e   : > { %v2914_v47 = vadd.f32 1e-05, %v2896_v4  ;;  %v2873_v42 = vpop.xlane.xlu1 %2872  ;;  %v2988_v36 = vadd.f32 %v6288_v44, %v2966_v3 }
 0x78f   : > { %4924 = vrsqrt.f32 %v2915_v53  ;;  %v2899_v54 = vmul.f32 0.03125, %v2873_v42  ;;  %v2870_v34 = vpop.xlane.xlu0 %2869 }
 0x790   : > { %v4917_v15 = vpop.eup %4916  ;;  %4926 = vrsqrt.f32 %v2914_v47  ;;  %v2898_v48 = vmul.f32 0.03125, %v2870_v34  ;;  %4575 = vmatprep.mubr.msk.f32.mxu0 %vm817_vm1, %v2988_v36 }
 0x791   : > { %v4919_v1 = vpop.eup %4918  ;;  %v2917_v16 = vadd.f32 1e-05, %v2899_v54  ;;  %4576 = vmatmul.mubr.msk.f32.gmra.mrb[76].mxu0 %vm817_vm1, %v2989_v7  ;;  %v2947_v28 = vmul.f32 %v4917_v15, %v6200_v2 }
 0x792   : > { %v2916_v23 = vadd.f32 1e-05, %v2898_v48  ;;  %v2879_v22 = vpop.xlane.xlu1 %2878  ;;  %v2946_v62 = vmul.f32 %v4919_v1, %v6203_v27 }
 0x793   : > { %4928 = vrsqrt.f32 %v2917_v16  ;;  %v2901_v33 = vmul.f32 0.03125, %v2879_v22  ;;  %v2876_v52 = vpop.xlane.xlu0 %2875  ;;  %v2969_v63 = vmul.f32 %v6285_v45, %v2947_v28 }
 0x794   : > { %4930 = vrsqrt.f32 %v2916_v23  ;;  %v2900_v6 = vmul.f32 0.03125, %v2876_v52  ;;  %v2968_v37 = vmul.f32 %v6285_v45, %v2946_v62 }
 0x795   : > { %v4921_v9 = vpop.eup %4920  ;;  %v2919_v10 = vadd.f32 1e-05, %v2901_v33  ;;  %v2991_v27 = vadd.f32 %v6288_v44, %v2969_v63 }
 0x796   : > { %v4923_v21 = vpop.eup %4922  ;;  %v2918_v56 = vadd.f32 1e-05, %v2900_v6  ;;  %v2990_v30 = vadd.f32 %v6288_v44, %v2968_v37  ;;  %v2949_v2 = vmul.f32 %v4921_v9, %v6211_v40 }
 0x797   : > { %4932 = vrsqrt.f32 %v2919_v10  ;;  %v2948_v51 = vmul.f32 %v4923_v21, %v6215_v20 }
 0x798   : > { %4934 = vrsqrt.f32 %v2918_v56  ;;  %4578 = vmatprep.mubr.msk.f32.mxu0 %vm817_vm1, %v2990_v30  ;;  %v2971_v58 = vmul.f32 %v6285_v45, %v2949_v2 }
 0x799   : > { %v4925_v43 = vpop.eup %4924  ;;  %4579 = vmatmul.mubr.msk.f32.gmra.mrb[78].mxu0 %vm817_vm1, %v2991_v27  ;;  %v2970_v38 = vmul.f32 %v6285_v45, %v2948_v51 }
 0x79a   : > { %v4927_v50 = vpop.eup %4926  ;;  %v2885_v4 = vpop.xlane.xlu1 %2884  ;;  %v2951_v3 = vmul.f32 %v4925_v43, %v6224_v0  ;;  %v2993_v36 = vadd.f32 %v6288_v44, %v2971_v58  ;;  %v3246_v58 = vld [vmem:[%s5160_s6 + $0x30] sm:$0xff]  ;;  %v3247_v43 = vld [vmem:[%s5160_s6 + $0x38] sm:$0xff] }
 0x79b   : > { %v2903_v40 = vmul.f32 0.03125, %v2885_v4  ;;  %v2882_v53 = vpop.xlane.xlu0 %2881  ;;  %v2992_v47 = vadd.f32 %v6288_v44, %v2970_v38  ;;  %v2950_v20 = vmul.f32 %v4927_v50, %v6228_v41  ;;  %v4747_v38 = vpack.c.bf16 %v3247_v43, %v3246_v58 }
 0x79c   : > { %v2902_v42 = vmul.f32 0.03125, %v2882_v53  ;;  %v2973_v54 = vmul.f32 %v6285_v45, %v2951_v3 }
 0x79d   : > { %v4929_v34 = vpop.eup %4928  ;;  %v2921_v7 = vadd.f32 1e-05, %v2903_v40  ;;  %4581 = vmatprep.mubr.msk.f32.mxu0 %vm817_vm1, %v2992_v47  ;;  %v2972_v15 = vmul.f32 %v6285_v45, %v2950_v20  ;;  %4748 = vmatprep.subr.bf16.mxu1 %v4747_v38 }
 0x79e   : > { %v4931_v48 = vpop.eup %4930  ;;  %v2920_v1 = vadd.f32 1e-05, %v2902_v42  ;;  %4582 = vmatmul.mubr.msk.f32.gmra.mrb[80].mxu0 %vm817_vm1, %v2993_v36  ;;  %v2953_v0 = vmul.f32 %v4929_v34, %v6238_v18  ;;  %v2995_v28 = vadd.f32 %v6288_v44, %v2973_v54  ;;  %4750 = vmatpush3.bf16.msra.mxu1 %v4747_v38 }
 0x79f   : > { %4936 = vrsqrt.f32 %v2921_v7  ;;  %v2994_v41 = vadd.f32 %v6288_v44, %v2972_v15  ;;  %v2952_v16 = vmul.f32 %v4931_v48, %v6242_v24 }
 0x7a0   : > { %4938 = vrsqrt.f32 %v2920_v1  ;;  %v2975_v23 = vmul.f32 %v6285_v45, %v2953_v0 }
 0x7a1   : > { %v4933_v22 = vpop.eup %4932  ;;  %4584 = vmatprep.mubr.msk.f32.mxu0 %vm817_vm1, %v2994_v41  ;;  %v2974_v62 = vmul.f32 %v6285_v45, %v2952_v16 }
 0x7a2   : > { %v4935_v33 = vpop.eup %4934  ;;  %4585 = vmatmul.mubr.msk.f32.gmra.mrb[82].mxu0 %vm817_vm1, %v2995_v28  ;;  %v2955_v18 = vmul.f32 %v4933_v22, %v6250_v14  ;;  %v2997_v24 = vadd.f32 %v6288_v44, %v2975_v23 }
 0x7a3   : > { %v2996_v52 = vadd.f32 %v6288_v44, %v2974_v62  ;;  %v2954_v63 = vmul.f32 %v4935_v33, %v6254_v12 }
 0x7a4   : > { %v2977_v6 = vmul.f32 %v6285_v45, %v2955_v18 }
 0x7a5   : > { %4587 = vmatprep.mubr.msk.f32.mxu0 %vm817_vm1, %v2996_v52  ;;  %v2976_v37 = vmul.f32 %v6285_v45, %v2954_v63 }
 0x7a6   : > { %4588 = vmatmul.mubr.msk.f32.gmra.mrb[84].mxu0 %vm817_vm1, %v2997_v24  ;;  %v2999_v14 = vadd.f32 %v6288_v44, %v2977_v6 }
 0x7a7   : > { %v2998_v9 = vadd.f32 %v6288_v44, %v2976_v37 }
 0x7a9   : > { %v4937_v10 = vpop.eup %4936  ;;  %4590 = vmatprep.mubr.msk.f32.mxu0 %vm817_vm1, %v2998_v9 }
 0x7aa   : > { %v4939_v12 = vpop.eup %4938  ;;  %4591 = vmatmul.mubr.msk.f32.gmra.mrb[86].mxu0 %vm817_vm1, %v2999_v14  ;;  %v2957_v21 = vmul.f32 %v4937_v10, %v6264_v25  ;;  %v6368_v25 = vld [vmem:[%s715_s18] ss:$0 sm:$0xff] }
 0x7ab   : > { %v2956_v56 = vmul.f32 %v4939_v12, %v6267_v8 }
 0x7ac   : > { %v2979_v30 = vmul.f32 %v6285_v45, %v2957_v21 }
 0x7ad   : > { %v2978_v2 = vmul.f32 %v6285_v45, %v2956_v56 }
 0x7ae   : > { %v3001_v51 = vadd.f32 %v6288_v44, %v2979_v30 }
 0x7af   : > { %v3000_v27 = vadd.f32 %v6288_v44, %v2978_v2 }
 0x7b1   : > { %4593 = vmatprep.mubr.msk.f32.mxu0 %vm817_vm1, %v3000_v27 }
 0x7b2   : > { %4594 = vmatmul.mubr.msk.f32.gmra.mrb[88].mxu0 %vm817_vm1, %v3001_v51 }
 0x853   : > { %v4571_v8 = vpop.f32.mrb[72].mxu0 }
 0x854   : > { %v3139_v45 = vadd.f32 %v4571_v8, %v6368_v25  ;;  %v3133_v50 = vpop.f32.mrb[73].mxu0 }
 0x855   : > { %v3134_v44 = vadd.f32 %v6368_v25, %v3133_v50 }
 0x856   : > { %v3223_v3 = vmax.f32 %v3139_v45, 0.0 }
 0x857   : > { %v3222_v4 = vmax.f32 %v3134_v44, 0.0 }
 0x859   : > { %4612 = vmatprep.mubr.msk.f32.mxu1 %vm3255_vm5, %v3222_v4 }
 0x85a   : > { %4613 = vmatmul.mubr.msk.f32.vlgmr.msra.gmra.mrb[72].mxu1 %vm3255_vm5, %v3223_v3 }
 0x85b   : > { %v4574_v40 = vpop.f32.mrb[74].mxu0 }
 0x85c   : > { %v3149_v53 = vadd.f32 %v4574_v40, %v6368_v25  ;;  %v3143_v47 = vpop.f32.mrb[75].mxu0 }
 0x85d   : > { %v3144_v20 = vadd.f32 %v6368_v25, %v3143_v47 }
 0x85e   : > { %v3225_v36 = vmax.f32 %v3149_v53, 0.0 }
 0x85f   : > { %v3224_v42 = vmax.f32 %v3144_v20, 0.0  ;;  %v6411_v20 = vld [vmem:[%s6532_s15] ss:$0 sm:$0xff] }
 0x861   : > { %4615 = vmatprep.mubr.msk.f32.mxu1 %vm3255_vm5, %v3224_v42 }
 0x862   : > { %4616 = vmatmul.mubr.msk.f32.gmra.mrb[74].mxu1 %vm3255_vm5, %v3225_v36 }
 0x864   : > { %v4577_v54 = vpop.f32.mrb[76].mxu0 }
 0x865   : > { %v3159_v34 = vadd.f32 %v4577_v54, %v6368_v25  ;;  %v3153_v7 = vpop.f32.mrb[77].mxu0 }
 0x866   : > { %v3154_v15 = vadd.f32 %v6368_v25, %v3153_v7 }
 0x867   : > { %v3227_v1 = vmax.f32 %v3159_v34, 0.0 }
 0x868   : > { %v3226_v48 = vmax.f32 %v3154_v15, 0.0 }
 0x86a   : > { %4618 = vmatprep.mubr.msk.f32.mxu1 %vm3255_vm5, %v3226_v48 }
 0x86b   : > { %4619 = vmatmul.mubr.msk.f32.gmra.mrb[76].mxu1 %vm3255_vm5, %v3227_v1 }
 0x86c   : > { %v4580_v0 = vpop.f32.mrb[78].mxu0 }
 0x86d   : > { %v3169_v41 = vadd.f32 %v4580_v0, %v6368_v25  ;;  %v3163_v16 = vpop.f32.mrb[79].mxu0 }
 0x86e   : > { %v3164_v28 = vadd.f32 %v6368_v25, %v3163_v16 }
 0x86f   : > { %v3229_v22 = vmax.f32 %v3169_v41, 0.0 }
 0x870   : > { %v3228_v23 = vmax.f32 %v3164_v28, 0.0 }
 0x871   : > { %v4583_v62 = vpop.f32.mrb[80].mxu0 }
 0x872   : > { %v3179_v33 = vadd.f32 %v4583_v62, %v6368_v25  ;;  %v3173_v18 = vpop.f32.mrb[81].mxu0  ;;  %4621 = vmatprep.mubr.msk.f32.mxu1 %vm3255_vm5, %v3228_v23 }
 0x873   : > { %v3174_v52 = vadd.f32 %v6368_v25, %v3173_v18  ;;  %4622 = vmatmul.mubr.msk.f32.gmra.mrb[78].mxu1 %vm3255_vm5, %v3229_v22 }
 0x874   : > { %v3231_v6 = vmax.f32 %v3179_v33, 0.0 }
 0x875   : > { %v3230_v63 = vmax.f32 %v3174_v52, 0.0  ;;  %v4586_v24 = vpop.f32.mrb[82].mxu0 }
 0x876   : > { %v3189_v37 = vadd.f32 %v4586_v24, %v6368_v25  ;;  %v3183_v9 = vpop.f32.mrb[83].mxu0 }
 0x877   : > { %v3184_v14 = vadd.f32 %v6368_v25, %v3183_v9  ;;  %4624 = vmatprep.mubr.msk.f32.mxu1 %vm3255_vm5, %v3230_v63 }
 0x878   : > { %4625 = vmatmul.mubr.msk.f32.gmra.mrb[80].mxu1 %vm3255_vm5, %v3231_v6  ;;  %v3233_v21 = vmax.f32 %v3189_v37, 0.0 }
 0x879   : > { %v3232_v10 = vmax.f32 %v3184_v14, 0.0  ;;  %v4589_v12 = vpop.f32.mrb[84].mxu0 }
 0x87a   : > { %v3199_v56 = vadd.f32 %v4589_v12, %v6368_v25  ;;  %v3193_v30 = vpop.f32.mrb[85].mxu0 }
 0x87b   : > { %v3194_v2 = vadd.f32 %v6368_v25, %v3193_v30  ;;  %4627 = vmatprep.mubr.msk.f32.mxu1 %vm3255_vm5, %v3232_v10 }
 0x87c   : > { %4628 = vmatmul.mubr.msk.f32.gmra.mrb[82].mxu1 %vm3255_vm5, %v3233_v21  ;;  %v3235_v58 = vmax.f32 %v3199_v56, 0.0 }
 0x87d   : > { %v3234_v27 = vmax.f32 %v3194_v2, 0.0  ;;  %v4592_v51 = vpop.f32.mrb[86].mxu0 }
 0x87e   : > { %v3209_v43 = vadd.f32 %v4592_v51, %v6368_v25  ;;  %v3203_v38 = vpop.f32.mrb[87].mxu0 }
 0x87f   : > { %v3204_v8 = vadd.f32 %v6368_v25, %v3203_v38  ;;  %4630 = vmatprep.mubr.msk.f32.mxu1 %vm3255_vm5, %v3234_v27 }
 0x880   : > { %4631 = vmatmul.mubr.msk.f32.gmra.mrb[84].mxu1 %vm3255_vm5, %v3235_v58  ;;  %v3237_v50 = vmax.f32 %v3209_v43, 0.0 }
 0x881   : > { %v3236_v45 = vmax.f32 %v3204_v8, 0.0 }
 0x883   : > { %4633 = vmatprep.mubr.msk.f32.mxu1 %vm3255_vm5, %v3236_v45 }
 0x884   : > { %4634 = vmatmul.mubr.msk.f32.gmra.mrb[86].mxu1 %vm3255_vm5, %v3237_v50 }
 0x885   : > { %v4595_v44 = vpop.f32.mrb[88].mxu0 }
 0x886   : > { %v3219_v4 = vadd.f32 %v4595_v44, %v6368_v25  ;;  %v3213_v3 = vpop.f32.mrb[89].mxu0 }
 0x887   : > { %v3214_v40 = vadd.f32 %v6368_v25, %v3213_v3 }
 0x888   : > { %v3239_v47 = vmax.f32 %v3219_v4, 0.0 }
 0x889   : > { %v3238_v53 = vmax.f32 %v3214_v40, 0.0 }
 0x88b   : > { %4636 = vmatprep.mubr.msk.f32.mxu1 %vm3255_vm5, %v3238_v53 }
 0x88c   : > { %4637 = vmatmul.mubr.msk.f32.gmra.mrb[88].mxu1 %vm3255_vm5, %v3239_v47 }
 0x92d   : > { %v4614_v42 = vpop.f32.mrb[72].mxu1 }
 0x92e   : > { %v3382_v36 = vadd.f32 %v4614_v42, %v6411_v20  ;;  %v3376_v54 = vpop.f32.mrb[73].mxu1 }
 0x92f   : > { %v3377_v34 = vadd.f32 %v6411_v20, %v3376_v54 }
 0x930   : > { %v3466_v25 = vadd.f32 %v3382_v36, %v6075_v5 }
 0x931   : > { %v3465_v7 = vadd.f32 %v3377_v34, %v6077_v59 }
 0x932   : > { %3484 = vst.msk [vmem:[#allocation2 + $0x8] sm:$0xff] %vm817_vm1, %v3466_v25 }
 0x933   : > { %3483 = vst.msk [vmem:[#allocation2] sm:$0xff] %vm817_vm1, %v3465_v7  ;;  %v4029_v30 = vrot.slane %v3465_v7, 9 }
 0x935   : > { %v4617_v15 = vpop.f32.mrb[74].mxu1 }
 0x936   : > { %v3392_v48 = vadd.f32 %v4617_v15, %v6411_v20  ;;  %v3386_v1 = vpop.f32.mrb[75].mxu1 }
 0x937   : > { %v3387_v0 = vadd.f32 %v6411_v20, %v3386_v1 }
 0x938   : > { %v3468_v41 = vadd.f32 %v3392_v48, %v6085_v55 }
 0x939   : > { %v3467_v16 = vadd.f32 %v3387_v0, %v6087_v32 }
 0x93a   : > { %3486 = vst.msk [vmem:[#allocation2 + $0x18] sm:$0xff] %vm817_vm1, %v3468_v41 }
 0x93b   : > { %3485 = vst.msk [vmem:[#allocation2 + $0x10] sm:$0xff] %vm817_vm1, %v3467_v16 }
 0x93e   : > { %v4620_v5 = vpop.f32.mrb[76].mxu1 }
 0x93f   : > { %v3402_v59 = vadd.f32 %v4620_v5, %v6411_v20  ;;  %v3396_v28 = vpop.f32.mrb[77].mxu1 }
 0x940   : > { %v3397_v23 = vadd.f32 %v6411_v20, %v3396_v28 }
 0x941   : > { %v3470_v22 = vadd.f32 %v3402_v59, %v6095_v31  ;;  %v3509_v31 = vcombine.high %v3465_v7, %v3465_v7 }
 0x942   : > { %v3469_v62 = vadd.f32 %v3397_v23, %v6097_v49 }
 0x943   : > { %3488 = vst.msk [vmem:[#allocation2 + $0x28] sm:$0xff] %vm817_vm1, %v3470_v22  ;;  %v3516_v14 = vrot.slane %v3509_v31, 5 }
 0x944   : > { %3487 = vst.msk [vmem:[#allocation2 + $0x20] sm:$0xff] %vm817_vm1, %v3469_v62 }
 0x945   : > { %v3517_v38 = vsel %vm3513_vm10, %v4029_v30, %v3516_v14 }
 0x946   : > { %v4623_v55 = vpop.f32.mrb[78].mxu1 }
 0x947   : > { %v3412_v32 = vadd.f32 %v4623_v55, %v6411_v20  ;;  %v3406_v33 = vpop.f32.mrb[79].mxu1 }
 0x948   : > { %v3407_v18 = vadd.f32 %v6411_v20, %v3406_v33 }
 0x949   : > { %v3472_v52 = vadd.f32 %v3412_v32, %v6105_v11 }
 0x94a   : > { %v3471_v63 = vadd.f32 %v3407_v18, %v6107_v19 }
 0x94b   : > { %3490 = vst.msk [vmem:[#allocation2 + $0x38] sm:$0xff] %vm817_vm1, %v3472_v52  ;;  %v4626_v24 = vpop.f32.mrb[80].mxu1 }
 0x94c   : > { %3489 = vst.msk [vmem:[#allocation2 + $0x30] sm:$0xff] %vm817_vm1, %v3471_v63  ;;  %v3422_v49 = vadd.f32 %v4626_v24, %v6411_v20  ;;  %v3416_v6 = vpop.f32.mrb[81].mxu1 }
 0x94d   : > { %v3417_v37 = vadd.f32 %v6411_v20, %v3416_v6 }
 0x94e   : > { %v3474_v9 = vadd.f32 %v3422_v49, %v6115_v26 }
 0x94f   : > { %v3473_v11 = vadd.f32 %v3417_v37, %v6117_v13  ;;  %v4629_v19 = vpop.f32.mrb[82].mxu1 }
 0x950   : > { %3492 = vst.msk [vmem:[#allocation2 + $0x48] sm:$0xff] %vm817_vm1, %v3474_v9  ;;  %v3503_v10 = vrot.slane %v3474_v9, 7  ;;  %v3510_v12 = vcombine.high %v3474_v9, %v3474_v9  ;;  %v3432_v21 = vadd.f32 %v4629_v19, %v6411_v20  ;;  %v3426_v56 = vpop.f32.mrb[83].mxu1  ;;  %v4030_v27 = vrot.slane %v3474_v9, 9 }
 0x951   : > { %3491 = vst.msk [vmem:[#allocation2 + $0x40] sm:$0xff] %vm817_vm1, %v3473_v11  ;;  %v3427_v26 = vadd.f32 %v6411_v20, %v3426_v56 }
 0x952   : > { %v3505_v2 = vsel %vm3504_vm8, %v3503_v10, %v3465_v7  ;;  %v3520_v13 = vrot.slane %v3510_v12, 5  ;;  %v3476_v51 = vadd.f32 %v3432_v21, %v6125_v60 }
 0x953   : > { %3508 = vst.msk [vmem:[%s5165_s29] sm:$0x3] %vm3507_vm9, %v3505_v2  ;;  %v3475_v58 = vadd.f32 %v3427_v26, %v6127_v29  ;;  %v4632_v43 = vpop.f32.mrb[84].mxu1 }
 0x954   : > { %v3521_v8 = vsel %vm3513_vm10, %v4030_v27, %v3520_v13  ;;  %3494 = vst.msk [vmem:[#allocation2 + $0x58] sm:$0xff] %vm817_vm1, %v3476_v51  ;;  %v3442_v45 = vadd.f32 %v4632_v43, %v6411_v20  ;;  %v3436_v50 = vpop.f32.mrb[85].mxu1 }
 0x955   : > { %v3522_v44 = vcombine.low %v3517_v38, %v3521_v8  ;;  %3493 = vst.msk [vmem:[#allocation2 + $0x50] sm:$0xff] %vm817_vm1, %v3475_v58  ;;  %v3437_v4 = vadd.f32 %v6411_v20, %v3436_v50 }
 0x956   : > { %v3478_v3 = vadd.f32 %v3442_v45, %v6135_v46 }
 0x957   : > { %3524 = vst.msk [vmem:[%s5171_s21] sm:$0xff] %vm817_vm1, %v3522_v44  ;;  %v3477_v60 = vadd.f32 %v3437_v4, %v6137_v17  ;;  %v4635_v29 = vpop.f32.mrb[86].mxu1 }
 0x958   : > { %3496 = vst.msk [vmem:[#allocation2 + $0x68] sm:$0xff] %vm817_vm1, %v3478_v3  ;;  %v3452_v40 = vadd.f32 %v4635_v29, %v6411_v20  ;;  %v3446_v53 = vpop.f32.mrb[87].mxu1 }
 0x959   : > { %3495 = vst.msk [vmem:[#allocation2 + $0x60] sm:$0xff] %vm817_vm1, %v3477_v60  ;;  %v3447_v47 = vadd.f32 %v6411_v20, %v3446_v53 }
 0x95a   : > { %v3480_v42 = vadd.f32 %v3452_v40, %v6145_v61 }
 0x95b   : > { %v3479_v36 = vadd.f32 %v3447_v47, %v6147_v39 }
 0x95c   : > { %3498 = vst.msk [vmem:[#allocation2 + $0x78] sm:$0xff] %vm817_vm1, %v3480_v42 }
 0x95d   : > { %3497 = vst.msk [vmem:[#allocation2 + $0x70] sm:$0xff] %vm817_vm1, %v3479_v36 }
 0x95f   : > { %v4638_v46 = vpop.f32.mrb[88].mxu1 }
 0x960   : > { %v3462_v17 = vadd.f32 %v4638_v46, %v6411_v20  ;;  %v3456_v54 = vpop.f32.mrb[89].mxu1 }
 0x961   : > { %v3457_v34 = vadd.f32 %v6411_v20, %v3456_v54 }
 0x962   : > { %v3482_v25 = vadd.f32 %v3462_v17, %v6155_v57 }
 0x963   : > { %v3481_v7 = vadd.f32 %v3457_v34, %v6157_v35 }
 0x964   : > { %3500 = vst.msk [vmem:[#allocation2 + $0x88] sm:$0xff] %vm817_vm1, %v3482_v25 }
 0x965   : > { %3499 = vst.msk [vmem:[#allocation2 + $0x80] sm:$0xff] %vm817_vm1, %v3481_v7 }
 0x966 PF: > { %s6533_s27 = sld [smem:[#allocation6_spill]]  ;;  %s6534_s21 = sld [smem:[#allocation4_spill]] }
 0x967   : > { %s6535_s22 = sld [smem:[#allocation5_spill]]  ;;  %s6536_s23 = sld [smem:[#allocation7_spill]] }
 0x968   : > { %s6537_s24 = sld [smem:[#allocation8_spill]] }
 0x96c   : > { %s23_s25 = sadd.s32 1, %s6533_s27  }
 0x96d   : > { %p20_p9 = scmp.ge.s32.totalorder %s23_s25, 10  }
 0x96f   :  { %22 = sbr.rel (!%p20_p9) target bundleno = 8 (0x8), region = 142 }

</bundles_post_ra>
